<compile_context>
chip_gen: v5e
topology: v5e:2x2
jax: 0.10.0
libtpu: 0.0.40
codegen_flags: <defaults>
</compile_context>

<pallas_src>
import jax
import jax.numpy as jnp
from jax.experimental import pallas as pl
from jax.experimental.pallas import tpu as pltpu


def _predictor_kernel(x_ref, w_ref, b_ref, out_ref):
    # x_ref: (TN, C*HW) lane-dense activation tile.
    # w_ref: (C*HW, OUT_PAD) row-replicated, 1/(H*W)-pre-scaled fused weight.
    # b_ref: (1, OUT_PAD) fused bias.
    # Pooling + both Linears == one MXU matmul with f32 accumulation.
    out_ref[...] = (
        jnp.dot(x_ref[...], w_ref[...], preferred_element_type=jnp.float32)
        + b_ref[...]
    )


def pack_fast_rcnn_params(w_cls, b_cls, w_bbox, b_bbox, h, w,
                          dtype=jnp.float32):
    """Build the fused, row-replicated, pre-scaled predictor parameters.

    Call ONCE per parameter set (at model build / weight-load time) and reuse
    the result across forward calls -- this is pure wrapper-side prep and must
    not sit on the per-call path.

    w_cls: (1, C), b_cls: (1,), w_bbox: (R4, C), b_bbox: (R4,)  (PyTorch Linear
    layout).  `dtype` may be jnp.bfloat16 when the upstream ROI head emits bf16
    features (accumulation stays f32 inside the kernel).
    Returns (w_big (C*HW, OUT_PAD), b_fused (1, OUT_PAD), R4).
    """
    hw = int(h) * int(w)
    c = w_cls.shape[1]
    r4 = w_bbox.shape[0]
    out_dim = 1 + r4
    out_pad = pl.cdiv(out_dim, 128) * 128          # lane-dense padded width
    scale = 1.0 / float(hw)                        # fold mean-pool into weights

    w_fused = jnp.zeros((c, out_pad), jnp.float32)
    w_fused = w_fused.at[:, 0:1].set(jnp.transpose(w_cls).astype(jnp.float32) * scale)
    w_fused = w_fused.at[:, 1:1 + r4].set(jnp.transpose(w_bbox).astype(jnp.float32) * scale)
    # Row-replicate over spatial positions so that
    #   x.reshape(N, C*HW) @ w_big == mean_pool(x) @ [w_cls^T | w_bbox^T]
    w_big = jnp.repeat(w_fused, hw, axis=0).astype(dtype)   # (C*HW, OUT_PAD)

    b_fused = jnp.zeros((1, out_pad), jnp.float32)
    b_fused = b_fused.at[0, 0].set(b_cls[0])
    b_fused = b_fused.at[0, 1:1 + r4].set(b_bbox)
    return w_big, b_fused, r4


def _pick_tile_n(n, bytes_per_row):
    # Lane-dense accounting: one activation row costs exactly C*HW*itemsize.
    # Keep each pipeline buffer <= ~6 MiB so that, worst case,
    #   2 x 6 MiB (activations) + 2 x 6.4 MiB (unpinned f32 weight) + output
    # stays comfortably under the 32 MiB scoped-VMEM limit requested below
    # (valid headroom on v5e / v6e / v7x).
    tn = (6 * 1024 * 1024) // max(int(bytes_per_row), 1)
    tn = max(8, min(512, (tn // 8) * 8))
    # Ensure several grid steps: both v7x TensorCores get work via the
    # "parallel" axis, and the DMA pipeline has something to overlap.
    tn = min(tn, max(8, pl.cdiv(pl.cdiv(n, 4), 8) * 8))
    return tn


def fast_rcnn_predictor(x_nchw, w_big, b_fused, r4, *, tile_n=None):
    """x_nchw: (N, C, H, W) features; (w_big, b_fused, r4) from
    pack_fast_rcnn_params (x dtype should match w_big dtype).
    Returns (cls_logit (N, 1), bbox_pred (N, R4))."""
    n, c, h, w = x_nchw.shape
    chw = c * h * w
    out_pad = w_big.shape[1]
    assert w_big.shape[0] == chw, "packed weight does not match feature shape"

    # Zero-cost view NCHW -> (N, C*H*W): last dim is contiguous in HBM, so
    # every activation DMA is a full-lane dense transfer.
    x_flat = x_nchw.reshape(n, chw)

    tn = _pick_tile_n(n, chw * x_flat.dtype.itemsize) if tile_n is None else tile_n
    grid = (pl.cdiv(n, tn),)   # partial trailing block handled by Pallas; no jnp.pad copy

    itemsize = x_flat.dtype.itemsize
    cost = pl.CostEstimate(
        flops=2 * n * chw * out_pad,
        transcendentals=0,
        bytes_accessed=(n * chw * itemsize            # activations (read once)
                        + chw * out_pad * w_big.dtype.itemsize   # weight
                        + out_pad * 4                  # bias
                        + n * out_pad * 4),            # output
    )

    def build(pin_resident):
        resident_kwargs = (
            {"pipeline_mode": pl.Buffered(1)} if pin_resident else {}
        )
        return pl.pallas_call(
            _predictor_kernel,
            out_shape=jax.ShapeDtypeStruct((n, out_pad), jnp.float32),
            grid=grid,
            in_specs=[
                # Streamed activation tiles (double-buffered by Pallas).
                pl.BlockSpec((tn, chw), lambda i: (i, 0)),
                # VMEM-resident fused weight / bias: constant index_map, pinned
                # to a single buffer (no double-buffer duplication).
                pl.BlockSpec((chw, out_pad), lambda i: (0, 0), **resident_kwargs),
                pl.BlockSpec((1, out_pad), lambda i: (0, 0), **resident_kwargs),
            ],
            out_specs=pl.BlockSpec((tn, out_pad), lambda i: (i, 0)),
            compiler_params=pltpu.CompilerParams(
                dimension_semantics=("parallel",),
                vmem_limit_bytes=32 * 1024 * 1024,
            ),
            cost_estimate=cost,
        )

    try:
        out = build(pin_resident=True)(x_flat, w_big, b_fused)
    except Exception:
        # pl.Buffered(1) pinning unsupported by this jax/Mosaic version: fall
        # back to default double-buffering (VMEM budget already allows it).
        out = build(pin_resident=False)(x_flat, w_big, b_fused)

    cls_logit = out[:, 0:1]
    bbox_pred = out[:, 1:1 + r4]
    return cls_logit, bbox_pred


if __name__ == "__main__":
    # Small, module-consistent shapes: ROI features (N, C, H, W).
    # N is deliberately NOT a multiple of 8 so the pad-free partial trailing
    # block path is exercised.
    N, C, H, W = 19, 256, 7, 7
    NUM_CLASSES = 8                 # config.MODEL.ROI_BOX_HEAD.NUM_CLASSES
    CLS_AGNOSTIC_BBOX_REG = False
    num_bbox_reg_classes = 2 if CLS_AGNOSTIC_BBOX_REG else NUM_CLASSES
    R4 = num_bbox_reg_classes * 4

    key = jax.random.PRNGKey(0)
    kx, kwc, kwb = jax.random.split(key, 3)

    x = jax.random.normal(kx, (N, C, H, W), dtype=jnp.float32)

    # Deterministic parameter init mirroring the module's __init__:
    #   cls_score.weight ~ N(0, 0.01), bias = 0
    #   bbox_pred.weight ~ N(0, 0.001), bias = 0
    w_cls = 0.01 * jax.random.normal(kwc, (1, C), dtype=jnp.float32)
    b_cls = jnp.zeros((1,), dtype=jnp.float32)
    w_bbox = 0.001 * jax.random.normal(kwb, (R4, C), dtype=jnp.float32)
    b_bbox = jnp.zeros((R4,), dtype=jnp.float32)

    # One-time parameter packing (hoisted out of the per-call path).
    w_big, b_fused, r4 = pack_fast_rcnn_params(w_cls, b_cls, w_bbox, b_bbox, H, W)
    jax.block_until_ready((w_big, b_fused))

    cls_logit, bbox_pred = fast_rcnn_predictor(x, w_big, b_fused, r4)
    jax.block_until_ready((cls_logit, bbox_pred))

    # Pure-JAX reference check.
    pooled_ref = jnp.mean(x, axis=(2, 3))                       # (N, C)
    cls_ref = pooled_ref @ w_cls.T + b_cls                      # (N, 1)
    bbox_ref = pooled_ref @ w_bbox.T + b_bbox                   # (N, R4)

    assert cls_logit.shape == (N, 1) and bbox_pred.shape == (N, R4)
    assert jnp.allclose(cls_logit, cls_ref, atol=1e-4, rtol=1e-4)
    assert jnp.allclose(bbox_pred, bbox_ref, atol=1e-4, rtol=1e-4)
    print("KERNEL_OK")
</pallas_src>

<mosaic_0001>
module attributes {stable_mosaic.version = 11 : i64} {
  func.func @_predictor_kernel(%arg0: i32, %arg1: memref<8x12544xf32, #tpu.memory_space<vmem>>, %arg2: memref<12544x128xf32, #tpu.memory_space<vmem>>, %arg3: memref<1x128xf32, #tpu.memory_space<vmem>>, %arg4: memref<8x128xf32, #tpu.memory_space<vmem>>) attributes {dimension_semantics = [#tpu.dimension_semantics<parallel>], iteration_bounds = array<i64: 3>, scalar_prefetch = 0 : i64, scratch_operands = 0 : i64, tpu.core_type = #tpu.core_type<tc>, window_params = [{transform_indices = @transform_0, window_bounds = array<i64: 8, 12544>}, {pipeline_mode = #tpu.pipeline_mode<synchronous>, transform_indices = @transform_1, window_bounds = array<i64: 12544, 128>}, {pipeline_mode = #tpu.pipeline_mode<synchronous>, transform_indices = @transform_2, window_bounds = array<i64: 1, 128>}, {transform_indices = @transform_3, window_bounds = array<i64: 8, 128>}]} {
    %c0 = arith.constant 0 : index
    %c0_0 = arith.constant 0 : index
    %0 = vector.load %arg1[%c0, %c0_0] : memref<8x12544xf32, #tpu.memory_space<vmem>>, vector<8x12544xf32>
    %c0_1 = arith.constant 0 : index
    %c0_2 = arith.constant 0 : index
    %1 = vector.load %arg2[%c0_1, %c0_2] : memref<12544x128xf32, #tpu.memory_space<vmem>>, vector<12544x128xf32>
    %cst = arith.constant dense<0.000000e+00> : vector<8x128xf32>
    %2 = tpu.matmul %0, %1, %cst {dimension_numbers = #tpu.dot_dimension_numbers<[1], [0], [0], [1], [0, 0, 1, 1], [], []>} : vector<8x12544xf32>, vector<12544x128xf32>, vector<8x128xf32> -> vector<8x128xf32>
    %c0_3 = arith.constant 0 : index
    %c0_4 = arith.constant 0 : index
    %3 = vector.load %arg3[%c0_3, %c0_4] : memref<1x128xf32, #tpu.memory_space<vmem>>, vector<1x128xf32>
    %4 = vector.broadcast %3 : vector<1x128xf32> to vector<8x128xf32>
    %5 = arith.addf %2, %4 : vector<8x128xf32>
    %c0_5 = arith.constant 0 : index
    %c0_6 = arith.constant 0 : index
    %6 = vector.load %arg4[%c0_5, %c0_6] : memref<8x128xf32, #tpu.memory_space<vmem>>, vector<8x128xf32>
    tpu.vector_store %arg4[%c0_5, %c0_6], %5 {strides = array<i32>} : memref<8x128xf32, #tpu.memory_space<vmem>>, vector<8x128xf32>,
    return
  }
  func.func @transform_0(%arg0: i32) -> (i32, i32) {
    %c0_i32 = arith.constant 0 : i32
    %c0_i32_0 = arith.constant 0 : i32
    return %arg0, %c0_i32 : i32, i32
  }
  func.func @transform_1(%arg0: i32) -> (i32, i32) {
    %c0_i32 = arith.constant 0 : i32
    %c0_i32_0 = arith.constant 0 : i32
    %c0_i32_1 = arith.constant 0 : i32
    return %c0_i32, %c0_i32_0 : i32, i32
  }
  func.func @transform_2(%arg0: i32) -> (i32, i32) {
    %c0_i32 = arith.constant 0 : i32
    %c0_i32_0 = arith.constant 0 : i32
    %c0_i32_1 = arith.constant 0 : i32
    return %c0_i32, %c0_i32_0 : i32, i32
  }
  func.func @transform_3(%arg0: i32) -> (i32, i32) {
    %c0_i32 = arith.constant 0 : i32
    %c0_i32_0 = arith.constant 0 : i32
    return %arg0, %c0_i32 : i32, i32
  }
}

module attributes {stable_mosaic.version = 11 : i64} {
  func.func @_predictor_kernel(%arg0: i32, %arg1: memref<8x12544xf32, #tpu.memory_space<vmem>>, %arg2: memref<12544x128xf32, #tpu.memory_space<vmem>>, %arg3: memref<1x128xf32, #tpu.memory_space<vmem>>, %arg4: memref<8x128xf32, #tpu.memory_space<vmem>>) attributes {dimension_semantics = [#tpu.dimension_semantics<parallel>], iteration_bounds = array<i64: 3>, scalar_prefetch = 0 : i64, scratch_operands = 0 : i64, tpu.core_type = #tpu.core_type<tc>, window_params = [{transform_indices = @transform_0, window_bounds = array<i64: 8, 12544>}, {pipeline_mode = #tpu.pipeline_mode<synchronous>, transform_indices = @transform_1, window_bounds = array<i64: 12544, 128>}, {pipeline_mode = #tpu.pipeline_mode<synchronous>, transform_indices = @transform_2, window_bounds = array<i64: 1, 128>}, {transform_indices = @transform_3, window_bounds = array<i64: 8, 128>}]} {
    %c0 = arith.constant 0 : index
    %c0_0 = arith.constant 0 : index
    %0 = vector.load %arg1[%c0, %c0_0] : memref<8x12544xf32, #tpu.memory_space<vmem>>, vector<8x12544xf32>
    %c0_1 = arith.constant 0 : index
    %c0_2 = arith.constant 0 : index
    %1 = vector.load %arg2[%c0_1, %c0_2] : memref<12544x128xf32, #tpu.memory_space<vmem>>, vector<12544x128xf32>
    %cst = arith.constant dense<0.000000e+00> : vector<8x128xf32>
    %2 = tpu.matmul %0, %1, %cst {dimension_numbers = #tpu.dot_dimension_numbers<[1], [0], [0], [1], [0, 0, 1, 1], [], []>} : vector<8x12544xf32>, vector<12544x128xf32>, vector<8x128xf32> -> vector<8x128xf32>
    %c0_3 = arith.constant 0 : index
    %c0_4 = arith.constant 0 : index
    %3 = vector.load %arg3[%c0_3, %c0_4] : memref<1x128xf32, #tpu.memory_space<vmem>>, vector<1x128xf32>
    %4 = vector.broadcast %3 : vector<1x128xf32> to vector<8x128xf32>
    %5 = arith.addf %2, %4 : vector<8x128xf32>
    %c0_5 = arith.constant 0 : index
    %c0_6 = arith.constant 0 : index
    %6 = vector.load %arg4[%c0_5, %c0_6] : memref<8x128xf32, #tpu.memory_space<vmem>>, vector<8x128xf32>
    tpu.vector_store %arg4[%c0_5, %c0_6], %5 {strides = array<i32>} : memref<8x128xf32, #tpu.memory_space<vmem>>, vector<8x128xf32>,
    return
  }
  func.func @transform_0(%arg0: i32) -> (i32, i32) {
    %c0_i32 = arith.constant 0 : i32
    %c0_i32_0 = arith.constant 0 : i32
    return %arg0, %c0_i32 : i32, i32
  }
  func.func @transform_1(%arg0: i32) -> (i32, i32) {
    %c0_i32 = arith.constant 0 : i32
    %c0_i32_0 = arith.constant 0 : i32
    %c0_i32_1 = arith.constant 0 : i32
    return %c0_i32, %c0_i32_0 : i32, i32
  }
  func.func @transform_2(%arg0: i32) -> (i32, i32) {
    %c0_i32 = arith.constant 0 : i32
    %c0_i32_0 = arith.constant 0 : i32
    %c0_i32_1 = arith.constant 0 : i32
    return %c0_i32, %c0_i32_0 : i32, i32
  }
  func.func @transform_3(%arg0: i32) -> (i32, i32) {
    %c0_i32 = arith.constant 0 : i32
    %c0_i32_0 = arith.constant 0 : i32
    return %arg0, %c0_i32 : i32, i32
  }
}

</mosaic_0001>

<bundles_post_ra>
// kernel: tpu_custom_call.1
= control target key start
LH: loop header
LB: loop body
LE: loop exit
PB: predicated region body
PF: predicated region fallthrough
CT: control target
= control target key end

     0   :  { %8 = vsyncpa [#allocation3], 0  ;;  %s4467_s0 = inlined_call_operand.hbm [shape: f32[19,12544], index: 0, kind: input, shape index: {}]   ;;  %s4468_s1 = inlined_call_operand.hbm [shape: f32[12544,128], index: 1, kind: input, shape index: {}]   ;;  %s4469_s2 = inlined_call_operand.hbm [shape: f32[1,128], index: 2, kind: input, shape index: {}]   ;;  %s4470_s3 = inlined_call_operand.hbm [shape: f32[19,128], index: 3, kind: output, shape index: {}]  }
   0x1   :  { %10 = vsyncpa [#allocation3 + $0x1], 0 }
   0x2   :  { %11 = vsyncpa [#allocation6], 0 }
   0x3   :  { %12 = vsyncpa [#allocation4], 0 }
   0x4   :  { %14 = vsyncpa [#allocation4 + $0x1], 0  ;;  %s4229_s12 = smov 0   ;;  %s4231_s13 = smov 0  }
   0x5   :  { %s4233_s14 = smov 0   ;;  %s4235_s15 = smov 0  }
   0x6 LB: > { %s130_s18 = sshll.u32 %s4468_s1, 4  ;;  %s4253_s19 = sadd.s32 4294967295, %s4203_s15   ;;  %s4203_s15 = sphi %s4235_s15, %s4479_s15   ;;  %s4199_s14 = sphi %s4233_s14, %s4478_s14   ;;  %s4195_s13 = sphi %s4231_s13, %s4477_s13   ;;  %s4191_s12 = sphi %s4229_s12, %s4476_s12   ;;  %s131_s18 = int_to_ptr.hbm [resolvable:$true] %s130_s18 }
   0x7   : > { %p3957_p0 = scmp.ge.s32.totalorder %s4203_s15, 1  ;;  %p41_p1 = scmp.eq.s32.totalorder %s4253_s19, 0 }
   0x8   : > { %p119_p2 = scmp.lt.s32.totalorder %s4203_s15, 4  ;;  %s4205_s21 = smov [#allocation5]  }
   0x9   : > { %s132_s22 = sshll.u32 %s4205_s21, 4  ;;  %s145_s25 = sshll.u32 %s4469_s2, 4  ;;  %s133_s22 = int_to_ptr.vmem [resolvable:$true] %s132_s22  ;;  %s146_s25 = int_to_ptr.hbm [resolvable:$true] %s145_s25 }
   0xa   : > { %p4258_p3 = pnand %p3957_p0, %p119_p2  ;;  %s4206_s26 = smov [#allocation7]  }
   0xb   : > { %s147_s27 = sshll.u32 %s4206_s26, 4  ;;  %s4207_s28 = smov 128   ;;  %s148_s27 = int_to_ptr.vmem [resolvable:$true] %s147_s27 }
   0xc   : > { %p3985_p4 = pneg %p4258_p3  ;;  %s4208_s29 = smov 8  }
   0xd   : > { %s3956_s30 = sadd.s32 4294967294, %s4203_s15   ;;  %s4271_s4 = sadd.s32 1, %s4203_s15  }
   0xe   : > { %p3986_p5 = pnand %p3985_p4, %p41_p1  ;;  %s24_s5 = ssub.s32 %s4203_s15, %s4271_s4 }
   0xf   : > { %s27_s6 = sadd.s32 1, %s4199_s14  ;;  %p25_p6 = scmp.eq.s32.totalorder %s24_s5, 0 }
  0x10   : > { %3988 = dma.hbm_to_vmem [thread:$0]  (!%p3986_p5), %s131_s18, 200704, %s133_s22, [#allocation6], %s4207_s28, %s4207_s28, %s4208_s29  }
  0x11   : > { %3991 = dma.hbm_to_vmem [thread:$0]  (!%p3986_p5), %s146_s25, 16, %s148_s27, [#allocation6]  }
  0x12   : > { %p34_p7 = scmp.ne.s32.totalorder %s4199_s14, %s4195_s13  ;;  %p35_p8 = scmp.eq.s32.totalorder %s4203_s15, 0 }
  0x13   : > { %p40_p9 = scmp.ne.s32.totalorder %s4195_s13, %s4191_s12  ;;  %p106_p12 = scmp.eq.s32.totalorder %s4253_s19, 2 }
  0x14   : > { %s4282_s7 = scalar_select %p25_p6, %s4199_s14, %s27_s6  }
  0x15   : > { %p36_p10 = por %p35_p8, %p34_p7  ;;  %p4286_p11 = por %p41_p1, %p40_p9 }
  0x16   : > { %p112_p13 = scmp.eq.s32.totalorder %s3956_s30, 2  ;;  %p4002_p0 = scmp.lt.s32.totalorder %s4203_s15, 3 }
  0x17   : > { %s158_s9 = sand.u32 1, %s4199_s14   ;;  %p4293_p2 = por %p106_p12, %p34_p7 }
  0x18   : > { %p4297_p4 = por %p112_p13, %p40_p9  ;;  %s3970_s16 = smul.u32 784, %s158_s9 }
  0x19   : > { %s3971_s17 = smul.u32 784, %s4203_s15  ;;  %p4302_p5 = pnand %p4002_p0, %p36_p10 }
  0x1a   : > { %s162_s24 = scalar_lea.vmem [#allocation2], %s3970_s16  ;;  %s159_s27 = scalar_lea.sflag [#allocation3], %s158_s9 }
  0x1b   : > { %s167_s23 = scalar_lea.hbm %s4467_s0, %s3971_s17  ;;  %s171_s25 = sshll.u32 %s162_s24, 4  ;;  %s172_s25 = int_to_ptr.vmem [resolvable:$true] %s171_s25 }
  0x1c   : > { %s169_s26 = sshll.u32 %s167_s23, 4  ;;  %p4107_p7 = pneg %p4302_p5  ;;  %s170_s26 = int_to_ptr.hbm [resolvable:$true] %s169_s26 }
  0x1d   : > { %s4103_s28 = sshra.s32 %s170_s26, 4  ;;  %s4110_s6 = scalar_lea.hbm %s4467_s0, 2352  ;;  %s4104_s28 = int_to_ptr.hbm [resolvable:$true] %s4103_s28 }
  0x1e   : > { %s4105_s29 = scalar_lea.hbm %s4104_s28, 784  ;;  %p4111_p10 = scmp.lt.s32.totalorder %s4104_s28, %s4467_s0 }
  0x1f   : > { %p4106_p6 = scmp.ne.s32.totalorder %s4104_s28, %s4105_s29  ;;  %p4112_p12 = scmp.lt.s32.totalorder %s4110_s6, %s4105_s29 }
  0x21   : > { %p4108_p8 = pnand %p4107_p7, %p4106_p6  ;;  %p4113_p13 = por %p4112_p12, %p4111_p10 }
  0x23   : > { %p4109_p9 = pneg %p4108_p8 }
  0x25   : > { %p4114_p0 = pnand %p4113_p13, %p4109_p9 }
  0x27   : > { %4117 = shalt.err (!%p4114_p0)
}
  0x28   : > { %3995 = dma.hbm_to_vmem [thread:$0]  (!%p4302_p5), %s170_s26, 12544, %s172_s25, %s159_s27  }
  0x29   : > { %180 = sbr.rel (%p4258_p3) target bundleno = 1030 (0x406), region = 32  ;;  %s4322_s9 = sand.u32 (!%p4258_p3), 1, %s4195_s13  }
  0x2a   : > { %s3972_s16 = smul.u32 (!%p4258_p3), 784, %s4322_s9  ;;  %s183_s22 = scalar_lea.sflag (!%p4258_p3), [#allocation3], %s4322_s9 }
  0x2c   : > { %s4326_s23 = scalar_lea.vmem (!%p4258_p3), [#allocation2], %s3972_s16 }
  0x2e   : > { %4178 = dma.done.wait (%p4286_p11), %s183_s22, 12544  }
  0x2f   : > { %4180 = vsyncadd (%p4286_p11), %s183_s22, 4294954752 }
  0x30   : > { %4182 = dma.done.wait (%p41_p1), [#allocation6], 200720  }
  0x31   : > { %4184 = vsyncadd (%p41_p1), [#allocation6], 4294766576  ;;  %v333_v0 = vld [vmem:[#allocation5 + $0x78] sm:$0xff]  ;;  %v332_v2 = vld [vmem:[#allocation5 + $0x70] sm:$0xff]  ;;  %s3965_s20 = sshll.u32 %s4322_s9, 3  ;;  %s3967_s8 = sshll.u32 %s4253_s19, 3 }
  0x32   : > { %v365_v1 = vld [vmem:[#allocation5 + $0x178] sm:$0xff]  ;;  %1890 = vmatpush.msra.mxu0 %v333_v0  ;;  %v364_v4 = vld [vmem:[#allocation5 + $0x170] sm:$0xff]  ;;  %v331_v6 = vld [vmem:[#allocation5 + $0x68] sm:$0xff]  ;;  %s3862_s25 = scalar_lea.hbm %s4470_s3, %s3967_s8  ;;  %s219_s26 = scalar_lea.vmem [#allocation8], %s3965_s20 }
  0x33   : > { %1930 = vmatpush.msra.mxu2 %v365_v1  ;;  %v349_v3 = vld [vmem:[#allocation5 + $0xf8] sm:$0xff]  ;;  %v348_v7 = vld [vmem:[#allocation5 + $0xf0] sm:$0xff]  ;;  %v363_v8 = vld [vmem:[#allocation5 + $0x168] sm:$0xff]  ;;  %s3864_s27 = sshll.u32 %s219_s26, 4  ;;  %s3866_s28 = sshll.u32 %s3862_s25, 4  ;;  %s3865_s27 = int_to_ptr.vmem [resolvable:$true] %s3864_s27  ;;  %s3867_s28 = int_to_ptr.hbm [resolvable:$true] %s3866_s28 }
  0x34   : > { %v381_v5 = vld [vmem:[#allocation5 + $0x1f8] sm:$0xff]  ;;  %1910 = vmatpush.msra.mxu1 %v349_v3  ;;  %1891 = vmatpush.msra.mxu0 %v332_v2  ;;  %v380_v9 = vld [vmem:[#allocation5 + $0x1f0] sm:$0xff]  ;;  %v347_v10 = vld [vmem:[#allocation5 + $0xe8] sm:$0xff]  ;;  %s3852_s29 = scalar_lea.sflag [#allocation4], %s4322_s9  ;;  %s4147_s30 = sshra.s32 %s3867_s28, 4  ;;  %s4148_s30 = int_to_ptr.hbm [resolvable:$true] %s4147_s30 }
  0x35   : > { %1950 = vmatpush.msra.mxu3 %v381_v5  ;;  %1931 = vmatpush.msra.mxu2 %v364_v4  ;;  %v330_v11 = vld [vmem:[#allocation5 + $0x60] sm:$0xff]  ;;  %v379_v13 = vld [vmem:[#allocation5 + $0x1e8] sm:$0xff]  ;;  %v329_v16 = vld [vmem:[#allocation5 + $0x58] sm:$0xff]  ;;  %s4149_s19 = scalar_lea.hbm %s4148_s30, 8  ;;  %s4153_s21 = scalar_lea.hbm %s4470_s3, 24 }
  0x36   : > { %1911 = vmatpush.msra.mxu1 %v348_v7  ;;  %v362_v12 = vld [vmem:[#allocation5 + $0x160] sm:$0xff]  ;;  %1892 = vmatpush.msra.mxu0 %v331_v6  ;;  %v361_v17 = vld [vmem:[#allocation5 + $0x158] sm:$0xff]  ;;  %v328_v20 = vld [vmem:[#allocation5 + $0x50] sm:$0xff]  ;;  %p4150_p1 = scmp.ne.s32.totalorder %s4148_s30, %s4149_s19  ;;  %p4154_p5 = scmp.lt.s32.totalorder %s4148_s30, %s4470_s3 }
  0x37   : > { %1951 = vmatpush.msra.mxu3 %v380_v9  ;;  %1932 = vmatpush.msra.mxu2 %v363_v8  ;;  %v346_v14 = vld [vmem:[#allocation5 + $0xe0] sm:$0xff]  ;;  %v345_v18 = vld [vmem:[#allocation5 + $0xd8] sm:$0xff]  ;;  %v360_v21 = vld [vmem:[#allocation5 + $0x150] sm:$0xff]  ;;  %p4155_p6 = scmp.lt.s32.totalorder %s4153_s21, %s4149_s19 }
  0x38   : > { %v378_v15 = vld [vmem:[#allocation5 + $0x1e0] sm:$0xff]  ;;  %1912 = vmatpush.msra.mxu1 %v347_v10  ;;  %1893 = vmatpush.msra.mxu0 %v330_v11  ;;  %v377_v19 = vld [vmem:[#allocation5 + $0x1d8] sm:$0xff]  ;;  %v344_v22 = vld [vmem:[#allocation5 + $0xd0] sm:$0xff]  ;;  %p4151_p3 = pnand %p4150_p1, %p4293_p2 }
  0x39   : > { %1952 = vmatpush.msra.mxu3 %v379_v13  ;;  %1933 = vmatpush.msra.mxu2 %v362_v12  ;;  %v376_v23 = vld [vmem:[#allocation5 + $0x1d0] sm:$0xff]  ;;  %v327_v24 = vld [vmem:[#allocation5 + $0x48] sm:$0xff]  ;;  %v326_v28 = vld [vmem:[#allocation5 + $0x40] sm:$0xff]  ;;  %p4156_p7 = por %p4155_p6, %p4154_p5 }
  0x3a   : > { %1913 = vmatpush.msra.mxu1 %v346_v14  ;;  %1894 = vmatpush.msra.mxu0 %v329_v16  ;;  %v359_v25 = vld [vmem:[#allocation5 + $0x148] sm:$0xff]  ;;  %v358_v29 = vld [vmem:[#allocation5 + $0x140] sm:$0xff]  ;;  %v325_v32 = vld [vmem:[#allocation5 + $0x38] sm:$0xff]  ;;  %p4152_p11 = pneg %p4151_p3 }
  0x3b   : > { %1953 = vmatpush.msra.mxu3 %v378_v15  ;;  %1934 = vmatpush.msra.mxu2 %v361_v17  ;;  %v343_v26 = vld [vmem:[#allocation5 + $0xc8] sm:$0xff]  ;;  %v342_v30 = vld [vmem:[#allocation5 + $0xc0] sm:$0xff]  ;;  %v357_v33 = vld [vmem:[#allocation5 + $0x138] sm:$0xff] }
  0x3c   : > { %1914 = vmatpush.msra.mxu1 %v345_v18  ;;  %1895 = vmatpush.msra.mxu0 %v328_v20  ;;  %v375_v27 = vld [vmem:[#allocation5 + $0x1c8] sm:$0xff]  ;;  %v374_v31 = vld [vmem:[#allocation5 + $0x1c0] sm:$0xff]  ;;  %v341_v34 = vld [vmem:[#allocation5 + $0xb8] sm:$0xff]  ;;  %p4157_p8 = pnand %p4156_p7, %p4152_p11 }
  0x3d   : > { %1954 = vmatpush.msra.mxu3 %v377_v19  ;;  %1935 = vmatpush.msra.mxu2 %v360_v21  ;;  %v373_v35 = vld [vmem:[#allocation5 + $0x1b8] sm:$0xff]  ;;  %v324_v36 = vld [vmem:[#allocation5 + $0x30] sm:$0xff]  ;;  %v323_v40 = vld [vmem:[#allocation5 + $0x28] sm:$0xff] }
  0x3e   : > { %1915 = vmatpush.msra.mxu1 %v344_v22  ;;  %1896 = vmatpush.msra.mxu0 %v327_v24  ;;  %v356_v37 = vld [vmem:[#allocation5 + $0x130] sm:$0xff]  ;;  %v355_v41 = vld [vmem:[#allocation5 + $0x128] sm:$0xff]  ;;  %v322_v44 = vld [vmem:[#allocation5 + $0x20] sm:$0xff] }
  0x3f   : > { %1955 = vmatpush.msra.mxu3 %v376_v23  ;;  %1936 = vmatpush.msra.mxu2 %v359_v25  ;;  %v340_v38 = vld [vmem:[#allocation5 + $0xb0] sm:$0xff]  ;;  %v339_v42 = vld [vmem:[#allocation5 + $0xa8] sm:$0xff]  ;;  %v354_v45 = vld [vmem:[#allocation5 + $0x120] sm:$0xff] }
  0x40   : > { %1916 = vmatpush.msra.mxu1 %v343_v26  ;;  %1897 = vmatpush.msra.mxu0 %v326_v28  ;;  %v372_v39 = vld [vmem:[#allocation5 + $0x1b0] sm:$0xff]  ;;  %v371_v43 = vld [vmem:[#allocation5 + $0x1a8] sm:$0xff]  ;;  %v338_v46 = vld [vmem:[#allocation5 + $0xa0] sm:$0xff] }
  0x41   : > { %1956 = vmatpush.msra.mxu3 %v375_v27  ;;  %1937 = vmatpush.msra.mxu2 %v358_v29  ;;  %v370_v47 = vld [vmem:[#allocation5 + $0x1a0] sm:$0xff]  ;;  %v321_v48 = vld [vmem:[#allocation5 + $0x18] sm:$0xff]  ;;  %v320_v52 = vld [vmem:[#allocation5 + $0x10] sm:$0xff] }
  0x42   : > { %1917 = vmatpush.msra.mxu1 %v342_v30  ;;  %1898 = vmatpush.msra.mxu0 %v325_v32  ;;  %v353_v49 = vld [vmem:[#allocation5 + $0x118] sm:$0xff]  ;;  %v352_v53 = vld [vmem:[#allocation5 + $0x110] sm:$0xff]  ;;  %v319_v56 = vld [vmem:[#allocation5 + $0x8] sm:$0xff] }
  0x43   : > { %1957 = vmatpush.msra.mxu3 %v374_v31  ;;  %1938 = vmatpush.msra.mxu2 %v357_v33  ;;  %v337_v50 = vld [vmem:[#allocation5 + $0x98] sm:$0xff]  ;;  %v336_v54 = vld [vmem:[#allocation5 + $0x90] sm:$0xff]  ;;  %v351_v57 = vld [vmem:[#allocation5 + $0x108] sm:$0xff] }
  0x44   : > { %1918 = vmatpush.msra.mxu1 %v341_v34  ;;  %1899 = vmatpush.msra.mxu0 %v324_v36  ;;  %v369_v51 = vld [vmem:[#allocation5 + $0x198] sm:$0xff]  ;;  %v368_v55 = vld [vmem:[#allocation5 + $0x190] sm:$0xff]  ;;  %v335_v58 = vld [vmem:[#allocation5 + $0x88] sm:$0xff] }
  0x45   : > { %1958 = vmatpush.msra.mxu3 %v373_v35  ;;  %1939 = vmatpush.msra.mxu2 %v356_v37  ;;  %v367_v59 = vld [vmem:[#allocation5 + $0x188] sm:$0xff]  ;;  %v318_v60 = vld [vmem:[#allocation5] sm:$0xff]  ;;  %v397_v62 = vld [vmem:[#allocation5 + $0x278] sm:$0xff] }
  0x46   : > { %1919 = vmatpush.msra.mxu1 %v340_v38  ;;  %1900 = vmatpush.msra.mxu0 %v323_v40  ;;  %v350_v61 = vld [vmem:[#allocation5 + $0x100] sm:$0xff]  ;;  %v429_v63 = vld [vmem:[#allocation5 + $0x378] sm:$0xff]  ;;  %v396_v2 = vld [vmem:[#allocation5 + $0x270] sm:$0xff] }
  0x47   : > { %1959 = vmatpush.msra.mxu3 %v372_v39  ;;  %1940 = vmatpush.msra.mxu2 %v355_v41  ;;  %v334_v0 = vld [vmem:[#allocation5 + $0x80] sm:$0xff]  ;;  %v413_v3 = vld [vmem:[#allocation5 + $0x2f8] sm:$0xff]  ;;  %v428_v4 = vld [vmem:[#allocation5 + $0x370] sm:$0xff] }
  0x48   : > { %1920 = vmatpush.msra.mxu1 %v339_v42  ;;  %1901 = vmatpush.msra.mxu0 %v322_v44  ;;  %v366_v1 = vld [vmem:[#allocation5 + $0x180] sm:$0xff]  ;;  %v445_v5 = vld [vmem:[#allocation5 + $0x3f8] sm:$0xff]  ;;  %v395_v6 = vld [vmem:[#allocation5 + $0x268] sm:$0xff] }
  0x49   : > { %1960 = vmatpush.msra.mxu3 %v371_v43  ;;  %1941 = vmatpush.msra.mxu2 %v354_v45  ;;  %v412_v7 = vld [vmem:[#allocation5 + $0x2f0] sm:$0xff]  ;;  %v427_v8 = vld [vmem:[#allocation5 + $0x368] sm:$0xff]  ;;  %v394_v10 = vld [vmem:[#allocation5 + $0x260] sm:$0xff] }
  0x4a   : > { %1921 = vmatpush.msra.mxu1 %v338_v46  ;;  %1902 = vmatpush.msra.mxu0 %v321_v48  ;;  %v444_v9 = vld [vmem:[#allocation5 + $0x3f0] sm:$0xff]  ;;  %v411_v11 = vld [vmem:[#allocation5 + $0x2e8] sm:$0xff]  ;;  %v426_v12 = vld [vmem:[#allocation5 + $0x360] sm:$0xff] }
  0x4b   : > { %1961 = vmatpush.msra.mxu3 %v370_v47  ;;  %1942 = vmatpush.msra.mxu2 %v353_v49  ;;  %v443_v13 = vld [vmem:[#allocation5 + $0x3e8] sm:$0xff]  ;;  %v393_v14 = vld [vmem:[#allocation5 + $0x258] sm:$0xff]  ;;  %v410_v15 = vld [vmem:[#allocation5 + $0x2e0] sm:$0xff] }
  0x4c   : > { %1922 = vmatpush.msra.mxu1 %v337_v50  ;;  %1903 = vmatpush.msra.mxu0 %v320_v52  ;;  %v425_v16 = vld [vmem:[#allocation5 + $0x358] sm:$0xff]  ;;  %v442_v17 = vld [vmem:[#allocation5 + $0x3e0] sm:$0xff]  ;;  %v392_v18 = vld [vmem:[#allocation5 + $0x250] sm:$0xff] }
  0x4d   : > { %1962 = vmatpush.msra.mxu3 %v369_v51  ;;  %1943 = vmatpush.msra.mxu2 %v352_v53  ;;  %v409_v19 = vld [vmem:[#allocation5 + $0x2d8] sm:$0xff]  ;;  %v424_v20 = vld [vmem:[#allocation5 + $0x350] sm:$0xff]  ;;  %v391_v22 = vld [vmem:[#allocation5 + $0x248] sm:$0xff] }
  0x4e   : > { %1923 = vmatpush.msra.mxu1 %v336_v54  ;;  %1904 = vmatpush.msra.mxu0 %v319_v56  ;;  %v441_v21 = vld [vmem:[#allocation5 + $0x3d8] sm:$0xff]  ;;  %v408_v23 = vld [vmem:[#allocation5 + $0x2d0] sm:$0xff]  ;;  %v423_v24 = vld [vmem:[#allocation5 + $0x348] sm:$0xff] }
  0x4f   : > { %1963 = vmatpush.msra.mxu3 %v368_v55  ;;  %1944 = vmatpush.msra.mxu2 %v351_v57  ;;  %v440_v25 = vld [vmem:[#allocation5 + $0x3d0] sm:$0xff]  ;;  %v390_v26 = vld [vmem:[#allocation5 + $0x240] sm:$0xff]  ;;  %v407_v27 = vld [vmem:[#allocation5 + $0x2c8] sm:$0xff] }
  0x50   : > { %1924 = vmatpush.msra.mxu1 %v335_v58  ;;  %1905 = vmatpush.msra.mxu0 %v318_v60  ;;  %v422_v28 = vld [vmem:[#allocation5 + $0x340] sm:$0xff]  ;;  %v439_v29 = vld [vmem:[#allocation5 + $0x3c8] sm:$0xff]  ;;  %v389_v30 = vld [vmem:[#allocation5 + $0x238] sm:$0xff] }
  0x51   : > { %1964 = vmatpush.msra.mxu3 %v367_v59  ;;  %1945 = vmatpush.msra.mxu2 %v350_v61  ;;  %v406_v31 = vld [vmem:[#allocation5 + $0x2c0] sm:$0xff]  ;;  %v421_v32 = vld [vmem:[#allocation5 + $0x338] sm:$0xff]  ;;  %v388_v34 = vld [vmem:[#allocation5 + $0x230] sm:$0xff] }
  0x52   : > { %1970 = vmatpush.msrb.mxu0 %v397_v62  ;;  %1925 = vmatpush.msra.mxu1 %v334_v0  ;;  %v438_v33 = vld [vmem:[#allocation5 + $0x3c0] sm:$0xff]  ;;  %v405_v35 = vld [vmem:[#allocation5 + $0x2b8] sm:$0xff]  ;;  %v420_v36 = vld [vmem:[#allocation5 + $0x330] sm:$0xff] }
  0x53   : > { %2010 = vmatpush.msrb.mxu2 %v429_v63  ;;  %1965 = vmatpush.msra.mxu3 %v366_v1  ;;  %v437_v37 = vld [vmem:[#allocation5 + $0x3b8] sm:$0xff]  ;;  %v387_v38 = vld [vmem:[#allocation5 + $0x228] sm:$0xff]  ;;  %v404_v39 = vld [vmem:[#allocation5 + $0x2b0] sm:$0xff] }
  0x54   : > { %1971 = vmatpush.msrb.mxu0 %v396_v2  ;;  %1990 = vmatpush.msrb.mxu1 %v413_v3  ;;  %v419_v40 = vld [vmem:[#allocation5 + $0x328] sm:$0xff]  ;;  %v436_v41 = vld [vmem:[#allocation5 + $0x3b0] sm:$0xff]  ;;  %v386_v42 = vld [vmem:[#allocation5 + $0x220] sm:$0xff] }
  0x55   : > { %2011 = vmatpush.msrb.mxu2 %v428_v4  ;;  %2030 = vmatpush.msrb.mxu3 %v445_v5  ;;  %v403_v43 = vld [vmem:[#allocation5 + $0x2a8] sm:$0xff]  ;;  %v418_v44 = vld [vmem:[#allocation5 + $0x320] sm:$0xff]  ;;  %v385_v46 = vld [vmem:[#allocation5 + $0x218] sm:$0xff] }
  0x56   : > { %1972 = vmatpush.msrb.mxu0 %v395_v6  ;;  %1991 = vmatpush.msrb.mxu1 %v412_v7  ;;  %v435_v45 = vld [vmem:[#allocation5 + $0x3a8] sm:$0xff]  ;;  %v402_v47 = vld [vmem:[#allocation5 + $0x2a0] sm:$0xff]  ;;  %v417_v48 = vld [vmem:[#allocation5 + $0x318] sm:$0xff] }
  0x57   : > { %2012 = vmatpush.msrb.mxu2 %v427_v8  ;;  %2031 = vmatpush.msrb.mxu3 %v444_v9  ;;  %v434_v49 = vld [vmem:[#allocation5 + $0x3a0] sm:$0xff]  ;;  %v384_v50 = vld [vmem:[#allocation5 + $0x210] sm:$0xff]  ;;  %v401_v51 = vld [vmem:[#allocation5 + $0x298] sm:$0xff] }
  0x58   : > { %1973 = vmatpush.msrb.mxu0 %v394_v10  ;;  %1992 = vmatpush.msrb.mxu1 %v411_v11  ;;  %v416_v52 = vld [vmem:[#allocation5 + $0x310] sm:$0xff]  ;;  %v433_v53 = vld [vmem:[#allocation5 + $0x398] sm:$0xff]  ;;  %v383_v54 = vld [vmem:[#allocation5 + $0x208] sm:$0xff] }
  0x59   : > { %2013 = vmatpush.msrb.mxu2 %v426_v12  ;;  %2032 = vmatpush.msrb.mxu3 %v443_v13  ;;  %v400_v55 = vld [vmem:[#allocation5 + $0x290] sm:$0xff]  ;;  %v415_v56 = vld [vmem:[#allocation5 + $0x308] sm:$0xff]  ;;  %v382_v59 = vld [vmem:[#allocation5 + $0x200] sm:$0xff] }
  0x5a   : > { %1974 = vmatpush.msrb.mxu0 %v393_v14  ;;  %1993 = vmatpush.msrb.mxu1 %v410_v15  ;;  %v432_v57 = vld [vmem:[#allocation5 + $0x390] sm:$0xff]  ;;  %v399_v60 = vld [vmem:[#allocation5 + $0x288] sm:$0xff]  ;;  %v414_v61 = vld [vmem:[#allocation5 + $0x300] sm:$0xff] }
  0x5b   : > { %2014 = vmatpush.msrb.mxu2 %v425_v16  ;;  %2033 = vmatpush.msrb.mxu3 %v442_v17  ;;  %v222_v58 = vld [vmem:[%s4326_s23 + $0x10] sm:$0xff]  ;;  %v431_v62 = vld [vmem:[#allocation5 + $0x388] sm:$0xff]  ;;  %v220_v63 = vld [vmem:[%s4326_s23] sm:$0xff] }
  0x5c   : > { %1975 = vmatpush.msrb.mxu0 %v392_v18  ;;  %1994 = vmatpush.msrb.mxu1 %v409_v19  ;;  %v223_v0 = vld [vmem:[%s4326_s23 + $0x18] sm:$0xff]  ;;  %v398_v3 = vld [vmem:[#allocation5 + $0x280] sm:$0xff]  ;;  %v221_v5 = vld [vmem:[%s4326_s23 + $0x8] sm:$0xff] }
  0x5d   : > { %2015 = vmatpush.msrb.mxu2 %v424_v20  ;;  %2034 = vmatpush.msrb.mxu3 %v441_v21  ;;  %v461_v1 = vld [vmem:[#allocation5 + $0x478] sm:$0xff]  ;;  %v430_v4 = vld [vmem:[#allocation5 + $0x380] sm:$0xff]  ;;  %v460_v6 = vld [vmem:[#allocation5 + $0x470] sm:$0xff] }
  0x5e   : > { %1976 = vmatpush.msrb.mxu0 %v391_v22  ;;  %1995 = vmatpush.msrb.mxu1 %v408_v23  ;;  %v493_v2 = vld [vmem:[#allocation5 + $0x578] sm:$0xff]  ;;  %v492_v8 = vld [vmem:[#allocation5 + $0x570] sm:$0xff]  ;;  %v459_v10 = vld [vmem:[#allocation5 + $0x468] sm:$0xff] }
  0x5f   : > { %2016 = vmatpush.msrb.mxu2 %v423_v24  ;;  %2035 = vmatpush.msrb.mxu3 %v440_v25  ;;  %v477_v7 = vld [vmem:[#allocation5 + $0x4f8] sm:$0xff]  ;;  %v476_v11 = vld [vmem:[#allocation5 + $0x4f0] sm:$0xff]  ;;  %v491_v12 = vld [vmem:[#allocation5 + $0x568] sm:$0xff] }
  0x60   : > { %1977 = vmatpush.msrb.mxu0 %v390_v26  ;;  %1996 = vmatpush.msrb.mxu1 %v407_v27  ;;  %v509_v9 = vld [vmem:[#allocation5 + $0x5f8] sm:$0xff]  ;;  %v508_v13 = vld [vmem:[#allocation5 + $0x5f0] sm:$0xff]  ;;  %v458_v15 = vld [vmem:[#allocation5 + $0x460] sm:$0xff] }
  0x61   : > { %2017 = vmatpush.msrb.mxu2 %v422_v28  ;;  %2036 = vmatpush.msrb.mxu3 %v439_v29  ;;  %v226_v14 = vld [vmem:[%s4326_s23 + $0x30] sm:$0xff]  ;;  %v475_v16 = vld [vmem:[#allocation5 + $0x4e8] sm:$0xff]  ;;  %v224_v19 = vld [vmem:[%s4326_s23 + $0x20] sm:$0xff] }
  0x62   : > { %1978 = vmatpush.msrb.mxu0 %v389_v30  ;;  %1997 = vmatpush.msrb.mxu1 %v406_v31  ;;  %v490_v17 = vld [vmem:[#allocation5 + $0x560] sm:$0xff]  ;;  %v507_v18 = vld [vmem:[#allocation5 + $0x5e8] sm:$0xff]  ;;  %v457_v21 = vld [vmem:[#allocation5 + $0x458] sm:$0xff] }
  0x63   : > { %2018 = vmatpush.msrb.mxu2 %v421_v32  ;;  %2037 = vmatpush.msrb.mxu3 %v438_v33  ;;  %v227_v20 = vld [vmem:[%s4326_s23 + $0x38] sm:$0xff]  ;;  %v474_v22 = vld [vmem:[#allocation5 + $0x4e0] sm:$0xff]  ;;  %v225_v25 = vld [vmem:[%s4326_s23 + $0x28] sm:$0xff] }
  0x64   : > { %1979 = vmatpush.msrb.mxu0 %v388_v34  ;;  %1998 = vmatpush.msrb.mxu1 %v405_v35  ;;  %v489_v23 = vld [vmem:[#allocation5 + $0x558] sm:$0xff]  ;;  %v506_v24 = vld [vmem:[#allocation5 + $0x5e0] sm:$0xff]  ;;  %v456_v26 = vld [vmem:[#allocation5 + $0x450] sm:$0xff] }
  0x65   : > { %2019 = vmatpush.msrb.mxu2 %v420_v36  ;;  %2038 = vmatpush.msrb.mxu3 %v437_v37  ;;  %v473_v27 = vld [vmem:[#allocation5 + $0x4d8] sm:$0xff]  ;;  %v488_v28 = vld [vmem:[#allocation5 + $0x550] sm:$0xff]  ;;  %v455_v30 = vld [vmem:[#allocation5 + $0x448] sm:$0xff] }
  0x66   : > { %1980 = vmatpush.msrb.mxu0 %v387_v38  ;;  %1999 = vmatpush.msrb.mxu1 %v404_v39  ;;  %v505_v29 = vld [vmem:[#allocation5 + $0x5d8] sm:$0xff]  ;;  %v472_v31 = vld [vmem:[#allocation5 + $0x4d0] sm:$0xff]  ;;  %v487_v32 = vld [vmem:[#allocation5 + $0x548] sm:$0xff] }
  0x67   : > { %2020 = vmatpush.msrb.mxu2 %v419_v40  ;;  %2039 = vmatpush.msrb.mxu3 %v436_v41  ;;  %v504_v33 = vld [vmem:[#allocation5 + $0x5d0] sm:$0xff]  ;;  %v454_v34 = vld [vmem:[#allocation5 + $0x440] sm:$0xff]  ;;  %v471_v35 = vld [vmem:[#allocation5 + $0x4c8] sm:$0xff] }
  0x68   : > { %1981 = vmatpush.msrb.mxu0 %v386_v42  ;;  %2000 = vmatpush.msrb.mxu1 %v403_v43  ;;  %v486_v36 = vld [vmem:[#allocation5 + $0x540] sm:$0xff]  ;;  %v503_v37 = vld [vmem:[#allocation5 + $0x5c8] sm:$0xff]  ;;  %v453_v38 = vld [vmem:[#allocation5 + $0x438] sm:$0xff] }
  0x69   : > { %2021 = vmatpush.msrb.mxu2 %v418_v44  ;;  %2040 = vmatpush.msrb.mxu3 %v435_v45  ;;  %v470_v39 = vld [vmem:[#allocation5 + $0x4c0] sm:$0xff]  ;;  %v485_v40 = vld [vmem:[#allocation5 + $0x538] sm:$0xff]  ;;  %v452_v42 = vld [vmem:[#allocation5 + $0x430] sm:$0xff] }
  0x6a   : > { %1982 = vmatpush.msrb.mxu0 %v385_v46  ;;  %2001 = vmatpush.msrb.mxu1 %v402_v47  ;;  %v502_v41 = vld [vmem:[#allocation5 + $0x5c0] sm:$0xff]  ;;  %v469_v43 = vld [vmem:[#allocation5 + $0x4b8] sm:$0xff]  ;;  %v484_v44 = vld [vmem:[#allocation5 + $0x530] sm:$0xff] }
  0x6b   : > { %2022 = vmatpush.msrb.mxu2 %v417_v48  ;;  %2041 = vmatpush.msrb.mxu3 %v434_v49  ;;  %v501_v45 = vld [vmem:[#allocation5 + $0x5b8] sm:$0xff]  ;;  %v451_v46 = vld [vmem:[#allocation5 + $0x428] sm:$0xff]  ;;  %v468_v47 = vld [vmem:[#allocation5 + $0x4b0] sm:$0xff] }
  0x6c   : > { %1983 = vmatpush.msrb.mxu0 %v384_v50  ;;  %2002 = vmatpush.msrb.mxu1 %v401_v51  ;;  %v483_v48 = vld [vmem:[#allocation5 + $0x528] sm:$0xff]  ;;  %v500_v49 = vld [vmem:[#allocation5 + $0x5b0] sm:$0xff]  ;;  %v450_v50 = vld [vmem:[#allocation5 + $0x420] sm:$0xff] }
  0x6d   : > { %2023 = vmatpush.msrb.mxu2 %v416_v52  ;;  %2042 = vmatpush.msrb.mxu3 %v433_v53  ;;  %v467_v51 = vld [vmem:[#allocation5 + $0x4a8] sm:$0xff]  ;;  %v482_v52 = vld [vmem:[#allocation5 + $0x520] sm:$0xff] }
  0x6e   : > { %1984 = vmatpush.msrb.mxu0 %v383_v54  ;;  %2003 = vmatpush.msrb.mxu1 %v400_v55  ;;  %v499_v53 = vld [vmem:[#allocation5 + $0x5a8] sm:$0xff]  ;;  %v449_v54 = vld [vmem:[#allocation5 + $0x418] sm:$0xff]  ;;  %v466_v55 = vld [vmem:[#allocation5 + $0x4a0] sm:$0xff] }
  0x6f   : > { %2024 = vmatpush.msrb.mxu2 %v415_v56  ;;  %2043 = vmatpush.msrb.mxu3 %v432_v57  ;;  %v481_v56 = vld [vmem:[#allocation5 + $0x518] sm:$0xff]  ;;  %v498_v57 = vld [vmem:[#allocation5 + $0x5a0] sm:$0xff] }
  0x70   : > { %1946 = vmatmul.f32.vlgmr.msra.gmra.mxu2 %v222_v58  ;;  %1985 = vmatpush.msrb.mxu0 %v382_v59  ;;  %v448_v58 = vld [vmem:[#allocation5 + $0x410] sm:$0xff]  ;;  %v465_v59 = vld [vmem:[#allocation5 + $0x498] sm:$0xff] }
  0x71   : > { %2004 = vmatpush.msrb.mxu1 %v399_v60  ;;  %2025 = vmatpush.msrb.mxu2 %v414_v61  ;;  %v480_v60 = vld [vmem:[#allocation5 + $0x510] sm:$0xff]  ;;  %v497_v61 = vld [vmem:[#allocation5 + $0x598] sm:$0xff] }
  0x72   : > { %2044 = vmatpush.msrb.mxu3 %v431_v62  ;;  %1906 = vmatmul.f32.vlgmr.msra.gmra.mxu0 %v220_v63  ;;  %v447_v62 = vld [vmem:[#allocation5 + $0x408] sm:$0xff]  ;;  %v464_v63 = vld [vmem:[#allocation5 + $0x490] sm:$0xff] }
  0x73   : > { %1966 = vmatmul.f32.vlgmr.msra.gmra.mxu3 %v223_v0  ;;  %2050 = vmatpush.msra.mxu0 %v461_v1  ;;  %v479_v0 = vld [vmem:[#allocation5 + $0x508] sm:$0xff]  ;;  %v496_v1 = vld [vmem:[#allocation5 + $0x590] sm:$0xff] }
  0x74   : > { %2090 = vmatpush.msra.mxu2 %v493_v2  ;;  %2005 = vmatpush.msrb.mxu1 %v398_v3  ;;  %v446_v2 = vld [vmem:[#allocation5 + $0x400] sm:$0xff]  ;;  %v463_v3 = vld [vmem:[#allocation5 + $0x488] sm:$0xff] }
  0x75   : > { %2045 = vmatpush.msrb.mxu3 %v430_v4  ;;  %1926 = vmatmul.f32.vlgmr.msra.gmra.mxu1 %v221_v5  ;;  %v478_v4 = vld [vmem:[#allocation5 + $0x500] sm:$0xff]  ;;  %v495_v5 = vld [vmem:[#allocation5 + $0x588] sm:$0xff] }
  0x76   : > { %2051 = vmatpush.msra.mxu0 %v460_v6  ;;  %2070 = vmatpush.msra.mxu1 %v477_v7  ;;  %v228_v6 = vld [vmem:[%s4326_s23 + $0x40] sm:$0xff]  ;;  %v230_v7 = vld [vmem:[%s4326_s23 + $0x50] sm:$0xff] }
  0x77   : > { %2091 = vmatpush.msra.mxu2 %v492_v8  ;;  %2110 = vmatpush.msra.mxu3 %v509_v9  ;;  %v525_v8 = vld [vmem:[#allocation5 + $0x678] sm:$0xff] }
  0x78   : > { %2052 = vmatpush.msra.mxu0 %v459_v10  ;;  %2071 = vmatpush.msra.mxu1 %v476_v11  ;;  %v557_v9 = vld [vmem:[#allocation5 + $0x778] sm:$0xff]  ;;  %v462_v10 = vld [vmem:[#allocation5 + $0x480] sm:$0xff] }
  0x79   : > { %2092 = vmatpush.msra.mxu2 %v491_v12  ;;  %2111 = vmatpush.msra.mxu3 %v508_v13  ;;  %v494_v11 = vld [vmem:[#allocation5 + $0x580] sm:$0xff]  ;;  %v229_v12 = vld [vmem:[%s4326_s23 + $0x48] sm:$0xff]  ;;  %v231_v13 = vld [vmem:[%s4326_s23 + $0x58] sm:$0xff] }
  0x7a   : > { %2026 = vmatmul.f32.vlgmr.msrb.gmra.mxu2 %v226_v14  ;;  %2053 = vmatpush.msra.mxu0 %v458_v15  ;;  %v524_v14 = vld [vmem:[#allocation5 + $0x670] sm:$0xff]  ;;  %v541_v15 = vld [vmem:[#allocation5 + $0x6f8] sm:$0xff] }
  0x7b   : > { %2072 = vmatpush.msra.mxu1 %v475_v16  ;;  %2093 = vmatpush.msra.mxu2 %v490_v17  ;;  %v556_v16 = vld [vmem:[#allocation5 + $0x770] sm:$0xff]  ;;  %v573_v17 = vld [vmem:[#allocation5 + $0x7f8] sm:$0xff] }
  0x7c   : > { %2112 = vmatpush.msra.mxu3 %v507_v18  ;;  %1986 = vmatmul.f32.vlgmr.msrb.gmra.mxu0 %v224_v19  ;;  %v523_v18 = vld [vmem:[#allocation5 + $0x668] sm:$0xff]  ;;  %v540_v19 = vld [vmem:[#allocation5 + $0x6f0] sm:$0xff] }
  0x7d   : > { %2046 = vmatmul.f32.vlgmr.msrb.gmra.mxu3 %v227_v20  ;;  %2054 = vmatpush.msra.mxu0 %v457_v21  ;;  %v555_v20 = vld [vmem:[#allocation5 + $0x768] sm:$0xff]  ;;  %v572_v21 = vld [vmem:[#allocation5 + $0x7f0] sm:$0xff] }
  0x7e   : > { %2073 = vmatpush.msra.mxu1 %v474_v22  ;;  %2094 = vmatpush.msra.mxu2 %v489_v23  ;;  %v522_v22 = vld [vmem:[#allocation5 + $0x660] sm:$0xff]  ;;  %v539_v23 = vld [vmem:[#allocation5 + $0x6e8] sm:$0xff] }
  0x7f   : > { %2113 = vmatpush.msra.mxu3 %v506_v24  ;;  %2006 = vmatmul.f32.vlgmr.msrb.gmra.mxu1 %v225_v25  ;;  %v554_v24 = vld [vmem:[#allocation5 + $0x760] sm:$0xff]  ;;  %v571_v25 = vld [vmem:[#allocation5 + $0x7e8] sm:$0xff] }
  0x80   : > { %2055 = vmatpush.msra.mxu0 %v456_v26  ;;  %2074 = vmatpush.msra.mxu1 %v473_v27  ;;  %v521_v26 = vld [vmem:[#allocation5 + $0x658] sm:$0xff]  ;;  %v538_v27 = vld [vmem:[#allocation5 + $0x6e0] sm:$0xff] }
  0x81   : > { %2095 = vmatpush.msra.mxu2 %v488_v28  ;;  %2114 = vmatpush.msra.mxu3 %v505_v29  ;;  %v553_v28 = vld [vmem:[#allocation5 + $0x758] sm:$0xff]  ;;  %v570_v29 = vld [vmem:[#allocation5 + $0x7e0] sm:$0xff] }
  0x82   : > { %2056 = vmatpush.msra.mxu0 %v455_v30  ;;  %2075 = vmatpush.msra.mxu1 %v472_v31  ;;  %v520_v30 = vld [vmem:[#allocation5 + $0x650] sm:$0xff]  ;;  %v537_v31 = vld [vmem:[#allocation5 + $0x6d8] sm:$0xff] }
  0x83   : > { %2096 = vmatpush.msra.mxu2 %v487_v32  ;;  %2115 = vmatpush.msra.mxu3 %v504_v33  ;;  %v552_v32 = vld [vmem:[#allocation5 + $0x750] sm:$0xff]  ;;  %v569_v33 = vld [vmem:[#allocation5 + $0x7d8] sm:$0xff] }
  0x84   : > { %2057 = vmatpush.msra.mxu0 %v454_v34  ;;  %2076 = vmatpush.msra.mxu1 %v471_v35  ;;  %v519_v34 = vld [vmem:[#allocation5 + $0x648] sm:$0xff]  ;;  %v536_v35 = vld [vmem:[#allocation5 + $0x6d0] sm:$0xff] }
  0x85   : > { %2097 = vmatpush.msra.mxu2 %v486_v36  ;;  %2116 = vmatpush.msra.mxu3 %v503_v37  ;;  %v551_v36 = vld [vmem:[#allocation5 + $0x748] sm:$0xff]  ;;  %v568_v37 = vld [vmem:[#allocation5 + $0x7d0] sm:$0xff] }
  0x86   : > { %2058 = vmatpush.msra.mxu0 %v453_v38  ;;  %2077 = vmatpush.msra.mxu1 %v470_v39  ;;  %v518_v38 = vld [vmem:[#allocation5 + $0x640] sm:$0xff]  ;;  %v535_v39 = vld [vmem:[#allocation5 + $0x6c8] sm:$0xff] }
  0x87   : > { %2098 = vmatpush.msra.mxu2 %v485_v40  ;;  %2117 = vmatpush.msra.mxu3 %v502_v41  ;;  %v550_v40 = vld [vmem:[#allocation5 + $0x740] sm:$0xff]  ;;  %v567_v41 = vld [vmem:[#allocation5 + $0x7c8] sm:$0xff] }
  0x88   : > { %2059 = vmatpush.msra.mxu0 %v452_v42  ;;  %2078 = vmatpush.msra.mxu1 %v469_v43  ;;  %v517_v42 = vld [vmem:[#allocation5 + $0x638] sm:$0xff]  ;;  %v534_v43 = vld [vmem:[#allocation5 + $0x6c0] sm:$0xff] }
  0x89   : > { %2099 = vmatpush.msra.mxu2 %v484_v44  ;;  %2118 = vmatpush.msra.mxu3 %v501_v45  ;;  %v549_v44 = vld [vmem:[#allocation5 + $0x738] sm:$0xff]  ;;  %v566_v45 = vld [vmem:[#allocation5 + $0x7c0] sm:$0xff] }
  0x8a   : > { %2060 = vmatpush.msra.mxu0 %v451_v46  ;;  %2079 = vmatpush.msra.mxu1 %v468_v47  ;;  %v516_v46 = vld [vmem:[#allocation5 + $0x630] sm:$0xff]  ;;  %v533_v47 = vld [vmem:[#allocation5 + $0x6b8] sm:$0xff] }
  0x8b   : > { %2100 = vmatpush.msra.mxu2 %v483_v48  ;;  %2119 = vmatpush.msra.mxu3 %v500_v49  ;;  %v548_v48 = vld [vmem:[#allocation5 + $0x730] sm:$0xff]  ;;  %v565_v49 = vld [vmem:[#allocation5 + $0x7b8] sm:$0xff] }
  0x8c   : > { %2061 = vmatpush.msra.mxu0 %v450_v50  ;;  %2080 = vmatpush.msra.mxu1 %v467_v51  ;;  %v515_v50 = vld [vmem:[#allocation5 + $0x628] sm:$0xff]  ;;  %v532_v51 = vld [vmem:[#allocation5 + $0x6b0] sm:$0xff] }
  0x8d   : > { %2101 = vmatpush.msra.mxu2 %v482_v52  ;;  %2120 = vmatpush.msra.mxu3 %v499_v53  ;;  %v547_v52 = vld [vmem:[#allocation5 + $0x728] sm:$0xff]  ;;  %v564_v53 = vld [vmem:[#allocation5 + $0x7b0] sm:$0xff] }
  0x8e   : > { %2062 = vmatpush.msra.mxu0 %v449_v54  ;;  %2081 = vmatpush.msra.mxu1 %v466_v55  ;;  %v514_v54 = vld [vmem:[#allocation5 + $0x620] sm:$0xff]  ;;  %v531_v55 = vld [vmem:[#allocation5 + $0x6a8] sm:$0xff] }
  0x8f   : > { %2102 = vmatpush.msra.mxu2 %v481_v56  ;;  %2121 = vmatpush.msra.mxu3 %v498_v57  ;;  %v546_v56 = vld [vmem:[#allocation5 + $0x720] sm:$0xff]  ;;  %v563_v57 = vld [vmem:[#allocation5 + $0x7a8] sm:$0xff] }
  0x90   : > { %2063 = vmatpush.msra.mxu0 %v448_v58  ;;  %2082 = vmatpush.msra.mxu1 %v465_v59  ;;  %v513_v58 = vld [vmem:[#allocation5 + $0x618] sm:$0xff]  ;;  %v530_v59 = vld [vmem:[#allocation5 + $0x6a0] sm:$0xff] }
  0x91   : > { %2103 = vmatpush.msra.mxu2 %v480_v60  ;;  %2122 = vmatpush.msra.mxu3 %v497_v61  ;;  %v545_v60 = vld [vmem:[#allocation5 + $0x718] sm:$0xff]  ;;  %v562_v61 = vld [vmem:[#allocation5 + $0x7a0] sm:$0xff] }
  0x92   : > { %2064 = vmatpush.msra.mxu0 %v447_v62  ;;  %2083 = vmatpush.msra.mxu1 %v464_v63  ;;  %v512_v62 = vld [vmem:[#allocation5 + $0x610] sm:$0xff]  ;;  %v529_v63 = vld [vmem:[#allocation5 + $0x698] sm:$0xff] }
  0x93   : > { %2104 = vmatpush.msra.mxu2 %v479_v0  ;;  %2123 = vmatpush.msra.mxu3 %v496_v1  ;;  %v544_v0 = vld [vmem:[#allocation5 + $0x710] sm:$0xff]  ;;  %v561_v1 = vld [vmem:[#allocation5 + $0x798] sm:$0xff] }
  0x94   : > { %2065 = vmatpush.msra.mxu0 %v446_v2  ;;  %2084 = vmatpush.msra.mxu1 %v463_v3  ;;  %v511_v2 = vld [vmem:[#allocation5 + $0x608] sm:$0xff]  ;;  %v528_v3 = vld [vmem:[#allocation5 + $0x690] sm:$0xff] }
  0x95   : > { %2105 = vmatpush.msra.mxu2 %v478_v4  ;;  %2124 = vmatpush.msra.mxu3 %v495_v5  ;;  %v543_v4 = vld [vmem:[#allocation5 + $0x708] sm:$0xff]  ;;  %v560_v5 = vld [vmem:[#allocation5 + $0x790] sm:$0xff] }
  0x96   : > { %2066 = vmatmul.f32.vlgmr.msra.gmra.mxu0 %v228_v6  ;;  %2106 = vmatmul.f32.vlgmr.msra.gmra.mxu2 %v230_v7  ;;  %v510_v6 = vld [vmem:[#allocation5 + $0x600] sm:$0xff]  ;;  %v527_v7 = vld [vmem:[#allocation5 + $0x688] sm:$0xff] }
  0x97   : > { %2130 = vmatpush.msrb.mxu0 %v525_v8  ;;  %2170 = vmatpush.msrb.mxu2 %v557_v9  ;;  %v542_v8 = vld [vmem:[#allocation5 + $0x700] sm:$0xff]  ;;  %v559_v9 = vld [vmem:[#allocation5 + $0x788] sm:$0xff] }
  0x98   : > { %2085 = vmatpush.msra.mxu1 %v462_v10  ;;  %2125 = vmatpush.msra.mxu3 %v494_v11  ;;  %v232_v10 = vld [vmem:[%s4326_s23 + $0x60] sm:$0xff]  ;;  %v234_v11 = vld [vmem:[%s4326_s23 + $0x70] sm:$0xff] }
  0x99   : > { %2086 = vmatmul.f32.vlgmr.msra.gmra.mxu1 %v229_v12  ;;  %2126 = vmatmul.f32.vlgmr.msra.gmra.mxu3 %v231_v13  ;;  %v589_v12 = vld [vmem:[#allocation5 + $0x878] sm:$0xff] }
  0x9a   : > { %2131 = vmatpush.msrb.mxu0 %v524_v14  ;;  %2150 = vmatpush.msrb.mxu1 %v541_v15  ;;  %v621_v13 = vld [vmem:[#allocation5 + $0x978] sm:$0xff]  ;;  %v526_v14 = vld [vmem:[#allocation5 + $0x680] sm:$0xff] }
  0x9b   : > { %2171 = vmatpush.msrb.mxu2 %v556_v16  ;;  %2190 = vmatpush.msrb.mxu3 %v573_v17  ;;  %v558_v15 = vld [vmem:[#allocation5 + $0x780] sm:$0xff]  ;;  %v233_v16 = vld [vmem:[%s4326_s23 + $0x68] sm:$0xff]  ;;  %v235_v17 = vld [vmem:[%s4326_s23 + $0x78] sm:$0xff] }
  0x9c   : > { %2132 = vmatpush.msrb.mxu0 %v523_v18  ;;  %2151 = vmatpush.msrb.mxu1 %v540_v19  ;;  %v588_v18 = vld [vmem:[#allocation5 + $0x870] sm:$0xff]  ;;  %v605_v19 = vld [vmem:[#allocation5 + $0x8f8] sm:$0xff] }
  0x9d   : > { %2172 = vmatpush.msrb.mxu2 %v555_v20  ;;  %2191 = vmatpush.msrb.mxu3 %v572_v21  ;;  %v620_v20 = vld [vmem:[#allocation5 + $0x970] sm:$0xff]  ;;  %v637_v21 = vld [vmem:[#allocation5 + $0x9f8] sm:$0xff] }
  0x9e   : > { %2133 = vmatpush.msrb.mxu0 %v522_v22  ;;  %2152 = vmatpush.msrb.mxu1 %v539_v23  ;;  %v587_v22 = vld [vmem:[#allocation5 + $0x868] sm:$0xff]  ;;  %v604_v23 = vld [vmem:[#allocation5 + $0x8f0] sm:$0xff] }
  0x9f   : > { %2173 = vmatpush.msrb.mxu2 %v554_v24  ;;  %2192 = vmatpush.msrb.mxu3 %v571_v25  ;;  %v619_v24 = vld [vmem:[#allocation5 + $0x968] sm:$0xff]  ;;  %v636_v25 = vld [vmem:[#allocation5 + $0x9f0] sm:$0xff] }
  0xa0   : > { %2134 = vmatpush.msrb.mxu0 %v521_v26  ;;  %2153 = vmatpush.msrb.mxu1 %v538_v27  ;;  %v586_v26 = vld [vmem:[#allocation5 + $0x860] sm:$0xff]  ;;  %v603_v27 = vld [vmem:[#allocation5 + $0x8e8] sm:$0xff] }
  0xa1   : > { %2174 = vmatpush.msrb.mxu2 %v553_v28  ;;  %2193 = vmatpush.msrb.mxu3 %v570_v29  ;;  %v618_v28 = vld [vmem:[#allocation5 + $0x960] sm:$0xff]  ;;  %v635_v29 = vld [vmem:[#allocation5 + $0x9e8] sm:$0xff] }
  0xa2   : > { %2135 = vmatpush.msrb.mxu0 %v520_v30  ;;  %2154 = vmatpush.msrb.mxu1 %v537_v31  ;;  %v585_v30 = vld [vmem:[#allocation5 + $0x858] sm:$0xff]  ;;  %v602_v31 = vld [vmem:[#allocation5 + $0x8e0] sm:$0xff] }
  0xa3   : > { %2175 = vmatpush.msrb.mxu2 %v552_v32  ;;  %2194 = vmatpush.msrb.mxu3 %v569_v33  ;;  %v617_v32 = vld [vmem:[#allocation5 + $0x958] sm:$0xff]  ;;  %v634_v33 = vld [vmem:[#allocation5 + $0x9e0] sm:$0xff] }
  0xa4   : > { %2136 = vmatpush.msrb.mxu0 %v519_v34  ;;  %2155 = vmatpush.msrb.mxu1 %v536_v35  ;;  %v584_v34 = vld [vmem:[#allocation5 + $0x850] sm:$0xff]  ;;  %v601_v35 = vld [vmem:[#allocation5 + $0x8d8] sm:$0xff] }
  0xa5   : > { %2176 = vmatpush.msrb.mxu2 %v551_v36  ;;  %2195 = vmatpush.msrb.mxu3 %v568_v37  ;;  %v616_v36 = vld [vmem:[#allocation5 + $0x950] sm:$0xff]  ;;  %v633_v37 = vld [vmem:[#allocation5 + $0x9d8] sm:$0xff] }
  0xa6   : > { %2137 = vmatpush.msrb.mxu0 %v518_v38  ;;  %2156 = vmatpush.msrb.mxu1 %v535_v39  ;;  %v583_v38 = vld [vmem:[#allocation5 + $0x848] sm:$0xff]  ;;  %v600_v39 = vld [vmem:[#allocation5 + $0x8d0] sm:$0xff] }
  0xa7   : > { %2177 = vmatpush.msrb.mxu2 %v550_v40  ;;  %2196 = vmatpush.msrb.mxu3 %v567_v41  ;;  %v615_v40 = vld [vmem:[#allocation5 + $0x948] sm:$0xff]  ;;  %v632_v41 = vld [vmem:[#allocation5 + $0x9d0] sm:$0xff] }
  0xa8   : > { %2138 = vmatpush.msrb.mxu0 %v517_v42  ;;  %2157 = vmatpush.msrb.mxu1 %v534_v43  ;;  %v582_v42 = vld [vmem:[#allocation5 + $0x840] sm:$0xff]  ;;  %v599_v43 = vld [vmem:[#allocation5 + $0x8c8] sm:$0xff] }
  0xa9   : > { %2178 = vmatpush.msrb.mxu2 %v549_v44  ;;  %2197 = vmatpush.msrb.mxu3 %v566_v45  ;;  %v614_v44 = vld [vmem:[#allocation5 + $0x940] sm:$0xff]  ;;  %v631_v45 = vld [vmem:[#allocation5 + $0x9c8] sm:$0xff] }
  0xaa   : > { %2139 = vmatpush.msrb.mxu0 %v516_v46  ;;  %2158 = vmatpush.msrb.mxu1 %v533_v47  ;;  %v581_v46 = vld [vmem:[#allocation5 + $0x838] sm:$0xff]  ;;  %v598_v47 = vld [vmem:[#allocation5 + $0x8c0] sm:$0xff] }
  0xab   : > { %2179 = vmatpush.msrb.mxu2 %v548_v48  ;;  %2198 = vmatpush.msrb.mxu3 %v565_v49  ;;  %v613_v48 = vld [vmem:[#allocation5 + $0x938] sm:$0xff]  ;;  %v630_v49 = vld [vmem:[#allocation5 + $0x9c0] sm:$0xff] }
  0xac   : > { %2140 = vmatpush.msrb.mxu0 %v515_v50  ;;  %2159 = vmatpush.msrb.mxu1 %v532_v51  ;;  %v580_v50 = vld [vmem:[#allocation5 + $0x830] sm:$0xff]  ;;  %v597_v51 = vld [vmem:[#allocation5 + $0x8b8] sm:$0xff] }
  0xad   : > { %2180 = vmatpush.msrb.mxu2 %v547_v52  ;;  %2199 = vmatpush.msrb.mxu3 %v564_v53  ;;  %v612_v52 = vld [vmem:[#allocation5 + $0x930] sm:$0xff]  ;;  %v629_v53 = vld [vmem:[#allocation5 + $0x9b8] sm:$0xff] }
  0xae   : > { %2141 = vmatpush.msrb.mxu0 %v514_v54  ;;  %2160 = vmatpush.msrb.mxu1 %v531_v55  ;;  %v579_v54 = vld [vmem:[#allocation5 + $0x828] sm:$0xff]  ;;  %v596_v55 = vld [vmem:[#allocation5 + $0x8b0] sm:$0xff] }
  0xaf   : > { %2181 = vmatpush.msrb.mxu2 %v546_v56  ;;  %2200 = vmatpush.msrb.mxu3 %v563_v57  ;;  %v611_v56 = vld [vmem:[#allocation5 + $0x928] sm:$0xff]  ;;  %v628_v57 = vld [vmem:[#allocation5 + $0x9b0] sm:$0xff] }
  0xb0   : > { %2142 = vmatpush.msrb.mxu0 %v513_v58  ;;  %2161 = vmatpush.msrb.mxu1 %v530_v59  ;;  %v578_v58 = vld [vmem:[#allocation5 + $0x820] sm:$0xff]  ;;  %v595_v59 = vld [vmem:[#allocation5 + $0x8a8] sm:$0xff] }
  0xb1   : > { %2182 = vmatpush.msrb.mxu2 %v545_v60  ;;  %2201 = vmatpush.msrb.mxu3 %v562_v61  ;;  %v610_v60 = vld [vmem:[#allocation5 + $0x920] sm:$0xff]  ;;  %v627_v61 = vld [vmem:[#allocation5 + $0x9a8] sm:$0xff] }
  0xb2   : > { %2143 = vmatpush.msrb.mxu0 %v512_v62  ;;  %2162 = vmatpush.msrb.mxu1 %v529_v63  ;;  %v577_v62 = vld [vmem:[#allocation5 + $0x818] sm:$0xff]  ;;  %v594_v63 = vld [vmem:[#allocation5 + $0x8a0] sm:$0xff] }
  0xb3   : > { %2183 = vmatpush.msrb.mxu2 %v544_v0  ;;  %2202 = vmatpush.msrb.mxu3 %v561_v1  ;;  %v609_v0 = vld [vmem:[#allocation5 + $0x918] sm:$0xff]  ;;  %v626_v1 = vld [vmem:[#allocation5 + $0x9a0] sm:$0xff] }
  0xb4   : > { %2144 = vmatpush.msrb.mxu0 %v511_v2  ;;  %2163 = vmatpush.msrb.mxu1 %v528_v3  ;;  %v576_v2 = vld [vmem:[#allocation5 + $0x810] sm:$0xff]  ;;  %v593_v3 = vld [vmem:[#allocation5 + $0x898] sm:$0xff] }
  0xb5   : > { %2184 = vmatpush.msrb.mxu2 %v543_v4  ;;  %2203 = vmatpush.msrb.mxu3 %v560_v5  ;;  %v608_v4 = vld [vmem:[#allocation5 + $0x910] sm:$0xff]  ;;  %v625_v5 = vld [vmem:[#allocation5 + $0x998] sm:$0xff] }
  0xb6   : > { %2145 = vmatpush.msrb.mxu0 %v510_v6  ;;  %2164 = vmatpush.msrb.mxu1 %v527_v7  ;;  %v575_v6 = vld [vmem:[#allocation5 + $0x808] sm:$0xff]  ;;  %v592_v7 = vld [vmem:[#allocation5 + $0x890] sm:$0xff] }
  0xb7   : > { %2185 = vmatpush.msrb.mxu2 %v542_v8  ;;  %2204 = vmatpush.msrb.mxu3 %v559_v9  ;;  %v607_v8 = vld [vmem:[#allocation5 + $0x908] sm:$0xff]  ;;  %v624_v9 = vld [vmem:[#allocation5 + $0x990] sm:$0xff] }
  0xb8   : > { %2146 = vmatmul.f32.vlgmr.msrb.gmra.mxu0 %v232_v10  ;;  %2186 = vmatmul.f32.vlgmr.msrb.gmra.mxu2 %v234_v11  ;;  %v574_v10 = vld [vmem:[#allocation5 + $0x800] sm:$0xff]  ;;  %v591_v11 = vld [vmem:[#allocation5 + $0x888] sm:$0xff] }
  0xb9   : > { %2210 = vmatpush.msra.mxu0 %v589_v12  ;;  %2250 = vmatpush.msra.mxu2 %v621_v13  ;;  %v606_v12 = vld [vmem:[#allocation5 + $0x900] sm:$0xff]  ;;  %v623_v13 = vld [vmem:[#allocation5 + $0x988] sm:$0xff] }
  0xba   : > { %2165 = vmatpush.msrb.mxu1 %v526_v14  ;;  %2205 = vmatpush.msrb.mxu3 %v558_v15  ;;  %v236_v14 = vld [vmem:[%s4326_s23 + $0x80] sm:$0xff]  ;;  %v238_v15 = vld [vmem:[%s4326_s23 + $0x90] sm:$0xff] }
  0xbb   : > { %2166 = vmatmul.f32.vlgmr.msrb.gmra.mxu1 %v233_v16  ;;  %2206 = vmatmul.f32.vlgmr.msrb.gmra.mxu3 %v235_v17  ;;  %v653_v16 = vld [vmem:[#allocation5 + $0xa78] sm:$0xff] }
  0xbc   : > { %2211 = vmatpush.msra.mxu0 %v588_v18  ;;  %2230 = vmatpush.msra.mxu1 %v605_v19  ;;  %v685_v17 = vld [vmem:[#allocation5 + $0xb78] sm:$0xff]  ;;  %v590_v18 = vld [vmem:[#allocation5 + $0x880] sm:$0xff] }
  0xbd   : > { %2251 = vmatpush.msra.mxu2 %v620_v20  ;;  %2270 = vmatpush.msra.mxu3 %v637_v21  ;;  %v622_v19 = vld [vmem:[#allocation5 + $0x980] sm:$0xff]  ;;  %v237_v20 = vld [vmem:[%s4326_s23 + $0x88] sm:$0xff]  ;;  %v239_v21 = vld [vmem:[%s4326_s23 + $0x98] sm:$0xff] }
  0xbe   : > { %2212 = vmatpush.msra.mxu0 %v587_v22  ;;  %2231 = vmatpush.msra.mxu1 %v604_v23  ;;  %v652_v22 = vld [vmem:[#allocation5 + $0xa70] sm:$0xff]  ;;  %v669_v23 = vld [vmem:[#allocation5 + $0xaf8] sm:$0xff] }
  0xbf   : > { %2252 = vmatpush.msra.mxu2 %v619_v24  ;;  %2271 = vmatpush.msra.mxu3 %v636_v25  ;;  %v684_v24 = vld [vmem:[#allocation5 + $0xb70] sm:$0xff]  ;;  %v701_v25 = vld [vmem:[#allocation5 + $0xbf8] sm:$0xff] }
  0xc0   : > { %2213 = vmatpush.msra.mxu0 %v586_v26  ;;  %2232 = vmatpush.msra.mxu1 %v603_v27  ;;  %v651_v26 = vld [vmem:[#allocation5 + $0xa68] sm:$0xff]  ;;  %v668_v27 = vld [vmem:[#allocation5 + $0xaf0] sm:$0xff] }
  0xc1   : > { %2253 = vmatpush.msra.mxu2 %v618_v28  ;;  %2272 = vmatpush.msra.mxu3 %v635_v29  ;;  %v683_v28 = vld [vmem:[#allocation5 + $0xb68] sm:$0xff]  ;;  %v700_v29 = vld [vmem:[#allocation5 + $0xbf0] sm:$0xff] }
  0xc2   : > { %2214 = vmatpush.msra.mxu0 %v585_v30  ;;  %2233 = vmatpush.msra.mxu1 %v602_v31  ;;  %v650_v30 = vld [vmem:[#allocation5 + $0xa60] sm:$0xff]  ;;  %v667_v31 = vld [vmem:[#allocation5 + $0xae8] sm:$0xff] }
  0xc3   : > { %2254 = vmatpush.msra.mxu2 %v617_v32  ;;  %2273 = vmatpush.msra.mxu3 %v634_v33  ;;  %v682_v32 = vld [vmem:[#allocation5 + $0xb60] sm:$0xff]  ;;  %v699_v33 = vld [vmem:[#allocation5 + $0xbe8] sm:$0xff] }
  0xc4   : > { %2215 = vmatpush.msra.mxu0 %v584_v34  ;;  %2234 = vmatpush.msra.mxu1 %v601_v35  ;;  %v649_v34 = vld [vmem:[#allocation5 + $0xa58] sm:$0xff]  ;;  %v666_v35 = vld [vmem:[#allocation5 + $0xae0] sm:$0xff] }
  0xc5   : > { %2255 = vmatpush.msra.mxu2 %v616_v36  ;;  %2274 = vmatpush.msra.mxu3 %v633_v37  ;;  %v681_v36 = vld [vmem:[#allocation5 + $0xb58] sm:$0xff]  ;;  %v698_v37 = vld [vmem:[#allocation5 + $0xbe0] sm:$0xff] }
  0xc6   : > { %2216 = vmatpush.msra.mxu0 %v583_v38  ;;  %2235 = vmatpush.msra.mxu1 %v600_v39  ;;  %v648_v38 = vld [vmem:[#allocation5 + $0xa50] sm:$0xff]  ;;  %v665_v39 = vld [vmem:[#allocation5 + $0xad8] sm:$0xff] }
  0xc7   : > { %2256 = vmatpush.msra.mxu2 %v615_v40  ;;  %2275 = vmatpush.msra.mxu3 %v632_v41  ;;  %v680_v40 = vld [vmem:[#allocation5 + $0xb50] sm:$0xff]  ;;  %v697_v41 = vld [vmem:[#allocation5 + $0xbd8] sm:$0xff] }
  0xc8   : > { %2217 = vmatpush.msra.mxu0 %v582_v42  ;;  %2236 = vmatpush.msra.mxu1 %v599_v43  ;;  %v647_v42 = vld [vmem:[#allocation5 + $0xa48] sm:$0xff]  ;;  %v664_v43 = vld [vmem:[#allocation5 + $0xad0] sm:$0xff] }
  0xc9   : > { %2257 = vmatpush.msra.mxu2 %v614_v44  ;;  %2276 = vmatpush.msra.mxu3 %v631_v45  ;;  %v679_v44 = vld [vmem:[#allocation5 + $0xb48] sm:$0xff]  ;;  %v696_v45 = vld [vmem:[#allocation5 + $0xbd0] sm:$0xff] }
  0xca   : > { %2218 = vmatpush.msra.mxu0 %v581_v46  ;;  %2237 = vmatpush.msra.mxu1 %v598_v47  ;;  %v646_v46 = vld [vmem:[#allocation5 + $0xa40] sm:$0xff]  ;;  %v663_v47 = vld [vmem:[#allocation5 + $0xac8] sm:$0xff] }
  0xcb   : > { %2258 = vmatpush.msra.mxu2 %v613_v48  ;;  %2277 = vmatpush.msra.mxu3 %v630_v49  ;;  %v678_v48 = vld [vmem:[#allocation5 + $0xb40] sm:$0xff]  ;;  %v695_v49 = vld [vmem:[#allocation5 + $0xbc8] sm:$0xff] }
  0xcc   : > { %2219 = vmatpush.msra.mxu0 %v580_v50  ;;  %2238 = vmatpush.msra.mxu1 %v597_v51  ;;  %v645_v50 = vld [vmem:[#allocation5 + $0xa38] sm:$0xff]  ;;  %v662_v51 = vld [vmem:[#allocation5 + $0xac0] sm:$0xff] }
  0xcd   : > { %2259 = vmatpush.msra.mxu2 %v612_v52  ;;  %2278 = vmatpush.msra.mxu3 %v629_v53  ;;  %v677_v52 = vld [vmem:[#allocation5 + $0xb38] sm:$0xff]  ;;  %v694_v53 = vld [vmem:[#allocation5 + $0xbc0] sm:$0xff] }
  0xce   : > { %2220 = vmatpush.msra.mxu0 %v579_v54  ;;  %2239 = vmatpush.msra.mxu1 %v596_v55  ;;  %v644_v54 = vld [vmem:[#allocation5 + $0xa30] sm:$0xff]  ;;  %v661_v55 = vld [vmem:[#allocation5 + $0xab8] sm:$0xff] }
  0xcf   : > { %2260 = vmatpush.msra.mxu2 %v611_v56  ;;  %2279 = vmatpush.msra.mxu3 %v628_v57  ;;  %v676_v56 = vld [vmem:[#allocation5 + $0xb30] sm:$0xff]  ;;  %v693_v57 = vld [vmem:[#allocation5 + $0xbb8] sm:$0xff] }
  0xd0   : > { %2221 = vmatpush.msra.mxu0 %v578_v58  ;;  %2240 = vmatpush.msra.mxu1 %v595_v59  ;;  %v643_v58 = vld [vmem:[#allocation5 + $0xa28] sm:$0xff]  ;;  %v660_v59 = vld [vmem:[#allocation5 + $0xab0] sm:$0xff] }
  0xd1   : > { %2261 = vmatpush.msra.mxu2 %v610_v60  ;;  %2280 = vmatpush.msra.mxu3 %v627_v61  ;;  %v675_v60 = vld [vmem:[#allocation5 + $0xb28] sm:$0xff]  ;;  %v692_v61 = vld [vmem:[#allocation5 + $0xbb0] sm:$0xff] }
  0xd2   : > { %2222 = vmatpush.msra.mxu0 %v577_v62  ;;  %2241 = vmatpush.msra.mxu1 %v594_v63  ;;  %v642_v62 = vld [vmem:[#allocation5 + $0xa20] sm:$0xff]  ;;  %v659_v63 = vld [vmem:[#allocation5 + $0xaa8] sm:$0xff] }
  0xd3   : > { %2262 = vmatpush.msra.mxu2 %v609_v0  ;;  %2281 = vmatpush.msra.mxu3 %v626_v1  ;;  %v674_v0 = vld [vmem:[#allocation5 + $0xb20] sm:$0xff]  ;;  %v691_v1 = vld [vmem:[#allocation5 + $0xba8] sm:$0xff] }
  0xd4   : > { %2223 = vmatpush.msra.mxu0 %v576_v2  ;;  %2242 = vmatpush.msra.mxu1 %v593_v3  ;;  %v641_v2 = vld [vmem:[#allocation5 + $0xa18] sm:$0xff]  ;;  %v658_v3 = vld [vmem:[#allocation5 + $0xaa0] sm:$0xff] }
  0xd5   : > { %2263 = vmatpush.msra.mxu2 %v608_v4  ;;  %2282 = vmatpush.msra.mxu3 %v625_v5  ;;  %v673_v4 = vld [vmem:[#allocation5 + $0xb18] sm:$0xff]  ;;  %v690_v5 = vld [vmem:[#allocation5 + $0xba0] sm:$0xff] }
  0xd6   : > { %2224 = vmatpush.msra.mxu0 %v575_v6  ;;  %2243 = vmatpush.msra.mxu1 %v592_v7  ;;  %v640_v6 = vld [vmem:[#allocation5 + $0xa10] sm:$0xff]  ;;  %v657_v7 = vld [vmem:[#allocation5 + $0xa98] sm:$0xff] }
  0xd7   : > { %2264 = vmatpush.msra.mxu2 %v607_v8  ;;  %2283 = vmatpush.msra.mxu3 %v624_v9  ;;  %v672_v8 = vld [vmem:[#allocation5 + $0xb10] sm:$0xff]  ;;  %v689_v9 = vld [vmem:[#allocation5 + $0xb98] sm:$0xff] }
  0xd8   : > { %2225 = vmatpush.msra.mxu0 %v574_v10  ;;  %2244 = vmatpush.msra.mxu1 %v591_v11  ;;  %v639_v10 = vld [vmem:[#allocation5 + $0xa08] sm:$0xff]  ;;  %v656_v11 = vld [vmem:[#allocation5 + $0xa90] sm:$0xff] }
  0xd9   : > { %2265 = vmatpush.msra.mxu2 %v606_v12  ;;  %2284 = vmatpush.msra.mxu3 %v623_v13  ;;  %v671_v12 = vld [vmem:[#allocation5 + $0xb08] sm:$0xff]  ;;  %v688_v13 = vld [vmem:[#allocation5 + $0xb90] sm:$0xff] }
  0xda   : > { %2226 = vmatmul.f32.vlgmr.msra.gmra.mxu0 %v236_v14  ;;  %2266 = vmatmul.f32.vlgmr.msra.gmra.mxu2 %v238_v15  ;;  %v638_v14 = vld [vmem:[#allocation5 + $0xa00] sm:$0xff]  ;;  %v655_v15 = vld [vmem:[#allocation5 + $0xa88] sm:$0xff] }
  0xdb   : > { %2290 = vmatpush.msrb.mxu0 %v653_v16  ;;  %2330 = vmatpush.msrb.mxu2 %v685_v17  ;;  %v670_v16 = vld [vmem:[#allocation5 + $0xb00] sm:$0xff]  ;;  %v687_v17 = vld [vmem:[#allocation5 + $0xb88] sm:$0xff] }
  0xdc   : > { %2245 = vmatpush.msra.mxu1 %v590_v18  ;;  %2285 = vmatpush.msra.mxu3 %v622_v19  ;;  %v240_v18 = vld [vmem:[%s4326_s23 + $0xa0] sm:$0xff]  ;;  %v242_v19 = vld [vmem:[%s4326_s23 + $0xb0] sm:$0xff] }
  0xdd   : > { %2246 = vmatmul.f32.vlgmr.msra.gmra.mxu1 %v237_v20  ;;  %2286 = vmatmul.f32.vlgmr.msra.gmra.mxu3 %v239_v21  ;;  %v717_v20 = vld [vmem:[#allocation5 + $0xc78] sm:$0xff] }
  0xde   : > { %2291 = vmatpush.msrb.mxu0 %v652_v22  ;;  %2310 = vmatpush.msrb.mxu1 %v669_v23  ;;  %v749_v21 = vld [vmem:[#allocation5 + $0xd78] sm:$0xff]  ;;  %v654_v22 = vld [vmem:[#allocation5 + $0xa80] sm:$0xff] }
  0xdf   : > { %2331 = vmatpush.msrb.mxu2 %v684_v24  ;;  %2350 = vmatpush.msrb.mxu3 %v701_v25  ;;  %v686_v23 = vld [vmem:[#allocation5 + $0xb80] sm:$0xff]  ;;  %v241_v24 = vld [vmem:[%s4326_s23 + $0xa8] sm:$0xff]  ;;  %v243_v25 = vld [vmem:[%s4326_s23 + $0xb8] sm:$0xff] }
  0xe0   : > { %2292 = vmatpush.msrb.mxu0 %v651_v26  ;;  %2311 = vmatpush.msrb.mxu1 %v668_v27  ;;  %v716_v26 = vld [vmem:[#allocation5 + $0xc70] sm:$0xff]  ;;  %v733_v27 = vld [vmem:[#allocation5 + $0xcf8] sm:$0xff] }
  0xe1   : > { %2332 = vmatpush.msrb.mxu2 %v683_v28  ;;  %2351 = vmatpush.msrb.mxu3 %v700_v29  ;;  %v748_v28 = vld [vmem:[#allocation5 + $0xd70] sm:$0xff]  ;;  %v765_v29 = vld [vmem:[#allocation5 + $0xdf8] sm:$0xff] }
  0xe2   : > { %2293 = vmatpush.msrb.mxu0 %v650_v30  ;;  %2312 = vmatpush.msrb.mxu1 %v667_v31  ;;  %v715_v30 = vld [vmem:[#allocation5 + $0xc68] sm:$0xff]  ;;  %v732_v31 = vld [vmem:[#allocation5 + $0xcf0] sm:$0xff] }
  0xe3   : > { %2333 = vmatpush.msrb.mxu2 %v682_v32  ;;  %2352 = vmatpush.msrb.mxu3 %v699_v33  ;;  %v747_v32 = vld [vmem:[#allocation5 + $0xd68] sm:$0xff]  ;;  %v764_v33 = vld [vmem:[#allocation5 + $0xdf0] sm:$0xff] }
  0xe4   : > { %2294 = vmatpush.msrb.mxu0 %v649_v34  ;;  %2313 = vmatpush.msrb.mxu1 %v666_v35  ;;  %v714_v34 = vld [vmem:[#allocation5 + $0xc60] sm:$0xff]  ;;  %v731_v35 = vld [vmem:[#allocation5 + $0xce8] sm:$0xff] }
  0xe5   : > { %2334 = vmatpush.msrb.mxu2 %v681_v36  ;;  %2353 = vmatpush.msrb.mxu3 %v698_v37  ;;  %v746_v36 = vld [vmem:[#allocation5 + $0xd60] sm:$0xff]  ;;  %v763_v37 = vld [vmem:[#allocation5 + $0xde8] sm:$0xff] }
  0xe6   : > { %2295 = vmatpush.msrb.mxu0 %v648_v38  ;;  %2314 = vmatpush.msrb.mxu1 %v665_v39  ;;  %v713_v38 = vld [vmem:[#allocation5 + $0xc58] sm:$0xff]  ;;  %v730_v39 = vld [vmem:[#allocation5 + $0xce0] sm:$0xff] }
  0xe7   : > { %2335 = vmatpush.msrb.mxu2 %v680_v40  ;;  %2354 = vmatpush.msrb.mxu3 %v697_v41  ;;  %v745_v40 = vld [vmem:[#allocation5 + $0xd58] sm:$0xff]  ;;  %v762_v41 = vld [vmem:[#allocation5 + $0xde0] sm:$0xff] }
  0xe8   : > { %2296 = vmatpush.msrb.mxu0 %v647_v42  ;;  %2315 = vmatpush.msrb.mxu1 %v664_v43  ;;  %v712_v42 = vld [vmem:[#allocation5 + $0xc50] sm:$0xff]  ;;  %v729_v43 = vld [vmem:[#allocation5 + $0xcd8] sm:$0xff] }
  0xe9   : > { %2336 = vmatpush.msrb.mxu2 %v679_v44  ;;  %2355 = vmatpush.msrb.mxu3 %v696_v45  ;;  %v744_v44 = vld [vmem:[#allocation5 + $0xd50] sm:$0xff]  ;;  %v761_v45 = vld [vmem:[#allocation5 + $0xdd8] sm:$0xff] }
  0xea   : > { %2297 = vmatpush.msrb.mxu0 %v646_v46  ;;  %2316 = vmatpush.msrb.mxu1 %v663_v47  ;;  %v711_v46 = vld [vmem:[#allocation5 + $0xc48] sm:$0xff]  ;;  %v728_v47 = vld [vmem:[#allocation5 + $0xcd0] sm:$0xff] }
  0xeb   : > { %2337 = vmatpush.msrb.mxu2 %v678_v48  ;;  %2356 = vmatpush.msrb.mxu3 %v695_v49  ;;  %v743_v48 = vld [vmem:[#allocation5 + $0xd48] sm:$0xff]  ;;  %v760_v49 = vld [vmem:[#allocation5 + $0xdd0] sm:$0xff] }
  0xec   : > { %2298 = vmatpush.msrb.mxu0 %v645_v50  ;;  %2317 = vmatpush.msrb.mxu1 %v662_v51  ;;  %v710_v50 = vld [vmem:[#allocation5 + $0xc40] sm:$0xff]  ;;  %v727_v51 = vld [vmem:[#allocation5 + $0xcc8] sm:$0xff] }
  0xed   : > { %2338 = vmatpush.msrb.mxu2 %v677_v52  ;;  %2357 = vmatpush.msrb.mxu3 %v694_v53  ;;  %v742_v52 = vld [vmem:[#allocation5 + $0xd40] sm:$0xff]  ;;  %v759_v53 = vld [vmem:[#allocation5 + $0xdc8] sm:$0xff] }
  0xee   : > { %2299 = vmatpush.msrb.mxu0 %v644_v54  ;;  %2318 = vmatpush.msrb.mxu1 %v661_v55  ;;  %v709_v54 = vld [vmem:[#allocation5 + $0xc38] sm:$0xff]  ;;  %v726_v55 = vld [vmem:[#allocation5 + $0xcc0] sm:$0xff] }
  0xef   : > { %2339 = vmatpush.msrb.mxu2 %v676_v56  ;;  %2358 = vmatpush.msrb.mxu3 %v693_v57  ;;  %v741_v56 = vld [vmem:[#allocation5 + $0xd38] sm:$0xff]  ;;  %v758_v57 = vld [vmem:[#allocation5 + $0xdc0] sm:$0xff] }
  0xf0   : > { %2300 = vmatpush.msrb.mxu0 %v643_v58  ;;  %2319 = vmatpush.msrb.mxu1 %v660_v59  ;;  %v708_v58 = vld [vmem:[#allocation5 + $0xc30] sm:$0xff]  ;;  %v725_v59 = vld [vmem:[#allocation5 + $0xcb8] sm:$0xff] }
  0xf1   : > { %2340 = vmatpush.msrb.mxu2 %v675_v60  ;;  %2359 = vmatpush.msrb.mxu3 %v692_v61  ;;  %v740_v60 = vld [vmem:[#allocation5 + $0xd30] sm:$0xff]  ;;  %v757_v61 = vld [vmem:[#allocation5 + $0xdb8] sm:$0xff] }
  0xf2   : > { %2301 = vmatpush.msrb.mxu0 %v642_v62  ;;  %2320 = vmatpush.msrb.mxu1 %v659_v63  ;;  %v707_v62 = vld [vmem:[#allocation5 + $0xc28] sm:$0xff]  ;;  %v724_v63 = vld [vmem:[#allocation5 + $0xcb0] sm:$0xff] }
  0xf3   : > { %2341 = vmatpush.msrb.mxu2 %v674_v0  ;;  %2360 = vmatpush.msrb.mxu3 %v691_v1  ;;  %v739_v0 = vld [vmem:[#allocation5 + $0xd28] sm:$0xff]  ;;  %v756_v1 = vld [vmem:[#allocation5 + $0xdb0] sm:$0xff] }
  0xf4   : > { %2302 = vmatpush.msrb.mxu0 %v641_v2  ;;  %2321 = vmatpush.msrb.mxu1 %v658_v3  ;;  %v706_v2 = vld [vmem:[#allocation5 + $0xc20] sm:$0xff]  ;;  %v723_v3 = vld [vmem:[#allocation5 + $0xca8] sm:$0xff] }
  0xf5   : > { %2342 = vmatpush.msrb.mxu2 %v673_v4  ;;  %2361 = vmatpush.msrb.mxu3 %v690_v5  ;;  %v738_v4 = vld [vmem:[#allocation5 + $0xd20] sm:$0xff]  ;;  %v755_v5 = vld [vmem:[#allocation5 + $0xda8] sm:$0xff] }
  0xf6   : > { %2303 = vmatpush.msrb.mxu0 %v640_v6  ;;  %2322 = vmatpush.msrb.mxu1 %v657_v7  ;;  %v705_v6 = vld [vmem:[#allocation5 + $0xc18] sm:$0xff]  ;;  %v722_v7 = vld [vmem:[#allocation5 + $0xca0] sm:$0xff] }
  0xf7   : > { %2343 = vmatpush.msrb.mxu2 %v672_v8  ;;  %2362 = vmatpush.msrb.mxu3 %v689_v9  ;;  %v737_v8 = vld [vmem:[#allocation5 + $0xd18] sm:$0xff]  ;;  %v754_v9 = vld [vmem:[#allocation5 + $0xda0] sm:$0xff] }
  0xf8   : > { %2304 = vmatpush.msrb.mxu0 %v639_v10  ;;  %2323 = vmatpush.msrb.mxu1 %v656_v11  ;;  %v704_v10 = vld [vmem:[#allocation5 + $0xc10] sm:$0xff]  ;;  %v721_v11 = vld [vmem:[#allocation5 + $0xc98] sm:$0xff] }
  0xf9   : > { %2344 = vmatpush.msrb.mxu2 %v671_v12  ;;  %2363 = vmatpush.msrb.mxu3 %v688_v13  ;;  %v736_v12 = vld [vmem:[#allocation5 + $0xd10] sm:$0xff]  ;;  %v753_v13 = vld [vmem:[#allocation5 + $0xd98] sm:$0xff] }
  0xfa   : > { %2305 = vmatpush.msrb.mxu0 %v638_v14  ;;  %2324 = vmatpush.msrb.mxu1 %v655_v15  ;;  %v703_v14 = vld [vmem:[#allocation5 + $0xc08] sm:$0xff]  ;;  %v720_v15 = vld [vmem:[#allocation5 + $0xc90] sm:$0xff] }
  0xfb   : > { %2345 = vmatpush.msrb.mxu2 %v670_v16  ;;  %2364 = vmatpush.msrb.mxu3 %v687_v17  ;;  %v735_v16 = vld [vmem:[#allocation5 + $0xd08] sm:$0xff]  ;;  %v752_v17 = vld [vmem:[#allocation5 + $0xd90] sm:$0xff] }
  0xfc   : > { %2306 = vmatmul.f32.vlgmr.msrb.gmra.mxu0 %v240_v18  ;;  %2346 = vmatmul.f32.vlgmr.msrb.gmra.mxu2 %v242_v19  ;;  %v702_v18 = vld [vmem:[#allocation5 + $0xc00] sm:$0xff]  ;;  %v719_v19 = vld [vmem:[#allocation5 + $0xc88] sm:$0xff] }
  0xfd   : > { %2370 = vmatpush.msra.mxu0 %v717_v20  ;;  %2410 = vmatpush.msra.mxu2 %v749_v21  ;;  %v734_v20 = vld [vmem:[#allocation5 + $0xd00] sm:$0xff]  ;;  %v751_v21 = vld [vmem:[#allocation5 + $0xd88] sm:$0xff] }
  0xfe   : > { %2325 = vmatpush.msrb.mxu1 %v654_v22  ;;  %2365 = vmatpush.msrb.mxu3 %v686_v23  ;;  %v244_v22 = vld [vmem:[%s4326_s23 + $0xc0] sm:$0xff]  ;;  %v246_v23 = vld [vmem:[%s4326_s23 + $0xd0] sm:$0xff] }
  0xff   : > { %2326 = vmatmul.f32.vlgmr.msrb.gmra.mxu1 %v241_v24  ;;  %2366 = vmatmul.f32.vlgmr.msrb.gmra.mxu3 %v243_v25  ;;  %v781_v24 = vld [vmem:[#allocation5 + $0xe78] sm:$0xff] }
 0x100   : > { %2371 = vmatpush.msra.mxu0 %v716_v26  ;;  %2390 = vmatpush.msra.mxu1 %v733_v27  ;;  %v813_v25 = vld [vmem:[#allocation5 + $0xf78] sm:$0xff]  ;;  %v718_v26 = vld [vmem:[#allocation5 + $0xc80] sm:$0xff] }
 0x101   : > { %2411 = vmatpush.msra.mxu2 %v748_v28  ;;  %2430 = vmatpush.msra.mxu3 %v765_v29  ;;  %v750_v27 = vld [vmem:[#allocation5 + $0xd80] sm:$0xff]  ;;  %v245_v28 = vld [vmem:[%s4326_s23 + $0xc8] sm:$0xff]  ;;  %v247_v29 = vld [vmem:[%s4326_s23 + $0xd8] sm:$0xff] }
 0x102   : > { %2372 = vmatpush.msra.mxu0 %v715_v30  ;;  %2391 = vmatpush.msra.mxu1 %v732_v31  ;;  %v780_v30 = vld [vmem:[#allocation5 + $0xe70] sm:$0xff]  ;;  %v797_v31 = vld [vmem:[#allocation5 + $0xef8] sm:$0xff] }
 0x103   : > { %2412 = vmatpush.msra.mxu2 %v747_v32  ;;  %2431 = vmatpush.msra.mxu3 %v764_v33  ;;  %v812_v32 = vld [vmem:[#allocation5 + $0xf70] sm:$0xff]  ;;  %v829_v33 = vld [vmem:[#allocation5 + $0xff8] sm:$0xff] }
 0x104   : > { %2373 = vmatpush.msra.mxu0 %v714_v34  ;;  %2392 = vmatpush.msra.mxu1 %v731_v35  ;;  %v779_v34 = vld [vmem:[#allocation5 + $0xe68] sm:$0xff]  ;;  %v796_v35 = vld [vmem:[#allocation5 + $0xef0] sm:$0xff] }
 0x105   : > { %2413 = vmatpush.msra.mxu2 %v746_v36  ;;  %2432 = vmatpush.msra.mxu3 %v763_v37  ;;  %v811_v36 = vld [vmem:[#allocation5 + $0xf68] sm:$0xff]  ;;  %v828_v37 = vld [vmem:[#allocation5 + $0xff0] sm:$0xff] }
 0x106   : > { %2374 = vmatpush.msra.mxu0 %v713_v38  ;;  %2393 = vmatpush.msra.mxu1 %v730_v39  ;;  %v778_v38 = vld [vmem:[#allocation5 + $0xe60] sm:$0xff]  ;;  %v795_v39 = vld [vmem:[#allocation5 + $0xee8] sm:$0xff] }
 0x107   : > { %2414 = vmatpush.msra.mxu2 %v745_v40  ;;  %2433 = vmatpush.msra.mxu3 %v762_v41  ;;  %v810_v40 = vld [vmem:[#allocation5 + $0xf60] sm:$0xff]  ;;  %v827_v41 = vld [vmem:[#allocation5 + $0xfe8] sm:$0xff] }
 0x108   : > { %2375 = vmatpush.msra.mxu0 %v712_v42  ;;  %2394 = vmatpush.msra.mxu1 %v729_v43  ;;  %v777_v42 = vld [vmem:[#allocation5 + $0xe58] sm:$0xff]  ;;  %v794_v43 = vld [vmem:[#allocation5 + $0xee0] sm:$0xff] }
 0x109   : > { %2415 = vmatpush.msra.mxu2 %v744_v44  ;;  %2434 = vmatpush.msra.mxu3 %v761_v45  ;;  %v809_v44 = vld [vmem:[#allocation5 + $0xf58] sm:$0xff]  ;;  %v826_v45 = vld [vmem:[#allocation5 + $0xfe0] sm:$0xff] }
 0x10a   : > { %2376 = vmatpush.msra.mxu0 %v711_v46  ;;  %2395 = vmatpush.msra.mxu1 %v728_v47  ;;  %v776_v46 = vld [vmem:[#allocation5 + $0xe50] sm:$0xff]  ;;  %v793_v47 = vld [vmem:[#allocation5 + $0xed8] sm:$0xff] }
 0x10b   : > { %2416 = vmatpush.msra.mxu2 %v743_v48  ;;  %2435 = vmatpush.msra.mxu3 %v760_v49  ;;  %v808_v48 = vld [vmem:[#allocation5 + $0xf50] sm:$0xff]  ;;  %v825_v49 = vld [vmem:[#allocation5 + $0xfd8] sm:$0xff] }
 0x10c   : > { %2377 = vmatpush.msra.mxu0 %v710_v50  ;;  %2396 = vmatpush.msra.mxu1 %v727_v51  ;;  %v775_v50 = vld [vmem:[#allocation5 + $0xe48] sm:$0xff]  ;;  %v792_v51 = vld [vmem:[#allocation5 + $0xed0] sm:$0xff] }
 0x10d   : > { %2417 = vmatpush.msra.mxu2 %v742_v52  ;;  %2436 = vmatpush.msra.mxu3 %v759_v53  ;;  %v807_v52 = vld [vmem:[#allocation5 + $0xf48] sm:$0xff]  ;;  %v824_v53 = vld [vmem:[#allocation5 + $0xfd0] sm:$0xff] }
 0x10e   : > { %2378 = vmatpush.msra.mxu0 %v709_v54  ;;  %2397 = vmatpush.msra.mxu1 %v726_v55  ;;  %v774_v54 = vld [vmem:[#allocation5 + $0xe40] sm:$0xff]  ;;  %v791_v55 = vld [vmem:[#allocation5 + $0xec8] sm:$0xff] }
 0x10f   : > { %2418 = vmatpush.msra.mxu2 %v741_v56  ;;  %2437 = vmatpush.msra.mxu3 %v758_v57  ;;  %v806_v56 = vld [vmem:[#allocation5 + $0xf40] sm:$0xff]  ;;  %v823_v57 = vld [vmem:[#allocation5 + $0xfc8] sm:$0xff] }
 0x110   : > { %2379 = vmatpush.msra.mxu0 %v708_v58  ;;  %2398 = vmatpush.msra.mxu1 %v725_v59  ;;  %v773_v58 = vld [vmem:[#allocation5 + $0xe38] sm:$0xff]  ;;  %v790_v59 = vld [vmem:[#allocation5 + $0xec0] sm:$0xff] }
 0x111   : > { %2419 = vmatpush.msra.mxu2 %v740_v60  ;;  %2438 = vmatpush.msra.mxu3 %v757_v61  ;;  %v805_v60 = vld [vmem:[#allocation5 + $0xf38] sm:$0xff]  ;;  %v822_v61 = vld [vmem:[#allocation5 + $0xfc0] sm:$0xff] }
 0x112   : > { %2380 = vmatpush.msra.mxu0 %v707_v62  ;;  %2399 = vmatpush.msra.mxu1 %v724_v63  ;;  %v772_v62 = vld [vmem:[#allocation5 + $0xe30] sm:$0xff]  ;;  %v789_v63 = vld [vmem:[#allocation5 + $0xeb8] sm:$0xff] }
 0x113   : > { %2420 = vmatpush.msra.mxu2 %v739_v0  ;;  %2439 = vmatpush.msra.mxu3 %v756_v1  ;;  %v804_v0 = vld [vmem:[#allocation5 + $0xf30] sm:$0xff]  ;;  %v821_v1 = vld [vmem:[#allocation5 + $0xfb8] sm:$0xff] }
 0x114   : > { %2381 = vmatpush.msra.mxu0 %v706_v2  ;;  %2400 = vmatpush.msra.mxu1 %v723_v3  ;;  %v771_v2 = vld [vmem:[#allocation5 + $0xe28] sm:$0xff]  ;;  %v788_v3 = vld [vmem:[#allocation5 + $0xeb0] sm:$0xff] }
 0x115   : > { %2421 = vmatpush.msra.mxu2 %v738_v4  ;;  %2440 = vmatpush.msra.mxu3 %v755_v5  ;;  %v803_v4 = vld [vmem:[#allocation5 + $0xf28] sm:$0xff]  ;;  %v820_v5 = vld [vmem:[#allocation5 + $0xfb0] sm:$0xff] }
 0x116   : > { %2382 = vmatpush.msra.mxu0 %v705_v6  ;;  %2401 = vmatpush.msra.mxu1 %v722_v7  ;;  %v770_v6 = vld [vmem:[#allocation5 + $0xe20] sm:$0xff]  ;;  %v787_v7 = vld [vmem:[#allocation5 + $0xea8] sm:$0xff] }
 0x117   : > { %2422 = vmatpush.msra.mxu2 %v737_v8  ;;  %2441 = vmatpush.msra.mxu3 %v754_v9  ;;  %v802_v8 = vld [vmem:[#allocation5 + $0xf20] sm:$0xff]  ;;  %v819_v9 = vld [vmem:[#allocation5 + $0xfa8] sm:$0xff] }
 0x118   : > { %2383 = vmatpush.msra.mxu0 %v704_v10  ;;  %2402 = vmatpush.msra.mxu1 %v721_v11  ;;  %v769_v10 = vld [vmem:[#allocation5 + $0xe18] sm:$0xff]  ;;  %v786_v11 = vld [vmem:[#allocation5 + $0xea0] sm:$0xff] }
 0x119   : > { %2423 = vmatpush.msra.mxu2 %v736_v12  ;;  %2442 = vmatpush.msra.mxu3 %v753_v13  ;;  %v801_v12 = vld [vmem:[#allocation5 + $0xf18] sm:$0xff]  ;;  %v818_v13 = vld [vmem:[#allocation5 + $0xfa0] sm:$0xff] }
 0x11a   : > { %2384 = vmatpush.msra.mxu0 %v703_v14  ;;  %2403 = vmatpush.msra.mxu1 %v720_v15  ;;  %v768_v14 = vld [vmem:[#allocation5 + $0xe10] sm:$0xff]  ;;  %v785_v15 = vld [vmem:[#allocation5 + $0xe98] sm:$0xff] }
 0x11b   : > { %2424 = vmatpush.msra.mxu2 %v735_v16  ;;  %2443 = vmatpush.msra.mxu3 %v752_v17  ;;  %v800_v16 = vld [vmem:[#allocation5 + $0xf10] sm:$0xff]  ;;  %v817_v17 = vld [vmem:[#allocation5 + $0xf98] sm:$0xff] }
 0x11c   : > { %2385 = vmatpush.msra.mxu0 %v702_v18  ;;  %2404 = vmatpush.msra.mxu1 %v719_v19  ;;  %v767_v18 = vld [vmem:[#allocation5 + $0xe08] sm:$0xff]  ;;  %v784_v19 = vld [vmem:[#allocation5 + $0xe90] sm:$0xff] }
 0x11d   : > { %2425 = vmatpush.msra.mxu2 %v734_v20  ;;  %2444 = vmatpush.msra.mxu3 %v751_v21  ;;  %v799_v20 = vld [vmem:[#allocation5 + $0xf08] sm:$0xff]  ;;  %v816_v21 = vld [vmem:[#allocation5 + $0xf90] sm:$0xff] }
 0x11e   : > { %2386 = vmatmul.f32.vlgmr.msra.gmra.mxu0 %v244_v22  ;;  %2426 = vmatmul.f32.vlgmr.msra.gmra.mxu2 %v246_v23  ;;  %v766_v22 = vld [vmem:[#allocation5 + $0xe00] sm:$0xff]  ;;  %v783_v23 = vld [vmem:[#allocation5 + $0xe88] sm:$0xff] }
 0x11f   : > { %2450 = vmatpush.msrb.mxu0 %v781_v24  ;;  %2490 = vmatpush.msrb.mxu2 %v813_v25  ;;  %v798_v24 = vld [vmem:[#allocation5 + $0xf00] sm:$0xff]  ;;  %v815_v25 = vld [vmem:[#allocation5 + $0xf88] sm:$0xff] }
 0x120   : > { %2405 = vmatpush.msra.mxu1 %v718_v26  ;;  %2445 = vmatpush.msra.mxu3 %v750_v27  ;;  %v248_v26 = vld [vmem:[%s4326_s23 + $0xe0] sm:$0xff]  ;;  %v250_v27 = vld [vmem:[%s4326_s23 + $0xf0] sm:$0xff] }
 0x121   : > { %2406 = vmatmul.f32.vlgmr.msra.gmra.mxu1 %v245_v28  ;;  %2446 = vmatmul.f32.vlgmr.msra.gmra.mxu3 %v247_v29  ;;  %v845_v28 = vld [vmem:[#allocation5 + $0x1078] sm:$0xff] }
 0x122   : > { %2451 = vmatpush.msrb.mxu0 %v780_v30  ;;  %2470 = vmatpush.msrb.mxu1 %v797_v31  ;;  %v877_v29 = vld [vmem:[#allocation5 + $0x1178] sm:$0xff]  ;;  %v782_v30 = vld [vmem:[#allocation5 + $0xe80] sm:$0xff] }
 0x123   : > { %2491 = vmatpush.msrb.mxu2 %v812_v32  ;;  %2510 = vmatpush.msrb.mxu3 %v829_v33  ;;  %v814_v31 = vld [vmem:[#allocation5 + $0xf80] sm:$0xff]  ;;  %v249_v32 = vld [vmem:[%s4326_s23 + $0xe8] sm:$0xff]  ;;  %v251_v33 = vld [vmem:[%s4326_s23 + $0xf8] sm:$0xff] }
 0x124   : > { %2452 = vmatpush.msrb.mxu0 %v779_v34  ;;  %2471 = vmatpush.msrb.mxu1 %v796_v35  ;;  %v844_v34 = vld [vmem:[#allocation5 + $0x1070] sm:$0xff]  ;;  %v861_v35 = vld [vmem:[#allocation5 + $0x10f8] sm:$0xff] }
 0x125   : > { %2492 = vmatpush.msrb.mxu2 %v811_v36  ;;  %2511 = vmatpush.msrb.mxu3 %v828_v37  ;;  %v876_v36 = vld [vmem:[#allocation5 + $0x1170] sm:$0xff]  ;;  %v893_v37 = vld [vmem:[#allocation5 + $0x11f8] sm:$0xff] }
 0x126   : > { %2453 = vmatpush.msrb.mxu0 %v778_v38  ;;  %2472 = vmatpush.msrb.mxu1 %v795_v39  ;;  %v843_v38 = vld [vmem:[#allocation5 + $0x1068] sm:$0xff]  ;;  %v860_v39 = vld [vmem:[#allocation5 + $0x10f0] sm:$0xff] }
 0x127   : > { %2493 = vmatpush.msrb.mxu2 %v810_v40  ;;  %2512 = vmatpush.msrb.mxu3 %v827_v41  ;;  %v875_v40 = vld [vmem:[#allocation5 + $0x1168] sm:$0xff]  ;;  %v892_v41 = vld [vmem:[#allocation5 + $0x11f0] sm:$0xff] }
 0x128   : > { %2454 = vmatpush.msrb.mxu0 %v777_v42  ;;  %2473 = vmatpush.msrb.mxu1 %v794_v43  ;;  %v842_v42 = vld [vmem:[#allocation5 + $0x1060] sm:$0xff]  ;;  %v859_v43 = vld [vmem:[#allocation5 + $0x10e8] sm:$0xff] }
 0x129   : > { %2494 = vmatpush.msrb.mxu2 %v809_v44  ;;  %2513 = vmatpush.msrb.mxu3 %v826_v45  ;;  %v874_v44 = vld [vmem:[#allocation5 + $0x1160] sm:$0xff]  ;;  %v891_v45 = vld [vmem:[#allocation5 + $0x11e8] sm:$0xff] }
 0x12a   : > { %2455 = vmatpush.msrb.mxu0 %v776_v46  ;;  %2474 = vmatpush.msrb.mxu1 %v793_v47  ;;  %v841_v46 = vld [vmem:[#allocation5 + $0x1058] sm:$0xff]  ;;  %v858_v47 = vld [vmem:[#allocation5 + $0x10e0] sm:$0xff] }
 0x12b   : > { %2495 = vmatpush.msrb.mxu2 %v808_v48  ;;  %2514 = vmatpush.msrb.mxu3 %v825_v49  ;;  %v873_v48 = vld [vmem:[#allocation5 + $0x1158] sm:$0xff]  ;;  %v890_v49 = vld [vmem:[#allocation5 + $0x11e0] sm:$0xff] }
 0x12c   : > { %2456 = vmatpush.msrb.mxu0 %v775_v50  ;;  %2475 = vmatpush.msrb.mxu1 %v792_v51  ;;  %v840_v50 = vld [vmem:[#allocation5 + $0x1050] sm:$0xff]  ;;  %v857_v51 = vld [vmem:[#allocation5 + $0x10d8] sm:$0xff] }
 0x12d   : > { %2496 = vmatpush.msrb.mxu2 %v807_v52  ;;  %2515 = vmatpush.msrb.mxu3 %v824_v53  ;;  %v872_v52 = vld [vmem:[#allocation5 + $0x1150] sm:$0xff]  ;;  %v889_v53 = vld [vmem:[#allocation5 + $0x11d8] sm:$0xff] }
 0x12e   : > { %2457 = vmatpush.msrb.mxu0 %v774_v54  ;;  %2476 = vmatpush.msrb.mxu1 %v791_v55  ;;  %v839_v54 = vld [vmem:[#allocation5 + $0x1048] sm:$0xff]  ;;  %v856_v55 = vld [vmem:[#allocation5 + $0x10d0] sm:$0xff] }
 0x12f   : > { %2497 = vmatpush.msrb.mxu2 %v806_v56  ;;  %2516 = vmatpush.msrb.mxu3 %v823_v57  ;;  %v871_v56 = vld [vmem:[#allocation5 + $0x1148] sm:$0xff]  ;;  %v888_v57 = vld [vmem:[#allocation5 + $0x11d0] sm:$0xff] }
 0x130   : > { %2458 = vmatpush.msrb.mxu0 %v773_v58  ;;  %2477 = vmatpush.msrb.mxu1 %v790_v59  ;;  %v838_v58 = vld [vmem:[#allocation5 + $0x1040] sm:$0xff]  ;;  %v855_v59 = vld [vmem:[#allocation5 + $0x10c8] sm:$0xff] }
 0x131   : > { %2498 = vmatpush.msrb.mxu2 %v805_v60  ;;  %2517 = vmatpush.msrb.mxu3 %v822_v61  ;;  %v870_v60 = vld [vmem:[#allocation5 + $0x1140] sm:$0xff]  ;;  %v887_v61 = vld [vmem:[#allocation5 + $0x11c8] sm:$0xff] }
 0x132   : > { %2459 = vmatpush.msrb.mxu0 %v772_v62  ;;  %2478 = vmatpush.msrb.mxu1 %v789_v63  ;;  %v837_v62 = vld [vmem:[#allocation5 + $0x1038] sm:$0xff]  ;;  %v854_v63 = vld [vmem:[#allocation5 + $0x10c0] sm:$0xff] }
 0x133   : > { %2499 = vmatpush.msrb.mxu2 %v804_v0  ;;  %2518 = vmatpush.msrb.mxu3 %v821_v1  ;;  %v869_v0 = vld [vmem:[#allocation5 + $0x1138] sm:$0xff]  ;;  %v886_v1 = vld [vmem:[#allocation5 + $0x11c0] sm:$0xff] }
 0x134   : > { %2460 = vmatpush.msrb.mxu0 %v771_v2  ;;  %2479 = vmatpush.msrb.mxu1 %v788_v3  ;;  %v836_v2 = vld [vmem:[#allocation5 + $0x1030] sm:$0xff]  ;;  %v853_v3 = vld [vmem:[#allocation5 + $0x10b8] sm:$0xff] }
 0x135   : > { %2500 = vmatpush.msrb.mxu2 %v803_v4  ;;  %2519 = vmatpush.msrb.mxu3 %v820_v5  ;;  %v868_v4 = vld [vmem:[#allocation5 + $0x1130] sm:$0xff]  ;;  %v885_v5 = vld [vmem:[#allocation5 + $0x11b8] sm:$0xff] }
 0x136   : > { %2461 = vmatpush.msrb.mxu0 %v770_v6  ;;  %2480 = vmatpush.msrb.mxu1 %v787_v7  ;;  %v835_v6 = vld [vmem:[#allocation5 + $0x1028] sm:$0xff]  ;;  %v852_v7 = vld [vmem:[#allocation5 + $0x10b0] sm:$0xff] }
 0x137   : > { %2501 = vmatpush.msrb.mxu2 %v802_v8  ;;  %2520 = vmatpush.msrb.mxu3 %v819_v9  ;;  %v867_v8 = vld [vmem:[#allocation5 + $0x1128] sm:$0xff]  ;;  %v884_v9 = vld [vmem:[#allocation5 + $0x11b0] sm:$0xff] }
 0x138   : > { %2462 = vmatpush.msrb.mxu0 %v769_v10  ;;  %2481 = vmatpush.msrb.mxu1 %v786_v11  ;;  %v834_v10 = vld [vmem:[#allocation5 + $0x1020] sm:$0xff]  ;;  %v851_v11 = vld [vmem:[#allocation5 + $0x10a8] sm:$0xff] }
 0x139   : > { %2502 = vmatpush.msrb.mxu2 %v801_v12  ;;  %2521 = vmatpush.msrb.mxu3 %v818_v13  ;;  %v866_v12 = vld [vmem:[#allocation5 + $0x1120] sm:$0xff]  ;;  %v883_v13 = vld [vmem:[#allocation5 + $0x11a8] sm:$0xff] }
 0x13a   : > { %2463 = vmatpush.msrb.mxu0 %v768_v14  ;;  %2482 = vmatpush.msrb.mxu1 %v785_v15  ;;  %v833_v14 = vld [vmem:[#allocation5 + $0x1018] sm:$0xff]  ;;  %v850_v15 = vld [vmem:[#allocation5 + $0x10a0] sm:$0xff] }
 0x13b   : > { %2503 = vmatpush.msrb.mxu2 %v800_v16  ;;  %2522 = vmatpush.msrb.mxu3 %v817_v17  ;;  %v865_v16 = vld [vmem:[#allocation5 + $0x1118] sm:$0xff]  ;;  %v882_v17 = vld [vmem:[#allocation5 + $0x11a0] sm:$0xff] }
 0x13c   : > { %2464 = vmatpush.msrb.mxu0 %v767_v18  ;;  %2483 = vmatpush.msrb.mxu1 %v784_v19  ;;  %v832_v18 = vld [vmem:[#allocation5 + $0x1010] sm:$0xff]  ;;  %v849_v19 = vld [vmem:[#allocation5 + $0x1098] sm:$0xff] }
 0x13d   : > { %2504 = vmatpush.msrb.mxu2 %v799_v20  ;;  %2523 = vmatpush.msrb.mxu3 %v816_v21  ;;  %v864_v20 = vld [vmem:[#allocation5 + $0x1110] sm:$0xff]  ;;  %v881_v21 = vld [vmem:[#allocation5 + $0x1198] sm:$0xff] }
 0x13e   : > { %2465 = vmatpush.msrb.mxu0 %v766_v22  ;;  %2484 = vmatpush.msrb.mxu1 %v783_v23  ;;  %v831_v22 = vld [vmem:[#allocation5 + $0x1008] sm:$0xff]  ;;  %v848_v23 = vld [vmem:[#allocation5 + $0x1090] sm:$0xff] }
 0x13f   : > { %2505 = vmatpush.msrb.mxu2 %v798_v24  ;;  %2524 = vmatpush.msrb.mxu3 %v815_v25  ;;  %v863_v24 = vld [vmem:[#allocation5 + $0x1108] sm:$0xff]  ;;  %v880_v25 = vld [vmem:[#allocation5 + $0x1190] sm:$0xff] }
 0x140   : > { %2466 = vmatmul.f32.vlgmr.msrb.gmra.mxu0 %v248_v26  ;;  %2506 = vmatmul.f32.vlgmr.msrb.gmra.mxu2 %v250_v27  ;;  %v830_v26 = vld [vmem:[#allocation5 + $0x1000] sm:$0xff]  ;;  %v847_v27 = vld [vmem:[#allocation5 + $0x1088] sm:$0xff] }
 0x141   : > { %2530 = vmatpush.msra.mxu0 %v845_v28  ;;  %2570 = vmatpush.msra.mxu2 %v877_v29  ;;  %v862_v28 = vld [vmem:[#allocation5 + $0x1100] sm:$0xff]  ;;  %v879_v29 = vld [vmem:[#allocation5 + $0x1188] sm:$0xff] }
 0x142   : > { %2485 = vmatpush.msrb.mxu1 %v782_v30  ;;  %2525 = vmatpush.msrb.mxu3 %v814_v31  ;;  %v252_v30 = vld [vmem:[%s4326_s23 + $0x100] sm:$0xff]  ;;  %v254_v31 = vld [vmem:[%s4326_s23 + $0x110] sm:$0xff] }
 0x143   : > { %2486 = vmatmul.f32.vlgmr.msrb.gmra.mxu1 %v249_v32  ;;  %2526 = vmatmul.f32.vlgmr.msrb.gmra.mxu3 %v251_v33  ;;  %v909_v32 = vld [vmem:[#allocation5 + $0x1278] sm:$0xff] }
 0x144   : > { %2531 = vmatpush.msra.mxu0 %v844_v34  ;;  %2550 = vmatpush.msra.mxu1 %v861_v35  ;;  %v941_v33 = vld [vmem:[#allocation5 + $0x1378] sm:$0xff]  ;;  %v846_v34 = vld [vmem:[#allocation5 + $0x1080] sm:$0xff] }
 0x145   : > { %2571 = vmatpush.msra.mxu2 %v876_v36  ;;  %2590 = vmatpush.msra.mxu3 %v893_v37  ;;  %v878_v35 = vld [vmem:[#allocation5 + $0x1180] sm:$0xff]  ;;  %v253_v36 = vld [vmem:[%s4326_s23 + $0x108] sm:$0xff]  ;;  %v255_v37 = vld [vmem:[%s4326_s23 + $0x118] sm:$0xff] }
 0x146   : > { %2532 = vmatpush.msra.mxu0 %v843_v38  ;;  %2551 = vmatpush.msra.mxu1 %v860_v39  ;;  %v908_v38 = vld [vmem:[#allocation5 + $0x1270] sm:$0xff]  ;;  %v925_v39 = vld [vmem:[#allocation5 + $0x12f8] sm:$0xff] }
 0x147   : > { %2572 = vmatpush.msra.mxu2 %v875_v40  ;;  %2591 = vmatpush.msra.mxu3 %v892_v41  ;;  %v940_v40 = vld [vmem:[#allocation5 + $0x1370] sm:$0xff]  ;;  %v957_v41 = vld [vmem:[#allocation5 + $0x13f8] sm:$0xff] }
 0x148   : > { %2533 = vmatpush.msra.mxu0 %v842_v42  ;;  %2552 = vmatpush.msra.mxu1 %v859_v43  ;;  %v907_v42 = vld [vmem:[#allocation5 + $0x1268] sm:$0xff]  ;;  %v924_v43 = vld [vmem:[#allocation5 + $0x12f0] sm:$0xff] }
 0x149   : > { %2573 = vmatpush.msra.mxu2 %v874_v44  ;;  %2592 = vmatpush.msra.mxu3 %v891_v45  ;;  %v939_v44 = vld [vmem:[#allocation5 + $0x1368] sm:$0xff]  ;;  %v956_v45 = vld [vmem:[#allocation5 + $0x13f0] sm:$0xff] }
 0x14a   : > { %2534 = vmatpush.msra.mxu0 %v841_v46  ;;  %2553 = vmatpush.msra.mxu1 %v858_v47  ;;  %v906_v46 = vld [vmem:[#allocation5 + $0x1260] sm:$0xff]  ;;  %v923_v47 = vld [vmem:[#allocation5 + $0x12e8] sm:$0xff] }
 0x14b   : > { %2574 = vmatpush.msra.mxu2 %v873_v48  ;;  %2593 = vmatpush.msra.mxu3 %v890_v49  ;;  %v938_v48 = vld [vmem:[#allocation5 + $0x1360] sm:$0xff]  ;;  %v955_v49 = vld [vmem:[#allocation5 + $0x13e8] sm:$0xff] }
 0x14c   : > { %2535 = vmatpush.msra.mxu0 %v840_v50  ;;  %2554 = vmatpush.msra.mxu1 %v857_v51  ;;  %v905_v50 = vld [vmem:[#allocation5 + $0x1258] sm:$0xff]  ;;  %v922_v51 = vld [vmem:[#allocation5 + $0x12e0] sm:$0xff] }
 0x14d   : > { %2575 = vmatpush.msra.mxu2 %v872_v52  ;;  %2594 = vmatpush.msra.mxu3 %v889_v53  ;;  %v937_v52 = vld [vmem:[#allocation5 + $0x1358] sm:$0xff]  ;;  %v954_v53 = vld [vmem:[#allocation5 + $0x13e0] sm:$0xff] }
 0x14e   : > { %2536 = vmatpush.msra.mxu0 %v839_v54  ;;  %2555 = vmatpush.msra.mxu1 %v856_v55  ;;  %v904_v54 = vld [vmem:[#allocation5 + $0x1250] sm:$0xff]  ;;  %v921_v55 = vld [vmem:[#allocation5 + $0x12d8] sm:$0xff] }
 0x14f   : > { %2576 = vmatpush.msra.mxu2 %v871_v56  ;;  %2595 = vmatpush.msra.mxu3 %v888_v57  ;;  %v936_v56 = vld [vmem:[#allocation5 + $0x1350] sm:$0xff]  ;;  %v953_v57 = vld [vmem:[#allocation5 + $0x13d8] sm:$0xff] }
 0x150   : > { %2537 = vmatpush.msra.mxu0 %v838_v58  ;;  %2556 = vmatpush.msra.mxu1 %v855_v59  ;;  %v903_v58 = vld [vmem:[#allocation5 + $0x1248] sm:$0xff]  ;;  %v920_v59 = vld [vmem:[#allocation5 + $0x12d0] sm:$0xff] }
 0x151   : > { %2577 = vmatpush.msra.mxu2 %v870_v60  ;;  %2596 = vmatpush.msra.mxu3 %v887_v61  ;;  %v935_v60 = vld [vmem:[#allocation5 + $0x1348] sm:$0xff]  ;;  %v952_v61 = vld [vmem:[#allocation5 + $0x13d0] sm:$0xff] }
 0x152   : > { %2538 = vmatpush.msra.mxu0 %v837_v62  ;;  %2557 = vmatpush.msra.mxu1 %v854_v63  ;;  %v902_v62 = vld [vmem:[#allocation5 + $0x1240] sm:$0xff]  ;;  %v919_v63 = vld [vmem:[#allocation5 + $0x12c8] sm:$0xff] }
 0x153   : > { %2578 = vmatpush.msra.mxu2 %v869_v0  ;;  %2597 = vmatpush.msra.mxu3 %v886_v1  ;;  %v934_v0 = vld [vmem:[#allocation5 + $0x1340] sm:$0xff]  ;;  %v951_v1 = vld [vmem:[#allocation5 + $0x13c8] sm:$0xff] }
 0x154   : > { %2539 = vmatpush.msra.mxu0 %v836_v2  ;;  %2558 = vmatpush.msra.mxu1 %v853_v3  ;;  %v901_v2 = vld [vmem:[#allocation5 + $0x1238] sm:$0xff]  ;;  %v918_v3 = vld [vmem:[#allocation5 + $0x12c0] sm:$0xff] }
 0x155   : > { %2579 = vmatpush.msra.mxu2 %v868_v4  ;;  %2598 = vmatpush.msra.mxu3 %v885_v5  ;;  %v933_v4 = vld [vmem:[#allocation5 + $0x1338] sm:$0xff]  ;;  %v950_v5 = vld [vmem:[#allocation5 + $0x13c0] sm:$0xff] }
 0x156   : > { %2540 = vmatpush.msra.mxu0 %v835_v6  ;;  %2559 = vmatpush.msra.mxu1 %v852_v7  ;;  %v900_v6 = vld [vmem:[#allocation5 + $0x1230] sm:$0xff]  ;;  %v917_v7 = vld [vmem:[#allocation5 + $0x12b8] sm:$0xff] }
 0x157   : > { %2580 = vmatpush.msra.mxu2 %v867_v8  ;;  %2599 = vmatpush.msra.mxu3 %v884_v9  ;;  %v932_v8 = vld [vmem:[#allocation5 + $0x1330] sm:$0xff]  ;;  %v949_v9 = vld [vmem:[#allocation5 + $0x13b8] sm:$0xff] }
 0x158   : > { %2541 = vmatpush.msra.mxu0 %v834_v10  ;;  %2560 = vmatpush.msra.mxu1 %v851_v11  ;;  %v899_v10 = vld [vmem:[#allocation5 + $0x1228] sm:$0xff]  ;;  %v916_v11 = vld [vmem:[#allocation5 + $0x12b0] sm:$0xff] }
 0x159   : > { %2581 = vmatpush.msra.mxu2 %v866_v12  ;;  %2600 = vmatpush.msra.mxu3 %v883_v13  ;;  %v931_v12 = vld [vmem:[#allocation5 + $0x1328] sm:$0xff]  ;;  %v948_v13 = vld [vmem:[#allocation5 + $0x13b0] sm:$0xff] }
 0x15a   : > { %2542 = vmatpush.msra.mxu0 %v833_v14  ;;  %2561 = vmatpush.msra.mxu1 %v850_v15  ;;  %v898_v14 = vld [vmem:[#allocation5 + $0x1220] sm:$0xff]  ;;  %v915_v15 = vld [vmem:[#allocation5 + $0x12a8] sm:$0xff] }
 0x15b   : > { %2582 = vmatpush.msra.mxu2 %v865_v16  ;;  %2601 = vmatpush.msra.mxu3 %v882_v17  ;;  %v930_v16 = vld [vmem:[#allocation5 + $0x1320] sm:$0xff]  ;;  %v947_v17 = vld [vmem:[#allocation5 + $0x13a8] sm:$0xff] }
 0x15c   : > { %2543 = vmatpush.msra.mxu0 %v832_v18  ;;  %2562 = vmatpush.msra.mxu1 %v849_v19  ;;  %v897_v18 = vld [vmem:[#allocation5 + $0x1218] sm:$0xff]  ;;  %v914_v19 = vld [vmem:[#allocation5 + $0x12a0] sm:$0xff] }
 0x15d   : > { %2583 = vmatpush.msra.mxu2 %v864_v20  ;;  %2602 = vmatpush.msra.mxu3 %v881_v21  ;;  %v929_v20 = vld [vmem:[#allocation5 + $0x1318] sm:$0xff]  ;;  %v946_v21 = vld [vmem:[#allocation5 + $0x13a0] sm:$0xff] }
 0x15e   : > { %2544 = vmatpush.msra.mxu0 %v831_v22  ;;  %2563 = vmatpush.msra.mxu1 %v848_v23  ;;  %v896_v22 = vld [vmem:[#allocation5 + $0x1210] sm:$0xff]  ;;  %v913_v23 = vld [vmem:[#allocation5 + $0x1298] sm:$0xff] }
 0x15f   : > { %2584 = vmatpush.msra.mxu2 %v863_v24  ;;  %2603 = vmatpush.msra.mxu3 %v880_v25  ;;  %v928_v24 = vld [vmem:[#allocation5 + $0x1310] sm:$0xff]  ;;  %v945_v25 = vld [vmem:[#allocation5 + $0x1398] sm:$0xff] }
 0x160   : > { %2545 = vmatpush.msra.mxu0 %v830_v26  ;;  %2564 = vmatpush.msra.mxu1 %v847_v27  ;;  %v895_v26 = vld [vmem:[#allocation5 + $0x1208] sm:$0xff]  ;;  %v912_v27 = vld [vmem:[#allocation5 + $0x1290] sm:$0xff] }
 0x161   : > { %2585 = vmatpush.msra.mxu2 %v862_v28  ;;  %2604 = vmatpush.msra.mxu3 %v879_v29  ;;  %v927_v28 = vld [vmem:[#allocation5 + $0x1308] sm:$0xff]  ;;  %v944_v29 = vld [vmem:[#allocation5 + $0x1390] sm:$0xff] }
 0x162   : > { %2546 = vmatmul.f32.vlgmr.msra.gmra.mxu0 %v252_v30  ;;  %2586 = vmatmul.f32.vlgmr.msra.gmra.mxu2 %v254_v31  ;;  %v894_v30 = vld [vmem:[#allocation5 + $0x1200] sm:$0xff]  ;;  %v911_v31 = vld [vmem:[#allocation5 + $0x1288] sm:$0xff] }
 0x163   : > { %2610 = vmatpush.msrb.mxu0 %v909_v32  ;;  %2650 = vmatpush.msrb.mxu2 %v941_v33  ;;  %v926_v32 = vld [vmem:[#allocation5 + $0x1300] sm:$0xff]  ;;  %v943_v33 = vld [vmem:[#allocation5 + $0x1388] sm:$0xff] }
 0x164   : > { %2565 = vmatpush.msra.mxu1 %v846_v34  ;;  %2605 = vmatpush.msra.mxu3 %v878_v35  ;;  %v256_v34 = vld [vmem:[%s4326_s23 + $0x120] sm:$0xff]  ;;  %v258_v35 = vld [vmem:[%s4326_s23 + $0x130] sm:$0xff] }
 0x165   : > { %2566 = vmatmul.f32.vlgmr.msra.gmra.mxu1 %v253_v36  ;;  %2606 = vmatmul.f32.vlgmr.msra.gmra.mxu3 %v255_v37  ;;  %v973_v36 = vld [vmem:[#allocation5 + $0x1478] sm:$0xff] }
 0x166   : > { %2611 = vmatpush.msrb.mxu0 %v908_v38  ;;  %2630 = vmatpush.msrb.mxu1 %v925_v39  ;;  %v1005_v37 = vld [vmem:[#allocation5 + $0x1578] sm:$0xff]  ;;  %v910_v38 = vld [vmem:[#allocation5 + $0x1280] sm:$0xff] }
 0x167   : > { %2651 = vmatpush.msrb.mxu2 %v940_v40  ;;  %2670 = vmatpush.msrb.mxu3 %v957_v41  ;;  %v942_v39 = vld [vmem:[#allocation5 + $0x1380] sm:$0xff]  ;;  %v257_v40 = vld [vmem:[%s4326_s23 + $0x128] sm:$0xff]  ;;  %v259_v41 = vld [vmem:[%s4326_s23 + $0x138] sm:$0xff] }
 0x168   : > { %2612 = vmatpush.msrb.mxu0 %v907_v42  ;;  %2631 = vmatpush.msrb.mxu1 %v924_v43  ;;  %v972_v42 = vld [vmem:[#allocation5 + $0x1470] sm:$0xff]  ;;  %v989_v43 = vld [vmem:[#allocation5 + $0x14f8] sm:$0xff] }
 0x169   : > { %2652 = vmatpush.msrb.mxu2 %v939_v44  ;;  %2671 = vmatpush.msrb.mxu3 %v956_v45  ;;  %v1004_v44 = vld [vmem:[#allocation5 + $0x1570] sm:$0xff]  ;;  %v1021_v45 = vld [vmem:[#allocation5 + $0x15f8] sm:$0xff] }
 0x16a   : > { %2613 = vmatpush.msrb.mxu0 %v906_v46  ;;  %2632 = vmatpush.msrb.mxu1 %v923_v47  ;;  %v971_v46 = vld [vmem:[#allocation5 + $0x1468] sm:$0xff]  ;;  %v988_v47 = vld [vmem:[#allocation5 + $0x14f0] sm:$0xff] }
 0x16b   : > { %2653 = vmatpush.msrb.mxu2 %v938_v48  ;;  %2672 = vmatpush.msrb.mxu3 %v955_v49  ;;  %v1003_v48 = vld [vmem:[#allocation5 + $0x1568] sm:$0xff]  ;;  %v1020_v49 = vld [vmem:[#allocation5 + $0x15f0] sm:$0xff] }
 0x16c   : > { %2614 = vmatpush.msrb.mxu0 %v905_v50  ;;  %2633 = vmatpush.msrb.mxu1 %v922_v51  ;;  %v970_v50 = vld [vmem:[#allocation5 + $0x1460] sm:$0xff]  ;;  %v987_v51 = vld [vmem:[#allocation5 + $0x14e8] sm:$0xff] }
 0x16d   : > { %2654 = vmatpush.msrb.mxu2 %v937_v52  ;;  %2673 = vmatpush.msrb.mxu3 %v954_v53  ;;  %v1002_v52 = vld [vmem:[#allocation5 + $0x1560] sm:$0xff]  ;;  %v1019_v53 = vld [vmem:[#allocation5 + $0x15e8] sm:$0xff] }
 0x16e   : > { %2615 = vmatpush.msrb.mxu0 %v904_v54  ;;  %2634 = vmatpush.msrb.mxu1 %v921_v55  ;;  %v969_v54 = vld [vmem:[#allocation5 + $0x1458] sm:$0xff]  ;;  %v986_v55 = vld [vmem:[#allocation5 + $0x14e0] sm:$0xff] }
 0x16f   : > { %2655 = vmatpush.msrb.mxu2 %v936_v56  ;;  %2674 = vmatpush.msrb.mxu3 %v953_v57  ;;  %v1001_v56 = vld [vmem:[#allocation5 + $0x1558] sm:$0xff]  ;;  %v1018_v57 = vld [vmem:[#allocation5 + $0x15e0] sm:$0xff] }
 0x170   : > { %2616 = vmatpush.msrb.mxu0 %v903_v58  ;;  %2635 = vmatpush.msrb.mxu1 %v920_v59  ;;  %v968_v58 = vld [vmem:[#allocation5 + $0x1450] sm:$0xff]  ;;  %v985_v59 = vld [vmem:[#allocation5 + $0x14d8] sm:$0xff] }
 0x171   : > { %2656 = vmatpush.msrb.mxu2 %v935_v60  ;;  %2675 = vmatpush.msrb.mxu3 %v952_v61  ;;  %v1000_v60 = vld [vmem:[#allocation5 + $0x1550] sm:$0xff]  ;;  %v1017_v61 = vld [vmem:[#allocation5 + $0x15d8] sm:$0xff] }
 0x172   : > { %2617 = vmatpush.msrb.mxu0 %v902_v62  ;;  %2636 = vmatpush.msrb.mxu1 %v919_v63  ;;  %v967_v62 = vld [vmem:[#allocation5 + $0x1448] sm:$0xff]  ;;  %v984_v63 = vld [vmem:[#allocation5 + $0x14d0] sm:$0xff] }
 0x173   : > { %2657 = vmatpush.msrb.mxu2 %v934_v0  ;;  %2676 = vmatpush.msrb.mxu3 %v951_v1  ;;  %v999_v0 = vld [vmem:[#allocation5 + $0x1548] sm:$0xff]  ;;  %v1016_v1 = vld [vmem:[#allocation5 + $0x15d0] sm:$0xff] }
 0x174   : > { %2618 = vmatpush.msrb.mxu0 %v901_v2  ;;  %2637 = vmatpush.msrb.mxu1 %v918_v3  ;;  %v966_v2 = vld [vmem:[#allocation5 + $0x1440] sm:$0xff]  ;;  %v983_v3 = vld [vmem:[#allocation5 + $0x14c8] sm:$0xff] }
 0x175   : > { %2658 = vmatpush.msrb.mxu2 %v933_v4  ;;  %2677 = vmatpush.msrb.mxu3 %v950_v5  ;;  %v998_v4 = vld [vmem:[#allocation5 + $0x1540] sm:$0xff]  ;;  %v1015_v5 = vld [vmem:[#allocation5 + $0x15c8] sm:$0xff] }
 0x176   : > { %2619 = vmatpush.msrb.mxu0 %v900_v6  ;;  %2638 = vmatpush.msrb.mxu1 %v917_v7  ;;  %v965_v6 = vld [vmem:[#allocation5 + $0x1438] sm:$0xff]  ;;  %v982_v7 = vld [vmem:[#allocation5 + $0x14c0] sm:$0xff] }
 0x177   : > { %2659 = vmatpush.msrb.mxu2 %v932_v8  ;;  %2678 = vmatpush.msrb.mxu3 %v949_v9  ;;  %v997_v8 = vld [vmem:[#allocation5 + $0x1538] sm:$0xff]  ;;  %v1014_v9 = vld [vmem:[#allocation5 + $0x15c0] sm:$0xff] }
 0x178   : > { %2620 = vmatpush.msrb.mxu0 %v899_v10  ;;  %2639 = vmatpush.msrb.mxu1 %v916_v11  ;;  %v964_v10 = vld [vmem:[#allocation5 + $0x1430] sm:$0xff]  ;;  %v981_v11 = vld [vmem:[#allocation5 + $0x14b8] sm:$0xff] }
 0x179   : > { %2660 = vmatpush.msrb.mxu2 %v931_v12  ;;  %2679 = vmatpush.msrb.mxu3 %v948_v13  ;;  %v996_v12 = vld [vmem:[#allocation5 + $0x1530] sm:$0xff]  ;;  %v1013_v13 = vld [vmem:[#allocation5 + $0x15b8] sm:$0xff] }
 0x17a   : > { %2621 = vmatpush.msrb.mxu0 %v898_v14  ;;  %2640 = vmatpush.msrb.mxu1 %v915_v15  ;;  %v963_v14 = vld [vmem:[#allocation5 + $0x1428] sm:$0xff]  ;;  %v980_v15 = vld [vmem:[#allocation5 + $0x14b0] sm:$0xff] }
 0x17b   : > { %2661 = vmatpush.msrb.mxu2 %v930_v16  ;;  %2680 = vmatpush.msrb.mxu3 %v947_v17  ;;  %v995_v16 = vld [vmem:[#allocation5 + $0x1528] sm:$0xff]  ;;  %v1012_v17 = vld [vmem:[#allocation5 + $0x15b0] sm:$0xff] }
 0x17c   : > { %2622 = vmatpush.msrb.mxu0 %v897_v18  ;;  %2641 = vmatpush.msrb.mxu1 %v914_v19  ;;  %v962_v18 = vld [vmem:[#allocation5 + $0x1420] sm:$0xff]  ;;  %v979_v19 = vld [vmem:[#allocation5 + $0x14a8] sm:$0xff] }
 0x17d   : > { %2662 = vmatpush.msrb.mxu2 %v929_v20  ;;  %2681 = vmatpush.msrb.mxu3 %v946_v21  ;;  %v994_v20 = vld [vmem:[#allocation5 + $0x1520] sm:$0xff]  ;;  %v1011_v21 = vld [vmem:[#allocation5 + $0x15a8] sm:$0xff] }
 0x17e   : > { %2623 = vmatpush.msrb.mxu0 %v896_v22  ;;  %2642 = vmatpush.msrb.mxu1 %v913_v23  ;;  %v961_v22 = vld [vmem:[#allocation5 + $0x1418] sm:$0xff]  ;;  %v978_v23 = vld [vmem:[#allocation5 + $0x14a0] sm:$0xff] }
 0x17f   : > { %2663 = vmatpush.msrb.mxu2 %v928_v24  ;;  %2682 = vmatpush.msrb.mxu3 %v945_v25  ;;  %v993_v24 = vld [vmem:[#allocation5 + $0x1518] sm:$0xff]  ;;  %v1010_v25 = vld [vmem:[#allocation5 + $0x15a0] sm:$0xff] }
 0x180   : > { %2624 = vmatpush.msrb.mxu0 %v895_v26  ;;  %2643 = vmatpush.msrb.mxu1 %v912_v27  ;;  %v960_v26 = vld [vmem:[#allocation5 + $0x1410] sm:$0xff]  ;;  %v977_v27 = vld [vmem:[#allocation5 + $0x1498] sm:$0xff] }
 0x181   : > { %2664 = vmatpush.msrb.mxu2 %v927_v28  ;;  %2683 = vmatpush.msrb.mxu3 %v944_v29  ;;  %v992_v28 = vld [vmem:[#allocation5 + $0x1510] sm:$0xff]  ;;  %v1009_v29 = vld [vmem:[#allocation5 + $0x1598] sm:$0xff] }
 0x182   : > { %2625 = vmatpush.msrb.mxu0 %v894_v30  ;;  %2644 = vmatpush.msrb.mxu1 %v911_v31  ;;  %v959_v30 = vld [vmem:[#allocation5 + $0x1408] sm:$0xff]  ;;  %v976_v31 = vld [vmem:[#allocation5 + $0x1490] sm:$0xff] }
 0x183   : > { %2665 = vmatpush.msrb.mxu2 %v926_v32  ;;  %2684 = vmatpush.msrb.mxu3 %v943_v33  ;;  %v991_v32 = vld [vmem:[#allocation5 + $0x1508] sm:$0xff]  ;;  %v1008_v33 = vld [vmem:[#allocation5 + $0x1590] sm:$0xff] }
 0x184   : > { %2626 = vmatmul.f32.vlgmr.msrb.gmra.mxu0 %v256_v34  ;;  %2666 = vmatmul.f32.vlgmr.msrb.gmra.mxu2 %v258_v35  ;;  %v958_v34 = vld [vmem:[#allocation5 + $0x1400] sm:$0xff]  ;;  %v975_v35 = vld [vmem:[#allocation5 + $0x1488] sm:$0xff] }
 0x185   : > { %2690 = vmatpush.msra.mxu0 %v973_v36  ;;  %2730 = vmatpush.msra.mxu2 %v1005_v37  ;;  %v990_v36 = vld [vmem:[#allocation5 + $0x1500] sm:$0xff]  ;;  %v1007_v37 = vld [vmem:[#allocation5 + $0x1588] sm:$0xff] }
 0x186   : > { %2645 = vmatpush.msrb.mxu1 %v910_v38  ;;  %2685 = vmatpush.msrb.mxu3 %v942_v39  ;;  %v260_v38 = vld [vmem:[%s4326_s23 + $0x140] sm:$0xff]  ;;  %v262_v39 = vld [vmem:[%s4326_s23 + $0x150] sm:$0xff] }
 0x187   : > { %2646 = vmatmul.f32.vlgmr.msrb.gmra.mxu1 %v257_v40  ;;  %2686 = vmatmul.f32.vlgmr.msrb.gmra.mxu3 %v259_v41  ;;  %v1037_v40 = vld [vmem:[#allocation5 + $0x1678] sm:$0xff] }
 0x188   : > { %2691 = vmatpush.msra.mxu0 %v972_v42  ;;  %2710 = vmatpush.msra.mxu1 %v989_v43  ;;  %v1069_v41 = vld [vmem:[#allocation5 + $0x1778] sm:$0xff]  ;;  %v974_v42 = vld [vmem:[#allocation5 + $0x1480] sm:$0xff] }
 0x189   : > { %2731 = vmatpush.msra.mxu2 %v1004_v44  ;;  %2750 = vmatpush.msra.mxu3 %v1021_v45  ;;  %v1006_v43 = vld [vmem:[#allocation5 + $0x1580] sm:$0xff]  ;;  %v261_v44 = vld [vmem:[%s4326_s23 + $0x148] sm:$0xff]  ;;  %v263_v45 = vld [vmem:[%s4326_s23 + $0x158] sm:$0xff] }
 0x18a   : > { %2692 = vmatpush.msra.mxu0 %v971_v46  ;;  %2711 = vmatpush.msra.mxu1 %v988_v47  ;;  %v1036_v46 = vld [vmem:[#allocation5 + $0x1670] sm:$0xff]  ;;  %v1053_v47 = vld [vmem:[#allocation5 + $0x16f8] sm:$0xff] }
 0x18b   : > { %2732 = vmatpush.msra.mxu2 %v1003_v48  ;;  %2751 = vmatpush.msra.mxu3 %v1020_v49  ;;  %v1068_v48 = vld [vmem:[#allocation5 + $0x1770] sm:$0xff]  ;;  %v1085_v49 = vld [vmem:[#allocation5 + $0x17f8] sm:$0xff] }
 0x18c   : > { %2693 = vmatpush.msra.mxu0 %v970_v50  ;;  %2712 = vmatpush.msra.mxu1 %v987_v51  ;;  %v1035_v50 = vld [vmem:[#allocation5 + $0x1668] sm:$0xff]  ;;  %v1052_v51 = vld [vmem:[#allocation5 + $0x16f0] sm:$0xff] }
 0x18d   : > { %2733 = vmatpush.msra.mxu2 %v1002_v52  ;;  %2752 = vmatpush.msra.mxu3 %v1019_v53  ;;  %v1067_v52 = vld [vmem:[#allocation5 + $0x1768] sm:$0xff]  ;;  %v1084_v53 = vld [vmem:[#allocation5 + $0x17f0] sm:$0xff] }
 0x18e   : > { %2694 = vmatpush.msra.mxu0 %v969_v54  ;;  %2713 = vmatpush.msra.mxu1 %v986_v55  ;;  %v1034_v54 = vld [vmem:[#allocation5 + $0x1660] sm:$0xff]  ;;  %v1051_v55 = vld [vmem:[#allocation5 + $0x16e8] sm:$0xff] }
 0x18f   : > { %2734 = vmatpush.msra.mxu2 %v1001_v56  ;;  %2753 = vmatpush.msra.mxu3 %v1018_v57  ;;  %v1066_v56 = vld [vmem:[#allocation5 + $0x1760] sm:$0xff]  ;;  %v1083_v57 = vld [vmem:[#allocation5 + $0x17e8] sm:$0xff] }
 0x190   : > { %2695 = vmatpush.msra.mxu0 %v968_v58  ;;  %2714 = vmatpush.msra.mxu1 %v985_v59  ;;  %v1033_v58 = vld [vmem:[#allocation5 + $0x1658] sm:$0xff]  ;;  %v1050_v59 = vld [vmem:[#allocation5 + $0x16e0] sm:$0xff] }
 0x191   : > { %2735 = vmatpush.msra.mxu2 %v1000_v60  ;;  %2754 = vmatpush.msra.mxu3 %v1017_v61  ;;  %v1065_v60 = vld [vmem:[#allocation5 + $0x1758] sm:$0xff]  ;;  %v1082_v61 = vld [vmem:[#allocation5 + $0x17e0] sm:$0xff] }
 0x192   : > { %2696 = vmatpush.msra.mxu0 %v967_v62  ;;  %2715 = vmatpush.msra.mxu1 %v984_v63  ;;  %v1032_v62 = vld [vmem:[#allocation5 + $0x1650] sm:$0xff]  ;;  %v1049_v63 = vld [vmem:[#allocation5 + $0x16d8] sm:$0xff] }
 0x193   : > { %2736 = vmatpush.msra.mxu2 %v999_v0  ;;  %2755 = vmatpush.msra.mxu3 %v1016_v1  ;;  %v1064_v0 = vld [vmem:[#allocation5 + $0x1750] sm:$0xff]  ;;  %v1081_v1 = vld [vmem:[#allocation5 + $0x17d8] sm:$0xff] }
 0x194   : > { %2697 = vmatpush.msra.mxu0 %v966_v2  ;;  %2716 = vmatpush.msra.mxu1 %v983_v3  ;;  %v1031_v2 = vld [vmem:[#allocation5 + $0x1648] sm:$0xff]  ;;  %v1048_v3 = vld [vmem:[#allocation5 + $0x16d0] sm:$0xff] }
 0x195   : > { %2737 = vmatpush.msra.mxu2 %v998_v4  ;;  %2756 = vmatpush.msra.mxu3 %v1015_v5  ;;  %v1063_v4 = vld [vmem:[#allocation5 + $0x1748] sm:$0xff]  ;;  %v1080_v5 = vld [vmem:[#allocation5 + $0x17d0] sm:$0xff] }
 0x196   : > { %2698 = vmatpush.msra.mxu0 %v965_v6  ;;  %2717 = vmatpush.msra.mxu1 %v982_v7  ;;  %v1030_v6 = vld [vmem:[#allocation5 + $0x1640] sm:$0xff]  ;;  %v1047_v7 = vld [vmem:[#allocation5 + $0x16c8] sm:$0xff] }
 0x197   : > { %2738 = vmatpush.msra.mxu2 %v997_v8  ;;  %2757 = vmatpush.msra.mxu3 %v1014_v9  ;;  %v1062_v8 = vld [vmem:[#allocation5 + $0x1740] sm:$0xff]  ;;  %v1079_v9 = vld [vmem:[#allocation5 + $0x17c8] sm:$0xff] }
 0x198   : > { %2699 = vmatpush.msra.mxu0 %v964_v10  ;;  %2718 = vmatpush.msra.mxu1 %v981_v11  ;;  %v1029_v10 = vld [vmem:[#allocation5 + $0x1638] sm:$0xff]  ;;  %v1046_v11 = vld [vmem:[#allocation5 + $0x16c0] sm:$0xff] }
 0x199   : > { %2739 = vmatpush.msra.mxu2 %v996_v12  ;;  %2758 = vmatpush.msra.mxu3 %v1013_v13  ;;  %v1061_v12 = vld [vmem:[#allocation5 + $0x1738] sm:$0xff]  ;;  %v1078_v13 = vld [vmem:[#allocation5 + $0x17c0] sm:$0xff] }
 0x19a   : > { %2700 = vmatpush.msra.mxu0 %v963_v14  ;;  %2719 = vmatpush.msra.mxu1 %v980_v15  ;;  %v1028_v14 = vld [vmem:[#allocation5 + $0x1630] sm:$0xff]  ;;  %v1045_v15 = vld [vmem:[#allocation5 + $0x16b8] sm:$0xff] }
 0x19b   : > { %2740 = vmatpush.msra.mxu2 %v995_v16  ;;  %2759 = vmatpush.msra.mxu3 %v1012_v17  ;;  %v1060_v16 = vld [vmem:[#allocation5 + $0x1730] sm:$0xff]  ;;  %v1077_v17 = vld [vmem:[#allocation5 + $0x17b8] sm:$0xff] }
 0x19c   : > { %2701 = vmatpush.msra.mxu0 %v962_v18  ;;  %2720 = vmatpush.msra.mxu1 %v979_v19  ;;  %v1027_v18 = vld [vmem:[#allocation5 + $0x1628] sm:$0xff]  ;;  %v1044_v19 = vld [vmem:[#allocation5 + $0x16b0] sm:$0xff] }
 0x19d   : > { %2741 = vmatpush.msra.mxu2 %v994_v20  ;;  %2760 = vmatpush.msra.mxu3 %v1011_v21  ;;  %v1059_v20 = vld [vmem:[#allocation5 + $0x1728] sm:$0xff]  ;;  %v1076_v21 = vld [vmem:[#allocation5 + $0x17b0] sm:$0xff] }
 0x19e   : > { %2702 = vmatpush.msra.mxu0 %v961_v22  ;;  %2721 = vmatpush.msra.mxu1 %v978_v23  ;;  %v1026_v22 = vld [vmem:[#allocation5 + $0x1620] sm:$0xff]  ;;  %v1043_v23 = vld [vmem:[#allocation5 + $0x16a8] sm:$0xff] }
 0x19f   : > { %2742 = vmatpush.msra.mxu2 %v993_v24  ;;  %2761 = vmatpush.msra.mxu3 %v1010_v25  ;;  %v1058_v24 = vld [vmem:[#allocation5 + $0x1720] sm:$0xff]  ;;  %v1075_v25 = vld [vmem:[#allocation5 + $0x17a8] sm:$0xff] }
 0x1a0   : > { %2703 = vmatpush.msra.mxu0 %v960_v26  ;;  %2722 = vmatpush.msra.mxu1 %v977_v27  ;;  %v1025_v26 = vld [vmem:[#allocation5 + $0x1618] sm:$0xff]  ;;  %v1042_v27 = vld [vmem:[#allocation5 + $0x16a0] sm:$0xff] }
 0x1a1   : > { %2743 = vmatpush.msra.mxu2 %v992_v28  ;;  %2762 = vmatpush.msra.mxu3 %v1009_v29  ;;  %v1057_v28 = vld [vmem:[#allocation5 + $0x1718] sm:$0xff]  ;;  %v1074_v29 = vld [vmem:[#allocation5 + $0x17a0] sm:$0xff] }
 0x1a2   : > { %2704 = vmatpush.msra.mxu0 %v959_v30  ;;  %2723 = vmatpush.msra.mxu1 %v976_v31  ;;  %v1024_v30 = vld [vmem:[#allocation5 + $0x1610] sm:$0xff]  ;;  %v1041_v31 = vld [vmem:[#allocation5 + $0x1698] sm:$0xff] }
 0x1a3   : > { %2744 = vmatpush.msra.mxu2 %v991_v32  ;;  %2763 = vmatpush.msra.mxu3 %v1008_v33  ;;  %v1056_v32 = vld [vmem:[#allocation5 + $0x1710] sm:$0xff]  ;;  %v1073_v33 = vld [vmem:[#allocation5 + $0x1798] sm:$0xff] }
 0x1a4   : > { %2705 = vmatpush.msra.mxu0 %v958_v34  ;;  %2724 = vmatpush.msra.mxu1 %v975_v35  ;;  %v1023_v34 = vld [vmem:[#allocation5 + $0x1608] sm:$0xff]  ;;  %v1040_v35 = vld [vmem:[#allocation5 + $0x1690] sm:$0xff] }
 0x1a5   : > { %2745 = vmatpush.msra.mxu2 %v990_v36  ;;  %2764 = vmatpush.msra.mxu3 %v1007_v37  ;;  %v1055_v36 = vld [vmem:[#allocation5 + $0x1708] sm:$0xff]  ;;  %v1072_v37 = vld [vmem:[#allocation5 + $0x1790] sm:$0xff] }
 0x1a6   : > { %2706 = vmatmul.f32.vlgmr.msra.gmra.mxu0 %v260_v38  ;;  %2746 = vmatmul.f32.vlgmr.msra.gmra.mxu2 %v262_v39  ;;  %v1022_v38 = vld [vmem:[#allocation5 + $0x1600] sm:$0xff]  ;;  %v1039_v39 = vld [vmem:[#allocation5 + $0x1688] sm:$0xff] }
 0x1a7   : > { %2770 = vmatpush.msrb.mxu0 %v1037_v40  ;;  %2810 = vmatpush.msrb.mxu2 %v1069_v41  ;;  %v1054_v40 = vld [vmem:[#allocation5 + $0x1700] sm:$0xff]  ;;  %v1071_v41 = vld [vmem:[#allocation5 + $0x1788] sm:$0xff] }
 0x1a8   : > { %2725 = vmatpush.msra.mxu1 %v974_v42  ;;  %2765 = vmatpush.msra.mxu3 %v1006_v43  ;;  %v264_v42 = vld [vmem:[%s4326_s23 + $0x160] sm:$0xff]  ;;  %v266_v43 = vld [vmem:[%s4326_s23 + $0x170] sm:$0xff] }
 0x1a9   : > { %2726 = vmatmul.f32.vlgmr.msra.gmra.mxu1 %v261_v44  ;;  %2766 = vmatmul.f32.vlgmr.msra.gmra.mxu3 %v263_v45  ;;  %v1101_v44 = vld [vmem:[#allocation5 + $0x1878] sm:$0xff] }
 0x1aa   : > { %2771 = vmatpush.msrb.mxu0 %v1036_v46  ;;  %2790 = vmatpush.msrb.mxu1 %v1053_v47  ;;  %v1133_v45 = vld [vmem:[#allocation5 + $0x1978] sm:$0xff]  ;;  %v1038_v46 = vld [vmem:[#allocation5 + $0x1680] sm:$0xff] }
 0x1ab   : > { %2811 = vmatpush.msrb.mxu2 %v1068_v48  ;;  %2830 = vmatpush.msrb.mxu3 %v1085_v49  ;;  %v1070_v47 = vld [vmem:[#allocation5 + $0x1780] sm:$0xff]  ;;  %v265_v48 = vld [vmem:[%s4326_s23 + $0x168] sm:$0xff]  ;;  %v267_v49 = vld [vmem:[%s4326_s23 + $0x178] sm:$0xff] }
 0x1ac   : > { %2772 = vmatpush.msrb.mxu0 %v1035_v50  ;;  %2791 = vmatpush.msrb.mxu1 %v1052_v51  ;;  %v1100_v50 = vld [vmem:[#allocation5 + $0x1870] sm:$0xff]  ;;  %v1117_v51 = vld [vmem:[#allocation5 + $0x18f8] sm:$0xff] }
 0x1ad   : > { %2812 = vmatpush.msrb.mxu2 %v1067_v52  ;;  %2831 = vmatpush.msrb.mxu3 %v1084_v53  ;;  %v1132_v52 = vld [vmem:[#allocation5 + $0x1970] sm:$0xff]  ;;  %v1149_v53 = vld [vmem:[#allocation5 + $0x19f8] sm:$0xff] }
 0x1ae   : > { %2773 = vmatpush.msrb.mxu0 %v1034_v54  ;;  %2792 = vmatpush.msrb.mxu1 %v1051_v55  ;;  %v1099_v54 = vld [vmem:[#allocation5 + $0x1868] sm:$0xff]  ;;  %v1116_v55 = vld [vmem:[#allocation5 + $0x18f0] sm:$0xff] }
 0x1af   : > { %2813 = vmatpush.msrb.mxu2 %v1066_v56  ;;  %2832 = vmatpush.msrb.mxu3 %v1083_v57  ;;  %v1131_v56 = vld [vmem:[#allocation5 + $0x1968] sm:$0xff]  ;;  %v1148_v57 = vld [vmem:[#allocation5 + $0x19f0] sm:$0xff] }
 0x1b0   : > { %2774 = vmatpush.msrb.mxu0 %v1033_v58  ;;  %2793 = vmatpush.msrb.mxu1 %v1050_v59  ;;  %v1098_v58 = vld [vmem:[#allocation5 + $0x1860] sm:$0xff]  ;;  %v1115_v59 = vld [vmem:[#allocation5 + $0x18e8] sm:$0xff] }
 0x1b1   : > { %2814 = vmatpush.msrb.mxu2 %v1065_v60  ;;  %2833 = vmatpush.msrb.mxu3 %v1082_v61  ;;  %v1130_v60 = vld [vmem:[#allocation5 + $0x1960] sm:$0xff]  ;;  %v1147_v61 = vld [vmem:[#allocation5 + $0x19e8] sm:$0xff] }
 0x1b2   : > { %2775 = vmatpush.msrb.mxu0 %v1032_v62  ;;  %2794 = vmatpush.msrb.mxu1 %v1049_v63  ;;  %v1097_v62 = vld [vmem:[#allocation5 + $0x1858] sm:$0xff]  ;;  %v1114_v63 = vld [vmem:[#allocation5 + $0x18e0] sm:$0xff] }
 0x1b3   : > { %2815 = vmatpush.msrb.mxu2 %v1064_v0  ;;  %2834 = vmatpush.msrb.mxu3 %v1081_v1  ;;  %v1129_v0 = vld [vmem:[#allocation5 + $0x1958] sm:$0xff]  ;;  %v1146_v1 = vld [vmem:[#allocation5 + $0x19e0] sm:$0xff] }
 0x1b4   : > { %2776 = vmatpush.msrb.mxu0 %v1031_v2  ;;  %2795 = vmatpush.msrb.mxu1 %v1048_v3  ;;  %v1096_v2 = vld [vmem:[#allocation5 + $0x1850] sm:$0xff]  ;;  %v1113_v3 = vld [vmem:[#allocation5 + $0x18d8] sm:$0xff] }
 0x1b5   : > { %2816 = vmatpush.msrb.mxu2 %v1063_v4  ;;  %2835 = vmatpush.msrb.mxu3 %v1080_v5  ;;  %v1128_v4 = vld [vmem:[#allocation5 + $0x1950] sm:$0xff]  ;;  %v1145_v5 = vld [vmem:[#allocation5 + $0x19d8] sm:$0xff] }
 0x1b6   : > { %2777 = vmatpush.msrb.mxu0 %v1030_v6  ;;  %2796 = vmatpush.msrb.mxu1 %v1047_v7  ;;  %v1095_v6 = vld [vmem:[#allocation5 + $0x1848] sm:$0xff]  ;;  %v1112_v7 = vld [vmem:[#allocation5 + $0x18d0] sm:$0xff] }
 0x1b7   : > { %2817 = vmatpush.msrb.mxu2 %v1062_v8  ;;  %2836 = vmatpush.msrb.mxu3 %v1079_v9  ;;  %v1127_v8 = vld [vmem:[#allocation5 + $0x1948] sm:$0xff]  ;;  %v1144_v9 = vld [vmem:[#allocation5 + $0x19d0] sm:$0xff] }
 0x1b8   : > { %2778 = vmatpush.msrb.mxu0 %v1029_v10  ;;  %2797 = vmatpush.msrb.mxu1 %v1046_v11  ;;  %v1094_v10 = vld [vmem:[#allocation5 + $0x1840] sm:$0xff]  ;;  %v1111_v11 = vld [vmem:[#allocation5 + $0x18c8] sm:$0xff] }
 0x1b9   : > { %2818 = vmatpush.msrb.mxu2 %v1061_v12  ;;  %2837 = vmatpush.msrb.mxu3 %v1078_v13  ;;  %v1126_v12 = vld [vmem:[#allocation5 + $0x1940] sm:$0xff]  ;;  %v1143_v13 = vld [vmem:[#allocation5 + $0x19c8] sm:$0xff] }
 0x1ba   : > { %2779 = vmatpush.msrb.mxu0 %v1028_v14  ;;  %2798 = vmatpush.msrb.mxu1 %v1045_v15  ;;  %v1093_v14 = vld [vmem:[#allocation5 + $0x1838] sm:$0xff]  ;;  %v1110_v15 = vld [vmem:[#allocation5 + $0x18c0] sm:$0xff] }
 0x1bb   : > { %2819 = vmatpush.msrb.mxu2 %v1060_v16  ;;  %2838 = vmatpush.msrb.mxu3 %v1077_v17  ;;  %v1125_v16 = vld [vmem:[#allocation5 + $0x1938] sm:$0xff]  ;;  %v1142_v17 = vld [vmem:[#allocation5 + $0x19c0] sm:$0xff] }
 0x1bc   : > { %2780 = vmatpush.msrb.mxu0 %v1027_v18  ;;  %2799 = vmatpush.msrb.mxu1 %v1044_v19  ;;  %v1092_v18 = vld [vmem:[#allocation5 + $0x1830] sm:$0xff]  ;;  %v1109_v19 = vld [vmem:[#allocation5 + $0x18b8] sm:$0xff] }
 0x1bd   : > { %2820 = vmatpush.msrb.mxu2 %v1059_v20  ;;  %2839 = vmatpush.msrb.mxu3 %v1076_v21  ;;  %v1124_v20 = vld [vmem:[#allocation5 + $0x1930] sm:$0xff]  ;;  %v1141_v21 = vld [vmem:[#allocation5 + $0x19b8] sm:$0xff] }
 0x1be   : > { %2781 = vmatpush.msrb.mxu0 %v1026_v22  ;;  %2800 = vmatpush.msrb.mxu1 %v1043_v23  ;;  %v1091_v22 = vld [vmem:[#allocation5 + $0x1828] sm:$0xff]  ;;  %v1108_v23 = vld [vmem:[#allocation5 + $0x18b0] sm:$0xff] }
 0x1bf   : > { %2821 = vmatpush.msrb.mxu2 %v1058_v24  ;;  %2840 = vmatpush.msrb.mxu3 %v1075_v25  ;;  %v1123_v24 = vld [vmem:[#allocation5 + $0x1928] sm:$0xff]  ;;  %v1140_v25 = vld [vmem:[#allocation5 + $0x19b0] sm:$0xff] }
 0x1c0   : > { %2782 = vmatpush.msrb.mxu0 %v1025_v26  ;;  %2801 = vmatpush.msrb.mxu1 %v1042_v27  ;;  %v1090_v26 = vld [vmem:[#allocation5 + $0x1820] sm:$0xff]  ;;  %v1107_v27 = vld [vmem:[#allocation5 + $0x18a8] sm:$0xff] }
 0x1c1   : > { %2822 = vmatpush.msrb.mxu2 %v1057_v28  ;;  %2841 = vmatpush.msrb.mxu3 %v1074_v29  ;;  %v1122_v28 = vld [vmem:[#allocation5 + $0x1920] sm:$0xff]  ;;  %v1139_v29 = vld [vmem:[#allocation5 + $0x19a8] sm:$0xff] }
 0x1c2   : > { %2783 = vmatpush.msrb.mxu0 %v1024_v30  ;;  %2802 = vmatpush.msrb.mxu1 %v1041_v31  ;;  %v1089_v30 = vld [vmem:[#allocation5 + $0x1818] sm:$0xff]  ;;  %v1106_v31 = vld [vmem:[#allocation5 + $0x18a0] sm:$0xff] }
 0x1c3   : > { %2823 = vmatpush.msrb.mxu2 %v1056_v32  ;;  %2842 = vmatpush.msrb.mxu3 %v1073_v33  ;;  %v1121_v32 = vld [vmem:[#allocation5 + $0x1918] sm:$0xff]  ;;  %v1138_v33 = vld [vmem:[#allocation5 + $0x19a0] sm:$0xff] }
 0x1c4   : > { %2784 = vmatpush.msrb.mxu0 %v1023_v34  ;;  %2803 = vmatpush.msrb.mxu1 %v1040_v35  ;;  %v1088_v34 = vld [vmem:[#allocation5 + $0x1810] sm:$0xff]  ;;  %v1105_v35 = vld [vmem:[#allocation5 + $0x1898] sm:$0xff] }
 0x1c5   : > { %2824 = vmatpush.msrb.mxu2 %v1055_v36  ;;  %2843 = vmatpush.msrb.mxu3 %v1072_v37  ;;  %v1120_v36 = vld [vmem:[#allocation5 + $0x1910] sm:$0xff]  ;;  %v1137_v37 = vld [vmem:[#allocation5 + $0x1998] sm:$0xff] }
 0x1c6   : > { %2785 = vmatpush.msrb.mxu0 %v1022_v38  ;;  %2804 = vmatpush.msrb.mxu1 %v1039_v39  ;;  %v1087_v38 = vld [vmem:[#allocation5 + $0x1808] sm:$0xff]  ;;  %v1104_v39 = vld [vmem:[#allocation5 + $0x1890] sm:$0xff] }
 0x1c7   : > { %2825 = vmatpush.msrb.mxu2 %v1054_v40  ;;  %2844 = vmatpush.msrb.mxu3 %v1071_v41  ;;  %v1119_v40 = vld [vmem:[#allocation5 + $0x1908] sm:$0xff]  ;;  %v1136_v41 = vld [vmem:[#allocation5 + $0x1990] sm:$0xff] }
 0x1c8   : > { %2786 = vmatmul.f32.vlgmr.msrb.gmra.mxu0 %v264_v42  ;;  %2826 = vmatmul.f32.vlgmr.msrb.gmra.mxu2 %v266_v43  ;;  %v1086_v42 = vld [vmem:[#allocation5 + $0x1800] sm:$0xff]  ;;  %v1103_v43 = vld [vmem:[#allocation5 + $0x1888] sm:$0xff] }
 0x1c9   : > { %2850 = vmatpush.msra.mxu0 %v1101_v44  ;;  %2890 = vmatpush.msra.mxu2 %v1133_v45  ;;  %v1118_v44 = vld [vmem:[#allocation5 + $0x1900] sm:$0xff]  ;;  %v1135_v45 = vld [vmem:[#allocation5 + $0x1988] sm:$0xff] }
 0x1ca   : > { %2805 = vmatpush.msrb.mxu1 %v1038_v46  ;;  %2845 = vmatpush.msrb.mxu3 %v1070_v47  ;;  %v268_v46 = vld [vmem:[%s4326_s23 + $0x180] sm:$0xff]  ;;  %v270_v47 = vld [vmem:[%s4326_s23 + $0x190] sm:$0xff] }
 0x1cb   : > { %2806 = vmatmul.f32.vlgmr.msrb.gmra.mxu1 %v265_v48  ;;  %2846 = vmatmul.f32.vlgmr.msrb.gmra.mxu3 %v267_v49  ;;  %v1165_v48 = vld [vmem:[#allocation5 + $0x1a78] sm:$0xff] }
 0x1cc   : > { %2851 = vmatpush.msra.mxu0 %v1100_v50  ;;  %2870 = vmatpush.msra.mxu1 %v1117_v51  ;;  %v1197_v49 = vld [vmem:[#allocation5 + $0x1b78] sm:$0xff]  ;;  %v1102_v50 = vld [vmem:[#allocation5 + $0x1880] sm:$0xff] }
 0x1cd   : > { %2891 = vmatpush.msra.mxu2 %v1132_v52  ;;  %2910 = vmatpush.msra.mxu3 %v1149_v53  ;;  %v1134_v51 = vld [vmem:[#allocation5 + $0x1980] sm:$0xff]  ;;  %v269_v52 = vld [vmem:[%s4326_s23 + $0x188] sm:$0xff]  ;;  %v271_v53 = vld [vmem:[%s4326_s23 + $0x198] sm:$0xff] }
 0x1ce   : > { %2852 = vmatpush.msra.mxu0 %v1099_v54  ;;  %2871 = vmatpush.msra.mxu1 %v1116_v55  ;;  %v1164_v54 = vld [vmem:[#allocation5 + $0x1a70] sm:$0xff]  ;;  %v1181_v55 = vld [vmem:[#allocation5 + $0x1af8] sm:$0xff] }
 0x1cf   : > { %2892 = vmatpush.msra.mxu2 %v1131_v56  ;;  %2911 = vmatpush.msra.mxu3 %v1148_v57  ;;  %v1196_v56 = vld [vmem:[#allocation5 + $0x1b70] sm:$0xff]  ;;  %v1213_v57 = vld [vmem:[#allocation5 + $0x1bf8] sm:$0xff] }
 0x1d0   : > { %2853 = vmatpush.msra.mxu0 %v1098_v58  ;;  %2872 = vmatpush.msra.mxu1 %v1115_v59  ;;  %v1163_v58 = vld [vmem:[#allocation5 + $0x1a68] sm:$0xff]  ;;  %v1180_v59 = vld [vmem:[#allocation5 + $0x1af0] sm:$0xff] }
 0x1d1   : > { %2893 = vmatpush.msra.mxu2 %v1130_v60  ;;  %2912 = vmatpush.msra.mxu3 %v1147_v61  ;;  %v1195_v60 = vld [vmem:[#allocation5 + $0x1b68] sm:$0xff]  ;;  %v1212_v61 = vld [vmem:[#allocation5 + $0x1bf0] sm:$0xff] }
 0x1d2   : > { %2854 = vmatpush.msra.mxu0 %v1097_v62  ;;  %2873 = vmatpush.msra.mxu1 %v1114_v63  ;;  %v1162_v62 = vld [vmem:[#allocation5 + $0x1a60] sm:$0xff]  ;;  %v1179_v63 = vld [vmem:[#allocation5 + $0x1ae8] sm:$0xff] }
 0x1d3   : > { %2894 = vmatpush.msra.mxu2 %v1129_v0  ;;  %2913 = vmatpush.msra.mxu3 %v1146_v1  ;;  %v1194_v0 = vld [vmem:[#allocation5 + $0x1b60] sm:$0xff]  ;;  %v1211_v1 = vld [vmem:[#allocation5 + $0x1be8] sm:$0xff] }
 0x1d4   : > { %2855 = vmatpush.msra.mxu0 %v1096_v2  ;;  %2874 = vmatpush.msra.mxu1 %v1113_v3  ;;  %v1161_v2 = vld [vmem:[#allocation5 + $0x1a58] sm:$0xff]  ;;  %v1178_v3 = vld [vmem:[#allocation5 + $0x1ae0] sm:$0xff] }
 0x1d5   : > { %2895 = vmatpush.msra.mxu2 %v1128_v4  ;;  %2914 = vmatpush.msra.mxu3 %v1145_v5  ;;  %v1193_v4 = vld [vmem:[#allocation5 + $0x1b58] sm:$0xff]  ;;  %v1210_v5 = vld [vmem:[#allocation5 + $0x1be0] sm:$0xff] }
 0x1d6   : > { %2856 = vmatpush.msra.mxu0 %v1095_v6  ;;  %2875 = vmatpush.msra.mxu1 %v1112_v7  ;;  %v1160_v6 = vld [vmem:[#allocation5 + $0x1a50] sm:$0xff]  ;;  %v1177_v7 = vld [vmem:[#allocation5 + $0x1ad8] sm:$0xff] }
 0x1d7   : > { %2896 = vmatpush.msra.mxu2 %v1127_v8  ;;  %2915 = vmatpush.msra.mxu3 %v1144_v9  ;;  %v1192_v8 = vld [vmem:[#allocation5 + $0x1b50] sm:$0xff]  ;;  %v1209_v9 = vld [vmem:[#allocation5 + $0x1bd8] sm:$0xff] }
 0x1d8   : > { %2857 = vmatpush.msra.mxu0 %v1094_v10  ;;  %2876 = vmatpush.msra.mxu1 %v1111_v11  ;;  %v1159_v10 = vld [vmem:[#allocation5 + $0x1a48] sm:$0xff]  ;;  %v1176_v11 = vld [vmem:[#allocation5 + $0x1ad0] sm:$0xff] }
 0x1d9   : > { %2897 = vmatpush.msra.mxu2 %v1126_v12  ;;  %2916 = vmatpush.msra.mxu3 %v1143_v13  ;;  %v1191_v12 = vld [vmem:[#allocation5 + $0x1b48] sm:$0xff]  ;;  %v1208_v13 = vld [vmem:[#allocation5 + $0x1bd0] sm:$0xff] }
 0x1da   : > { %2858 = vmatpush.msra.mxu0 %v1093_v14  ;;  %2877 = vmatpush.msra.mxu1 %v1110_v15  ;;  %v1158_v14 = vld [vmem:[#allocation5 + $0x1a40] sm:$0xff]  ;;  %v1175_v15 = vld [vmem:[#allocation5 + $0x1ac8] sm:$0xff] }
 0x1db   : > { %2898 = vmatpush.msra.mxu2 %v1125_v16  ;;  %2917 = vmatpush.msra.mxu3 %v1142_v17  ;;  %v1190_v16 = vld [vmem:[#allocation5 + $0x1b40] sm:$0xff]  ;;  %v1207_v17 = vld [vmem:[#allocation5 + $0x1bc8] sm:$0xff] }
 0x1dc   : > { %2859 = vmatpush.msra.mxu0 %v1092_v18  ;;  %2878 = vmatpush.msra.mxu1 %v1109_v19  ;;  %v1157_v18 = vld [vmem:[#allocation5 + $0x1a38] sm:$0xff]  ;;  %v1174_v19 = vld [vmem:[#allocation5 + $0x1ac0] sm:$0xff] }
 0x1dd   : > { %2899 = vmatpush.msra.mxu2 %v1124_v20  ;;  %2918 = vmatpush.msra.mxu3 %v1141_v21  ;;  %v1189_v20 = vld [vmem:[#allocation5 + $0x1b38] sm:$0xff]  ;;  %v1206_v21 = vld [vmem:[#allocation5 + $0x1bc0] sm:$0xff] }
 0x1de   : > { %2860 = vmatpush.msra.mxu0 %v1091_v22  ;;  %2879 = vmatpush.msra.mxu1 %v1108_v23  ;;  %v1156_v22 = vld [vmem:[#allocation5 + $0x1a30] sm:$0xff]  ;;  %v1173_v23 = vld [vmem:[#allocation5 + $0x1ab8] sm:$0xff] }
 0x1df   : > { %2900 = vmatpush.msra.mxu2 %v1123_v24  ;;  %2919 = vmatpush.msra.mxu3 %v1140_v25  ;;  %v1188_v24 = vld [vmem:[#allocation5 + $0x1b30] sm:$0xff]  ;;  %v1205_v25 = vld [vmem:[#allocation5 + $0x1bb8] sm:$0xff] }
 0x1e0   : > { %2861 = vmatpush.msra.mxu0 %v1090_v26  ;;  %2880 = vmatpush.msra.mxu1 %v1107_v27  ;;  %v1155_v26 = vld [vmem:[#allocation5 + $0x1a28] sm:$0xff]  ;;  %v1172_v27 = vld [vmem:[#allocation5 + $0x1ab0] sm:$0xff] }
 0x1e1   : > { %2901 = vmatpush.msra.mxu2 %v1122_v28  ;;  %2920 = vmatpush.msra.mxu3 %v1139_v29  ;;  %v1187_v28 = vld [vmem:[#allocation5 + $0x1b28] sm:$0xff]  ;;  %v1204_v29 = vld [vmem:[#allocation5 + $0x1bb0] sm:$0xff] }
 0x1e2   : > { %2862 = vmatpush.msra.mxu0 %v1089_v30  ;;  %2881 = vmatpush.msra.mxu1 %v1106_v31  ;;  %v1154_v30 = vld [vmem:[#allocation5 + $0x1a20] sm:$0xff]  ;;  %v1171_v31 = vld [vmem:[#allocation5 + $0x1aa8] sm:$0xff] }
 0x1e3   : > { %2902 = vmatpush.msra.mxu2 %v1121_v32  ;;  %2921 = vmatpush.msra.mxu3 %v1138_v33  ;;  %v1186_v32 = vld [vmem:[#allocation5 + $0x1b20] sm:$0xff]  ;;  %v1203_v33 = vld [vmem:[#allocation5 + $0x1ba8] sm:$0xff] }
 0x1e4   : > { %2863 = vmatpush.msra.mxu0 %v1088_v34  ;;  %2882 = vmatpush.msra.mxu1 %v1105_v35  ;;  %v1153_v34 = vld [vmem:[#allocation5 + $0x1a18] sm:$0xff]  ;;  %v1170_v35 = vld [vmem:[#allocation5 + $0x1aa0] sm:$0xff] }
 0x1e5   : > { %2903 = vmatpush.msra.mxu2 %v1120_v36  ;;  %2922 = vmatpush.msra.mxu3 %v1137_v37  ;;  %v1185_v36 = vld [vmem:[#allocation5 + $0x1b18] sm:$0xff]  ;;  %v1202_v37 = vld [vmem:[#allocation5 + $0x1ba0] sm:$0xff] }
 0x1e6   : > { %2864 = vmatpush.msra.mxu0 %v1087_v38  ;;  %2883 = vmatpush.msra.mxu1 %v1104_v39  ;;  %v1152_v38 = vld [vmem:[#allocation5 + $0x1a10] sm:$0xff]  ;;  %v1169_v39 = vld [vmem:[#allocation5 + $0x1a98] sm:$0xff] }
 0x1e7   : > { %2904 = vmatpush.msra.mxu2 %v1119_v40  ;;  %2923 = vmatpush.msra.mxu3 %v1136_v41  ;;  %v1184_v40 = vld [vmem:[#allocation5 + $0x1b10] sm:$0xff]  ;;  %v1201_v41 = vld [vmem:[#allocation5 + $0x1b98] sm:$0xff] }
 0x1e8   : > { %2865 = vmatpush.msra.mxu0 %v1086_v42  ;;  %2884 = vmatpush.msra.mxu1 %v1103_v43  ;;  %v1151_v42 = vld [vmem:[#allocation5 + $0x1a08] sm:$0xff]  ;;  %v1168_v43 = vld [vmem:[#allocation5 + $0x1a90] sm:$0xff] }
 0x1e9   : > { %2905 = vmatpush.msra.mxu2 %v1118_v44  ;;  %2924 = vmatpush.msra.mxu3 %v1135_v45  ;;  %v1183_v44 = vld [vmem:[#allocation5 + $0x1b08] sm:$0xff]  ;;  %v1200_v45 = vld [vmem:[#allocation5 + $0x1b90] sm:$0xff] }
 0x1ea   : > { %2866 = vmatmul.f32.vlgmr.msra.gmra.mxu0 %v268_v46  ;;  %2906 = vmatmul.f32.vlgmr.msra.gmra.mxu2 %v270_v47  ;;  %v1150_v46 = vld [vmem:[#allocation5 + $0x1a00] sm:$0xff]  ;;  %v1167_v47 = vld [vmem:[#allocation5 + $0x1a88] sm:$0xff] }
 0x1eb   : > { %2930 = vmatpush.msrb.mxu0 %v1165_v48  ;;  %2970 = vmatpush.msrb.mxu2 %v1197_v49  ;;  %v1182_v48 = vld [vmem:[#allocation5 + $0x1b00] sm:$0xff]  ;;  %v1199_v49 = vld [vmem:[#allocation5 + $0x1b88] sm:$0xff] }
 0x1ec   : > { %2885 = vmatpush.msra.mxu1 %v1102_v50  ;;  %2925 = vmatpush.msra.mxu3 %v1134_v51  ;;  %v272_v50 = vld [vmem:[%s4326_s23 + $0x1a0] sm:$0xff]  ;;  %v274_v51 = vld [vmem:[%s4326_s23 + $0x1b0] sm:$0xff] }
 0x1ed   : > { %2886 = vmatmul.f32.vlgmr.msra.gmra.mxu1 %v269_v52  ;;  %2926 = vmatmul.f32.vlgmr.msra.gmra.mxu3 %v271_v53  ;;  %v1229_v52 = vld [vmem:[#allocation5 + $0x1c78] sm:$0xff] }
 0x1ee   : > { %2931 = vmatpush.msrb.mxu0 %v1164_v54  ;;  %2950 = vmatpush.msrb.mxu1 %v1181_v55  ;;  %v1261_v53 = vld [vmem:[#allocation5 + $0x1d78] sm:$0xff]  ;;  %v1166_v54 = vld [vmem:[#allocation5 + $0x1a80] sm:$0xff] }
 0x1ef   : > { %2971 = vmatpush.msrb.mxu2 %v1196_v56  ;;  %2990 = vmatpush.msrb.mxu3 %v1213_v57  ;;  %v1198_v55 = vld [vmem:[#allocation5 + $0x1b80] sm:$0xff]  ;;  %v273_v56 = vld [vmem:[%s4326_s23 + $0x1a8] sm:$0xff]  ;;  %v275_v57 = vld [vmem:[%s4326_s23 + $0x1b8] sm:$0xff] }
 0x1f0   : > { %2932 = vmatpush.msrb.mxu0 %v1163_v58  ;;  %2951 = vmatpush.msrb.mxu1 %v1180_v59  ;;  %v1228_v58 = vld [vmem:[#allocation5 + $0x1c70] sm:$0xff]  ;;  %v1245_v59 = vld [vmem:[#allocation5 + $0x1cf8] sm:$0xff] }
 0x1f1   : > { %2972 = vmatpush.msrb.mxu2 %v1195_v60  ;;  %2991 = vmatpush.msrb.mxu3 %v1212_v61  ;;  %v1260_v60 = vld [vmem:[#allocation5 + $0x1d70] sm:$0xff]  ;;  %v1277_v61 = vld [vmem:[#allocation5 + $0x1df8] sm:$0xff] }
 0x1f2   : > { %2933 = vmatpush.msrb.mxu0 %v1162_v62  ;;  %2952 = vmatpush.msrb.mxu1 %v1179_v63  ;;  %v1227_v62 = vld [vmem:[#allocation5 + $0x1c68] sm:$0xff]  ;;  %v1244_v63 = vld [vmem:[#allocation5 + $0x1cf0] sm:$0xff] }
 0x1f3   : > { %2973 = vmatpush.msrb.mxu2 %v1194_v0  ;;  %2992 = vmatpush.msrb.mxu3 %v1211_v1  ;;  %v1259_v0 = vld [vmem:[#allocation5 + $0x1d68] sm:$0xff]  ;;  %v1276_v1 = vld [vmem:[#allocation5 + $0x1df0] sm:$0xff] }
 0x1f4   : > { %2934 = vmatpush.msrb.mxu0 %v1161_v2  ;;  %2953 = vmatpush.msrb.mxu1 %v1178_v3  ;;  %v1226_v2 = vld [vmem:[#allocation5 + $0x1c60] sm:$0xff]  ;;  %v1243_v3 = vld [vmem:[#allocation5 + $0x1ce8] sm:$0xff] }
 0x1f5   : > { %2974 = vmatpush.msrb.mxu2 %v1193_v4  ;;  %2993 = vmatpush.msrb.mxu3 %v1210_v5  ;;  %v1258_v4 = vld [vmem:[#allocation5 + $0x1d60] sm:$0xff]  ;;  %v1275_v5 = vld [vmem:[#allocation5 + $0x1de8] sm:$0xff] }
 0x1f6   : > { %2935 = vmatpush.msrb.mxu0 %v1160_v6  ;;  %2954 = vmatpush.msrb.mxu1 %v1177_v7  ;;  %v1225_v6 = vld [vmem:[#allocation5 + $0x1c58] sm:$0xff]  ;;  %v1242_v7 = vld [vmem:[#allocation5 + $0x1ce0] sm:$0xff] }
 0x1f7   : > { %2975 = vmatpush.msrb.mxu2 %v1192_v8  ;;  %2994 = vmatpush.msrb.mxu3 %v1209_v9  ;;  %v1257_v8 = vld [vmem:[#allocation5 + $0x1d58] sm:$0xff]  ;;  %v1274_v9 = vld [vmem:[#allocation5 + $0x1de0] sm:$0xff] }
 0x1f8   : > { %2936 = vmatpush.msrb.mxu0 %v1159_v10  ;;  %2955 = vmatpush.msrb.mxu1 %v1176_v11  ;;  %v1224_v10 = vld [vmem:[#allocation5 + $0x1c50] sm:$0xff]  ;;  %v1241_v11 = vld [vmem:[#allocation5 + $0x1cd8] sm:$0xff] }
 0x1f9   : > { %2976 = vmatpush.msrb.mxu2 %v1191_v12  ;;  %2995 = vmatpush.msrb.mxu3 %v1208_v13  ;;  %v1256_v12 = vld [vmem:[#allocation5 + $0x1d50] sm:$0xff]  ;;  %v1273_v13 = vld [vmem:[#allocation5 + $0x1dd8] sm:$0xff] }
 0x1fa   : > { %2937 = vmatpush.msrb.mxu0 %v1158_v14  ;;  %2956 = vmatpush.msrb.mxu1 %v1175_v15  ;;  %v1223_v14 = vld [vmem:[#allocation5 + $0x1c48] sm:$0xff]  ;;  %v1240_v15 = vld [vmem:[#allocation5 + $0x1cd0] sm:$0xff] }
 0x1fb   : > { %2977 = vmatpush.msrb.mxu2 %v1190_v16  ;;  %2996 = vmatpush.msrb.mxu3 %v1207_v17  ;;  %v1255_v16 = vld [vmem:[#allocation5 + $0x1d48] sm:$0xff]  ;;  %v1272_v17 = vld [vmem:[#allocation5 + $0x1dd0] sm:$0xff] }
 0x1fc   : > { %2938 = vmatpush.msrb.mxu0 %v1157_v18  ;;  %2957 = vmatpush.msrb.mxu1 %v1174_v19  ;;  %v1222_v18 = vld [vmem:[#allocation5 + $0x1c40] sm:$0xff]  ;;  %v1239_v19 = vld [vmem:[#allocation5 + $0x1cc8] sm:$0xff] }
 0x1fd   : > { %2978 = vmatpush.msrb.mxu2 %v1189_v20  ;;  %2997 = vmatpush.msrb.mxu3 %v1206_v21  ;;  %v1254_v20 = vld [vmem:[#allocation5 + $0x1d40] sm:$0xff]  ;;  %v1271_v21 = vld [vmem:[#allocation5 + $0x1dc8] sm:$0xff] }
 0x1fe   : > { %2939 = vmatpush.msrb.mxu0 %v1156_v22  ;;  %2958 = vmatpush.msrb.mxu1 %v1173_v23  ;;  %v1221_v22 = vld [vmem:[#allocation5 + $0x1c38] sm:$0xff]  ;;  %v1238_v23 = vld [vmem:[#allocation5 + $0x1cc0] sm:$0xff] }
 0x1ff   : > { %2979 = vmatpush.msrb.mxu2 %v1188_v24  ;;  %2998 = vmatpush.msrb.mxu3 %v1205_v25  ;;  %v1253_v24 = vld [vmem:[#allocation5 + $0x1d38] sm:$0xff]  ;;  %v1270_v25 = vld [vmem:[#allocation5 + $0x1dc0] sm:$0xff] }
 0x200   : > { %2940 = vmatpush.msrb.mxu0 %v1155_v26  ;;  %2959 = vmatpush.msrb.mxu1 %v1172_v27  ;;  %v1220_v26 = vld [vmem:[#allocation5 + $0x1c30] sm:$0xff]  ;;  %v1237_v27 = vld [vmem:[#allocation5 + $0x1cb8] sm:$0xff] }
 0x201   : > { %2980 = vmatpush.msrb.mxu2 %v1187_v28  ;;  %2999 = vmatpush.msrb.mxu3 %v1204_v29  ;;  %v1252_v28 = vld [vmem:[#allocation5 + $0x1d30] sm:$0xff]  ;;  %v1269_v29 = vld [vmem:[#allocation5 + $0x1db8] sm:$0xff] }
 0x202   : > { %2941 = vmatpush.msrb.mxu0 %v1154_v30  ;;  %2960 = vmatpush.msrb.mxu1 %v1171_v31  ;;  %v1219_v30 = vld [vmem:[#allocation5 + $0x1c28] sm:$0xff]  ;;  %v1236_v31 = vld [vmem:[#allocation5 + $0x1cb0] sm:$0xff] }
 0x203   : > { %2981 = vmatpush.msrb.mxu2 %v1186_v32  ;;  %3000 = vmatpush.msrb.mxu3 %v1203_v33  ;;  %v1251_v32 = vld [vmem:[#allocation5 + $0x1d28] sm:$0xff]  ;;  %v1268_v33 = vld [vmem:[#allocation5 + $0x1db0] sm:$0xff] }
 0x204   : > { %2942 = vmatpush.msrb.mxu0 %v1153_v34  ;;  %2961 = vmatpush.msrb.mxu1 %v1170_v35  ;;  %v1218_v34 = vld [vmem:[#allocation5 + $0x1c20] sm:$0xff]  ;;  %v1235_v35 = vld [vmem:[#allocation5 + $0x1ca8] sm:$0xff] }
 0x205   : > { %2982 = vmatpush.msrb.mxu2 %v1185_v36  ;;  %3001 = vmatpush.msrb.mxu3 %v1202_v37  ;;  %v1250_v36 = vld [vmem:[#allocation5 + $0x1d20] sm:$0xff]  ;;  %v1267_v37 = vld [vmem:[#allocation5 + $0x1da8] sm:$0xff] }
 0x206   : > { %2943 = vmatpush.msrb.mxu0 %v1152_v38  ;;  %2962 = vmatpush.msrb.mxu1 %v1169_v39  ;;  %v1217_v38 = vld [vmem:[#allocation5 + $0x1c18] sm:$0xff]  ;;  %v1234_v39 = vld [vmem:[#allocation5 + $0x1ca0] sm:$0xff] }
 0x207   : > { %2983 = vmatpush.msrb.mxu2 %v1184_v40  ;;  %3002 = vmatpush.msrb.mxu3 %v1201_v41  ;;  %v1249_v40 = vld [vmem:[#allocation5 + $0x1d18] sm:$0xff]  ;;  %v1266_v41 = vld [vmem:[#allocation5 + $0x1da0] sm:$0xff] }
 0x208   : > { %2944 = vmatpush.msrb.mxu0 %v1151_v42  ;;  %2963 = vmatpush.msrb.mxu1 %v1168_v43  ;;  %v1216_v42 = vld [vmem:[#allocation5 + $0x1c10] sm:$0xff]  ;;  %v1233_v43 = vld [vmem:[#allocation5 + $0x1c98] sm:$0xff] }
 0x209   : > { %2984 = vmatpush.msrb.mxu2 %v1183_v44  ;;  %3003 = vmatpush.msrb.mxu3 %v1200_v45  ;;  %v1248_v44 = vld [vmem:[#allocation5 + $0x1d10] sm:$0xff]  ;;  %v1265_v45 = vld [vmem:[#allocation5 + $0x1d98] sm:$0xff] }
 0x20a   : > { %2945 = vmatpush.msrb.mxu0 %v1150_v46  ;;  %2964 = vmatpush.msrb.mxu1 %v1167_v47  ;;  %v1215_v46 = vld [vmem:[#allocation5 + $0x1c08] sm:$0xff]  ;;  %v1232_v47 = vld [vmem:[#allocation5 + $0x1c90] sm:$0xff] }
 0x20b   : > { %2985 = vmatpush.msrb.mxu2 %v1182_v48  ;;  %3004 = vmatpush.msrb.mxu3 %v1199_v49  ;;  %v1247_v48 = vld [vmem:[#allocation5 + $0x1d08] sm:$0xff]  ;;  %v1264_v49 = vld [vmem:[#allocation5 + $0x1d90] sm:$0xff] }
 0x20c   : > { %2946 = vmatmul.f32.vlgmr.msrb.gmra.mxu0 %v272_v50  ;;  %2986 = vmatmul.f32.vlgmr.msrb.gmra.mxu2 %v274_v51  ;;  %v1214_v50 = vld [vmem:[#allocation5 + $0x1c00] sm:$0xff]  ;;  %v1231_v51 = vld [vmem:[#allocation5 + $0x1c88] sm:$0xff] }
 0x20d   : > { %3010 = vmatpush.msra.mxu0 %v1229_v52  ;;  %3050 = vmatpush.msra.mxu2 %v1261_v53  ;;  %v1246_v52 = vld [vmem:[#allocation5 + $0x1d00] sm:$0xff]  ;;  %v1263_v53 = vld [vmem:[#allocation5 + $0x1d88] sm:$0xff] }
 0x20e   : > { %2965 = vmatpush.msrb.mxu1 %v1166_v54  ;;  %3005 = vmatpush.msrb.mxu3 %v1198_v55  ;;  %v276_v54 = vld [vmem:[%s4326_s23 + $0x1c0] sm:$0xff]  ;;  %v278_v55 = vld [vmem:[%s4326_s23 + $0x1d0] sm:$0xff] }
 0x20f   : > { %2966 = vmatmul.f32.vlgmr.msrb.gmra.mxu1 %v273_v56  ;;  %3006 = vmatmul.f32.vlgmr.msrb.gmra.mxu3 %v275_v57  ;;  %v1293_v56 = vld [vmem:[#allocation5 + $0x1e78] sm:$0xff] }
 0x210   : > { %3011 = vmatpush.msra.mxu0 %v1228_v58  ;;  %3030 = vmatpush.msra.mxu1 %v1245_v59  ;;  %v1325_v57 = vld [vmem:[#allocation5 + $0x1f78] sm:$0xff]  ;;  %v1230_v58 = vld [vmem:[#allocation5 + $0x1c80] sm:$0xff] }
 0x211   : > { %3051 = vmatpush.msra.mxu2 %v1260_v60  ;;  %3070 = vmatpush.msra.mxu3 %v1277_v61  ;;  %v1262_v59 = vld [vmem:[#allocation5 + $0x1d80] sm:$0xff]  ;;  %v277_v60 = vld [vmem:[%s4326_s23 + $0x1c8] sm:$0xff]  ;;  %v279_v61 = vld [vmem:[%s4326_s23 + $0x1d8] sm:$0xff] }
 0x212   : > { %3012 = vmatpush.msra.mxu0 %v1227_v62  ;;  %3031 = vmatpush.msra.mxu1 %v1244_v63  ;;  %v1292_v62 = vld [vmem:[#allocation5 + $0x1e70] sm:$0xff]  ;;  %v1309_v63 = vld [vmem:[#allocation5 + $0x1ef8] sm:$0xff] }
 0x213   : > { %3052 = vmatpush.msra.mxu2 %v1259_v0  ;;  %3071 = vmatpush.msra.mxu3 %v1276_v1  ;;  %v1324_v0 = vld [vmem:[#allocation5 + $0x1f70] sm:$0xff]  ;;  %v1341_v1 = vld [vmem:[#allocation5 + $0x1ff8] sm:$0xff] }
 0x214   : > { %3013 = vmatpush.msra.mxu0 %v1226_v2  ;;  %3032 = vmatpush.msra.mxu1 %v1243_v3  ;;  %v1291_v2 = vld [vmem:[#allocation5 + $0x1e68] sm:$0xff]  ;;  %v1308_v3 = vld [vmem:[#allocation5 + $0x1ef0] sm:$0xff] }
 0x215   : > { %3053 = vmatpush.msra.mxu2 %v1258_v4  ;;  %3072 = vmatpush.msra.mxu3 %v1275_v5  ;;  %v1323_v4 = vld [vmem:[#allocation5 + $0x1f68] sm:$0xff]  ;;  %v1340_v5 = vld [vmem:[#allocation5 + $0x1ff0] sm:$0xff] }
 0x216   : > { %3014 = vmatpush.msra.mxu0 %v1225_v6  ;;  %3033 = vmatpush.msra.mxu1 %v1242_v7  ;;  %v1290_v6 = vld [vmem:[#allocation5 + $0x1e60] sm:$0xff]  ;;  %v1307_v7 = vld [vmem:[#allocation5 + $0x1ee8] sm:$0xff] }
 0x217   : > { %3054 = vmatpush.msra.mxu2 %v1257_v8  ;;  %3073 = vmatpush.msra.mxu3 %v1274_v9  ;;  %v1322_v8 = vld [vmem:[#allocation5 + $0x1f60] sm:$0xff]  ;;  %v1339_v9 = vld [vmem:[#allocation5 + $0x1fe8] sm:$0xff] }
 0x218   : > { %3015 = vmatpush.msra.mxu0 %v1224_v10  ;;  %3034 = vmatpush.msra.mxu1 %v1241_v11  ;;  %v1289_v10 = vld [vmem:[#allocation5 + $0x1e58] sm:$0xff]  ;;  %v1306_v11 = vld [vmem:[#allocation5 + $0x1ee0] sm:$0xff] }
 0x219   : > { %3055 = vmatpush.msra.mxu2 %v1256_v12  ;;  %3074 = vmatpush.msra.mxu3 %v1273_v13  ;;  %v1321_v12 = vld [vmem:[#allocation5 + $0x1f58] sm:$0xff]  ;;  %v1338_v13 = vld [vmem:[#allocation5 + $0x1fe0] sm:$0xff] }
 0x21a   : > { %3016 = vmatpush.msra.mxu0 %v1223_v14  ;;  %3035 = vmatpush.msra.mxu1 %v1240_v15  ;;  %v1288_v14 = vld [vmem:[#allocation5 + $0x1e50] sm:$0xff]  ;;  %v1305_v15 = vld [vmem:[#allocation5 + $0x1ed8] sm:$0xff] }
 0x21b   : > { %3056 = vmatpush.msra.mxu2 %v1255_v16  ;;  %3075 = vmatpush.msra.mxu3 %v1272_v17  ;;  %v1320_v16 = vld [vmem:[#allocation5 + $0x1f50] sm:$0xff]  ;;  %v1337_v17 = vld [vmem:[#allocation5 + $0x1fd8] sm:$0xff] }
 0x21c   : > { %3017 = vmatpush.msra.mxu0 %v1222_v18  ;;  %3036 = vmatpush.msra.mxu1 %v1239_v19  ;;  %v1287_v18 = vld [vmem:[#allocation5 + $0x1e48] sm:$0xff]  ;;  %v1304_v19 = vld [vmem:[#allocation5 + $0x1ed0] sm:$0xff] }
 0x21d   : > { %3057 = vmatpush.msra.mxu2 %v1254_v20  ;;  %3076 = vmatpush.msra.mxu3 %v1271_v21  ;;  %v1319_v20 = vld [vmem:[#allocation5 + $0x1f48] sm:$0xff]  ;;  %v1336_v21 = vld [vmem:[#allocation5 + $0x1fd0] sm:$0xff] }
 0x21e   : > { %3018 = vmatpush.msra.mxu0 %v1221_v22  ;;  %3037 = vmatpush.msra.mxu1 %v1238_v23  ;;  %v1286_v22 = vld [vmem:[#allocation5 + $0x1e40] sm:$0xff]  ;;  %v1303_v23 = vld [vmem:[#allocation5 + $0x1ec8] sm:$0xff] }
 0x21f   : > { %3058 = vmatpush.msra.mxu2 %v1253_v24  ;;  %3077 = vmatpush.msra.mxu3 %v1270_v25  ;;  %v1318_v24 = vld [vmem:[#allocation5 + $0x1f40] sm:$0xff]  ;;  %v1335_v25 = vld [vmem:[#allocation5 + $0x1fc8] sm:$0xff] }
 0x220   : > { %3019 = vmatpush.msra.mxu0 %v1220_v26  ;;  %3038 = vmatpush.msra.mxu1 %v1237_v27  ;;  %v1285_v26 = vld [vmem:[#allocation5 + $0x1e38] sm:$0xff]  ;;  %v1302_v27 = vld [vmem:[#allocation5 + $0x1ec0] sm:$0xff] }
 0x221   : > { %3059 = vmatpush.msra.mxu2 %v1252_v28  ;;  %3078 = vmatpush.msra.mxu3 %v1269_v29  ;;  %v1317_v28 = vld [vmem:[#allocation5 + $0x1f38] sm:$0xff]  ;;  %v1334_v29 = vld [vmem:[#allocation5 + $0x1fc0] sm:$0xff] }
 0x222   : > { %3020 = vmatpush.msra.mxu0 %v1219_v30  ;;  %3039 = vmatpush.msra.mxu1 %v1236_v31  ;;  %v1284_v30 = vld [vmem:[#allocation5 + $0x1e30] sm:$0xff]  ;;  %v1301_v31 = vld [vmem:[#allocation5 + $0x1eb8] sm:$0xff] }
 0x223   : > { %3060 = vmatpush.msra.mxu2 %v1251_v32  ;;  %3079 = vmatpush.msra.mxu3 %v1268_v33  ;;  %v1316_v32 = vld [vmem:[#allocation5 + $0x1f30] sm:$0xff]  ;;  %v1333_v33 = vld [vmem:[#allocation5 + $0x1fb8] sm:$0xff] }
 0x224   : > { %3021 = vmatpush.msra.mxu0 %v1218_v34  ;;  %3040 = vmatpush.msra.mxu1 %v1235_v35  ;;  %v1283_v34 = vld [vmem:[#allocation5 + $0x1e28] sm:$0xff]  ;;  %v1300_v35 = vld [vmem:[#allocation5 + $0x1eb0] sm:$0xff] }
 0x225   : > { %3061 = vmatpush.msra.mxu2 %v1250_v36  ;;  %3080 = vmatpush.msra.mxu3 %v1267_v37  ;;  %v1315_v36 = vld [vmem:[#allocation5 + $0x1f28] sm:$0xff]  ;;  %v1332_v37 = vld [vmem:[#allocation5 + $0x1fb0] sm:$0xff] }
 0x226   : > { %3022 = vmatpush.msra.mxu0 %v1217_v38  ;;  %3041 = vmatpush.msra.mxu1 %v1234_v39  ;;  %v1282_v38 = vld [vmem:[#allocation5 + $0x1e20] sm:$0xff]  ;;  %v1299_v39 = vld [vmem:[#allocation5 + $0x1ea8] sm:$0xff] }
 0x227   : > { %3062 = vmatpush.msra.mxu2 %v1249_v40  ;;  %3081 = vmatpush.msra.mxu3 %v1266_v41  ;;  %v1314_v40 = vld [vmem:[#allocation5 + $0x1f20] sm:$0xff]  ;;  %v1331_v41 = vld [vmem:[#allocation5 + $0x1fa8] sm:$0xff] }
 0x228   : > { %3023 = vmatpush.msra.mxu0 %v1216_v42  ;;  %3042 = vmatpush.msra.mxu1 %v1233_v43  ;;  %v1281_v42 = vld [vmem:[#allocation5 + $0x1e18] sm:$0xff]  ;;  %v1298_v43 = vld [vmem:[#allocation5 + $0x1ea0] sm:$0xff] }
 0x229   : > { %3063 = vmatpush.msra.mxu2 %v1248_v44  ;;  %3082 = vmatpush.msra.mxu3 %v1265_v45  ;;  %v1313_v44 = vld [vmem:[#allocation5 + $0x1f18] sm:$0xff]  ;;  %v1330_v45 = vld [vmem:[#allocation5 + $0x1fa0] sm:$0xff] }
 0x22a   : > { %3024 = vmatpush.msra.mxu0 %v1215_v46  ;;  %3043 = vmatpush.msra.mxu1 %v1232_v47  ;;  %v1280_v46 = vld [vmem:[#allocation5 + $0x1e10] sm:$0xff]  ;;  %v1297_v47 = vld [vmem:[#allocation5 + $0x1e98] sm:$0xff] }
 0x22b   : > { %3064 = vmatpush.msra.mxu2 %v1247_v48  ;;  %3083 = vmatpush.msra.mxu3 %v1264_v49  ;;  %v1312_v48 = vld [vmem:[#allocation5 + $0x1f10] sm:$0xff]  ;;  %v1329_v49 = vld [vmem:[#allocation5 + $0x1f98] sm:$0xff] }
 0x22c   : > { %3025 = vmatpush.msra.mxu0 %v1214_v50  ;;  %3044 = vmatpush.msra.mxu1 %v1231_v51  ;;  %v1279_v50 = vld [vmem:[#allocation5 + $0x1e08] sm:$0xff]  ;;  %v1296_v51 = vld [vmem:[#allocation5 + $0x1e90] sm:$0xff] }
 0x22d   : > { %3065 = vmatpush.msra.mxu2 %v1246_v52  ;;  %3084 = vmatpush.msra.mxu3 %v1263_v53  ;;  %v1311_v52 = vld [vmem:[#allocation5 + $0x1f08] sm:$0xff]  ;;  %v1328_v53 = vld [vmem:[#allocation5 + $0x1f90] sm:$0xff] }
 0x22e   : > { %3026 = vmatmul.f32.vlgmr.msra.gmra.mxu0 %v276_v54  ;;  %3066 = vmatmul.f32.vlgmr.msra.gmra.mxu2 %v278_v55  ;;  %v1278_v54 = vld [vmem:[#allocation5 + $0x1e00] sm:$0xff]  ;;  %v1295_v55 = vld [vmem:[#allocation5 + $0x1e88] sm:$0xff] }
 0x22f   : > { %3090 = vmatpush.msrb.mxu0 %v1293_v56  ;;  %3130 = vmatpush.msrb.mxu2 %v1325_v57  ;;  %v1310_v56 = vld [vmem:[#allocation5 + $0x1f00] sm:$0xff]  ;;  %v1327_v57 = vld [vmem:[#allocation5 + $0x1f88] sm:$0xff] }
 0x230   : > { %3045 = vmatpush.msra.mxu1 %v1230_v58  ;;  %3085 = vmatpush.msra.mxu3 %v1262_v59  ;;  %v280_v58 = vld [vmem:[%s4326_s23 + $0x1e0] sm:$0xff]  ;;  %v282_v59 = vld [vmem:[%s4326_s23 + $0x1f0] sm:$0xff] }
 0x231   : > { %3046 = vmatmul.f32.vlgmr.msra.gmra.mxu1 %v277_v60  ;;  %3086 = vmatmul.f32.vlgmr.msra.gmra.mxu3 %v279_v61  ;;  %v1357_v60 = vld [vmem:[#allocation5 + $0x2078] sm:$0xff] }
 0x232   : > { %3091 = vmatpush.msrb.mxu0 %v1292_v62  ;;  %3110 = vmatpush.msrb.mxu1 %v1309_v63  ;;  %v1389_v61 = vld [vmem:[#allocation5 + $0x2178] sm:$0xff]  ;;  %v1294_v62 = vld [vmem:[#allocation5 + $0x1e80] sm:$0xff] }
 0x233   : > { %3131 = vmatpush.msrb.mxu2 %v1324_v0  ;;  %3150 = vmatpush.msrb.mxu3 %v1341_v1  ;;  %v1326_v63 = vld [vmem:[#allocation5 + $0x1f80] sm:$0xff]  ;;  %v281_v0 = vld [vmem:[%s4326_s23 + $0x1e8] sm:$0xff]  ;;  %v283_v1 = vld [vmem:[%s4326_s23 + $0x1f8] sm:$0xff] }
 0x234   : > { %3092 = vmatpush.msrb.mxu0 %v1291_v2  ;;  %3111 = vmatpush.msrb.mxu1 %v1308_v3  ;;  %v1356_v2 = vld [vmem:[#allocation5 + $0x2070] sm:$0xff]  ;;  %v1373_v3 = vld [vmem:[#allocation5 + $0x20f8] sm:$0xff] }
 0x235   : > { %3132 = vmatpush.msrb.mxu2 %v1323_v4  ;;  %3151 = vmatpush.msrb.mxu3 %v1340_v5  ;;  %v1388_v4 = vld [vmem:[#allocation5 + $0x2170] sm:$0xff]  ;;  %v1405_v5 = vld [vmem:[#allocation5 + $0x21f8] sm:$0xff] }
 0x236   : > { %3093 = vmatpush.msrb.mxu0 %v1290_v6  ;;  %3112 = vmatpush.msrb.mxu1 %v1307_v7  ;;  %v1355_v6 = vld [vmem:[#allocation5 + $0x2068] sm:$0xff]  ;;  %v1372_v7 = vld [vmem:[#allocation5 + $0x20f0] sm:$0xff] }
 0x237   : > { %3133 = vmatpush.msrb.mxu2 %v1322_v8  ;;  %3152 = vmatpush.msrb.mxu3 %v1339_v9  ;;  %v1387_v8 = vld [vmem:[#allocation5 + $0x2168] sm:$0xff]  ;;  %v1404_v9 = vld [vmem:[#allocation5 + $0x21f0] sm:$0xff] }
 0x238   : > { %3094 = vmatpush.msrb.mxu0 %v1289_v10  ;;  %3113 = vmatpush.msrb.mxu1 %v1306_v11  ;;  %v1354_v10 = vld [vmem:[#allocation5 + $0x2060] sm:$0xff]  ;;  %v1371_v11 = vld [vmem:[#allocation5 + $0x20e8] sm:$0xff] }
 0x239   : > { %3134 = vmatpush.msrb.mxu2 %v1321_v12  ;;  %3153 = vmatpush.msrb.mxu3 %v1338_v13  ;;  %v1386_v12 = vld [vmem:[#allocation5 + $0x2160] sm:$0xff]  ;;  %v1403_v13 = vld [vmem:[#allocation5 + $0x21e8] sm:$0xff] }
 0x23a   : > { %3095 = vmatpush.msrb.mxu0 %v1288_v14  ;;  %3114 = vmatpush.msrb.mxu1 %v1305_v15  ;;  %v1353_v14 = vld [vmem:[#allocation5 + $0x2058] sm:$0xff]  ;;  %v1370_v15 = vld [vmem:[#allocation5 + $0x20e0] sm:$0xff] }
 0x23b   : > { %3135 = vmatpush.msrb.mxu2 %v1320_v16  ;;  %3154 = vmatpush.msrb.mxu3 %v1337_v17  ;;  %v1385_v16 = vld [vmem:[#allocation5 + $0x2158] sm:$0xff]  ;;  %v1402_v17 = vld [vmem:[#allocation5 + $0x21e0] sm:$0xff] }
 0x23c   : > { %3096 = vmatpush.msrb.mxu0 %v1287_v18  ;;  %3115 = vmatpush.msrb.mxu1 %v1304_v19  ;;  %v1352_v18 = vld [vmem:[#allocation5 + $0x2050] sm:$0xff]  ;;  %v1369_v19 = vld [vmem:[#allocation5 + $0x20d8] sm:$0xff] }
 0x23d   : > { %3136 = vmatpush.msrb.mxu2 %v1319_v20  ;;  %3155 = vmatpush.msrb.mxu3 %v1336_v21  ;;  %v1384_v20 = vld [vmem:[#allocation5 + $0x2150] sm:$0xff]  ;;  %v1401_v21 = vld [vmem:[#allocation5 + $0x21d8] sm:$0xff] }
 0x23e   : > { %3097 = vmatpush.msrb.mxu0 %v1286_v22  ;;  %3116 = vmatpush.msrb.mxu1 %v1303_v23  ;;  %v1351_v22 = vld [vmem:[#allocation5 + $0x2048] sm:$0xff]  ;;  %v1368_v23 = vld [vmem:[#allocation5 + $0x20d0] sm:$0xff] }
 0x23f   : > { %3137 = vmatpush.msrb.mxu2 %v1318_v24  ;;  %3156 = vmatpush.msrb.mxu3 %v1335_v25  ;;  %v1383_v24 = vld [vmem:[#allocation5 + $0x2148] sm:$0xff]  ;;  %v1400_v25 = vld [vmem:[#allocation5 + $0x21d0] sm:$0xff] }
 0x240   : > { %3098 = vmatpush.msrb.mxu0 %v1285_v26  ;;  %3117 = vmatpush.msrb.mxu1 %v1302_v27  ;;  %v1350_v26 = vld [vmem:[#allocation5 + $0x2040] sm:$0xff]  ;;  %v1367_v27 = vld [vmem:[#allocation5 + $0x20c8] sm:$0xff] }
 0x241   : > { %3138 = vmatpush.msrb.mxu2 %v1317_v28  ;;  %3157 = vmatpush.msrb.mxu3 %v1334_v29  ;;  %v1382_v28 = vld [vmem:[#allocation5 + $0x2140] sm:$0xff]  ;;  %v1399_v29 = vld [vmem:[#allocation5 + $0x21c8] sm:$0xff] }
 0x242   : > { %3099 = vmatpush.msrb.mxu0 %v1284_v30  ;;  %3118 = vmatpush.msrb.mxu1 %v1301_v31  ;;  %v1349_v30 = vld [vmem:[#allocation5 + $0x2038] sm:$0xff]  ;;  %v1366_v31 = vld [vmem:[#allocation5 + $0x20c0] sm:$0xff] }
 0x243   : > { %3139 = vmatpush.msrb.mxu2 %v1316_v32  ;;  %3158 = vmatpush.msrb.mxu3 %v1333_v33  ;;  %v1381_v32 = vld [vmem:[#allocation5 + $0x2138] sm:$0xff]  ;;  %v1398_v33 = vld [vmem:[#allocation5 + $0x21c0] sm:$0xff] }
 0x244   : > { %3100 = vmatpush.msrb.mxu0 %v1283_v34  ;;  %3119 = vmatpush.msrb.mxu1 %v1300_v35  ;;  %v1348_v34 = vld [vmem:[#allocation5 + $0x2030] sm:$0xff]  ;;  %v1365_v35 = vld [vmem:[#allocation5 + $0x20b8] sm:$0xff] }
 0x245   : > { %3140 = vmatpush.msrb.mxu2 %v1315_v36  ;;  %3159 = vmatpush.msrb.mxu3 %v1332_v37  ;;  %v1380_v36 = vld [vmem:[#allocation5 + $0x2130] sm:$0xff]  ;;  %v1397_v37 = vld [vmem:[#allocation5 + $0x21b8] sm:$0xff] }
 0x246   : > { %3101 = vmatpush.msrb.mxu0 %v1282_v38  ;;  %3120 = vmatpush.msrb.mxu1 %v1299_v39  ;;  %v1347_v38 = vld [vmem:[#allocation5 + $0x2028] sm:$0xff]  ;;  %v1364_v39 = vld [vmem:[#allocation5 + $0x20b0] sm:$0xff] }
 0x247   : > { %3141 = vmatpush.msrb.mxu2 %v1314_v40  ;;  %3160 = vmatpush.msrb.mxu3 %v1331_v41  ;;  %v1379_v40 = vld [vmem:[#allocation5 + $0x2128] sm:$0xff]  ;;  %v1396_v41 = vld [vmem:[#allocation5 + $0x21b0] sm:$0xff] }
 0x248   : > { %3102 = vmatpush.msrb.mxu0 %v1281_v42  ;;  %3121 = vmatpush.msrb.mxu1 %v1298_v43  ;;  %v1346_v42 = vld [vmem:[#allocation5 + $0x2020] sm:$0xff]  ;;  %v1363_v43 = vld [vmem:[#allocation5 + $0x20a8] sm:$0xff] }
 0x249   : > { %3142 = vmatpush.msrb.mxu2 %v1313_v44  ;;  %3161 = vmatpush.msrb.mxu3 %v1330_v45  ;;  %v1378_v44 = vld [vmem:[#allocation5 + $0x2120] sm:$0xff]  ;;  %v1395_v45 = vld [vmem:[#allocation5 + $0x21a8] sm:$0xff] }
 0x24a   : > { %3103 = vmatpush.msrb.mxu0 %v1280_v46  ;;  %3122 = vmatpush.msrb.mxu1 %v1297_v47  ;;  %v1345_v46 = vld [vmem:[#allocation5 + $0x2018] sm:$0xff]  ;;  %v1362_v47 = vld [vmem:[#allocation5 + $0x20a0] sm:$0xff] }
 0x24b   : > { %3143 = vmatpush.msrb.mxu2 %v1312_v48  ;;  %3162 = vmatpush.msrb.mxu3 %v1329_v49  ;;  %v1377_v48 = vld [vmem:[#allocation5 + $0x2118] sm:$0xff]  ;;  %v1394_v49 = vld [vmem:[#allocation5 + $0x21a0] sm:$0xff] }
 0x24c   : > { %3104 = vmatpush.msrb.mxu0 %v1279_v50  ;;  %3123 = vmatpush.msrb.mxu1 %v1296_v51  ;;  %v1344_v50 = vld [vmem:[#allocation5 + $0x2010] sm:$0xff]  ;;  %v1361_v51 = vld [vmem:[#allocation5 + $0x2098] sm:$0xff] }
 0x24d   : > { %3144 = vmatpush.msrb.mxu2 %v1311_v52  ;;  %3163 = vmatpush.msrb.mxu3 %v1328_v53  ;;  %v1376_v52 = vld [vmem:[#allocation5 + $0x2110] sm:$0xff]  ;;  %v1393_v53 = vld [vmem:[#allocation5 + $0x2198] sm:$0xff] }
 0x24e   : > { %3105 = vmatpush.msrb.mxu0 %v1278_v54  ;;  %3124 = vmatpush.msrb.mxu1 %v1295_v55  ;;  %v1343_v54 = vld [vmem:[#allocation5 + $0x2008] sm:$0xff]  ;;  %v1360_v55 = vld [vmem:[#allocation5 + $0x2090] sm:$0xff] }
 0x24f   : > { %3145 = vmatpush.msrb.mxu2 %v1310_v56  ;;  %3164 = vmatpush.msrb.mxu3 %v1327_v57  ;;  %v1375_v56 = vld [vmem:[#allocation5 + $0x2108] sm:$0xff]  ;;  %v1392_v57 = vld [vmem:[#allocation5 + $0x2190] sm:$0xff] }
 0x250   : > { %3106 = vmatmul.f32.vlgmr.msrb.gmra.mxu0 %v280_v58  ;;  %3146 = vmatmul.f32.vlgmr.msrb.gmra.mxu2 %v282_v59  ;;  %v1342_v58 = vld [vmem:[#allocation5 + $0x2000] sm:$0xff]  ;;  %v1359_v59 = vld [vmem:[#allocation5 + $0x2088] sm:$0xff] }
 0x251   : > { %3170 = vmatpush.msra.mxu0 %v1357_v60  ;;  %3210 = vmatpush.msra.mxu2 %v1389_v61  ;;  %v1374_v60 = vld [vmem:[#allocation5 + $0x2100] sm:$0xff]  ;;  %v1391_v61 = vld [vmem:[#allocation5 + $0x2188] sm:$0xff] }
 0x252   : > { %3125 = vmatpush.msrb.mxu1 %v1294_v62  ;;  %3165 = vmatpush.msrb.mxu3 %v1326_v63  ;;  %v284_v62 = vld [vmem:[%s4326_s23 + $0x200] sm:$0xff]  ;;  %v286_v63 = vld [vmem:[%s4326_s23 + $0x210] sm:$0xff] }
 0x253   : > { %3126 = vmatmul.f32.vlgmr.msrb.gmra.mxu1 %v281_v0  ;;  %3166 = vmatmul.f32.vlgmr.msrb.gmra.mxu3 %v283_v1  ;;  %v1421_v0 = vld [vmem:[#allocation5 + $0x2278] sm:$0xff] }
 0x254   : > { %3171 = vmatpush.msra.mxu0 %v1356_v2  ;;  %3190 = vmatpush.msra.mxu1 %v1373_v3  ;;  %v1453_v1 = vld [vmem:[#allocation5 + $0x2378] sm:$0xff]  ;;  %v1358_v2 = vld [vmem:[#allocation5 + $0x2080] sm:$0xff] }
 0x255   : > { %3211 = vmatpush.msra.mxu2 %v1388_v4  ;;  %3230 = vmatpush.msra.mxu3 %v1405_v5  ;;  %v1390_v3 = vld [vmem:[#allocation5 + $0x2180] sm:$0xff]  ;;  %v285_v4 = vld [vmem:[%s4326_s23 + $0x208] sm:$0xff]  ;;  %v287_v5 = vld [vmem:[%s4326_s23 + $0x218] sm:$0xff] }
 0x256   : > { %3172 = vmatpush.msra.mxu0 %v1355_v6  ;;  %3191 = vmatpush.msra.mxu1 %v1372_v7  ;;  %v1420_v6 = vld [vmem:[#allocation5 + $0x2270] sm:$0xff]  ;;  %v1437_v7 = vld [vmem:[#allocation5 + $0x22f8] sm:$0xff] }
 0x257   : > { %3212 = vmatpush.msra.mxu2 %v1387_v8  ;;  %3231 = vmatpush.msra.mxu3 %v1404_v9  ;;  %v1452_v8 = vld [vmem:[#allocation5 + $0x2370] sm:$0xff]  ;;  %v1469_v9 = vld [vmem:[#allocation5 + $0x23f8] sm:$0xff] }
 0x258   : > { %3173 = vmatpush.msra.mxu0 %v1354_v10  ;;  %3192 = vmatpush.msra.mxu1 %v1371_v11  ;;  %v1419_v10 = vld [vmem:[#allocation5 + $0x2268] sm:$0xff]  ;;  %v1436_v11 = vld [vmem:[#allocation5 + $0x22f0] sm:$0xff] }
 0x259   : > { %3213 = vmatpush.msra.mxu2 %v1386_v12  ;;  %3232 = vmatpush.msra.mxu3 %v1403_v13  ;;  %v1451_v12 = vld [vmem:[#allocation5 + $0x2368] sm:$0xff]  ;;  %v1468_v13 = vld [vmem:[#allocation5 + $0x23f0] sm:$0xff] }
 0x25a   : > { %3174 = vmatpush.msra.mxu0 %v1353_v14  ;;  %3193 = vmatpush.msra.mxu1 %v1370_v15  ;;  %v1418_v14 = vld [vmem:[#allocation5 + $0x2260] sm:$0xff]  ;;  %v1435_v15 = vld [vmem:[#allocation5 + $0x22e8] sm:$0xff] }
 0x25b   : > { %3214 = vmatpush.msra.mxu2 %v1385_v16  ;;  %3233 = vmatpush.msra.mxu3 %v1402_v17  ;;  %v1450_v16 = vld [vmem:[#allocation5 + $0x2360] sm:$0xff]  ;;  %v1467_v17 = vld [vmem:[#allocation5 + $0x23e8] sm:$0xff] }
 0x25c   : > { %3175 = vmatpush.msra.mxu0 %v1352_v18  ;;  %3194 = vmatpush.msra.mxu1 %v1369_v19  ;;  %v1417_v18 = vld [vmem:[#allocation5 + $0x2258] sm:$0xff]  ;;  %v1434_v19 = vld [vmem:[#allocation5 + $0x22e0] sm:$0xff] }
 0x25d   : > { %3215 = vmatpush.msra.mxu2 %v1384_v20  ;;  %3234 = vmatpush.msra.mxu3 %v1401_v21  ;;  %v1449_v20 = vld [vmem:[#allocation5 + $0x2358] sm:$0xff]  ;;  %v1466_v21 = vld [vmem:[#allocation5 + $0x23e0] sm:$0xff] }
 0x25e   : > { %3176 = vmatpush.msra.mxu0 %v1351_v22  ;;  %3195 = vmatpush.msra.mxu1 %v1368_v23  ;;  %v1416_v22 = vld [vmem:[#allocation5 + $0x2250] sm:$0xff]  ;;  %v1433_v23 = vld [vmem:[#allocation5 + $0x22d8] sm:$0xff] }
 0x25f   : > { %3216 = vmatpush.msra.mxu2 %v1383_v24  ;;  %3235 = vmatpush.msra.mxu3 %v1400_v25  ;;  %v1448_v24 = vld [vmem:[#allocation5 + $0x2350] sm:$0xff]  ;;  %v1465_v25 = vld [vmem:[#allocation5 + $0x23d8] sm:$0xff] }
 0x260   : > { %3177 = vmatpush.msra.mxu0 %v1350_v26  ;;  %3196 = vmatpush.msra.mxu1 %v1367_v27  ;;  %v1415_v26 = vld [vmem:[#allocation5 + $0x2248] sm:$0xff]  ;;  %v1432_v27 = vld [vmem:[#allocation5 + $0x22d0] sm:$0xff] }
 0x261   : > { %3217 = vmatpush.msra.mxu2 %v1382_v28  ;;  %3236 = vmatpush.msra.mxu3 %v1399_v29  ;;  %v1447_v28 = vld [vmem:[#allocation5 + $0x2348] sm:$0xff]  ;;  %v1464_v29 = vld [vmem:[#allocation5 + $0x23d0] sm:$0xff] }
 0x262   : > { %3178 = vmatpush.msra.mxu0 %v1349_v30  ;;  %3197 = vmatpush.msra.mxu1 %v1366_v31  ;;  %v1414_v30 = vld [vmem:[#allocation5 + $0x2240] sm:$0xff]  ;;  %v1431_v31 = vld [vmem:[#allocation5 + $0x22c8] sm:$0xff] }
 0x263   : > { %3218 = vmatpush.msra.mxu2 %v1381_v32  ;;  %3237 = vmatpush.msra.mxu3 %v1398_v33  ;;  %v1446_v32 = vld [vmem:[#allocation5 + $0x2340] sm:$0xff]  ;;  %v1463_v33 = vld [vmem:[#allocation5 + $0x23c8] sm:$0xff] }
 0x264   : > { %3179 = vmatpush.msra.mxu0 %v1348_v34  ;;  %3198 = vmatpush.msra.mxu1 %v1365_v35  ;;  %v1413_v34 = vld [vmem:[#allocation5 + $0x2238] sm:$0xff]  ;;  %v1430_v35 = vld [vmem:[#allocation5 + $0x22c0] sm:$0xff] }
 0x265   : > { %3219 = vmatpush.msra.mxu2 %v1380_v36  ;;  %3238 = vmatpush.msra.mxu3 %v1397_v37  ;;  %v1445_v36 = vld [vmem:[#allocation5 + $0x2338] sm:$0xff]  ;;  %v1462_v37 = vld [vmem:[#allocation5 + $0x23c0] sm:$0xff] }
 0x266   : > { %3180 = vmatpush.msra.mxu0 %v1347_v38  ;;  %3199 = vmatpush.msra.mxu1 %v1364_v39  ;;  %v1412_v38 = vld [vmem:[#allocation5 + $0x2230] sm:$0xff]  ;;  %v1429_v39 = vld [vmem:[#allocation5 + $0x22b8] sm:$0xff] }
 0x267   : > { %3220 = vmatpush.msra.mxu2 %v1379_v40  ;;  %3239 = vmatpush.msra.mxu3 %v1396_v41  ;;  %v1444_v40 = vld [vmem:[#allocation5 + $0x2330] sm:$0xff]  ;;  %v1461_v41 = vld [vmem:[#allocation5 + $0x23b8] sm:$0xff] }
 0x268   : > { %3181 = vmatpush.msra.mxu0 %v1346_v42  ;;  %3200 = vmatpush.msra.mxu1 %v1363_v43  ;;  %v1411_v42 = vld [vmem:[#allocation5 + $0x2228] sm:$0xff]  ;;  %v1428_v43 = vld [vmem:[#allocation5 + $0x22b0] sm:$0xff] }
 0x269   : > { %3221 = vmatpush.msra.mxu2 %v1378_v44  ;;  %3240 = vmatpush.msra.mxu3 %v1395_v45  ;;  %v1443_v44 = vld [vmem:[#allocation5 + $0x2328] sm:$0xff]  ;;  %v1460_v45 = vld [vmem:[#allocation5 + $0x23b0] sm:$0xff] }
 0x26a   : > { %3182 = vmatpush.msra.mxu0 %v1345_v46  ;;  %3201 = vmatpush.msra.mxu1 %v1362_v47  ;;  %v1410_v46 = vld [vmem:[#allocation5 + $0x2220] sm:$0xff]  ;;  %v1427_v47 = vld [vmem:[#allocation5 + $0x22a8] sm:$0xff] }
 0x26b   : > { %3222 = vmatpush.msra.mxu2 %v1377_v48  ;;  %3241 = vmatpush.msra.mxu3 %v1394_v49  ;;  %v1442_v48 = vld [vmem:[#allocation5 + $0x2320] sm:$0xff]  ;;  %v1459_v49 = vld [vmem:[#allocation5 + $0x23a8] sm:$0xff] }
 0x26c   : > { %3183 = vmatpush.msra.mxu0 %v1344_v50  ;;  %3202 = vmatpush.msra.mxu1 %v1361_v51  ;;  %v1409_v50 = vld [vmem:[#allocation5 + $0x2218] sm:$0xff]  ;;  %v1426_v51 = vld [vmem:[#allocation5 + $0x22a0] sm:$0xff] }
 0x26d   : > { %3223 = vmatpush.msra.mxu2 %v1376_v52  ;;  %3242 = vmatpush.msra.mxu3 %v1393_v53  ;;  %v1441_v52 = vld [vmem:[#allocation5 + $0x2318] sm:$0xff]  ;;  %v1458_v53 = vld [vmem:[#allocation5 + $0x23a0] sm:$0xff] }
 0x26e   : > { %3184 = vmatpush.msra.mxu0 %v1343_v54  ;;  %3203 = vmatpush.msra.mxu1 %v1360_v55  ;;  %v1408_v54 = vld [vmem:[#allocation5 + $0x2210] sm:$0xff]  ;;  %v1425_v55 = vld [vmem:[#allocation5 + $0x2298] sm:$0xff] }
 0x26f   : > { %3224 = vmatpush.msra.mxu2 %v1375_v56  ;;  %3243 = vmatpush.msra.mxu3 %v1392_v57  ;;  %v1440_v56 = vld [vmem:[#allocation5 + $0x2310] sm:$0xff]  ;;  %v1457_v57 = vld [vmem:[#allocation5 + $0x2398] sm:$0xff] }
 0x270   : > { %3185 = vmatpush.msra.mxu0 %v1342_v58  ;;  %3204 = vmatpush.msra.mxu1 %v1359_v59  ;;  %v1407_v58 = vld [vmem:[#allocation5 + $0x2208] sm:$0xff]  ;;  %v1424_v59 = vld [vmem:[#allocation5 + $0x2290] sm:$0xff] }
 0x271   : > { %3225 = vmatpush.msra.mxu2 %v1374_v60  ;;  %3244 = vmatpush.msra.mxu3 %v1391_v61  ;;  %v1439_v60 = vld [vmem:[#allocation5 + $0x2308] sm:$0xff]  ;;  %v1456_v61 = vld [vmem:[#allocation5 + $0x2390] sm:$0xff] }
 0x272   : > { %3186 = vmatmul.f32.vlgmr.msra.gmra.mxu0 %v284_v62  ;;  %3226 = vmatmul.f32.vlgmr.msra.gmra.mxu2 %v286_v63  ;;  %v1406_v62 = vld [vmem:[#allocation5 + $0x2200] sm:$0xff]  ;;  %v1423_v63 = vld [vmem:[#allocation5 + $0x2288] sm:$0xff] }
 0x273   : > { %3250 = vmatpush.msrb.mxu0 %v1421_v0  ;;  %3290 = vmatpush.msrb.mxu2 %v1453_v1  ;;  %v1438_v0 = vld [vmem:[#allocation5 + $0x2300] sm:$0xff]  ;;  %v1455_v1 = vld [vmem:[#allocation5 + $0x2388] sm:$0xff] }
 0x274   : > { %3205 = vmatpush.msra.mxu1 %v1358_v2  ;;  %3245 = vmatpush.msra.mxu3 %v1390_v3  ;;  %v288_v2 = vld [vmem:[%s4326_s23 + $0x220] sm:$0xff]  ;;  %v290_v3 = vld [vmem:[%s4326_s23 + $0x230] sm:$0xff] }
 0x275   : > { %3206 = vmatmul.f32.vlgmr.msra.gmra.mxu1 %v285_v4  ;;  %3246 = vmatmul.f32.vlgmr.msra.gmra.mxu3 %v287_v5  ;;  %v1485_v4 = vld [vmem:[#allocation5 + $0x2478] sm:$0xff] }
 0x276   : > { %3251 = vmatpush.msrb.mxu0 %v1420_v6  ;;  %3270 = vmatpush.msrb.mxu1 %v1437_v7  ;;  %v1517_v5 = vld [vmem:[#allocation5 + $0x2578] sm:$0xff]  ;;  %v1422_v6 = vld [vmem:[#allocation5 + $0x2280] sm:$0xff] }
 0x277   : > { %3291 = vmatpush.msrb.mxu2 %v1452_v8  ;;  %3310 = vmatpush.msrb.mxu3 %v1469_v9  ;;  %v1454_v7 = vld [vmem:[#allocation5 + $0x2380] sm:$0xff]  ;;  %v289_v8 = vld [vmem:[%s4326_s23 + $0x228] sm:$0xff]  ;;  %v291_v9 = vld [vmem:[%s4326_s23 + $0x238] sm:$0xff] }
 0x278   : > { %3252 = vmatpush.msrb.mxu0 %v1419_v10  ;;  %3271 = vmatpush.msrb.mxu1 %v1436_v11  ;;  %v1484_v10 = vld [vmem:[#allocation5 + $0x2470] sm:$0xff]  ;;  %v1501_v11 = vld [vmem:[#allocation5 + $0x24f8] sm:$0xff] }
 0x279   : > { %3292 = vmatpush.msrb.mxu2 %v1451_v12  ;;  %3311 = vmatpush.msrb.mxu3 %v1468_v13  ;;  %v1516_v12 = vld [vmem:[#allocation5 + $0x2570] sm:$0xff]  ;;  %v1533_v13 = vld [vmem:[#allocation5 + $0x25f8] sm:$0xff] }
 0x27a   : > { %3253 = vmatpush.msrb.mxu0 %v1418_v14  ;;  %3272 = vmatpush.msrb.mxu1 %v1435_v15  ;;  %v1483_v14 = vld [vmem:[#allocation5 + $0x2468] sm:$0xff]  ;;  %v1500_v15 = vld [vmem:[#allocation5 + $0x24f0] sm:$0xff] }
 0x27b   : > { %3293 = vmatpush.msrb.mxu2 %v1450_v16  ;;  %3312 = vmatpush.msrb.mxu3 %v1467_v17  ;;  %v1515_v16 = vld [vmem:[#allocation5 + $0x2568] sm:$0xff]  ;;  %v1532_v17 = vld [vmem:[#allocation5 + $0x25f0] sm:$0xff] }
 0x27c   : > { %3254 = vmatpush.msrb.mxu0 %v1417_v18  ;;  %3273 = vmatpush.msrb.mxu1 %v1434_v19  ;;  %v1482_v18 = vld [vmem:[#allocation5 + $0x2460] sm:$0xff]  ;;  %v1499_v19 = vld [vmem:[#allocation5 + $0x24e8] sm:$0xff] }
 0x27d   : > { %3294 = vmatpush.msrb.mxu2 %v1449_v20  ;;  %3313 = vmatpush.msrb.mxu3 %v1466_v21  ;;  %v1514_v20 = vld [vmem:[#allocation5 + $0x2560] sm:$0xff]  ;;  %v1531_v21 = vld [vmem:[#allocation5 + $0x25e8] sm:$0xff] }
 0x27e   : > { %3255 = vmatpush.msrb.mxu0 %v1416_v22  ;;  %3274 = vmatpush.msrb.mxu1 %v1433_v23  ;;  %v1481_v22 = vld [vmem:[#allocation5 + $0x2458] sm:$0xff]  ;;  %v1498_v23 = vld [vmem:[#allocation5 + $0x24e0] sm:$0xff] }
 0x27f   : > { %3295 = vmatpush.msrb.mxu2 %v1448_v24  ;;  %3314 = vmatpush.msrb.mxu3 %v1465_v25  ;;  %v1513_v24 = vld [vmem:[#allocation5 + $0x2558] sm:$0xff]  ;;  %v1530_v25 = vld [vmem:[#allocation5 + $0x25e0] sm:$0xff] }
 0x280   : > { %3256 = vmatpush.msrb.mxu0 %v1415_v26  ;;  %3275 = vmatpush.msrb.mxu1 %v1432_v27  ;;  %v1480_v26 = vld [vmem:[#allocation5 + $0x2450] sm:$0xff]  ;;  %v1497_v27 = vld [vmem:[#allocation5 + $0x24d8] sm:$0xff] }
 0x281   : > { %3296 = vmatpush.msrb.mxu2 %v1447_v28  ;;  %3315 = vmatpush.msrb.mxu3 %v1464_v29  ;;  %v1512_v28 = vld [vmem:[#allocation5 + $0x2550] sm:$0xff]  ;;  %v1529_v29 = vld [vmem:[#allocation5 + $0x25d8] sm:$0xff] }
 0x282   : > { %3257 = vmatpush.msrb.mxu0 %v1414_v30  ;;  %3276 = vmatpush.msrb.mxu1 %v1431_v31  ;;  %v1479_v30 = vld [vmem:[#allocation5 + $0x2448] sm:$0xff]  ;;  %v1496_v31 = vld [vmem:[#allocation5 + $0x24d0] sm:$0xff] }
 0x283   : > { %3297 = vmatpush.msrb.mxu2 %v1446_v32  ;;  %3316 = vmatpush.msrb.mxu3 %v1463_v33  ;;  %v1511_v32 = vld [vmem:[#allocation5 + $0x2548] sm:$0xff]  ;;  %v1528_v33 = vld [vmem:[#allocation5 + $0x25d0] sm:$0xff] }
 0x284   : > { %3258 = vmatpush.msrb.mxu0 %v1413_v34  ;;  %3277 = vmatpush.msrb.mxu1 %v1430_v35  ;;  %v1478_v34 = vld [vmem:[#allocation5 + $0x2440] sm:$0xff]  ;;  %v1495_v35 = vld [vmem:[#allocation5 + $0x24c8] sm:$0xff] }
 0x285   : > { %3298 = vmatpush.msrb.mxu2 %v1445_v36  ;;  %3317 = vmatpush.msrb.mxu3 %v1462_v37  ;;  %v1510_v36 = vld [vmem:[#allocation5 + $0x2540] sm:$0xff]  ;;  %v1527_v37 = vld [vmem:[#allocation5 + $0x25c8] sm:$0xff] }
 0x286   : > { %3259 = vmatpush.msrb.mxu0 %v1412_v38  ;;  %3278 = vmatpush.msrb.mxu1 %v1429_v39  ;;  %v1477_v38 = vld [vmem:[#allocation5 + $0x2438] sm:$0xff]  ;;  %v1494_v39 = vld [vmem:[#allocation5 + $0x24c0] sm:$0xff] }
 0x287   : > { %3299 = vmatpush.msrb.mxu2 %v1444_v40  ;;  %3318 = vmatpush.msrb.mxu3 %v1461_v41  ;;  %v1509_v40 = vld [vmem:[#allocation5 + $0x2538] sm:$0xff]  ;;  %v1526_v41 = vld [vmem:[#allocation5 + $0x25c0] sm:$0xff] }
 0x288   : > { %3260 = vmatpush.msrb.mxu0 %v1411_v42  ;;  %3279 = vmatpush.msrb.mxu1 %v1428_v43  ;;  %v1476_v42 = vld [vmem:[#allocation5 + $0x2430] sm:$0xff]  ;;  %v1493_v43 = vld [vmem:[#allocation5 + $0x24b8] sm:$0xff] }
 0x289   : > { %3300 = vmatpush.msrb.mxu2 %v1443_v44  ;;  %3319 = vmatpush.msrb.mxu3 %v1460_v45  ;;  %v1508_v44 = vld [vmem:[#allocation5 + $0x2530] sm:$0xff]  ;;  %v1525_v45 = vld [vmem:[#allocation5 + $0x25b8] sm:$0xff] }
 0x28a   : > { %3261 = vmatpush.msrb.mxu0 %v1410_v46  ;;  %3280 = vmatpush.msrb.mxu1 %v1427_v47  ;;  %v1475_v46 = vld [vmem:[#allocation5 + $0x2428] sm:$0xff]  ;;  %v1492_v47 = vld [vmem:[#allocation5 + $0x24b0] sm:$0xff] }
 0x28b   : > { %3301 = vmatpush.msrb.mxu2 %v1442_v48  ;;  %3320 = vmatpush.msrb.mxu3 %v1459_v49  ;;  %v1507_v48 = vld [vmem:[#allocation5 + $0x2528] sm:$0xff]  ;;  %v1524_v49 = vld [vmem:[#allocation5 + $0x25b0] sm:$0xff] }
 0x28c   : > { %3262 = vmatpush.msrb.mxu0 %v1409_v50  ;;  %3281 = vmatpush.msrb.mxu1 %v1426_v51  ;;  %v1474_v50 = vld [vmem:[#allocation5 + $0x2420] sm:$0xff]  ;;  %v1491_v51 = vld [vmem:[#allocation5 + $0x24a8] sm:$0xff] }
 0x28d   : > { %3302 = vmatpush.msrb.mxu2 %v1441_v52  ;;  %3321 = vmatpush.msrb.mxu3 %v1458_v53  ;;  %v1506_v52 = vld [vmem:[#allocation5 + $0x2520] sm:$0xff]  ;;  %v1523_v53 = vld [vmem:[#allocation5 + $0x25a8] sm:$0xff] }
 0x28e   : > { %3263 = vmatpush.msrb.mxu0 %v1408_v54  ;;  %3282 = vmatpush.msrb.mxu1 %v1425_v55  ;;  %v1473_v54 = vld [vmem:[#allocation5 + $0x2418] sm:$0xff]  ;;  %v1490_v55 = vld [vmem:[#allocation5 + $0x24a0] sm:$0xff] }
 0x28f   : > { %3303 = vmatpush.msrb.mxu2 %v1440_v56  ;;  %3322 = vmatpush.msrb.mxu3 %v1457_v57  ;;  %v1505_v56 = vld [vmem:[#allocation5 + $0x2518] sm:$0xff]  ;;  %v1522_v57 = vld [vmem:[#allocation5 + $0x25a0] sm:$0xff] }
 0x290   : > { %3264 = vmatpush.msrb.mxu0 %v1407_v58  ;;  %3283 = vmatpush.msrb.mxu1 %v1424_v59  ;;  %v1472_v58 = vld [vmem:[#allocation5 + $0x2410] sm:$0xff]  ;;  %v1489_v59 = vld [vmem:[#allocation5 + $0x2498] sm:$0xff] }
 0x291   : > { %3304 = vmatpush.msrb.mxu2 %v1439_v60  ;;  %3323 = vmatpush.msrb.mxu3 %v1456_v61  ;;  %v1504_v60 = vld [vmem:[#allocation5 + $0x2510] sm:$0xff]  ;;  %v1521_v61 = vld [vmem:[#allocation5 + $0x2598] sm:$0xff] }
 0x292   : > { %3265 = vmatpush.msrb.mxu0 %v1406_v62  ;;  %3284 = vmatpush.msrb.mxu1 %v1423_v63  ;;  %v1471_v62 = vld [vmem:[#allocation5 + $0x2408] sm:$0xff]  ;;  %v1488_v63 = vld [vmem:[#allocation5 + $0x2490] sm:$0xff] }
 0x293   : > { %3305 = vmatpush.msrb.mxu2 %v1438_v0  ;;  %3324 = vmatpush.msrb.mxu3 %v1455_v1  ;;  %v1503_v0 = vld [vmem:[#allocation5 + $0x2508] sm:$0xff]  ;;  %v1520_v1 = vld [vmem:[#allocation5 + $0x2590] sm:$0xff] }
 0x294   : > { %3266 = vmatmul.f32.vlgmr.msrb.gmra.mxu0 %v288_v2  ;;  %3306 = vmatmul.f32.vlgmr.msrb.gmra.mxu2 %v290_v3  ;;  %v1470_v2 = vld [vmem:[#allocation5 + $0x2400] sm:$0xff]  ;;  %v1487_v3 = vld [vmem:[#allocation5 + $0x2488] sm:$0xff] }
 0x295   : > { %3330 = vmatpush.msra.mxu0 %v1485_v4  ;;  %3370 = vmatpush.msra.mxu2 %v1517_v5  ;;  %v1502_v4 = vld [vmem:[#allocation5 + $0x2500] sm:$0xff]  ;;  %v1519_v5 = vld [vmem:[#allocation5 + $0x2588] sm:$0xff] }
 0x296   : > { %3285 = vmatpush.msrb.mxu1 %v1422_v6  ;;  %3325 = vmatpush.msrb.mxu3 %v1454_v7  ;;  %v292_v6 = vld [vmem:[%s4326_s23 + $0x240] sm:$0xff]  ;;  %v294_v7 = vld [vmem:[%s4326_s23 + $0x250] sm:$0xff] }
 0x297   : > { %3286 = vmatmul.f32.vlgmr.msrb.gmra.mxu1 %v289_v8  ;;  %3326 = vmatmul.f32.vlgmr.msrb.gmra.mxu3 %v291_v9  ;;  %v1549_v8 = vld [vmem:[#allocation5 + $0x2678] sm:$0xff] }
 0x298   : > { %3331 = vmatpush.msra.mxu0 %v1484_v10  ;;  %3350 = vmatpush.msra.mxu1 %v1501_v11  ;;  %v1581_v9 = vld [vmem:[#allocation5 + $0x2778] sm:$0xff]  ;;  %v1486_v10 = vld [vmem:[#allocation5 + $0x2480] sm:$0xff] }
 0x299   : > { %3371 = vmatpush.msra.mxu2 %v1516_v12  ;;  %3390 = vmatpush.msra.mxu3 %v1533_v13  ;;  %v1518_v11 = vld [vmem:[#allocation5 + $0x2580] sm:$0xff]  ;;  %v293_v12 = vld [vmem:[%s4326_s23 + $0x248] sm:$0xff]  ;;  %v295_v13 = vld [vmem:[%s4326_s23 + $0x258] sm:$0xff] }
 0x29a   : > { %3332 = vmatpush.msra.mxu0 %v1483_v14  ;;  %3351 = vmatpush.msra.mxu1 %v1500_v15  ;;  %v1548_v14 = vld [vmem:[#allocation5 + $0x2670] sm:$0xff]  ;;  %v1565_v15 = vld [vmem:[#allocation5 + $0x26f8] sm:$0xff] }
 0x29b   : > { %3372 = vmatpush.msra.mxu2 %v1515_v16  ;;  %3391 = vmatpush.msra.mxu3 %v1532_v17  ;;  %v1580_v16 = vld [vmem:[#allocation5 + $0x2770] sm:$0xff]  ;;  %v1597_v17 = vld [vmem:[#allocation5 + $0x27f8] sm:$0xff] }
 0x29c   : > { %3333 = vmatpush.msra.mxu0 %v1482_v18  ;;  %3352 = vmatpush.msra.mxu1 %v1499_v19  ;;  %v1547_v18 = vld [vmem:[#allocation5 + $0x2668] sm:$0xff]  ;;  %v1564_v19 = vld [vmem:[#allocation5 + $0x26f0] sm:$0xff] }
 0x29d   : > { %3373 = vmatpush.msra.mxu2 %v1514_v20  ;;  %3392 = vmatpush.msra.mxu3 %v1531_v21  ;;  %v1579_v20 = vld [vmem:[#allocation5 + $0x2768] sm:$0xff]  ;;  %v1596_v21 = vld [vmem:[#allocation5 + $0x27f0] sm:$0xff] }
 0x29e   : > { %3334 = vmatpush.msra.mxu0 %v1481_v22  ;;  %3353 = vmatpush.msra.mxu1 %v1498_v23  ;;  %v1546_v22 = vld [vmem:[#allocation5 + $0x2660] sm:$0xff]  ;;  %v1563_v23 = vld [vmem:[#allocation5 + $0x26e8] sm:$0xff] }
 0x29f   : > { %3374 = vmatpush.msra.mxu2 %v1513_v24  ;;  %3393 = vmatpush.msra.mxu3 %v1530_v25  ;;  %v1578_v24 = vld [vmem:[#allocation5 + $0x2760] sm:$0xff]  ;;  %v1595_v25 = vld [vmem:[#allocation5 + $0x27e8] sm:$0xff] }
 0x2a0   : > { %3335 = vmatpush.msra.mxu0 %v1480_v26  ;;  %3354 = vmatpush.msra.mxu1 %v1497_v27  ;;  %v1545_v26 = vld [vmem:[#allocation5 + $0x2658] sm:$0xff]  ;;  %v1562_v27 = vld [vmem:[#allocation5 + $0x26e0] sm:$0xff] }
 0x2a1   : > { %3375 = vmatpush.msra.mxu2 %v1512_v28  ;;  %3394 = vmatpush.msra.mxu3 %v1529_v29  ;;  %v1577_v28 = vld [vmem:[#allocation5 + $0x2758] sm:$0xff]  ;;  %v1594_v29 = vld [vmem:[#allocation5 + $0x27e0] sm:$0xff] }
 0x2a2   : > { %3336 = vmatpush.msra.mxu0 %v1479_v30  ;;  %3355 = vmatpush.msra.mxu1 %v1496_v31  ;;  %v1544_v30 = vld [vmem:[#allocation5 + $0x2650] sm:$0xff]  ;;  %v1561_v31 = vld [vmem:[#allocation5 + $0x26d8] sm:$0xff] }
 0x2a3   : > { %3376 = vmatpush.msra.mxu2 %v1511_v32  ;;  %3395 = vmatpush.msra.mxu3 %v1528_v33  ;;  %v1576_v32 = vld [vmem:[#allocation5 + $0x2750] sm:$0xff]  ;;  %v1593_v33 = vld [vmem:[#allocation5 + $0x27d8] sm:$0xff] }
 0x2a4   : > { %3337 = vmatpush.msra.mxu0 %v1478_v34  ;;  %3356 = vmatpush.msra.mxu1 %v1495_v35  ;;  %v1543_v34 = vld [vmem:[#allocation5 + $0x2648] sm:$0xff]  ;;  %v1560_v35 = vld [vmem:[#allocation5 + $0x26d0] sm:$0xff] }
 0x2a5   : > { %3377 = vmatpush.msra.mxu2 %v1510_v36  ;;  %3396 = vmatpush.msra.mxu3 %v1527_v37  ;;  %v1575_v36 = vld [vmem:[#allocation5 + $0x2748] sm:$0xff]  ;;  %v1592_v37 = vld [vmem:[#allocation5 + $0x27d0] sm:$0xff] }
 0x2a6   : > { %3338 = vmatpush.msra.mxu0 %v1477_v38  ;;  %3357 = vmatpush.msra.mxu1 %v1494_v39  ;;  %v1542_v38 = vld [vmem:[#allocation5 + $0x2640] sm:$0xff]  ;;  %v1559_v39 = vld [vmem:[#allocation5 + $0x26c8] sm:$0xff] }
 0x2a7   : > { %3378 = vmatpush.msra.mxu2 %v1509_v40  ;;  %3397 = vmatpush.msra.mxu3 %v1526_v41  ;;  %v1574_v40 = vld [vmem:[#allocation5 + $0x2740] sm:$0xff]  ;;  %v1591_v41 = vld [vmem:[#allocation5 + $0x27c8] sm:$0xff] }
 0x2a8   : > { %3339 = vmatpush.msra.mxu0 %v1476_v42  ;;  %3358 = vmatpush.msra.mxu1 %v1493_v43  ;;  %v1541_v42 = vld [vmem:[#allocation5 + $0x2638] sm:$0xff]  ;;  %v1558_v43 = vld [vmem:[#allocation5 + $0x26c0] sm:$0xff] }
 0x2a9   : > { %3379 = vmatpush.msra.mxu2 %v1508_v44  ;;  %3398 = vmatpush.msra.mxu3 %v1525_v45  ;;  %v1573_v44 = vld [vmem:[#allocation5 + $0x2738] sm:$0xff]  ;;  %v1590_v45 = vld [vmem:[#allocation5 + $0x27c0] sm:$0xff] }
 0x2aa   : > { %3340 = vmatpush.msra.mxu0 %v1475_v46  ;;  %3359 = vmatpush.msra.mxu1 %v1492_v47  ;;  %v1540_v46 = vld [vmem:[#allocation5 + $0x2630] sm:$0xff]  ;;  %v1557_v47 = vld [vmem:[#allocation5 + $0x26b8] sm:$0xff] }
 0x2ab   : > { %3380 = vmatpush.msra.mxu2 %v1507_v48  ;;  %3399 = vmatpush.msra.mxu3 %v1524_v49  ;;  %v1572_v48 = vld [vmem:[#allocation5 + $0x2730] sm:$0xff]  ;;  %v1589_v49 = vld [vmem:[#allocation5 + $0x27b8] sm:$0xff] }
 0x2ac   : > { %3341 = vmatpush.msra.mxu0 %v1474_v50  ;;  %3360 = vmatpush.msra.mxu1 %v1491_v51  ;;  %v1539_v50 = vld [vmem:[#allocation5 + $0x2628] sm:$0xff]  ;;  %v1556_v51 = vld [vmem:[#allocation5 + $0x26b0] sm:$0xff] }
 0x2ad   : > { %3381 = vmatpush.msra.mxu2 %v1506_v52  ;;  %3400 = vmatpush.msra.mxu3 %v1523_v53  ;;  %v1571_v52 = vld [vmem:[#allocation5 + $0x2728] sm:$0xff]  ;;  %v1588_v53 = vld [vmem:[#allocation5 + $0x27b0] sm:$0xff] }
 0x2ae   : > { %3342 = vmatpush.msra.mxu0 %v1473_v54  ;;  %3361 = vmatpush.msra.mxu1 %v1490_v55  ;;  %v1538_v54 = vld [vmem:[#allocation5 + $0x2620] sm:$0xff]  ;;  %v1555_v55 = vld [vmem:[#allocation5 + $0x26a8] sm:$0xff] }
 0x2af   : > { %3382 = vmatpush.msra.mxu2 %v1505_v56  ;;  %3401 = vmatpush.msra.mxu3 %v1522_v57  ;;  %v1570_v56 = vld [vmem:[#allocation5 + $0x2720] sm:$0xff]  ;;  %v1587_v57 = vld [vmem:[#allocation5 + $0x27a8] sm:$0xff] }
 0x2b0   : > { %3343 = vmatpush.msra.mxu0 %v1472_v58  ;;  %3362 = vmatpush.msra.mxu1 %v1489_v59  ;;  %v1537_v58 = vld [vmem:[#allocation5 + $0x2618] sm:$0xff]  ;;  %v1554_v59 = vld [vmem:[#allocation5 + $0x26a0] sm:$0xff] }
 0x2b1   : > { %3383 = vmatpush.msra.mxu2 %v1504_v60  ;;  %3402 = vmatpush.msra.mxu3 %v1521_v61  ;;  %v1569_v60 = vld [vmem:[#allocation5 + $0x2718] sm:$0xff]  ;;  %v1586_v61 = vld [vmem:[#allocation5 + $0x27a0] sm:$0xff] }
 0x2b2   : > { %3344 = vmatpush.msra.mxu0 %v1471_v62  ;;  %3363 = vmatpush.msra.mxu1 %v1488_v63  ;;  %v1536_v62 = vld [vmem:[#allocation5 + $0x2610] sm:$0xff]  ;;  %v1553_v63 = vld [vmem:[#allocation5 + $0x2698] sm:$0xff] }
 0x2b3   : > { %3384 = vmatpush.msra.mxu2 %v1503_v0  ;;  %3403 = vmatpush.msra.mxu3 %v1520_v1  ;;  %v1568_v0 = vld [vmem:[#allocation5 + $0x2710] sm:$0xff]  ;;  %v1585_v1 = vld [vmem:[#allocation5 + $0x2798] sm:$0xff] }
 0x2b4   : > { %3345 = vmatpush.msra.mxu0 %v1470_v2  ;;  %3364 = vmatpush.msra.mxu1 %v1487_v3  ;;  %v1535_v2 = vld [vmem:[#allocation5 + $0x2608] sm:$0xff]  ;;  %v1552_v3 = vld [vmem:[#allocation5 + $0x2690] sm:$0xff] }
 0x2b5   : > { %3385 = vmatpush.msra.mxu2 %v1502_v4  ;;  %3404 = vmatpush.msra.mxu3 %v1519_v5  ;;  %v1567_v4 = vld [vmem:[#allocation5 + $0x2708] sm:$0xff]  ;;  %v1584_v5 = vld [vmem:[#allocation5 + $0x2790] sm:$0xff] }
 0x2b6   : > { %3346 = vmatmul.f32.vlgmr.msra.gmra.mxu0 %v292_v6  ;;  %3386 = vmatmul.f32.vlgmr.msra.gmra.mxu2 %v294_v7  ;;  %v1534_v6 = vld [vmem:[#allocation5 + $0x2600] sm:$0xff]  ;;  %v1551_v7 = vld [vmem:[#allocation5 + $0x2688] sm:$0xff] }
 0x2b7   : > { %3410 = vmatpush.msrb.mxu0 %v1549_v8  ;;  %3450 = vmatpush.msrb.mxu2 %v1581_v9  ;;  %v4042_v8 = vld [vmem:[#allocation7] ss:$0 sm:$0xff] }
 0x2b8   : > { %3365 = vmatpush.msra.mxu1 %v1486_v10  ;;  %3405 = vmatpush.msra.mxu3 %v1518_v11  ;;  %v1566_v9 = vld [vmem:[#allocation5 + $0x2700] sm:$0xff]  ;;  %v1583_v10 = vld [vmem:[#allocation5 + $0x2788] sm:$0xff]  ;;  %v1907_v11 = vpop.f32.mrf.mxu0 }
 0x2b9   : > { %3366 = vmatmul.f32.vlgmr.msra.gmra.mxu1 %v293_v12  ;;  %3406 = vmatmul.f32.vlgmr.msra.gmra.mxu3 %v295_v13  ;;  %v296_v12 = vld [vmem:[%s4326_s23 + $0x260] sm:$0xff]  ;;  %v298_v13 = vld [vmem:[%s4326_s23 + $0x270] sm:$0xff] }
 0x2ba   : > { %3411 = vmatpush.msrb.mxu0 %v1548_v14  ;;  %3430 = vmatpush.msrb.mxu1 %v1565_v15  ;;  %v1613_v14 = vld [vmem:[#allocation5 + $0x2878] sm:$0xff] }
 0x2bb   : > { %3451 = vmatpush.msrb.mxu2 %v1580_v16  ;;  %3470 = vmatpush.msrb.mxu3 %v1597_v17  ;;  %v1645_v15 = vld [vmem:[#allocation5 + $0x2978] sm:$0xff]  ;;  %v1550_v16 = vld [vmem:[#allocation5 + $0x2680] sm:$0xff] }
 0x2bc   : > { %3412 = vmatpush.msrb.mxu0 %v1547_v18  ;;  %3431 = vmatpush.msrb.mxu1 %v1564_v19  ;;  %v1582_v17 = vld [vmem:[#allocation5 + $0x2780] sm:$0xff]  ;;  %v1908_v18 = vadd.f32 %v4042_v8, %v1907_v11  ;;  %v297_v19 = vld [vmem:[%s4326_s23 + $0x268] sm:$0xff] }
 0x2bd   : > { %3452 = vmatpush.msrb.mxu2 %v1579_v20  ;;  %3471 = vmatpush.msrb.mxu3 %v1596_v21  ;;  %v299_v20 = vld [vmem:[%s4326_s23 + $0x278] sm:$0xff]  ;;  %v1927_v21 = vpop.f32.mrf.mxu1  ;;  %v1602_v8 = vld [vmem:[#allocation5 + $0x2820] sm:$0xff] }
 0x2be   : > { %3413 = vmatpush.msrb.mxu0 %v1546_v22  ;;  %3432 = vmatpush.msrb.mxu1 %v1563_v23  ;;  %v1612_v22 = vld [vmem:[#allocation5 + $0x2870] sm:$0xff]  ;;  %v1629_v23 = vld [vmem:[#allocation5 + $0x28f8] sm:$0xff]  ;;  %v1651_v11 = vld [vmem:[#allocation5 + $0x29a8] sm:$0xff] }
 0x2bf   : > { %3453 = vmatpush.msrb.mxu2 %v1578_v24  ;;  %3472 = vmatpush.msrb.mxu3 %v1595_v25  ;;  %v1644_v24 = vld [vmem:[#allocation5 + $0x2970] sm:$0xff]  ;;  %v1661_v25 = vld [vmem:[#allocation5 + $0x29f8] sm:$0xff] }
 0x2c0   : > { %3414 = vmatpush.msrb.mxu0 %v1545_v26  ;;  %3433 = vmatpush.msrb.mxu1 %v1562_v27  ;;  %v1611_v26 = vld [vmem:[#allocation5 + $0x2868] sm:$0xff]  ;;  %v1628_v27 = vld [vmem:[#allocation5 + $0x28f0] sm:$0xff] }
 0x2c1   : > { %3454 = vmatpush.msrb.mxu2 %v1577_v28  ;;  %3473 = vmatpush.msrb.mxu3 %v1594_v29  ;;  %v1928_v28 = vadd.f32 %v1927_v21, %v1908_v18  ;;  %v1643_v29 = vld [vmem:[#allocation5 + $0x2968] sm:$0xff]  ;;  %v1600_v18 = vld [vmem:[#allocation5 + $0x2810] sm:$0xff]  ;;  %v1649_v21 = vld [vmem:[#allocation5 + $0x2998] sm:$0xff] }
 0x2c2   : > { %3415 = vmatpush.msrb.mxu0 %v1544_v30  ;;  %3434 = vmatpush.msrb.mxu1 %v1561_v31  ;;  %v1660_v30 = vld [vmem:[#allocation5 + $0x29f0] sm:$0xff]  ;;  %v1947_v31 = vpop.f32.mrf.mxu2 }
 0x2c3   : > { %3455 = vmatpush.msrb.mxu2 %v1576_v32  ;;  %3474 = vmatpush.msrb.mxu3 %v1593_v33  ;;  %v1610_v32 = vld [vmem:[#allocation5 + $0x2860] sm:$0xff]  ;;  %v1627_v33 = vld [vmem:[#allocation5 + $0x28e8] sm:$0xff] }
 0x2c4   : > { %3416 = vmatpush.msrb.mxu0 %v1543_v34  ;;  %3435 = vmatpush.msrb.mxu1 %v1560_v35  ;;  %v1642_v34 = vld [vmem:[#allocation5 + $0x2960] sm:$0xff]  ;;  %v1659_v35 = vld [vmem:[#allocation5 + $0x29e8] sm:$0xff] }
 0x2c5   : > { %3456 = vmatpush.msrb.mxu2 %v1575_v36  ;;  %3475 = vmatpush.msrb.mxu3 %v1592_v37  ;;  %v1609_v36 = vld [vmem:[#allocation5 + $0x2858] sm:$0xff]  ;;  %v1626_v37 = vld [vmem:[#allocation5 + $0x28e0] sm:$0xff] }
 0x2c6   : > { %3417 = vmatpush.msrb.mxu0 %v1542_v38  ;;  %3436 = vmatpush.msrb.mxu1 %v1559_v39  ;;  %v1948_v38 = vadd.f32 %v1947_v31, %v1928_v28  ;;  %v1641_v39 = vld [vmem:[#allocation5 + $0x2958] sm:$0xff]  ;;  %v1598_v28 = vld [vmem:[#allocation5 + $0x2800] sm:$0xff] }
 0x2c7   : > { %3457 = vmatpush.msrb.mxu2 %v1574_v40  ;;  %3476 = vmatpush.msrb.mxu3 %v1591_v41  ;;  %v1658_v40 = vld [vmem:[#allocation5 + $0x29e0] sm:$0xff]  ;;  %v1967_v41 = vpop.f32.mrf.mxu3 }
 0x2c8   : > { %3418 = vmatpush.msrb.mxu0 %v1541_v42  ;;  %3437 = vmatpush.msrb.mxu1 %v1558_v43  ;;  %v1608_v42 = vld [vmem:[#allocation5 + $0x2850] sm:$0xff]  ;;  %v1625_v43 = vld [vmem:[#allocation5 + $0x28d8] sm:$0xff]  ;;  %v1630_v31 = vld [vmem:[#allocation5 + $0x2900] sm:$0xff] }
 0x2c9   : > { %3458 = vmatpush.msrb.mxu2 %v1573_v44  ;;  %3477 = vmatpush.msrb.mxu3 %v1590_v45  ;;  %v1640_v44 = vld [vmem:[#allocation5 + $0x2950] sm:$0xff]  ;;  %v1657_v45 = vld [vmem:[#allocation5 + $0x29d8] sm:$0xff] }
 0x2ca   : > { %3419 = vmatpush.msrb.mxu0 %v1540_v46  ;;  %3438 = vmatpush.msrb.mxu1 %v1557_v47  ;;  %v1607_v46 = vld [vmem:[#allocation5 + $0x2848] sm:$0xff]  ;;  %v1624_v47 = vld [vmem:[#allocation5 + $0x28d0] sm:$0xff] }
 0x2cb   : > { %3459 = vmatpush.msrb.mxu2 %v1572_v48  ;;  %3478 = vmatpush.msrb.mxu3 %v1589_v49  ;;  %v1968_v48 = vadd.f32 %v1967_v41, %v1948_v38  ;;  %v1639_v49 = vld [vmem:[#allocation5 + $0x2948] sm:$0xff] }
 0x2cc   : > { %3420 = vmatpush.msrb.mxu0 %v1539_v50  ;;  %3439 = vmatpush.msrb.mxu1 %v1556_v51  ;;  %v1656_v50 = vld [vmem:[#allocation5 + $0x29d0] sm:$0xff]  ;;  %v1987_v51 = vpop.f32.mrf.mxu0 }
 0x2cd   : > { %3460 = vmatpush.msrb.mxu2 %v1571_v52  ;;  %3479 = vmatpush.msrb.mxu3 %v1588_v53  ;;  %v1606_v52 = vld [vmem:[#allocation5 + $0x2840] sm:$0xff]  ;;  %v1623_v53 = vld [vmem:[#allocation5 + $0x28c8] sm:$0xff] }
 0x2ce   : > { %3421 = vmatpush.msrb.mxu0 %v1538_v54  ;;  %3440 = vmatpush.msrb.mxu1 %v1555_v55  ;;  %v1638_v54 = vld [vmem:[#allocation5 + $0x2940] sm:$0xff]  ;;  %v1655_v55 = vld [vmem:[#allocation5 + $0x29c8] sm:$0xff] }
 0x2cf   : > { %3461 = vmatpush.msrb.mxu2 %v1570_v56  ;;  %3480 = vmatpush.msrb.mxu3 %v1587_v57  ;;  %v1605_v56 = vld [vmem:[#allocation5 + $0x2838] sm:$0xff]  ;;  %v1622_v57 = vld [vmem:[#allocation5 + $0x28c0] sm:$0xff] }
 0x2d0   : > { %3422 = vmatpush.msrb.mxu0 %v1537_v58  ;;  %3441 = vmatpush.msrb.mxu1 %v1554_v59  ;;  %v1988_v58 = vadd.f32 %v1987_v51, %v1968_v48  ;;  %v1637_v59 = vld [vmem:[#allocation5 + $0x2938] sm:$0xff]  ;;  %v1692_v51 = vld [vmem:[#allocation5 + $0x2af0] sm:$0xff] }
 0x2d1   : > { %3462 = vmatpush.msrb.mxu2 %v1569_v60  ;;  %3481 = vmatpush.msrb.mxu3 %v1586_v61  ;;  %v1654_v60 = vld [vmem:[#allocation5 + $0x29c0] sm:$0xff]  ;;  %v2007_v61 = vpop.f32.mrf.mxu1  ;;  %v1725_v48 = vld [vmem:[#allocation5 + $0x2bf8] sm:$0xff] }
 0x2d2   : > { %3423 = vmatpush.msrb.mxu0 %v1536_v62  ;;  %3442 = vmatpush.msrb.mxu1 %v1553_v63  ;;  %v1604_v62 = vld [vmem:[#allocation5 + $0x2830] sm:$0xff]  ;;  %v1621_v63 = vld [vmem:[#allocation5 + $0x28b8] sm:$0xff] }
 0x2d3   : > { %3463 = vmatpush.msrb.mxu2 %v1568_v0  ;;  %3482 = vmatpush.msrb.mxu3 %v1585_v1  ;;  %v1636_v0 = vld [vmem:[#allocation5 + $0x2930] sm:$0xff]  ;;  %v1653_v1 = vld [vmem:[#allocation5 + $0x29b8] sm:$0xff] }
 0x2d4   : > { %3424 = vmatpush.msrb.mxu0 %v1535_v2  ;;  %3443 = vmatpush.msrb.mxu1 %v1552_v3  ;;  %v1603_v2 = vld [vmem:[#allocation5 + $0x2828] sm:$0xff]  ;;  %v1620_v3 = vld [vmem:[#allocation5 + $0x28b0] sm:$0xff] }
 0x2d5   : > { %3464 = vmatpush.msrb.mxu2 %v1567_v4  ;;  %3483 = vmatpush.msrb.mxu3 %v1584_v5  ;;  %v2008_v4 = vadd.f32 %v2007_v61, %v1988_v58  ;;  %v1635_v5 = vld [vmem:[#allocation5 + $0x2928] sm:$0xff]  ;;  %v1706_v58 = vld [vmem:[#allocation5 + $0x2b60] sm:$0xff] }
 0x2d6   : > { %3425 = vmatpush.msrb.mxu0 %v1534_v6  ;;  %3444 = vmatpush.msrb.mxu1 %v1551_v7  ;;  %v1652_v6 = vld [vmem:[#allocation5 + $0x29b0] sm:$0xff]  ;;  %v2027_v7 = vpop.f32.mrf.mxu2  ;;  %v1690_v61 = vld [vmem:[#allocation5 + $0x2ae0] sm:$0xff] }
 0x2d7   : > { %3465 = vmatpush.msrb.mxu2 %v1566_v9  ;;  %3484 = vmatpush.msrb.mxu3 %v1583_v10  ;;  %v1619_v9 = vld [vmem:[#allocation5 + $0x28a8] sm:$0xff]  ;;  %v1634_v10 = vld [vmem:[#allocation5 + $0x2920] sm:$0xff] }
 0x2d8   : > { %3426 = vmatmul.f32.vlgmr.msrb.gmra.mxu0 %v296_v12  ;;  %3466 = vmatmul.f32.vlgmr.msrb.gmra.mxu2 %v298_v13  ;;  %v1601_v12 = vld [vmem:[#allocation5 + $0x2818] sm:$0xff]  ;;  %v1618_v13 = vld [vmem:[#allocation5 + $0x28a0] sm:$0xff] }
 0x2d9   : > { %3490 = vmatpush.msra.mxu0 %v1613_v14  ;;  %3530 = vmatpush.msra.mxu2 %v1645_v15  ;;  %v2028_v14 = vadd.f32 %v2027_v7, %v2008_v4  ;;  %v1633_v15 = vld [vmem:[#allocation5 + $0x2918] sm:$0xff]  ;;  %v1704_v4 = vld [vmem:[#allocation5 + $0x2b50] sm:$0xff]  ;;  %v1671_v7 = vld [vmem:[#allocation5 + $0x2a48] sm:$0xff] }
 0x2da   : > { %3445 = vmatpush.msrb.mxu1 %v1550_v16  ;;  %3485 = vmatpush.msrb.mxu3 %v1582_v17  ;;  %v1650_v16 = vld [vmem:[#allocation5 + $0x29a0] sm:$0xff]  ;;  %v2047_v17 = vpop.f32.mrf.mxu3 }
 0x2db   : > { %3446 = vmatmul.f32.vlgmr.msrb.gmra.mxu1 %v297_v19  ;;  %3486 = vmatmul.f32.vlgmr.msrb.gmra.mxu3 %v299_v20  ;;  %v1617_v19 = vld [vmem:[#allocation5 + $0x2898] sm:$0xff]  ;;  %v1632_v20 = vld [vmem:[#allocation5 + $0x2910] sm:$0xff] }
 0x2dc   : > { %3491 = vmatpush.msra.mxu0 %v1612_v22  ;;  %3510 = vmatpush.msra.mxu1 %v1629_v23  ;;  %v2067_v22 = vpop.f32.mrf.mxu0  ;;  %v1599_v23 = vld [vmem:[#allocation5 + $0x2808] sm:$0xff] }
 0x2dd   : > { %3531 = vmatpush.msra.mxu2 %v1644_v24  ;;  %3550 = vmatpush.msra.mxu3 %v1661_v25  ;;  %v1616_v24 = vld [vmem:[#allocation5 + $0x2890] sm:$0xff]  ;;  %v2048_v25 = vadd.f32 %v2047_v17, %v2028_v14 }
 0x2de   : > { %3492 = vmatpush.msra.mxu0 %v1611_v26  ;;  %3511 = vmatpush.msra.mxu1 %v1628_v27  ;;  %v1631_v26 = vld [vmem:[#allocation5 + $0x2908] sm:$0xff]  ;;  %v1648_v27 = vld [vmem:[#allocation5 + $0x2990] sm:$0xff]  ;;  %v2107_v38 = vpop.f32.mrf.mxu2 }
 0x2df   : > { %3532 = vmatpush.msra.mxu2 %v1643_v29  ;;  %3551 = vmatpush.msra.mxu3 %v1660_v30  ;;  %v1615_v29 = vld [vmem:[#allocation5 + $0x2888] sm:$0xff]  ;;  %v2068_v30 = vadd.f32 %v2067_v22, %v2048_v25 }
 0x2e0   : > { %3493 = vmatpush.msra.mxu0 %v1610_v32  ;;  %3512 = vmatpush.msra.mxu1 %v1627_v33  ;;  %v1647_v32 = vld [vmem:[#allocation5 + $0x2988] sm:$0xff]  ;;  %v2087_v33 = vpop.f32.mrf.mxu1 }
 0x2e1   : > { %3533 = vmatpush.msra.mxu2 %v1642_v34  ;;  %3552 = vmatpush.msra.mxu3 %v1659_v35  ;;  %v300_v34 = vld [vmem:[%s4326_s23 + $0x280] sm:$0xff]  ;;  %v302_v35 = vld [vmem:[%s4326_s23 + $0x290] sm:$0xff]  ;;  %v2088_v41 = vadd.f32 %v2087_v33, %v2068_v30 }
 0x2e2   : > { %3494 = vmatpush.msra.mxu0 %v1609_v36  ;;  %3513 = vmatpush.msra.mxu1 %v1626_v37  ;;  %v1677_v36 = vld [vmem:[#allocation5 + $0x2a78] sm:$0xff] }
 0x2e3   : > { %3534 = vmatpush.msra.mxu2 %v1641_v39  ;;  %3553 = vmatpush.msra.mxu3 %v1658_v40  ;;  %v1709_v37 = vld [vmem:[#allocation5 + $0x2b78] sm:$0xff]  ;;  %v1614_v39 = vld [vmem:[#allocation5 + $0x2880] sm:$0xff] }
 0x2e4   : > { %3495 = vmatpush.msra.mxu0 %v1608_v42  ;;  %3514 = vmatpush.msra.mxu1 %v1625_v43  ;;  %v1646_v40 = vld [vmem:[#allocation5 + $0x2980] sm:$0xff]  ;;  %v301_v42 = vld [vmem:[%s4326_s23 + $0x288] sm:$0xff]  ;;  %v303_v43 = vld [vmem:[%s4326_s23 + $0x298] sm:$0xff] }
 0x2e5   : > { %3535 = vmatpush.msra.mxu2 %v1640_v44  ;;  %3554 = vmatpush.msra.mxu3 %v1657_v45  ;;  %v1676_v44 = vld [vmem:[#allocation5 + $0x2a70] sm:$0xff]  ;;  %v1693_v45 = vld [vmem:[#allocation5 + $0x2af8] sm:$0xff] }
 0x2e6   : > { %3496 = vmatpush.msra.mxu0 %v1607_v46  ;;  %3515 = vmatpush.msra.mxu1 %v1624_v47  ;;  %v2108_v46 = vadd.f32 %v2107_v38, %v2088_v41  ;;  %v1708_v47 = vld [vmem:[#allocation5 + $0x2b70] sm:$0xff] }
 0x2e7   : > { %3536 = vmatpush.msra.mxu2 %v1639_v49  ;;  %3555 = vmatpush.msra.mxu3 %v1656_v50  ;;  %v2127_v49 = vpop.f32.mrf.mxu3  ;;  %v1675_v50 = vld [vmem:[#allocation5 + $0x2a68] sm:$0xff] }
 0x2e8   : > { %3497 = vmatpush.msra.mxu0 %v1606_v52  ;;  %3516 = vmatpush.msra.mxu1 %v1623_v53  ;;  %v1707_v52 = vld [vmem:[#allocation5 + $0x2b68] sm:$0xff]  ;;  %v1724_v53 = vld [vmem:[#allocation5 + $0x2bf0] sm:$0xff] }
 0x2e9   : > { %3537 = vmatpush.msra.mxu2 %v1638_v54  ;;  %3556 = vmatpush.msra.mxu3 %v1655_v55  ;;  %v2147_v54 = vpop.f32.mrf.mxu0  ;;  %v1674_v55 = vld [vmem:[#allocation5 + $0x2a60] sm:$0xff] }
 0x2ea   : > { %3498 = vmatpush.msra.mxu0 %v1605_v56  ;;  %3517 = vmatpush.msra.mxu1 %v1622_v57  ;;  %v1691_v56 = vld [vmem:[#allocation5 + $0x2ae8] sm:$0xff]  ;;  %v2128_v57 = vadd.f32 %v2127_v49, %v2108_v46 }
 0x2eb   : > { %3538 = vmatpush.msra.mxu2 %v1637_v59  ;;  %3557 = vmatpush.msra.mxu3 %v1654_v60  ;;  %v1723_v59 = vld [vmem:[#allocation5 + $0x2be8] sm:$0xff]  ;;  %v1673_v60 = vld [vmem:[#allocation5 + $0x2a58] sm:$0xff] }
 0x2ec   : > { %3499 = vmatpush.msra.mxu0 %v1604_v62  ;;  %3518 = vmatpush.msra.mxu1 %v1621_v63  ;;  %v2148_v62 = vadd.f32 %v2147_v54, %v2128_v57  ;;  %v1705_v63 = vld [vmem:[#allocation5 + $0x2b58] sm:$0xff] }
 0x2ed   : > { %3539 = vmatpush.msra.mxu2 %v1636_v0  ;;  %3558 = vmatpush.msra.mxu3 %v1653_v1  ;;  %v1722_v0 = vld [vmem:[#allocation5 + $0x2be0] sm:$0xff]  ;;  %v2167_v1 = vpop.f32.mrf.mxu1 }
 0x2ee   : > { %3500 = vmatpush.msra.mxu0 %v1603_v2  ;;  %3519 = vmatpush.msra.mxu1 %v1620_v3  ;;  %v1672_v2 = vld [vmem:[#allocation5 + $0x2a50] sm:$0xff]  ;;  %v1689_v3 = vld [vmem:[#allocation5 + $0x2ad8] sm:$0xff] }
 0x2ef   : > { %3540 = vmatpush.msra.mxu2 %v1635_v5  ;;  %3559 = vmatpush.msra.mxu3 %v1652_v6  ;;  %v1721_v5 = vld [vmem:[#allocation5 + $0x2bd8] sm:$0xff]  ;;  %v2187_v6 = vpop.f32.mrf.mxu2  ;;  %v2207_v17 = vpop.f32.mrf.mxu3 }
 0x2f0   : > { %3501 = vmatpush.msra.mxu0 %v1602_v8  ;;  %3520 = vmatpush.msra.mxu1 %v1619_v9  ;;  %v1688_v8 = vld [vmem:[#allocation5 + $0x2ad0] sm:$0xff]  ;;  %v2168_v9 = vadd.f32 %v2167_v1, %v2148_v62 }
 0x2f1   : > { %3541 = vmatpush.msra.mxu2 %v1634_v10  ;;  %3560 = vmatpush.msra.mxu3 %v1651_v11  ;;  %v1703_v10 = vld [vmem:[#allocation5 + $0x2b48] sm:$0xff]  ;;  %v1720_v11 = vld [vmem:[#allocation5 + $0x2bd0] sm:$0xff]  ;;  %v2227_v22 = vpop.f32.mrf.mxu0 }
 0x2f2   : > { %3502 = vmatpush.msra.mxu0 %v1601_v12  ;;  %3521 = vmatpush.msra.mxu1 %v1618_v13  ;;  %v1670_v12 = vld [vmem:[#allocation5 + $0x2a40] sm:$0xff]  ;;  %v1687_v13 = vld [vmem:[#allocation5 + $0x2ac8] sm:$0xff]  ;;  %v2188_v14 = vadd.f32 %v2187_v6, %v2168_v9 }
 0x2f3   : > { %3542 = vmatpush.msra.mxu2 %v1633_v15  ;;  %3561 = vmatpush.msra.mxu3 %v1650_v16  ;;  %v1702_v15 = vld [vmem:[#allocation5 + $0x2b40] sm:$0xff]  ;;  %v1719_v16 = vld [vmem:[#allocation5 + $0x2bc8] sm:$0xff] }
 0x2f4   : > { %3503 = vmatpush.msra.mxu0 %v1600_v18  ;;  %3522 = vmatpush.msra.mxu1 %v1617_v19  ;;  %v1669_v18 = vld [vmem:[#allocation5 + $0x2a38] sm:$0xff]  ;;  %v1686_v19 = vld [vmem:[#allocation5 + $0x2ac0] sm:$0xff]  ;;  %v2208_v25 = vadd.f32 %v2207_v17, %v2188_v14 }
 0x2f5   : > { %3543 = vmatpush.msra.mxu2 %v1632_v20  ;;  %3562 = vmatpush.msra.mxu3 %v1649_v21  ;;  %v1701_v20 = vld [vmem:[#allocation5 + $0x2b38] sm:$0xff]  ;;  %v1718_v21 = vld [vmem:[#allocation5 + $0x2bc0] sm:$0xff]  ;;  %v2247_v33 = vpop.f32.mrf.mxu1 }
 0x2f6   : > { %3504 = vmatpush.msra.mxu0 %v1599_v23  ;;  %3523 = vmatpush.msra.mxu1 %v1616_v24  ;;  %v1668_v23 = vld [vmem:[#allocation5 + $0x2a30] sm:$0xff]  ;;  %v1685_v24 = vld [vmem:[#allocation5 + $0x2ab8] sm:$0xff]  ;;  %v2228_v30 = vadd.f32 %v2227_v22, %v2208_v25 }
 0x2f7   : > { %3544 = vmatpush.msra.mxu2 %v1631_v26  ;;  %3563 = vmatpush.msra.mxu3 %v1648_v27  ;;  %v1700_v26 = vld [vmem:[#allocation5 + $0x2b30] sm:$0xff]  ;;  %v1717_v27 = vld [vmem:[#allocation5 + $0x2bb8] sm:$0xff]  ;;  %v2267_v38 = vpop.f32.mrf.mxu2  ;;  %v2287_v49 = vpop.f32.mrf.mxu3 }
 0x2f8   : > { %3505 = vmatpush.msra.mxu0 %v1598_v28  ;;  %3524 = vmatpush.msra.mxu1 %v1615_v29  ;;  %v1667_v28 = vld [vmem:[#allocation5 + $0x2a28] sm:$0xff]  ;;  %v1684_v29 = vld [vmem:[#allocation5 + $0x2ab0] sm:$0xff]  ;;  %v2248_v41 = vadd.f32 %v2247_v33, %v2228_v30 }
 0x2f9   : > { %3545 = vmatpush.msra.mxu2 %v1630_v31  ;;  %3564 = vmatpush.msra.mxu3 %v1647_v32  ;;  %v1699_v31 = vld [vmem:[#allocation5 + $0x2b28] sm:$0xff]  ;;  %v1716_v32 = vld [vmem:[#allocation5 + $0x2bb0] sm:$0xff]  ;;  %v2307_v54 = vpop.f32.mrf.mxu0 }
 0x2fa   : > { %3506 = vmatmul.f32.vlgmr.msra.gmra.mxu0 %v300_v34  ;;  %3546 = vmatmul.f32.vlgmr.msra.gmra.mxu2 %v302_v35  ;;  %v1666_v34 = vld [vmem:[#allocation5 + $0x2a20] sm:$0xff]  ;;  %v1683_v35 = vld [vmem:[#allocation5 + $0x2aa8] sm:$0xff]  ;;  %v2268_v46 = vadd.f32 %v2267_v38, %v2248_v41 }
 0x2fb   : > { %3570 = vmatpush.msrb.mxu0 %v1677_v36  ;;  %3610 = vmatpush.msrb.mxu2 %v1709_v37  ;;  %v1698_v36 = vld [vmem:[#allocation5 + $0x2b20] sm:$0xff]  ;;  %v1715_v37 = vld [vmem:[#allocation5 + $0x2ba8] sm:$0xff] }
 0x2fc   : > { %3525 = vmatpush.msra.mxu1 %v1614_v39  ;;  %3565 = vmatpush.msra.mxu3 %v1646_v40  ;;  %v1665_v39 = vld [vmem:[#allocation5 + $0x2a18] sm:$0xff]  ;;  %v1682_v40 = vld [vmem:[#allocation5 + $0x2aa0] sm:$0xff]  ;;  %v2288_v57 = vadd.f32 %v2287_v49, %v2268_v46 }
 0x2fd   : > { %3526 = vmatmul.f32.vlgmr.msra.gmra.mxu1 %v301_v42  ;;  %3566 = vmatmul.f32.vlgmr.msra.gmra.mxu3 %v303_v43  ;;  %v1697_v42 = vld [vmem:[#allocation5 + $0x2b18] sm:$0xff]  ;;  %v1714_v43 = vld [vmem:[#allocation5 + $0x2ba0] sm:$0xff]  ;;  %v2327_v1 = vpop.f32.mrf.mxu1 }
 0x2fe   : > { %3571 = vmatpush.msrb.mxu0 %v1676_v44  ;;  %3590 = vmatpush.msrb.mxu1 %v1693_v45  ;;  %v1664_v44 = vld [vmem:[#allocation5 + $0x2a10] sm:$0xff]  ;;  %v1681_v45 = vld [vmem:[#allocation5 + $0x2a98] sm:$0xff]  ;;  %v2308_v62 = vadd.f32 %v2307_v54, %v2288_v57 }
 0x2ff   : > { %3611 = vmatpush.msrb.mxu2 %v1708_v47  ;;  %3630 = vmatpush.msrb.mxu3 %v1725_v48  ;;  %v1696_v47 = vld [vmem:[#allocation5 + $0x2b10] sm:$0xff]  ;;  %v1713_v48 = vld [vmem:[#allocation5 + $0x2b98] sm:$0xff]  ;;  %v2347_v6 = vpop.f32.mrf.mxu2  ;;  %v2367_v17 = vpop.f32.mrf.mxu3 }
 0x300   : > { %3572 = vmatpush.msrb.mxu0 %v1675_v50  ;;  %3591 = vmatpush.msrb.mxu1 %v1692_v51  ;;  %v1663_v50 = vld [vmem:[#allocation5 + $0x2a08] sm:$0xff]  ;;  %v1680_v51 = vld [vmem:[#allocation5 + $0x2a90] sm:$0xff]  ;;  %v2328_v9 = vadd.f32 %v2327_v1, %v2308_v62 }
 0x301   : > { %3612 = vmatpush.msrb.mxu2 %v1707_v52  ;;  %3631 = vmatpush.msrb.mxu3 %v1724_v53  ;;  %v1695_v52 = vld [vmem:[#allocation5 + $0x2b08] sm:$0xff]  ;;  %v1712_v53 = vld [vmem:[#allocation5 + $0x2b90] sm:$0xff]  ;;  %v2387_v22 = vpop.f32.mrf.mxu0 }
 0x302   : > { %3573 = vmatpush.msrb.mxu0 %v1674_v55  ;;  %3592 = vmatpush.msrb.mxu1 %v1691_v56  ;;  %v1662_v55 = vld [vmem:[#allocation5 + $0x2a00] sm:$0xff]  ;;  %v1679_v56 = vld [vmem:[#allocation5 + $0x2a88] sm:$0xff]  ;;  %v2348_v14 = vadd.f32 %v2347_v6, %v2328_v9 }
 0x303   : > { %3613 = vmatpush.msrb.mxu2 %v1706_v58  ;;  %3632 = vmatpush.msrb.mxu3 %v1723_v59  ;;  %v1694_v58 = vld [vmem:[#allocation5 + $0x2b00] sm:$0xff]  ;;  %v1711_v59 = vld [vmem:[#allocation5 + $0x2b88] sm:$0xff] }
 0x304   : > { %3574 = vmatpush.msrb.mxu0 %v1673_v60  ;;  %3593 = vmatpush.msrb.mxu1 %v1690_v61  ;;  %v304_v60 = vld [vmem:[%s4326_s23 + $0x2a0] sm:$0xff]  ;;  %v306_v61 = vld [vmem:[%s4326_s23 + $0x2b0] sm:$0xff]  ;;  %v2368_v25 = vadd.f32 %v2367_v17, %v2348_v14 }
 0x305   : > { %3614 = vmatpush.msrb.mxu2 %v1705_v63  ;;  %3633 = vmatpush.msrb.mxu3 %v1722_v0  ;;  %v1741_v63 = vld [vmem:[#allocation5 + $0x2c78] sm:$0xff]  ;;  %v2407_v33 = vpop.f32.mrf.mxu1 }
 0x306   : > { %3575 = vmatpush.msrb.mxu0 %v1672_v2  ;;  %3594 = vmatpush.msrb.mxu1 %v1689_v3  ;;  %v1773_v0 = vld [vmem:[#allocation5 + $0x2d78] sm:$0xff]  ;;  %v1678_v2 = vld [vmem:[#allocation5 + $0x2a80] sm:$0xff]  ;;  %v2388_v30 = vadd.f32 %v2387_v22, %v2368_v25 }
 0x307   : > { %3615 = vmatpush.msrb.mxu2 %v1704_v4  ;;  %3634 = vmatpush.msrb.mxu3 %v1721_v5  ;;  %v1710_v3 = vld [vmem:[#allocation5 + $0x2b80] sm:$0xff]  ;;  %v305_v4 = vld [vmem:[%s4326_s23 + $0x2a8] sm:$0xff]  ;;  %v307_v5 = vld [vmem:[%s4326_s23 + $0x2b8] sm:$0xff]  ;;  %v2427_v38 = vpop.f32.mrf.mxu2  ;;  %v2447_v49 = vpop.f32.mrf.mxu3 }
 0x308   : > { %3576 = vmatpush.msrb.mxu0 %v1671_v7  ;;  %3595 = vmatpush.msrb.mxu1 %v1688_v8  ;;  %v1740_v7 = vld [vmem:[#allocation5 + $0x2c70] sm:$0xff]  ;;  %v1757_v8 = vld [vmem:[#allocation5 + $0x2cf8] sm:$0xff]  ;;  %v2408_v41 = vadd.f32 %v2407_v33, %v2388_v30 }
 0x309   : > { %3616 = vmatpush.msrb.mxu2 %v1703_v10  ;;  %3635 = vmatpush.msrb.mxu3 %v1720_v11  ;;  %v1772_v10 = vld [vmem:[#allocation5 + $0x2d70] sm:$0xff]  ;;  %v1789_v11 = vld [vmem:[#allocation5 + $0x2df8] sm:$0xff]  ;;  %v2467_v54 = vpop.f32.mrf.mxu0 }
 0x30a   : > { %3577 = vmatpush.msrb.mxu0 %v1670_v12  ;;  %3596 = vmatpush.msrb.mxu1 %v1687_v13  ;;  %v1739_v12 = vld [vmem:[#allocation5 + $0x2c68] sm:$0xff]  ;;  %v1756_v13 = vld [vmem:[#allocation5 + $0x2cf0] sm:$0xff]  ;;  %v2428_v46 = vadd.f32 %v2427_v38, %v2408_v41 }
 0x30b   : > { %3617 = vmatpush.msrb.mxu2 %v1702_v15  ;;  %3636 = vmatpush.msrb.mxu3 %v1719_v16  ;;  %v1771_v15 = vld [vmem:[#allocation5 + $0x2d68] sm:$0xff]  ;;  %v1788_v16 = vld [vmem:[#allocation5 + $0x2df0] sm:$0xff] }
 0x30c   : > { %3578 = vmatpush.msrb.mxu0 %v1669_v18  ;;  %3597 = vmatpush.msrb.mxu1 %v1686_v19  ;;  %v1738_v18 = vld [vmem:[#allocation5 + $0x2c60] sm:$0xff]  ;;  %v1755_v19 = vld [vmem:[#allocation5 + $0x2ce8] sm:$0xff]  ;;  %v2448_v57 = vadd.f32 %v2447_v49, %v2428_v46 }
 0x30d   : > { %3618 = vmatpush.msrb.mxu2 %v1701_v20  ;;  %3637 = vmatpush.msrb.mxu3 %v1718_v21  ;;  %v1770_v20 = vld [vmem:[#allocation5 + $0x2d60] sm:$0xff]  ;;  %v1787_v21 = vld [vmem:[#allocation5 + $0x2de8] sm:$0xff]  ;;  %v2487_v1 = vpop.f32.mrf.mxu1 }
 0x30e   : > { %3579 = vmatpush.msrb.mxu0 %v1668_v23  ;;  %3598 = vmatpush.msrb.mxu1 %v1685_v24  ;;  %v1737_v23 = vld [vmem:[#allocation5 + $0x2c58] sm:$0xff]  ;;  %v1754_v24 = vld [vmem:[#allocation5 + $0x2ce0] sm:$0xff]  ;;  %v2468_v62 = vadd.f32 %v2467_v54, %v2448_v57 }
 0x30f   : > { %3619 = vmatpush.msrb.mxu2 %v1700_v26  ;;  %3638 = vmatpush.msrb.mxu3 %v1717_v27  ;;  %v1769_v26 = vld [vmem:[#allocation5 + $0x2d58] sm:$0xff]  ;;  %v1786_v27 = vld [vmem:[#allocation5 + $0x2de0] sm:$0xff]  ;;  %v2507_v6 = vpop.f32.mrf.mxu2  ;;  %v2527_v17 = vpop.f32.mrf.mxu3 }
 0x310   : > { %3580 = vmatpush.msrb.mxu0 %v1667_v28  ;;  %3599 = vmatpush.msrb.mxu1 %v1684_v29  ;;  %v1736_v28 = vld [vmem:[#allocation5 + $0x2c50] sm:$0xff]  ;;  %v1753_v29 = vld [vmem:[#allocation5 + $0x2cd8] sm:$0xff]  ;;  %v2488_v9 = vadd.f32 %v2487_v1, %v2468_v62 }
 0x311   : > { %3620 = vmatpush.msrb.mxu2 %v1699_v31  ;;  %3639 = vmatpush.msrb.mxu3 %v1716_v32  ;;  %v1768_v31 = vld [vmem:[#allocation5 + $0x2d50] sm:$0xff]  ;;  %v1785_v32 = vld [vmem:[#allocation5 + $0x2dd8] sm:$0xff]  ;;  %v2547_v22 = vpop.f32.mrf.mxu0 }
 0x312   : > { %3581 = vmatpush.msrb.mxu0 %v1666_v34  ;;  %3600 = vmatpush.msrb.mxu1 %v1683_v35  ;;  %v1735_v34 = vld [vmem:[#allocation5 + $0x2c48] sm:$0xff]  ;;  %v1752_v35 = vld [vmem:[#allocation5 + $0x2cd0] sm:$0xff]  ;;  %v2508_v14 = vadd.f32 %v2507_v6, %v2488_v9 }
 0x313   : > { %3621 = vmatpush.msrb.mxu2 %v1698_v36  ;;  %3640 = vmatpush.msrb.mxu3 %v1715_v37  ;;  %v1767_v36 = vld [vmem:[#allocation5 + $0x2d48] sm:$0xff]  ;;  %v1784_v37 = vld [vmem:[#allocation5 + $0x2dd0] sm:$0xff] }
 0x314   : > { %3582 = vmatpush.msrb.mxu0 %v1665_v39  ;;  %3601 = vmatpush.msrb.mxu1 %v1682_v40  ;;  %v1734_v39 = vld [vmem:[#allocation5 + $0x2c40] sm:$0xff]  ;;  %v1751_v40 = vld [vmem:[#allocation5 + $0x2cc8] sm:$0xff]  ;;  %v2528_v25 = vadd.f32 %v2527_v17, %v2508_v14 }
 0x315   : > { %3622 = vmatpush.msrb.mxu2 %v1697_v42  ;;  %3641 = vmatpush.msrb.mxu3 %v1714_v43  ;;  %v1766_v42 = vld [vmem:[#allocation5 + $0x2d40] sm:$0xff]  ;;  %v1783_v43 = vld [vmem:[#allocation5 + $0x2dc8] sm:$0xff]  ;;  %v2567_v33 = vpop.f32.mrf.mxu1 }
 0x316   : > { %3583 = vmatpush.msrb.mxu0 %v1664_v44  ;;  %3602 = vmatpush.msrb.mxu1 %v1681_v45  ;;  %v1733_v44 = vld [vmem:[#allocation5 + $0x2c38] sm:$0xff]  ;;  %v1750_v45 = vld [vmem:[#allocation5 + $0x2cc0] sm:$0xff]  ;;  %v2548_v30 = vadd.f32 %v2547_v22, %v2528_v25 }
 0x317   : > { %3623 = vmatpush.msrb.mxu2 %v1696_v47  ;;  %3642 = vmatpush.msrb.mxu3 %v1713_v48  ;;  %v1765_v47 = vld [vmem:[#allocation5 + $0x2d38] sm:$0xff]  ;;  %v1782_v48 = vld [vmem:[#allocation5 + $0x2dc0] sm:$0xff]  ;;  %v2587_v38 = vpop.f32.mrf.mxu2  ;;  %v2607_v49 = vpop.f32.mrf.mxu3 }
 0x318   : > { %3584 = vmatpush.msrb.mxu0 %v1663_v50  ;;  %3603 = vmatpush.msrb.mxu1 %v1680_v51  ;;  %v1732_v50 = vld [vmem:[#allocation5 + $0x2c30] sm:$0xff]  ;;  %v1749_v51 = vld [vmem:[#allocation5 + $0x2cb8] sm:$0xff]  ;;  %v2568_v41 = vadd.f32 %v2567_v33, %v2548_v30 }
 0x319   : > { %3624 = vmatpush.msrb.mxu2 %v1695_v52  ;;  %3643 = vmatpush.msrb.mxu3 %v1712_v53  ;;  %v1764_v52 = vld [vmem:[#allocation5 + $0x2d30] sm:$0xff]  ;;  %v1781_v53 = vld [vmem:[#allocation5 + $0x2db8] sm:$0xff]  ;;  %v2627_v54 = vpop.f32.mrf.mxu0 }
 0x31a   : > { %3585 = vmatpush.msrb.mxu0 %v1662_v55  ;;  %3604 = vmatpush.msrb.mxu1 %v1679_v56  ;;  %v1731_v55 = vld [vmem:[#allocation5 + $0x2c28] sm:$0xff]  ;;  %v1748_v56 = vld [vmem:[#allocation5 + $0x2cb0] sm:$0xff]  ;;  %v2588_v46 = vadd.f32 %v2587_v38, %v2568_v41 }
 0x31b   : > { %3625 = vmatpush.msrb.mxu2 %v1694_v58  ;;  %3644 = vmatpush.msrb.mxu3 %v1711_v59  ;;  %v1763_v58 = vld [vmem:[#allocation5 + $0x2d28] sm:$0xff]  ;;  %v1780_v59 = vld [vmem:[#allocation5 + $0x2db0] sm:$0xff] }
 0x31c   : > { %3586 = vmatmul.f32.vlgmr.msrb.gmra.mxu0 %v304_v60  ;;  %3626 = vmatmul.f32.vlgmr.msrb.gmra.mxu2 %v306_v61  ;;  %v1730_v60 = vld [vmem:[#allocation5 + $0x2c20] sm:$0xff]  ;;  %v1747_v61 = vld [vmem:[#allocation5 + $0x2ca8] sm:$0xff]  ;;  %v2608_v57 = vadd.f32 %v2607_v49, %v2588_v46 }
 0x31d   : > { %3650 = vmatpush.msra.mxu0 %v1741_v63  ;;  %3690 = vmatpush.msra.mxu2 %v1773_v0  ;;  %v1762_v63 = vld [vmem:[#allocation5 + $0x2d20] sm:$0xff]  ;;  %v1779_v0 = vld [vmem:[#allocation5 + $0x2da8] sm:$0xff]  ;;  %v2647_v1 = vpop.f32.mrf.mxu1 }
 0x31e   : > { %3605 = vmatpush.msrb.mxu1 %v1678_v2  ;;  %3645 = vmatpush.msrb.mxu3 %v1710_v3  ;;  %v1729_v2 = vld [vmem:[#allocation5 + $0x2c18] sm:$0xff]  ;;  %v1746_v3 = vld [vmem:[#allocation5 + $0x2ca0] sm:$0xff]  ;;  %v2628_v62 = vadd.f32 %v2627_v54, %v2608_v57 }
 0x31f   : > { %3606 = vmatmul.f32.vlgmr.msrb.gmra.mxu1 %v305_v4  ;;  %3646 = vmatmul.f32.vlgmr.msrb.gmra.mxu3 %v307_v5  ;;  %v1761_v4 = vld [vmem:[#allocation5 + $0x2d18] sm:$0xff]  ;;  %v1778_v5 = vld [vmem:[#allocation5 + $0x2da0] sm:$0xff]  ;;  %v2667_v6 = vpop.f32.mrf.mxu2  ;;  %v2687_v17 = vpop.f32.mrf.mxu3 }
 0x320   : > { %3651 = vmatpush.msra.mxu0 %v1740_v7  ;;  %3670 = vmatpush.msra.mxu1 %v1757_v8  ;;  %v1728_v7 = vld [vmem:[#allocation5 + $0x2c10] sm:$0xff]  ;;  %v1745_v8 = vld [vmem:[#allocation5 + $0x2c98] sm:$0xff]  ;;  %v2648_v9 = vadd.f32 %v2647_v1, %v2628_v62  ;;  %v1867_v62 = vld [vmem:[#allocation5 + $0x3068] sm:$0xff] }
 0x321   : > { %3691 = vmatpush.msra.mxu2 %v1772_v10  ;;  %3710 = vmatpush.msra.mxu3 %v1789_v11  ;;  %v1760_v10 = vld [vmem:[#allocation5 + $0x2d10] sm:$0xff]  ;;  %v1777_v11 = vld [vmem:[#allocation5 + $0x2d98] sm:$0xff]  ;;  %v2707_v22 = vpop.f32.mrf.mxu0  ;;  %v1866_v1 = vld [vmem:[#allocation5 + $0x3060] sm:$0xff] }
 0x322   : > { %3652 = vmatpush.msra.mxu0 %v1739_v12  ;;  %3671 = vmatpush.msra.mxu1 %v1756_v13  ;;  %v1727_v12 = vld [vmem:[#allocation5 + $0x2c08] sm:$0xff]  ;;  %v1744_v13 = vld [vmem:[#allocation5 + $0x2c90] sm:$0xff]  ;;  %v2668_v14 = vadd.f32 %v2667_v6, %v2648_v9  ;;  %v1882_v6 = vld [vmem:[#allocation5 + $0x30e0] sm:$0xff] }
 0x323   : > { %3692 = vmatpush.msra.mxu2 %v1771_v15  ;;  %3711 = vmatpush.msra.mxu3 %v1788_v16  ;;  %v1759_v15 = vld [vmem:[#allocation5 + $0x2d08] sm:$0xff]  ;;  %v1776_v16 = vld [vmem:[#allocation5 + $0x2d90] sm:$0xff] }
 0x324   : > { %3653 = vmatpush.msra.mxu0 %v1738_v18  ;;  %3672 = vmatpush.msra.mxu1 %v1755_v19  ;;  %v1726_v18 = vld [vmem:[#allocation5 + $0x2c00] sm:$0xff]  ;;  %v1743_v19 = vld [vmem:[#allocation5 + $0x2c88] sm:$0xff]  ;;  %v2688_v25 = vadd.f32 %v2687_v17, %v2668_v14 }
 0x325   : > { %3693 = vmatpush.msra.mxu2 %v1770_v20  ;;  %3712 = vmatpush.msra.mxu3 %v1787_v21  ;;  %v1758_v20 = vld [vmem:[#allocation5 + $0x2d00] sm:$0xff]  ;;  %v1775_v21 = vld [vmem:[#allocation5 + $0x2d88] sm:$0xff]  ;;  %v2727_v33 = vpop.f32.mrf.mxu1 }
 0x326   : > { %3654 = vmatpush.msra.mxu0 %v1737_v23  ;;  %3673 = vmatpush.msra.mxu1 %v1754_v24  ;;  %v308_v23 = vld [vmem:[%s4326_s23 + $0x2c0] sm:$0xff]  ;;  %v310_v24 = vld [vmem:[%s4326_s23 + $0x2d0] sm:$0xff]  ;;  %v2708_v30 = vadd.f32 %v2707_v22, %v2688_v25  ;;  %v1859_v25 = vld [vmem:[#allocation5 + $0x3028] sm:$0xff] }
 0x327   : > { %3694 = vmatpush.msra.mxu2 %v1769_v26  ;;  %3713 = vmatpush.msra.mxu3 %v1786_v27  ;;  %v1805_v26 = vld [vmem:[#allocation5 + $0x2e78] sm:$0xff]  ;;  %v2747_v38 = vpop.f32.mrf.mxu2  ;;  %v2767_v49 = vpop.f32.mrf.mxu3 }
 0x328   : > { %3655 = vmatpush.msra.mxu0 %v1736_v28  ;;  %3674 = vmatpush.msra.mxu1 %v1753_v29  ;;  %v1837_v27 = vld [vmem:[#allocation5 + $0x2f78] sm:$0xff]  ;;  %v1742_v28 = vld [vmem:[#allocation5 + $0x2c80] sm:$0xff]  ;;  %v2728_v41 = vadd.f32 %v2727_v33, %v2708_v30  ;;  %v1875_v30 = vld [vmem:[#allocation5 + $0x30a8] sm:$0xff] }
 0x329   : > { %3695 = vmatpush.msra.mxu2 %v1768_v31  ;;  %3714 = vmatpush.msra.mxu3 %v1785_v32  ;;  %v1774_v29 = vld [vmem:[#allocation5 + $0x2d80] sm:$0xff]  ;;  %v309_v31 = vld [vmem:[%s4326_s23 + $0x2c8] sm:$0xff]  ;;  %v311_v32 = vld [vmem:[%s4326_s23 + $0x2d8] sm:$0xff]  ;;  %v2787_v54 = vpop.f32.mrf.mxu0 }
 0x32a   : > { %3656 = vmatpush.msra.mxu0 %v1735_v34  ;;  %3675 = vmatpush.msra.mxu1 %v1752_v35  ;;  %v1804_v34 = vld [vmem:[#allocation5 + $0x2e70] sm:$0xff]  ;;  %v1821_v35 = vld [vmem:[#allocation5 + $0x2ef8] sm:$0xff]  ;;  %v2748_v46 = vadd.f32 %v2747_v38, %v2728_v41  ;;  %v1874_v33 = vld [vmem:[#allocation5 + $0x30a0] sm:$0xff] }
 0x32b   : > { %3696 = vmatpush.msra.mxu2 %v1767_v36  ;;  %3715 = vmatpush.msra.mxu3 %v1784_v37  ;;  %v1836_v36 = vld [vmem:[#allocation5 + $0x2f70] sm:$0xff]  ;;  %v1853_v37 = vld [vmem:[#allocation5 + $0x2ff8] sm:$0xff]  ;;  %v1855_v38 = vld [vmem:[#allocation5 + $0x3008] sm:$0xff] }
 0x32c   : > { %3657 = vmatpush.msra.mxu0 %v1734_v39  ;;  %3676 = vmatpush.msra.mxu1 %v1751_v40  ;;  %v1803_v39 = vld [vmem:[#allocation5 + $0x2e68] sm:$0xff]  ;;  %v1820_v40 = vld [vmem:[#allocation5 + $0x2ef0] sm:$0xff]  ;;  %v2768_v57 = vadd.f32 %v2767_v49, %v2748_v46  ;;  %v1854_v41 = vld [vmem:[#allocation5 + $0x3000] sm:$0xff] }
 0x32d   : > { %3697 = vmatpush.msra.mxu2 %v1766_v42  ;;  %3716 = vmatpush.msra.mxu3 %v1783_v43  ;;  %v1835_v42 = vld [vmem:[#allocation5 + $0x2f68] sm:$0xff]  ;;  %v1852_v43 = vld [vmem:[#allocation5 + $0x2ff0] sm:$0xff]  ;;  %v1870_v46 = vld [vmem:[#allocation5 + $0x3080] sm:$0xff] }
 0x32e   : > { %3658 = vmatpush.msra.mxu0 %v1733_v44  ;;  %3677 = vmatpush.msra.mxu1 %v1750_v45  ;;  %v1802_v44 = vld [vmem:[#allocation5 + $0x2e60] sm:$0xff]  ;;  %v1819_v45 = vld [vmem:[#allocation5 + $0x2ee8] sm:$0xff] }
 0x32f   : > { %3698 = vmatpush.msra.mxu2 %v1765_v47  ;;  %3717 = vmatpush.msra.mxu3 %v1782_v48  ;;  %v1834_v47 = vld [vmem:[#allocation5 + $0x2f60] sm:$0xff]  ;;  %v1851_v48 = vld [vmem:[#allocation5 + $0x2fe8] sm:$0xff]  ;;  %v2847_v9 = vpop.f32.mrf.mxu3 }
 0x330   : > { %3659 = vmatpush.msra.mxu0 %v1732_v50  ;;  %3678 = vmatpush.msra.mxu1 %v1749_v51  ;;  %v1801_v50 = vld [vmem:[#allocation5 + $0x2e58] sm:$0xff]  ;;  %v1818_v51 = vld [vmem:[#allocation5 + $0x2ee0] sm:$0xff] }
 0x331   : > { %3699 = vmatpush.msra.mxu2 %v1764_v52  ;;  %3718 = vmatpush.msra.mxu3 %v1781_v53  ;;  %v1833_v52 = vld [vmem:[#allocation5 + $0x2f58] sm:$0xff]  ;;  %v1850_v53 = vld [vmem:[#allocation5 + $0x2fe0] sm:$0xff] }
 0x332   : > { %3660 = vmatpush.msra.mxu0 %v1731_v55  ;;  %3679 = vmatpush.msra.mxu1 %v1748_v56  ;;  %v1800_v55 = vld [vmem:[#allocation5 + $0x2e50] sm:$0xff]  ;;  %v1817_v56 = vld [vmem:[#allocation5 + $0x2ed8] sm:$0xff] }
 0x333   : > { %3700 = vmatpush.msra.mxu2 %v1763_v58  ;;  %3719 = vmatpush.msra.mxu3 %v1780_v59  ;;  %v1832_v58 = vld [vmem:[#allocation5 + $0x2f50] sm:$0xff]  ;;  %v1849_v59 = vld [vmem:[#allocation5 + $0x2fd8] sm:$0xff] }
 0x334   : > { %3661 = vmatpush.msra.mxu0 %v1730_v60  ;;  %3680 = vmatpush.msra.mxu1 %v1747_v61  ;;  %v1799_v60 = vld [vmem:[#allocation5 + $0x2e48] sm:$0xff]  ;;  %v1816_v61 = vld [vmem:[#allocation5 + $0x2ed0] sm:$0xff] }
 0x335   : > { %3701 = vmatpush.msra.mxu2 %v1762_v63  ;;  %3720 = vmatpush.msra.mxu3 %v1779_v0  ;;  %v1831_v63 = vld [vmem:[#allocation5 + $0x2f48] sm:$0xff]  ;;  %v1848_v0 = vld [vmem:[#allocation5 + $0x2fd0] sm:$0xff] }
 0x336   : > { %3662 = vmatpush.msra.mxu0 %v1729_v2  ;;  %3681 = vmatpush.msra.mxu1 %v1746_v3  ;;  %v1798_v2 = vld [vmem:[#allocation5 + $0x2e40] sm:$0xff]  ;;  %v1815_v3 = vld [vmem:[#allocation5 + $0x2ec8] sm:$0xff] }
 0x337   : > { %3702 = vmatpush.msra.mxu2 %v1761_v4  ;;  %3721 = vmatpush.msra.mxu3 %v1778_v5  ;;  %v1830_v4 = vld [vmem:[#allocation5 + $0x2f40] sm:$0xff]  ;;  %v1847_v5 = vld [vmem:[#allocation5 + $0x2fc8] sm:$0xff] }
 0x338   : > { %3663 = vmatpush.msra.mxu0 %v1728_v7  ;;  %3682 = vmatpush.msra.mxu1 %v1745_v8  ;;  %v1797_v7 = vld [vmem:[#allocation5 + $0x2e38] sm:$0xff]  ;;  %v1814_v8 = vld [vmem:[#allocation5 + $0x2ec0] sm:$0xff] }
 0x339   : > { %3703 = vmatpush.msra.mxu2 %v1760_v10  ;;  %3722 = vmatpush.msra.mxu3 %v1777_v11  ;;  %v1829_v10 = vld [vmem:[#allocation5 + $0x2f38] sm:$0xff]  ;;  %v1846_v11 = vld [vmem:[#allocation5 + $0x2fc0] sm:$0xff] }
 0x33a   : > { %3664 = vmatpush.msra.mxu0 %v1727_v12  ;;  %3683 = vmatpush.msra.mxu1 %v1744_v13  ;;  %v1796_v12 = vld [vmem:[#allocation5 + $0x2e30] sm:$0xff]  ;;  %v1813_v13 = vld [vmem:[#allocation5 + $0x2eb8] sm:$0xff] }
 0x33b   : > { %3704 = vmatpush.msra.mxu2 %v1759_v15  ;;  %3723 = vmatpush.msra.mxu3 %v1776_v16  ;;  %v1828_v15 = vld [vmem:[#allocation5 + $0x2f30] sm:$0xff]  ;;  %v1845_v16 = vld [vmem:[#allocation5 + $0x2fb8] sm:$0xff] }
 0x33c   : > { %3665 = vmatpush.msra.mxu0 %v1726_v18  ;;  %3684 = vmatpush.msra.mxu1 %v1743_v19  ;;  %v1795_v18 = vld [vmem:[#allocation5 + $0x2e28] sm:$0xff]  ;;  %v1812_v19 = vld [vmem:[#allocation5 + $0x2eb0] sm:$0xff] }
 0x33d   : > { %3705 = vmatpush.msra.mxu2 %v1758_v20  ;;  %3724 = vmatpush.msra.mxu3 %v1775_v21  ;;  %v1827_v20 = vld [vmem:[#allocation5 + $0x2f28] sm:$0xff]  ;;  %v1844_v21 = vld [vmem:[#allocation5 + $0x2fb0] sm:$0xff] }
 0x33e   : > { %3666 = vmatmul.f32.vlgmr.msra.gmra.mxu0 %v308_v23  ;;  %3706 = vmatmul.f32.vlgmr.msra.gmra.mxu2 %v310_v24  ;;  %v1794_v23 = vld [vmem:[#allocation5 + $0x2e20] sm:$0xff]  ;;  %v1811_v24 = vld [vmem:[#allocation5 + $0x2ea8] sm:$0xff] }
 0x33f   : > { %3730 = vmatpush.msrb.mxu0 %v1805_v26  ;;  %3770 = vmatpush.msrb.mxu2 %v1837_v27  ;;  %v1826_v26 = vld [vmem:[#allocation5 + $0x2f20] sm:$0xff]  ;;  %v1843_v27 = vld [vmem:[#allocation5 + $0x2fa8] sm:$0xff] }
 0x340   : > { %3685 = vmatpush.msra.mxu1 %v1742_v28  ;;  %3725 = vmatpush.msra.mxu3 %v1774_v29  ;;  %v1793_v28 = vld [vmem:[#allocation5 + $0x2e18] sm:$0xff]  ;;  %v1810_v29 = vld [vmem:[#allocation5 + $0x2ea0] sm:$0xff] }
 0x341   : > { %3686 = vmatmul.f32.vlgmr.msra.gmra.mxu1 %v309_v31  ;;  %3726 = vmatmul.f32.vlgmr.msra.gmra.mxu3 %v311_v32  ;;  %v1825_v31 = vld [vmem:[#allocation5 + $0x2f18] sm:$0xff]  ;;  %v1842_v32 = vld [vmem:[#allocation5 + $0x2fa0] sm:$0xff] }
 0x342   : > { %3731 = vmatpush.msrb.mxu0 %v1804_v34  ;;  %3750 = vmatpush.msrb.mxu1 %v1821_v35  ;;  %v1792_v34 = vld [vmem:[#allocation5 + $0x2e10] sm:$0xff]  ;;  %v1809_v35 = vld [vmem:[#allocation5 + $0x2e98] sm:$0xff] }
 0x343   : > { %3771 = vmatpush.msrb.mxu2 %v1836_v36  ;;  %3790 = vmatpush.msrb.mxu3 %v1853_v37  ;;  %v1824_v36 = vld [vmem:[#allocation5 + $0x2f10] sm:$0xff]  ;;  %v1841_v37 = vld [vmem:[#allocation5 + $0x2f98] sm:$0xff] }
 0x344   : > { %3732 = vmatpush.msrb.mxu0 %v1803_v39  ;;  %3751 = vmatpush.msrb.mxu1 %v1820_v40  ;;  %v1791_v39 = vld [vmem:[#allocation5 + $0x2e08] sm:$0xff]  ;;  %v1808_v40 = vld [vmem:[#allocation5 + $0x2e90] sm:$0xff] }
 0x345   : > { %3772 = vmatpush.msrb.mxu2 %v1835_v42  ;;  %3791 = vmatpush.msrb.mxu3 %v1852_v43  ;;  %v1823_v42 = vld [vmem:[#allocation5 + $0x2f08] sm:$0xff]  ;;  %v1840_v43 = vld [vmem:[#allocation5 + $0x2f90] sm:$0xff] }
 0x346   : > { %3733 = vmatpush.msrb.mxu0 %v1802_v44  ;;  %3752 = vmatpush.msrb.mxu1 %v1819_v45  ;;  %v1790_v44 = vld [vmem:[#allocation5 + $0x2e00] sm:$0xff]  ;;  %v1807_v45 = vld [vmem:[#allocation5 + $0x2e88] sm:$0xff] }
 0x347   : > { %3773 = vmatpush.msrb.mxu2 %v1834_v47  ;;  %3792 = vmatpush.msrb.mxu3 %v1851_v48  ;;  %v1822_v47 = vld [vmem:[#allocation5 + $0x2f00] sm:$0xff]  ;;  %v1839_v48 = vld [vmem:[#allocation5 + $0x2f88] sm:$0xff] }
 0x348   : > { %3734 = vmatpush.msrb.mxu0 %v1801_v50  ;;  %3753 = vmatpush.msrb.mxu1 %v1818_v51  ;;  %v312_v50 = vld [vmem:[%s4326_s23 + $0x2e0] sm:$0xff]  ;;  %v314_v51 = vld [vmem:[%s4326_s23 + $0x2f0] sm:$0xff] }
 0x349   : > { %3774 = vmatpush.msrb.mxu2 %v1833_v52  ;;  %3793 = vmatpush.msrb.mxu3 %v1850_v53  ;;  %v1869_v52 = vld [vmem:[#allocation5 + $0x3078] sm:$0xff]  ;;  %v1806_v53 = vld [vmem:[#allocation5 + $0x2e80] sm:$0xff] }
 0x34a   : > { %3735 = vmatpush.msrb.mxu0 %v1800_v55  ;;  %3754 = vmatpush.msrb.mxu1 %v1817_v56  ;;  %v1838_v55 = vld [vmem:[#allocation5 + $0x2f80] sm:$0xff]  ;;  %v313_v56 = vld [vmem:[%s4326_s23 + $0x2e8] sm:$0xff] }
 0x34b   : > { %3775 = vmatpush.msrb.mxu2 %v1832_v58  ;;  %3794 = vmatpush.msrb.mxu3 %v1849_v59  ;;  %v315_v58 = vld [vmem:[%s4326_s23 + $0x2f8] sm:$0xff]  ;;  %v1868_v59 = vld [vmem:[#allocation5 + $0x3070] sm:$0xff] }
 0x34c   : > { %3736 = vmatpush.msrb.mxu0 %v1799_v60  ;;  %3755 = vmatpush.msrb.mxu1 %v1816_v61  ;;  %v1885_v60 = vld [vmem:[#allocation5 + $0x30f8] sm:$0xff]  ;;  %v2788_v61 = vadd.f32 %v2787_v54, %v2768_v57 }
 0x34d   : > { %3776 = vmatpush.msrb.mxu2 %v1831_v63  ;;  %3795 = vmatpush.msrb.mxu3 %v1848_v0  ;;  %v2807_v63 = vpop.f32.mrf.mxu1  ;;  %v1884_v0 = vld [vmem:[#allocation5 + $0x30f0] sm:$0xff] }
 0x34e   : > { %3737 = vmatpush.msrb.mxu0 %v1798_v2  ;;  %3756 = vmatpush.msrb.mxu1 %v1815_v3  ;;  %v2827_v2 = vpop.f32.mrf.mxu2  ;;  %v1883_v3 = vld [vmem:[#allocation5 + $0x30e8] sm:$0xff] }
 0x34f   : > { %3777 = vmatpush.msrb.mxu2 %v1830_v4  ;;  %3796 = vmatpush.msrb.mxu3 %v1847_v5  ;;  %v2808_v4 = vadd.f32 %v2807_v63, %v2788_v61  ;;  %v1865_v5 = vld [vmem:[#allocation5 + $0x3058] sm:$0xff] }
 0x350   : > { %3738 = vmatpush.msrb.mxu0 %v1797_v7  ;;  %3757 = vmatpush.msrb.mxu1 %v1814_v8  ;;  %v1864_v8 = vld [vmem:[#allocation5 + $0x3050] sm:$0xff] }
 0x351   : > { %3778 = vmatpush.msrb.mxu2 %v1829_v10  ;;  %3797 = vmatpush.msrb.mxu3 %v1846_v11  ;;  %v2828_v7 = vadd.f32 %v2827_v2, %v2808_v4  ;;  %v1881_v10 = vld [vmem:[#allocation5 + $0x30d8] sm:$0xff]  ;;  %v1863_v11 = vld [vmem:[#allocation5 + $0x3048] sm:$0xff] }
 0x352   : > { %3739 = vmatpush.msrb.mxu0 %v1796_v12  ;;  %3758 = vmatpush.msrb.mxu1 %v1813_v13  ;;  %v2867_v12 = vpop.f32.mrf.mxu0  ;;  %v1880_v13 = vld [vmem:[#allocation5 + $0x30d0] sm:$0xff] }
 0x353   : > { %3779 = vmatpush.msrb.mxu2 %v1828_v15  ;;  %3798 = vmatpush.msrb.mxu3 %v1845_v16  ;;  %v2848_v14 = vadd.f32 %v2847_v9, %v2828_v7  ;;  %v1862_v15 = vld [vmem:[#allocation5 + $0x3040] sm:$0xff]  ;;  %v1879_v16 = vld [vmem:[#allocation5 + $0x30c8] sm:$0xff] }
 0x354   : > { %3740 = vmatpush.msrb.mxu0 %v1795_v18  ;;  %3759 = vmatpush.msrb.mxu1 %v1812_v19  ;;  %v1861_v18 = vld [vmem:[#allocation5 + $0x3038] sm:$0xff] }
 0x355   : > { %3780 = vmatpush.msrb.mxu2 %v1827_v20  ;;  %3799 = vmatpush.msrb.mxu3 %v1844_v21  ;;  %v2868_v17 = vadd.f32 %v2867_v12, %v2848_v14  ;;  %v2887_v19 = vpop.f32.mrf.mxu1  ;;  %v1878_v20 = vld [vmem:[#allocation5 + $0x30c0] sm:$0xff]  ;;  %v1860_v21 = vld [vmem:[#allocation5 + $0x3030] sm:$0xff] }
 0x356   : > { %3741 = vmatpush.msrb.mxu0 %v1794_v23  ;;  %3760 = vmatpush.msrb.mxu1 %v1811_v24  ;;  %v2907_v22 = vpop.f32.mrf.mxu2  ;;  %v1877_v23 = vld [vmem:[#allocation5 + $0x30b8] sm:$0xff] }
 0x357   : > { %3781 = vmatpush.msrb.mxu2 %v1826_v26  ;;  %3800 = vmatpush.msrb.mxu3 %v1843_v27  ;;  %v2888_v24 = vadd.f32 %v2887_v19, %v2868_v17  ;;  %v1876_v26 = vld [vmem:[#allocation5 + $0x30b0] sm:$0xff] }
 0x358   : > { %3742 = vmatpush.msrb.mxu0 %v1793_v28  ;;  %3761 = vmatpush.msrb.mxu1 %v1810_v29  ;;  %v1858_v28 = vld [vmem:[#allocation5 + $0x3020] sm:$0xff]  ;;  %v2927_v29 = vpop.f32.mrf.mxu3 }
 0x359   : > { %3782 = vmatpush.msrb.mxu2 %v1825_v31  ;;  %3801 = vmatpush.msrb.mxu3 %v1842_v32  ;;  %v2908_v27 = vadd.f32 %v2907_v22, %v2888_v24  ;;  %v1857_v31 = vld [vmem:[#allocation5 + $0x3018] sm:$0xff] }
 0x35a   : > { %3743 = vmatpush.msrb.mxu0 %v1792_v34  ;;  %3762 = vmatpush.msrb.mxu1 %v1809_v35  ;;  %v2947_v32 = vpop.f32.mrf.mxu0  ;;  %v1856_v35 = vld [vmem:[#allocation5 + $0x3010] sm:$0xff] }
 0x35b   : > { %3783 = vmatpush.msrb.mxu2 %v1824_v36  ;;  %3802 = vmatpush.msrb.mxu3 %v1841_v37  ;;  %v2928_v34 = vadd.f32 %v2927_v29, %v2908_v27  ;;  %v1873_v36 = vld [vmem:[#allocation5 + $0x3098] sm:$0xff] }
 0x35c   : > { %3744 = vmatpush.msrb.mxu0 %v1791_v39  ;;  %3763 = vmatpush.msrb.mxu1 %v1808_v40  ;;  %v1872_v40 = vld [vmem:[#allocation5 + $0x3090] sm:$0xff] }
 0x35d   : > { %3784 = vmatpush.msrb.mxu2 %v1823_v42  ;;  %3803 = vmatpush.msrb.mxu3 %v1840_v43  ;;  %v2948_v37 = vadd.f32 %v2947_v32, %v2928_v34  ;;  %v2967_v39 = vpop.f32.mrf.mxu1  ;;  %v1871_v43 = vld [vmem:[#allocation5 + $0x3088] sm:$0xff] }
 0x35e   : > { %3745 = vmatpush.msrb.mxu0 %v1790_v44  ;;  %3764 = vmatpush.msrb.mxu1 %v1807_v45  ;;  %v2987_v42 = vpop.f32.mrf.mxu2  ;;  %v316_v44 = vld [vmem:[%s4326_s23 + $0x300] sm:$0xff] }
 0x35f   : > { %3785 = vmatpush.msrb.mxu2 %v1822_v47  ;;  %3804 = vmatpush.msrb.mxu3 %v1839_v48  ;;  %v2968_v45 = vadd.f32 %v2967_v39, %v2948_v37  ;;  %v317_v48 = vld [vmem:[%s4326_s23 + $0x308] sm:$0xff] }
 0x360   : > { %3746 = vmatmul.f32.vlgmr.msrb.gmra.mxu0 %v312_v50  ;;  %3786 = vmatmul.f32.vlgmr.msrb.gmra.mxu2 %v314_v51  ;;  %v3007_v49 = vpop.f32.mrf.mxu3 }
 0x361   : > { %3810 = vmatpush.msra.mxu0 %v1869_v52  ;;  %3765 = vmatpush.msrb.mxu1 %v1806_v53  ;;  %v2988_v47 = vadd.f32 %v2987_v42, %v2968_v45 }
 0x362   : > { %3805 = vmatpush.msrb.mxu3 %v1838_v55  ;;  %3766 = vmatmul.f32.vlgmr.msrb.gmra.mxu1 %v313_v56  ;;  %v3027_v50 = vpop.f32.mrf.mxu0 }
 0x363   : > { %3806 = vmatmul.f32.vlgmr.msrb.gmra.mxu3 %v315_v58  ;;  %3811 = vmatpush.msra.mxu0 %v1868_v59  ;;  %v3008_v51 = vadd.f32 %v3007_v49, %v2988_v47 }
 0x364   : > { %3830 = vmatpush.msra.mxu1 %v1885_v60 }
 0x365   : > { %3812 = vmatpush.msra.mxu0 %v1867_v62  ;;  %v3028_v52 = vadd.f32 %v3027_v50, %v3008_v51  ;;  %v3047_v53 = vpop.f32.mrf.mxu1 }
 0x366   : > { %3831 = vmatpush.msra.mxu1 %v1884_v0  ;;  %v3067_v54 = vpop.f32.mrf.mxu2 }
 0x367   : > { %3813 = vmatpush.msra.mxu0 %v1866_v1  ;;  %v3048_v55 = vadd.f32 %v3047_v53, %v3028_v52 }
 0x368   : > { %3832 = vmatpush.msra.mxu1 %v1883_v3  ;;  %v3087_v57 = vpop.f32.mrf.mxu3 }
 0x369   : > { %3814 = vmatpush.msra.mxu0 %v1865_v5  ;;  %v3068_v56 = vadd.f32 %v3067_v54, %v3048_v55 }
 0x36a   : > { %3833 = vmatpush.msra.mxu1 %v1882_v6  ;;  %v3107_v58 = vpop.f32.mrf.mxu0 }
 0x36b   : > { %3815 = vmatpush.msra.mxu0 %v1864_v8  ;;  %v3088_v59 = vadd.f32 %v3087_v57, %v3068_v56 }
 0x36c   : > { %3834 = vmatpush.msra.mxu1 %v1881_v10 }
 0x36d   : > { %3816 = vmatpush.msra.mxu0 %v1863_v11  ;;  %v3108_v60 = vadd.f32 %v3107_v58, %v3088_v59  ;;  %v3127_v61 = vpop.f32.mrf.mxu1 }
 0x36e   : > { %3835 = vmatpush.msra.mxu1 %v1880_v13  ;;  %v3147_v62 = vpop.f32.mrf.mxu2 }
 0x36f   : > { %3817 = vmatpush.msra.mxu0 %v1862_v15  ;;  %v3128_v63 = vadd.f32 %v3127_v61, %v3108_v60 }
 0x370   : > { %3836 = vmatpush.msra.mxu1 %v1879_v16  ;;  %v3167_v1 = vpop.f32.mrf.mxu3 }
 0x371   : > { %3818 = vmatpush.msra.mxu0 %v1861_v18  ;;  %v3148_v0 = vadd.f32 %v3147_v62, %v3128_v63 }
 0x372   : > { %3837 = vmatpush.msra.mxu1 %v1878_v20  ;;  %v3187_v2 = vpop.f32.mrf.mxu0 }
 0x373   : > { %3819 = vmatpush.msra.mxu0 %v1860_v21  ;;  %v3168_v3 = vadd.f32 %v3167_v1, %v3148_v0 }
 0x374   : > { %3838 = vmatpush.msra.mxu1 %v1877_v23 }
 0x375   : > { %3820 = vmatpush.msra.mxu0 %v1859_v25  ;;  %v3188_v4 = vadd.f32 %v3187_v2, %v3168_v3  ;;  %v3207_v5 = vpop.f32.mrf.mxu1 }
 0x376   : > { %3839 = vmatpush.msra.mxu1 %v1876_v26  ;;  %v3227_v6 = vpop.f32.mrf.mxu2 }
 0x377   : > { %3821 = vmatpush.msra.mxu0 %v1858_v28  ;;  %v3208_v7 = vadd.f32 %v3207_v5, %v3188_v4 }
 0x378   : > { %3840 = vmatpush.msra.mxu1 %v1875_v30  ;;  %v3247_v9 = vpop.f32.mrf.mxu3 }
 0x379   : > { %3822 = vmatpush.msra.mxu0 %v1857_v31  ;;  %v3228_v8 = vadd.f32 %v3227_v6, %v3208_v7 }
 0x37a   : > { %3841 = vmatpush.msra.mxu1 %v1874_v33  ;;  %v3267_v10 = vpop.f32.mrf.mxu0 }
 0x37b   : > { %3823 = vmatpush.msra.mxu0 %v1856_v35  ;;  %v3248_v11 = vadd.f32 %v3247_v9, %v3228_v8 }
 0x37c   : > { %3842 = vmatpush.msra.mxu1 %v1873_v36 }
 0x37d   : > { %3824 = vmatpush.msra.mxu0 %v1855_v38  ;;  %v3268_v12 = vadd.f32 %v3267_v10, %v3248_v11  ;;  %v3287_v13 = vpop.f32.mrf.mxu1 }
 0x37e   : > { %3843 = vmatpush.msra.mxu1 %v1872_v40  ;;  %v3307_v14 = vpop.f32.mrf.mxu2 }
 0x37f   : > { %3825 = vmatpush.msra.mxu0 %v1854_v41  ;;  %v3288_v15 = vadd.f32 %v3287_v13, %v3268_v12 }
 0x380   : > { %3844 = vmatpush.msra.mxu1 %v1871_v43  ;;  %3826 = vmatmul.f32.vlgmr.msra.gmra.mxu0 %v316_v44  ;;  %v3327_v17 = vpop.f32.mrf.mxu3 }
 0x381   : > { %v3308_v16 = vadd.f32 %v3307_v14, %v3288_v15 }
 0x382   : > { %3845 = vmatpush.msra.mxu1 %v1870_v46  ;;  %v3347_v18 = vpop.f32.mrf.mxu0 }
 0x383   : > { %3846 = vmatmul.f32.vlgmr.msra.gmra.mxu1 %v317_v48  ;;  %v3328_v19 = vadd.f32 %v3327_v17, %v3308_v16 }
 0x385   : > { %v3348_v20 = vadd.f32 %v3347_v18, %v3328_v19  ;;  %v3367_v21 = vpop.f32.mrf.mxu1 }
 0x386   : > { %v3387_v22 = vpop.f32.mrf.mxu2 }
 0x387   : > { %v3368_v23 = vadd.f32 %v3367_v21, %v3348_v20 }
 0x388   : > { %v3407_v25 = vpop.f32.mrf.mxu3 }
 0x389   : > { %v3388_v24 = vadd.f32 %v3387_v22, %v3368_v23 }
 0x38a   : > { %v3427_v26 = vpop.f32.mrf.mxu0 }
 0x38b   : > { %v3408_v27 = vadd.f32 %v3407_v25, %v3388_v24 }
 0x38d   : > { %v3428_v28 = vadd.f32 %v3427_v26, %v3408_v27  ;;  %v3447_v29 = vpop.f32.mrf.mxu1 }
 0x38e   : > { %v3467_v30 = vpop.f32.mrf.mxu2 }
 0x38f   : > { %v3448_v31 = vadd.f32 %v3447_v29, %v3428_v28 }
 0x390   : > { %v3487_v33 = vpop.f32.mrf.mxu3 }
 0x391   : > { %v3468_v32 = vadd.f32 %v3467_v30, %v3448_v31 }
 0x392   : > { %v3507_v34 = vpop.f32.mrf.mxu0 }
 0x393   : > { %v3488_v35 = vadd.f32 %v3487_v33, %v3468_v32 }
 0x395   : > { %v3508_v36 = vadd.f32 %v3507_v34, %v3488_v35  ;;  %v3527_v37 = vpop.f32.mrf.mxu1 }
 0x396   : > { %v3547_v38 = vpop.f32.mrf.mxu2 }
 0x397   : > { %v3528_v39 = vadd.f32 %v3527_v37, %v3508_v36 }
 0x398   : > { %v3567_v41 = vpop.f32.mrf.mxu3 }
 0x399   : > { %v3548_v40 = vadd.f32 %v3547_v38, %v3528_v39 }
 0x39a   : > { %v3587_v42 = vpop.f32.mrf.mxu0 }
 0x39b   : > { %v3568_v43 = vadd.f32 %v3567_v41, %v3548_v40 }
 0x39d   : > { %v3588_v44 = vadd.f32 %v3587_v42, %v3568_v43  ;;  %v3607_v45 = vpop.f32.mrf.mxu1 }
 0x39f   : > { %v3627_v46 = vpop.f32.mrf.mxu2  ;;  %v3608_v47 = vadd.f32 %v3607_v45, %v3588_v44 }
 0x3a1   : > { %v3628_v48 = vadd.f32 %v3627_v46, %v3608_v47 }
 0x3a2   : > { %v3647_v49 = vpop.f32.mrf.mxu3 }
 0x3a3   : > { %v3648_v51 = vadd.f32 %v3647_v49, %v3628_v48 }
 0x3bb   : > { %v3667_v50 = vpop.f32.mrf.mxu0 }
 0x3bc   : > { %v3668_v52 = vadd.f32 %v3667_v50, %v3648_v51 }
 0x3be   : > { %v3687_v53 = vpop.f32.mrf.mxu1 }
 0x3bf   : > { %v3688_v55 = vadd.f32 %v3687_v53, %v3668_v52 }
 0x3c1   : > { %v3707_v54 = vpop.f32.mrf.mxu2 }
 0x3c2   : > { %v3708_v56 = vadd.f32 %v3707_v54, %v3688_v55 }
 0x3c4   : > { %v3727_v57 = vpop.f32.mrf.mxu3 }
 0x3c5   : > { %v3728_v59 = vadd.f32 %v3727_v57, %v3708_v56 }
 0x3dd   : > { %v3747_v58 = vpop.f32.mrf.mxu0 }
 0x3de   : > { %v3748_v60 = vadd.f32 %v3747_v58, %v3728_v59 }
 0x3df   : > { %v3767_v61 = vpop.f32.mrf.mxu1 }
 0x3e0   : > { %v3768_v63 = vadd.f32 %v3767_v61, %v3748_v60 }
 0x3e3   : > { %v3787_v62 = vpop.f32.mrf.mxu2 }
 0x3e4   : > { %v3788_v0 = vadd.f32 %v3787_v62, %v3768_v63 }
 0x3e6   : > { %v3807_v1 = vpop.f32.mrf.mxu3 }
 0x3e7   : > { %v3808_v2 = vadd.f32 %v3807_v1, %v3788_v0 }
 0x3fd   : > { %v3827_v3 = vpop.f32.mrf.mxu0 }
 0x3fe   : > { %v3828_v4 = vadd.f32 %v3827_v3, %v3808_v2 }
 0x400   : > { %v3847_v5 = vpop.f32.mrf.mxu1 }
 0x401   : > { %v3848_v6 = vadd.f32 %v3847_v5, %v3828_v4 }
 0x403   : > { %3850 = vst [vmem:[%s219_s26] sm:$0xff] %v3848_v6 }
 0x404   : > { %4160 = shalt.err (!%p4157_p8)
}
 0x405   : > { %3983 = dma.vmem_to_hbm [thread:$0]  (%p4293_p2), %s3865_s27, 128, %s3867_s28, %s3852_s29  }
 0x406 PF: > { %p4005_p9 = scmp.ge.s32.totalorder %s4203_s15, 2  ;;  %s3878_s9 = sand.u32 1, %s4191_s12  }
 0x407   : > { %s3879_s22 = scalar_lea.sflag [#allocation4], %s3878_s9 }
 0x408   : > { %p3997_p10 = pnand %p4005_p9, %p4297_p4 }
 0x40a   : > { %p3998_p12 = pneg %p3997_p10 }
 0x40c   : > { %4186 = dma.done.wait (%p3998_p12), %s3879_s22, 128  }
 0x40d   : > { %4188 = vsyncadd (%p3998_p12), %s3879_s22, 4294967168  ;;  %p17_p13 = scmp.ge.s32.totalorder %s4271_s4, 5   ;;  %s4476_s12 = smov %s4195_s13 }
 0x40e   : > { %s4477_s13 = smov %s4199_s14  ;;  %s4478_s14 = smov %s4282_s7 }
 0x40f   : > { %s4479_s15 = smov %s4271_s4  ;;  %19 = sbr.rel (!%p17_p13) target bundleno = 6 (0x6), region = 85 }
 0x414   :  { %3885 = vsyncpa [#allocation3], 1 }
 0x415   :  { %3887 = vsyncpa [#allocation3 + $0x1], 1 }
 0x416   :  { %3888 = vsyncpa [#allocation6], 1 }
 0x417   :  { %3889 = vsyncpa [#allocation4], 1 }
 0x418   :  { %3891 = vsyncpa [#allocation4 + $0x1], 1 }

// kernel: tpu_custom_call.1
= control target key start
LH: loop header
LB: loop body
LE: loop exit
PB: predicated region body
PF: predicated region fallthrough
CT: control target
= control target key end

     0   :  { %8 = vsyncpa [#allocation3], 0  ;;  %s4467_s0 = inlined_call_operand.hbm [shape: f32[19,12544], index: 0, kind: input, shape index: {}]   ;;  %s4468_s1 = inlined_call_operand.hbm [shape: f32[12544,128], index: 1, kind: input, shape index: {}]   ;;  %s4469_s2 = inlined_call_operand.hbm [shape: f32[1,128], index: 2, kind: input, shape index: {}]   ;;  %s4470_s3 = inlined_call_operand.hbm [shape: f32[19,128], index: 3, kind: output, shape index: {}]  }
   0x1   :  { %10 = vsyncpa [#allocation3 + $0x1], 0 }
   0x2   :  { %11 = vsyncpa [#allocation6], 0 }
   0x3   :  { %12 = vsyncpa [#allocation4], 0 }
   0x4   :  { %14 = vsyncpa [#allocation4 + $0x1], 0  ;;  %s4229_s12 = smov 0   ;;  %s4231_s13 = smov 0  }
   0x5   :  { %s4233_s14 = smov 0   ;;  %s4235_s15 = smov 0  }
   0x6 LB: > { %s130_s18 = sshll.u32 %s4468_s1, 4  ;;  %s4253_s19 = sadd.s32 4294967295, %s4203_s15   ;;  %s4203_s15 = sphi %s4235_s15, %s4479_s15   ;;  %s4199_s14 = sphi %s4233_s14, %s4478_s14   ;;  %s4195_s13 = sphi %s4231_s13, %s4477_s13   ;;  %s4191_s12 = sphi %s4229_s12, %s4476_s12   ;;  %s131_s18 = int_to_ptr.hbm [resolvable:$true] %s130_s18 }
   0x7   : > { %p3957_p0 = scmp.ge.s32.totalorder %s4203_s15, 1  ;;  %p41_p1 = scmp.eq.s32.totalorder %s4253_s19, 0 }
   0x8   : > { %p119_p2 = scmp.lt.s32.totalorder %s4203_s15, 4  ;;  %s4205_s21 = smov [#allocation5]  }
   0x9   : > { %s132_s22 = sshll.u32 %s4205_s21, 4  ;;  %s145_s25 = sshll.u32 %s4469_s2, 4  ;;  %s133_s22 = int_to_ptr.vmem [resolvable:$true] %s132_s22  ;;  %s146_s25 = int_to_ptr.hbm [resolvable:$true] %s145_s25 }
   0xa   : > { %p4258_p3 = pnand %p3957_p0, %p119_p2  ;;  %s4206_s26 = smov [#allocation7]  }
   0xb   : > { %s147_s27 = sshll.u32 %s4206_s26, 4  ;;  %s4207_s28 = smov 128   ;;  %s148_s27 = int_to_ptr.vmem [resolvable:$true] %s147_s27 }
   0xc   : > { %p3985_p4 = pneg %p4258_p3  ;;  %s4208_s29 = smov 8  }
   0xd   : > { %s3956_s30 = sadd.s32 4294967294, %s4203_s15   ;;  %s4271_s4 = sadd.s32 1, %s4203_s15  }
   0xe   : > { %p3986_p5 = pnand %p3985_p4, %p41_p1  ;;  %s24_s5 = ssub.s32 %s4203_s15, %s4271_s4 }
   0xf   : > { %s27_s6 = sadd.s32 1, %s4199_s14  ;;  %p25_p6 = scmp.eq.s32.totalorder %s24_s5, 0 }
  0x10   : > { %3988 = dma.hbm_to_vmem [thread:$0]  (!%p3986_p5), %s131_s18, 200704, %s133_s22, [#allocation6], %s4207_s28, %s4207_s28, %s4208_s29  }
  0x11   : > { %3991 = dma.hbm_to_vmem [thread:$0]  (!%p3986_p5), %s146_s25, 16, %s148_s27, [#allocation6]  }
  0x12   : > { %p34_p7 = scmp.ne.s32.totalorder %s4199_s14, %s4195_s13  ;;  %p35_p8 = scmp.eq.s32.totalorder %s4203_s15, 0 }
  0x13   : > { %p40_p9 = scmp.ne.s32.totalorder %s4195_s13, %s4191_s12  ;;  %p106_p12 = scmp.eq.s32.totalorder %s4253_s19, 2 }
  0x14   : > { %s4282_s7 = scalar_select %p25_p6, %s4199_s14, %s27_s6  }
  0x15   : > { %p36_p10 = por %p35_p8, %p34_p7  ;;  %p4286_p11 = por %p41_p1, %p40_p9 }
  0x16   : > { %p112_p13 = scmp.eq.s32.totalorder %s3956_s30, 2  ;;  %p4002_p0 = scmp.lt.s32.totalorder %s4203_s15, 3 }
  0x17   : > { %s158_s9 = sand.u32 1, %s4199_s14   ;;  %p4293_p2 = por %p106_p12, %p34_p7 }
  0x18   : > { %p4297_p4 = por %p112_p13, %p40_p9  ;;  %s3970_s16 = smul.u32 784, %s158_s9 }
  0x19   : > { %s3971_s17 = smul.u32 784, %s4203_s15  ;;  %p4302_p5 = pnand %p4002_p0, %p36_p10 }
  0x1a   : > { %s162_s24 = scalar_lea.vmem [#allocation2], %s3970_s16  ;;  %s159_s27 = scalar_lea.sflag [#allocation3], %s158_s9 }
  0x1b   : > { %s167_s23 = scalar_lea.hbm %s4467_s0, %s3971_s17  ;;  %s171_s25 = sshll.u32 %s162_s24, 4  ;;  %s172_s25 = int_to_ptr.vmem [resolvable:$true] %s171_s25 }
  0x1c   : > { %s169_s26 = sshll.u32 %s167_s23, 4  ;;  %p4107_p7 = pneg %p4302_p5  ;;  %s170_s26 = int_to_ptr.hbm [resolvable:$true] %s169_s26 }
  0x1d   : > { %s4103_s28 = sshra.s32 %s170_s26, 4  ;;  %s4110_s6 = scalar_lea.hbm %s4467_s0, 2352  ;;  %s4104_s28 = int_to_ptr.hbm [resolvable:$true] %s4103_s28 }
  0x1e   : > { %s4105_s29 = scalar_lea.hbm %s4104_s28, 784  ;;  %p4111_p10 = scmp.lt.s32.totalorder %s4104_s28, %s4467_s0 }
  0x1f   : > { %p4106_p6 = scmp.ne.s32.totalorder %s4104_s28, %s4105_s29  ;;  %p4112_p12 = scmp.lt.s32.totalorder %s4110_s6, %s4105_s29 }
  0x21   : > { %p4108_p8 = pnand %p4107_p7, %p4106_p6  ;;  %p4113_p13 = por %p4112_p12, %p4111_p10 }
  0x23   : > { %p4109_p9 = pneg %p4108_p8 }
  0x25   : > { %p4114_p0 = pnand %p4113_p13, %p4109_p9 }
  0x27   : > { %4117 = shalt.err (!%p4114_p0)
}
  0x28   : > { %3995 = dma.hbm_to_vmem [thread:$0]  (!%p4302_p5), %s170_s26, 12544, %s172_s25, %s159_s27  }
  0x29   : > { %180 = sbr.rel (%p4258_p3) target bundleno = 1030 (0x406), region = 32  ;;  %s4322_s9 = sand.u32 (!%p4258_p3), 1, %s4195_s13  }
  0x2a   : > { %s3972_s16 = smul.u32 (!%p4258_p3), 784, %s4322_s9  ;;  %s183_s22 = scalar_lea.sflag (!%p4258_p3), [#allocation3], %s4322_s9 }
  0x2c   : > { %s4326_s23 = scalar_lea.vmem (!%p4258_p3), [#allocation2], %s3972_s16 }
  0x2e   : > { %4178 = dma.done.wait (%p4286_p11), %s183_s22, 12544  }
  0x2f   : > { %4180 = vsyncadd (%p4286_p11), %s183_s22, 4294954752 }
  0x30   : > { %4182 = dma.done.wait (%p41_p1), [#allocation6], 200720  }
  0x31   : > { %4184 = vsyncadd (%p41_p1), [#allocation6], 4294766576  ;;  %v333_v0 = vld [vmem:[#allocation5 + $0x78] sm:$0xff]  ;;  %v332_v2 = vld [vmem:[#allocation5 + $0x70] sm:$0xff]  ;;  %s3965_s20 = sshll.u32 %s4322_s9, 3  ;;  %s3967_s8 = sshll.u32 %s4253_s19, 3 }
  0x32   : > { %v365_v1 = vld [vmem:[#allocation5 + $0x178] sm:$0xff]  ;;  %1890 = vmatpush.msra.mxu0 %v333_v0  ;;  %v364_v4 = vld [vmem:[#allocation5 + $0x170] sm:$0xff]  ;;  %v331_v6 = vld [vmem:[#allocation5 + $0x68] sm:$0xff]  ;;  %s3862_s25 = scalar_lea.hbm %s4470_s3, %s3967_s8  ;;  %s219_s26 = scalar_lea.vmem [#allocation8], %s3965_s20 }
  0x33   : > { %1930 = vmatpush.msra.mxu2 %v365_v1  ;;  %v349_v3 = vld [vmem:[#allocation5 + $0xf8] sm:$0xff]  ;;  %v348_v7 = vld [vmem:[#allocation5 + $0xf0] sm:$0xff]  ;;  %v363_v8 = vld [vmem:[#allocation5 + $0x168] sm:$0xff]  ;;  %s3864_s27 = sshll.u32 %s219_s26, 4  ;;  %s3866_s28 = sshll.u32 %s3862_s25, 4  ;;  %s3865_s27 = int_to_ptr.vmem [resolvable:$true] %s3864_s27  ;;  %s3867_s28 = int_to_ptr.hbm [resolvable:$true] %s3866_s28 }
  0x34   : > { %v381_v5 = vld [vmem:[#allocation5 + $0x1f8] sm:$0xff]  ;;  %1910 = vmatpush.msra.mxu1 %v349_v3  ;;  %1891 = vmatpush.msra.mxu0 %v332_v2  ;;  %v380_v9 = vld [vmem:[#allocation5 + $0x1f0] sm:$0xff]  ;;  %v347_v10 = vld [vmem:[#allocation5 + $0xe8] sm:$0xff]  ;;  %s3852_s29 = scalar_lea.sflag [#allocation4], %s4322_s9  ;;  %s4147_s30 = sshra.s32 %s3867_s28, 4  ;;  %s4148_s30 = int_to_ptr.hbm [resolvable:$true] %s4147_s30 }
  0x35   : > { %1950 = vmatpush.msra.mxu3 %v381_v5  ;;  %1931 = vmatpush.msra.mxu2 %v364_v4  ;;  %v330_v11 = vld [vmem:[#allocation5 + $0x60] sm:$0xff]  ;;  %v379_v13 = vld [vmem:[#allocation5 + $0x1e8] sm:$0xff]  ;;  %v329_v16 = vld [vmem:[#allocation5 + $0x58] sm:$0xff]  ;;  %s4149_s19 = scalar_lea.hbm %s4148_s30, 8  ;;  %s4153_s21 = scalar_lea.hbm %s4470_s3, 24 }
  0x36   : > { %1911 = vmatpush.msra.mxu1 %v348_v7  ;;  %v362_v12 = vld [vmem:[#allocation5 + $0x160] sm:$0xff]  ;;  %1892 = vmatpush.msra.mxu0 %v331_v6  ;;  %v361_v17 = vld [vmem:[#allocation5 + $0x158] sm:$0xff]  ;;  %v328_v20 = vld [vmem:[#allocation5 + $0x50] sm:$0xff]  ;;  %p4150_p1 = scmp.ne.s32.totalorder %s4148_s30, %s4149_s19  ;;  %p4154_p5 = scmp.lt.s32.totalorder %s4148_s30, %s4470_s3 }
  0x37   : > { %1951 = vmatpush.msra.mxu3 %v380_v9  ;;  %1932 = vmatpush.msra.mxu2 %v363_v8  ;;  %v346_v14 = vld [vmem:[#allocation5 + $0xe0] sm:$0xff]  ;;  %v345_v18 = vld [vmem:[#allocation5 + $0xd8] sm:$0xff]  ;;  %v360_v21 = vld [vmem:[#allocation5 + $0x150] sm:$0xff]  ;;  %p4155_p6 = scmp.lt.s32.totalorder %s4153_s21, %s4149_s19 }
  0x38   : > { %v378_v15 = vld [vmem:[#allocation5 + $0x1e0] sm:$0xff]  ;;  %1912 = vmatpush.msra.mxu1 %v347_v10  ;;  %1893 = vmatpush.msra.mxu0 %v330_v11  ;;  %v377_v19 = vld [vmem:[#allocation5 + $0x1d8] sm:$0xff]  ;;  %v344_v22 = vld [vmem:[#allocation5 + $0xd0] sm:$0xff]  ;;  %p4151_p3 = pnand %p4150_p1, %p4293_p2 }
  0x39   : > { %1952 = vmatpush.msra.mxu3 %v379_v13  ;;  %1933 = vmatpush.msra.mxu2 %v362_v12  ;;  %v376_v23 = vld [vmem:[#allocation5 + $0x1d0] sm:$0xff]  ;;  %v327_v24 = vld [vmem:[#allocation5 + $0x48] sm:$0xff]  ;;  %v326_v28 = vld [vmem:[#allocation5 + $0x40] sm:$0xff]  ;;  %p4156_p7 = por %p4155_p6, %p4154_p5 }
  0x3a   : > { %1913 = vmatpush.msra.mxu1 %v346_v14  ;;  %1894 = vmatpush.msra.mxu0 %v329_v16  ;;  %v359_v25 = vld [vmem:[#allocation5 + $0x148] sm:$0xff]  ;;  %v358_v29 = vld [vmem:[#allocation5 + $0x140] sm:$0xff]  ;;  %v325_v32 = vld [vmem:[#allocation5 + $0x38] sm:$0xff]  ;;  %p4152_p11 = pneg %p4151_p3 }
  0x3b   : > { %1953 = vmatpush.msra.mxu3 %v378_v15  ;;  %1934 = vmatpush.msra.mxu2 %v361_v17  ;;  %v343_v26 = vld [vmem:[#allocation5 + $0xc8] sm:$0xff]  ;;  %v342_v30 = vld [vmem:[#allocation5 + $0xc0] sm:$0xff]  ;;  %v357_v33 = vld [vmem:[#allocation5 + $0x138] sm:$0xff] }
  0x3c   : > { %1914 = vmatpush.msra.mxu1 %v345_v18  ;;  %1895 = vmatpush.msra.mxu0 %v328_v20  ;;  %v375_v27 = vld [vmem:[#allocation5 + $0x1c8] sm:$0xff]  ;;  %v374_v31 = vld [vmem:[#allocation5 + $0x1c0] sm:$0xff]  ;;  %v341_v34 = vld [vmem:[#allocation5 + $0xb8] sm:$0xff]  ;;  %p4157_p8 = pnand %p4156_p7, %p4152_p11 }
  0x3d   : > { %1954 = vmatpush.msra.mxu3 %v377_v19  ;;  %1935 = vmatpush.msra.mxu2 %v360_v21  ;;  %v373_v35 = vld [vmem:[#allocation5 + $0x1b8] sm:$0xff]  ;;  %v324_v36 = vld [vmem:[#allocation5 + $0x30] sm:$0xff]  ;;  %v323_v40 = vld [vmem:[#allocation5 + $0x28] sm:$0xff] }
  0x3e   : > { %1915 = vmatpush.msra.mxu1 %v344_v22  ;;  %1896 = vmatpush.msra.mxu0 %v327_v24  ;;  %v356_v37 = vld [vmem:[#allocation5 + $0x130] sm:$0xff]  ;;  %v355_v41 = vld [vmem:[#allocation5 + $0x128] sm:$0xff]  ;;  %v322_v44 = vld [vmem:[#allocation5 + $0x20] sm:$0xff] }
  0x3f   : > { %1955 = vmatpush.msra.mxu3 %v376_v23  ;;  %1936 = vmatpush.msra.mxu2 %v359_v25  ;;  %v340_v38 = vld [vmem:[#allocation5 + $0xb0] sm:$0xff]  ;;  %v339_v42 = vld [vmem:[#allocation5 + $0xa8] sm:$0xff]  ;;  %v354_v45 = vld [vmem:[#allocation5 + $0x120] sm:$0xff] }
  0x40   : > { %1916 = vmatpush.msra.mxu1 %v343_v26  ;;  %1897 = vmatpush.msra.mxu0 %v326_v28  ;;  %v372_v39 = vld [vmem:[#allocation5 + $0x1b0] sm:$0xff]  ;;  %v371_v43 = vld [vmem:[#allocation5 + $0x1a8] sm:$0xff]  ;;  %v338_v46 = vld [vmem:[#allocation5 + $0xa0] sm:$0xff] }
  0x41   : > { %1956 = vmatpush.msra.mxu3 %v375_v27  ;;  %1937 = vmatpush.msra.mxu2 %v358_v29  ;;  %v370_v47 = vld [vmem:[#allocation5 + $0x1a0] sm:$0xff]  ;;  %v321_v48 = vld [vmem:[#allocation5 + $0x18] sm:$0xff]  ;;  %v320_v52 = vld [vmem:[#allocation5 + $0x10] sm:$0xff] }
  0x42   : > { %1917 = vmatpush.msra.mxu1 %v342_v30  ;;  %1898 = vmatpush.msra.mxu0 %v325_v32  ;;  %v353_v49 = vld [vmem:[#allocation5 + $0x118] sm:$0xff]  ;;  %v352_v53 = vld [vmem:[#allocation5 + $0x110] sm:$0xff]  ;;  %v319_v56 = vld [vmem:[#allocation5 + $0x8] sm:$0xff] }
  0x43   : > { %1957 = vmatpush.msra.mxu3 %v374_v31  ;;  %1938 = vmatpush.msra.mxu2 %v357_v33  ;;  %v337_v50 = vld [vmem:[#allocation5 + $0x98] sm:$0xff]  ;;  %v336_v54 = vld [vmem:[#allocation5 + $0x90] sm:$0xff]  ;;  %v351_v57 = vld [vmem:[#allocation5 + $0x108] sm:$0xff] }
  0x44   : > { %1918 = vmatpush.msra.mxu1 %v341_v34  ;;  %1899 = vmatpush.msra.mxu0 %v324_v36  ;;  %v369_v51 = vld [vmem:[#allocation5 + $0x198] sm:$0xff]  ;;  %v368_v55 = vld [vmem:[#allocation5 + $0x190] sm:$0xff]  ;;  %v335_v58 = vld [vmem:[#allocation5 + $0x88] sm:$0xff] }
  0x45   : > { %1958 = vmatpush.msra.mxu3 %v373_v35  ;;  %1939 = vmatpush.msra.mxu2 %v356_v37  ;;  %v367_v59 = vld [vmem:[#allocation5 + $0x188] sm:$0xff]  ;;  %v318_v60 = vld [vmem:[#allocation5] sm:$0xff]  ;;  %v397_v62 = vld [vmem:[#allocation5 + $0x278] sm:$0xff] }
  0x46   : > { %1919 = vmatpush.msra.mxu1 %v340_v38  ;;  %1900 = vmatpush.msra.mxu0 %v323_v40  ;;  %v350_v61 = vld [vmem:[#allocation5 + $0x100] sm:$0xff]  ;;  %v429_v63 = vld [vmem:[#allocation5 + $0x378] sm:$0xff]  ;;  %v396_v2 = vld [vmem:[#allocation5 + $0x270] sm:$0xff] }
  0x47   : > { %1959 = vmatpush.msra.mxu3 %v372_v39  ;;  %1940 = vmatpush.msra.mxu2 %v355_v41  ;;  %v334_v0 = vld [vmem:[#allocation5 + $0x80] sm:$0xff]  ;;  %v413_v3 = vld [vmem:[#allocation5 + $0x2f8] sm:$0xff]  ;;  %v428_v4 = vld [vmem:[#allocation5 + $0x370] sm:$0xff] }
  0x48   : > { %1920 = vmatpush.msra.mxu1 %v339_v42  ;;  %1901 = vmatpush.msra.mxu0 %v322_v44  ;;  %v366_v1 = vld [vmem:[#allocation5 + $0x180] sm:$0xff]  ;;  %v445_v5 = vld [vmem:[#allocation5 + $0x3f8] sm:$0xff]  ;;  %v395_v6 = vld [vmem:[#allocation5 + $0x268] sm:$0xff] }
  0x49   : > { %1960 = vmatpush.msra.mxu3 %v371_v43  ;;  %1941 = vmatpush.msra.mxu2 %v354_v45  ;;  %v412_v7 = vld [vmem:[#allocation5 + $0x2f0] sm:$0xff]  ;;  %v427_v8 = vld [vmem:[#allocation5 + $0x368] sm:$0xff]  ;;  %v394_v10 = vld [vmem:[#allocation5 + $0x260] sm:$0xff] }
  0x4a   : > { %1921 = vmatpush.msra.mxu1 %v338_v46  ;;  %1902 = vmatpush.msra.mxu0 %v321_v48  ;;  %v444_v9 = vld [vmem:[#allocation5 + $0x3f0] sm:$0xff]  ;;  %v411_v11 = vld [vmem:[#allocation5 + $0x2e8] sm:$0xff]  ;;  %v426_v12 = vld [vmem:[#allocation5 + $0x360] sm:$0xff] }
  0x4b   : > { %1961 = vmatpush.msra.mxu3 %v370_v47  ;;  %1942 = vmatpush.msra.mxu2 %v353_v49  ;;  %v443_v13 = vld [vmem:[#allocation5 + $0x3e8] sm:$0xff]  ;;  %v393_v14 = vld [vmem:[#allocation5 + $0x258] sm:$0xff]  ;;  %v410_v15 = vld [vmem:[#allocation5 + $0x2e0] sm:$0xff] }
  0x4c   : > { %1922 = vmatpush.msra.mxu1 %v337_v50  ;;  %1903 = vmatpush.msra.mxu0 %v320_v52  ;;  %v425_v16 = vld [vmem:[#allocation5 + $0x358] sm:$0xff]  ;;  %v442_v17 = vld [vmem:[#allocation5 + $0x3e0] sm:$0xff]  ;;  %v392_v18 = vld [vmem:[#allocation5 + $0x250] sm:$0xff] }
  0x4d   : > { %1962 = vmatpush.msra.mxu3 %v369_v51  ;;  %1943 = vmatpush.msra.mxu2 %v352_v53  ;;  %v409_v19 = vld [vmem:[#allocation5 + $0x2d8] sm:$0xff]  ;;  %v424_v20 = vld [vmem:[#allocation5 + $0x350] sm:$0xff]  ;;  %v391_v22 = vld [vmem:[#allocation5 + $0x248] sm:$0xff] }
  0x4e   : > { %1923 = vmatpush.msra.mxu1 %v336_v54  ;;  %1904 = vmatpush.msra.mxu0 %v319_v56  ;;  %v441_v21 = vld [vmem:[#allocation5 + $0x3d8] sm:$0xff]  ;;  %v408_v23 = vld [vmem:[#allocation5 + $0x2d0] sm:$0xff]  ;;  %v423_v24 = vld [vmem:[#allocation5 + $0x348] sm:$0xff] }
  0x4f   : > { %1963 = vmatpush.msra.mxu3 %v368_v55  ;;  %1944 = vmatpush.msra.mxu2 %v351_v57  ;;  %v440_v25 = vld [vmem:[#allocation5 + $0x3d0] sm:$0xff]  ;;  %v390_v26 = vld [vmem:[#allocation5 + $0x240] sm:$0xff]  ;;  %v407_v27 = vld [vmem:[#allocation5 + $0x2c8] sm:$0xff] }
  0x50   : > { %1924 = vmatpush.msra.mxu1 %v335_v58  ;;  %1905 = vmatpush.msra.mxu0 %v318_v60  ;;  %v422_v28 = vld [vmem:[#allocation5 + $0x340] sm:$0xff]  ;;  %v439_v29 = vld [vmem:[#allocation5 + $0x3c8] sm:$0xff]  ;;  %v389_v30 = vld [vmem:[#allocation5 + $0x238] sm:$0xff] }
  0x51   : > { %1964 = vmatpush.msra.mxu3 %v367_v59  ;;  %1945 = vmatpush.msra.mxu2 %v350_v61  ;;  %v406_v31 = vld [vmem:[#allocation5 + $0x2c0] sm:$0xff]  ;;  %v421_v32 = vld [vmem:[#allocation5 + $0x338] sm:$0xff]  ;;  %v388_v34 = vld [vmem:[#allocation5 + $0x230] sm:$0xff] }
  0x52   : > { %1970 = vmatpush.msrb.mxu0 %v397_v62  ;;  %1925 = vmatpush.msra.mxu1 %v334_v0  ;;  %v438_v33 = vld [vmem:[#allocation5 + $0x3c0] sm:$0xff]  ;;  %v405_v35 = vld [vmem:[#allocation5 + $0x2b8] sm:$0xff]  ;;  %v420_v36 = vld [vmem:[#allocation5 + $0x330] sm:$0xff] }
  0x53   : > { %2010 = vmatpush.msrb.mxu2 %v429_v63  ;;  %1965 = vmatpush.msra.mxu3 %v366_v1  ;;  %v437_v37 = vld [vmem:[#allocation5 + $0x3b8] sm:$0xff]  ;;  %v387_v38 = vld [vmem:[#allocation5 + $0x228] sm:$0xff]  ;;  %v404_v39 = vld [vmem:[#allocation5 + $0x2b0] sm:$0xff] }
  0x54   : > { %1971 = vmatpush.msrb.mxu0 %v396_v2  ;;  %1990 = vmatpush.msrb.mxu1 %v413_v3  ;;  %v419_v40 = vld [vmem:[#allocation5 + $0x328] sm:$0xff]  ;;  %v436_v41 = vld [vmem:[#allocation5 + $0x3b0] sm:$0xff]  ;;  %v386_v42 = vld [vmem:[#allocation5 + $0x220] sm:$0xff] }
  0x55   : > { %2011 = vmatpush.msrb.mxu2 %v428_v4  ;;  %2030 = vmatpush.msrb.mxu3 %v445_v5  ;;  %v403_v43 = vld [vmem:[#allocation5 + $0x2a8] sm:$0xff]  ;;  %v418_v44 = vld [vmem:[#allocation5 + $0x320] sm:$0xff]  ;;  %v385_v46 = vld [vmem:[#allocation5 + $0x218] sm:$0xff] }
  0x56   : > { %1972 = vmatpush.msrb.mxu0 %v395_v6  ;;  %1991 = vmatpush.msrb.mxu1 %v412_v7  ;;  %v435_v45 = vld [vmem:[#allocation5 + $0x3a8] sm:$0xff]  ;;  %v402_v47 = vld [vmem:[#allocation5 + $0x2a0] sm:$0xff]  ;;  %v417_v48 = vld [vmem:[#allocation5 + $0x318] sm:$0xff] }
  0x57   : > { %2012 = vmatpush.msrb.mxu2 %v427_v8  ;;  %2031 = vmatpush.msrb.mxu3 %v444_v9  ;;  %v434_v49 = vld [vmem:[#allocation5 + $0x3a0] sm:$0xff]  ;;  %v384_v50 = vld [vmem:[#allocation5 + $0x210] sm:$0xff]  ;;  %v401_v51 = vld [vmem:[#allocation5 + $0x298] sm:$0xff] }
  0x58   : > { %1973 = vmatpush.msrb.mxu0 %v394_v10  ;;  %1992 = vmatpush.msrb.mxu1 %v411_v11  ;;  %v416_v52 = vld [vmem:[#allocation5 + $0x310] sm:$0xff]  ;;  %v433_v53 = vld [vmem:[#allocation5 + $0x398] sm:$0xff]  ;;  %v383_v54 = vld [vmem:[#allocation5 + $0x208] sm:$0xff] }
  0x59   : > { %2013 = vmatpush.msrb.mxu2 %v426_v12  ;;  %2032 = vmatpush.msrb.mxu3 %v443_v13  ;;  %v400_v55 = vld [vmem:[#allocation5 + $0x290] sm:$0xff]  ;;  %v415_v56 = vld [vmem:[#allocation5 + $0x308] sm:$0xff]  ;;  %v382_v59 = vld [vmem:[#allocation5 + $0x200] sm:$0xff] }
  0x5a   : > { %1974 = vmatpush.msrb.mxu0 %v393_v14  ;;  %1993 = vmatpush.msrb.mxu1 %v410_v15  ;;  %v432_v57 = vld [vmem:[#allocation5 + $0x390] sm:$0xff]  ;;  %v399_v60 = vld [vmem:[#allocation5 + $0x288] sm:$0xff]  ;;  %v414_v61 = vld [vmem:[#allocation5 + $0x300] sm:$0xff] }
  0x5b   : > { %2014 = vmatpush.msrb.mxu2 %v425_v16  ;;  %2033 = vmatpush.msrb.mxu3 %v442_v17  ;;  %v222_v58 = vld [vmem:[%s4326_s23 + $0x10] sm:$0xff]  ;;  %v431_v62 = vld [vmem:[#allocation5 + $0x388] sm:$0xff]  ;;  %v220_v63 = vld [vmem:[%s4326_s23] sm:$0xff] }
  0x5c   : > { %1975 = vmatpush.msrb.mxu0 %v392_v18  ;;  %1994 = vmatpush.msrb.mxu1 %v409_v19  ;;  %v223_v0 = vld [vmem:[%s4326_s23 + $0x18] sm:$0xff]  ;;  %v398_v3 = vld [vmem:[#allocation5 + $0x280] sm:$0xff]  ;;  %v221_v5 = vld [vmem:[%s4326_s23 + $0x8] sm:$0xff] }
  0x5d   : > { %2015 = vmatpush.msrb.mxu2 %v424_v20  ;;  %2034 = vmatpush.msrb.mxu3 %v441_v21  ;;  %v461_v1 = vld [vmem:[#allocation5 + $0x478] sm:$0xff]  ;;  %v430_v4 = vld [vmem:[#allocation5 + $0x380] sm:$0xff]  ;;  %v460_v6 = vld [vmem:[#allocation5 + $0x470] sm:$0xff] }
  0x5e   : > { %1976 = vmatpush.msrb.mxu0 %v391_v22  ;;  %1995 = vmatpush.msrb.mxu1 %v408_v23  ;;  %v493_v2 = vld [vmem:[#allocation5 + $0x578] sm:$0xff]  ;;  %v492_v8 = vld [vmem:[#allocation5 + $0x570] sm:$0xff]  ;;  %v459_v10 = vld [vmem:[#allocation5 + $0x468] sm:$0xff] }
  0x5f   : > { %2016 = vmatpush.msrb.mxu2 %v423_v24  ;;  %2035 = vmatpush.msrb.mxu3 %v440_v25  ;;  %v477_v7 = vld [vmem:[#allocation5 + $0x4f8] sm:$0xff]  ;;  %v476_v11 = vld [vmem:[#allocation5 + $0x4f0] sm:$0xff]  ;;  %v491_v12 = vld [vmem:[#allocation5 + $0x568] sm:$0xff] }
  0x60   : > { %1977 = vmatpush.msrb.mxu0 %v390_v26  ;;  %1996 = vmatpush.msrb.mxu1 %v407_v27  ;;  %v509_v9 = vld [vmem:[#allocation5 + $0x5f8] sm:$0xff]  ;;  %v508_v13 = vld [vmem:[#allocation5 + $0x5f0] sm:$0xff]  ;;  %v458_v15 = vld [vmem:[#allocation5 + $0x460] sm:$0xff] }
  0x61   : > { %2017 = vmatpush.msrb.mxu2 %v422_v28  ;;  %2036 = vmatpush.msrb.mxu3 %v439_v29  ;;  %v226_v14 = vld [vmem:[%s4326_s23 + $0x30] sm:$0xff]  ;;  %v475_v16 = vld [vmem:[#allocation5 + $0x4e8] sm:$0xff]  ;;  %v224_v19 = vld [vmem:[%s4326_s23 + $0x20] sm:$0xff] }
  0x62   : > { %1978 = vmatpush.msrb.mxu0 %v389_v30  ;;  %1997 = vmatpush.msrb.mxu1 %v406_v31  ;;  %v490_v17 = vld [vmem:[#allocation5 + $0x560] sm:$0xff]  ;;  %v507_v18 = vld [vmem:[#allocation5 + $0x5e8] sm:$0xff]  ;;  %v457_v21 = vld [vmem:[#allocation5 + $0x458] sm:$0xff] }
  0x63   : > { %2018 = vmatpush.msrb.mxu2 %v421_v32  ;;  %2037 = vmatpush.msrb.mxu3 %v438_v33  ;;  %v227_v20 = vld [vmem:[%s4326_s23 + $0x38] sm:$0xff]  ;;  %v474_v22 = vld [vmem:[#allocation5 + $0x4e0] sm:$0xff]  ;;  %v225_v25 = vld [vmem:[%s4326_s23 + $0x28] sm:$0xff] }
  0x64   : > { %1979 = vmatpush.msrb.mxu0 %v388_v34  ;;  %1998 = vmatpush.msrb.mxu1 %v405_v35  ;;  %v489_v23 = vld [vmem:[#allocation5 + $0x558] sm:$0xff]  ;;  %v506_v24 = vld [vmem:[#allocation5 + $0x5e0] sm:$0xff]  ;;  %v456_v26 = vld [vmem:[#allocation5 + $0x450] sm:$0xff] }
  0x65   : > { %2019 = vmatpush.msrb.mxu2 %v420_v36  ;;  %2038 = vmatpush.msrb.mxu3 %v437_v37  ;;  %v473_v27 = vld [vmem:[#allocation5 + $0x4d8] sm:$0xff]  ;;  %v488_v28 = vld [vmem:[#allocation5 + $0x550] sm:$0xff]  ;;  %v455_v30 = vld [vmem:[#allocation5 + $0x448] sm:$0xff] }
  0x66   : > { %1980 = vmatpush.msrb.mxu0 %v387_v38  ;;  %1999 = vmatpush.msrb.mxu1 %v404_v39  ;;  %v505_v29 = vld [vmem:[#allocation5 + $0x5d8] sm:$0xff]  ;;  %v472_v31 = vld [vmem:[#allocation5 + $0x4d0] sm:$0xff]  ;;  %v487_v32 = vld [vmem:[#allocation5 + $0x548] sm:$0xff] }
  0x67   : > { %2020 = vmatpush.msrb.mxu2 %v419_v40  ;;  %2039 = vmatpush.msrb.mxu3 %v436_v41  ;;  %v504_v33 = vld [vmem:[#allocation5 + $0x5d0] sm:$0xff]  ;;  %v454_v34 = vld [vmem:[#allocation5 + $0x440] sm:$0xff]  ;;  %v471_v35 = vld [vmem:[#allocation5 + $0x4c8] sm:$0xff] }
  0x68   : > { %1981 = vmatpush.msrb.mxu0 %v386_v42  ;;  %2000 = vmatpush.msrb.mxu1 %v403_v43  ;;  %v486_v36 = vld [vmem:[#allocation5 + $0x540] sm:$0xff]  ;;  %v503_v37 = vld [vmem:[#allocation5 + $0x5c8] sm:$0xff]  ;;  %v453_v38 = vld [vmem:[#allocation5 + $0x438] sm:$0xff] }
  0x69   : > { %2021 = vmatpush.msrb.mxu2 %v418_v44  ;;  %2040 = vmatpush.msrb.mxu3 %v435_v45  ;;  %v470_v39 = vld [vmem:[#allocation5 + $0x4c0] sm:$0xff]  ;;  %v485_v40 = vld [vmem:[#allocation5 + $0x538] sm:$0xff]  ;;  %v452_v42 = vld [vmem:[#allocation5 + $0x430] sm:$0xff] }
  0x6a   : > { %1982 = vmatpush.msrb.mxu0 %v385_v46  ;;  %2001 = vmatpush.msrb.mxu1 %v402_v47  ;;  %v502_v41 = vld [vmem:[#allocation5 + $0x5c0] sm:$0xff]  ;;  %v469_v43 = vld [vmem:[#allocation5 + $0x4b8] sm:$0xff]  ;;  %v484_v44 = vld [vmem:[#allocation5 + $0x530] sm:$0xff] }
  0x6b   : > { %2022 = vmatpush.msrb.mxu2 %v417_v48  ;;  %2041 = vmatpush.msrb.mxu3 %v434_v49  ;;  %v501_v45 = vld [vmem:[#allocation5 + $0x5b8] sm:$0xff]  ;;  %v451_v46 = vld [vmem:[#allocation5 + $0x428] sm:$0xff]  ;;  %v468_v47 = vld [vmem:[#allocation5 + $0x4b0] sm:$0xff] }
  0x6c   : > { %1983 = vmatpush.msrb.mxu0 %v384_v50  ;;  %2002 = vmatpush.msrb.mxu1 %v401_v51  ;;  %v483_v48 = vld [vmem:[#allocation5 + $0x528] sm:$0xff]  ;;  %v500_v49 = vld [vmem:[#allocation5 + $0x5b0] sm:$0xff]  ;;  %v450_v50 = vld [vmem:[#allocation5 + $0x420] sm:$0xff] }
  0x6d   : > { %2023 = vmatpush.msrb.mxu2 %v416_v52  ;;  %2042 = vmatpush.msrb.mxu3 %v433_v53  ;;  %v467_v51 = vld [vmem:[#allocation5 + $0x4a8] sm:$0xff]  ;;  %v482_v52 = vld [vmem:[#allocation5 + $0x520] sm:$0xff] }
  0x6e   : > { %1984 = vmatpush.msrb.mxu0 %v383_v54  ;;  %2003 = vmatpush.msrb.mxu1 %v400_v55  ;;  %v499_v53 = vld [vmem:[#allocation5 + $0x5a8] sm:$0xff]  ;;  %v449_v54 = vld [vmem:[#allocation5 + $0x418] sm:$0xff]  ;;  %v466_v55 = vld [vmem:[#allocation5 + $0x4a0] sm:$0xff] }
  0x6f   : > { %2024 = vmatpush.msrb.mxu2 %v415_v56  ;;  %2043 = vmatpush.msrb.mxu3 %v432_v57  ;;  %v481_v56 = vld [vmem:[#allocation5 + $0x518] sm:$0xff]  ;;  %v498_v57 = vld [vmem:[#allocation5 + $0x5a0] sm:$0xff] }
  0x70   : > { %1946 = vmatmul.f32.vlgmr.msra.gmra.mxu2 %v222_v58  ;;  %1985 = vmatpush.msrb.mxu0 %v382_v59  ;;  %v448_v58 = vld [vmem:[#allocation5 + $0x410] sm:$0xff]  ;;  %v465_v59 = vld [vmem:[#allocation5 + $0x498] sm:$0xff] }
  0x71   : > { %2004 = vmatpush.msrb.mxu1 %v399_v60  ;;  %2025 = vmatpush.msrb.mxu2 %v414_v61  ;;  %v480_v60 = vld [vmem:[#allocation5 + $0x510] sm:$0xff]  ;;  %v497_v61 = vld [vmem:[#allocation5 + $0x598] sm:$0xff] }
  0x72   : > { %2044 = vmatpush.msrb.mxu3 %v431_v62  ;;  %1906 = vmatmul.f32.vlgmr.msra.gmra.mxu0 %v220_v63  ;;  %v447_v62 = vld [vmem:[#allocation5 + $0x408] sm:$0xff]  ;;  %v464_v63 = vld [vmem:[#allocation5 + $0x490] sm:$0xff] }
  0x73   : > { %1966 = vmatmul.f32.vlgmr.msra.gmra.mxu3 %v223_v0  ;;  %2050 = vmatpush.msra.mxu0 %v461_v1  ;;  %v479_v0 = vld [vmem:[#allocation5 + $0x508] sm:$0xff]  ;;  %v496_v1 = vld [vmem:[#allocation5 + $0x590] sm:$0xff] }
  0x74   : > { %2090 = vmatpush.msra.mxu2 %v493_v2  ;;  %2005 = vmatpush.msrb.mxu1 %v398_v3  ;;  %v446_v2 = vld [vmem:[#allocation5 + $0x400] sm:$0xff]  ;;  %v463_v3 = vld [vmem:[#allocation5 + $0x488] sm:$0xff] }
  0x75   : > { %2045 = vmatpush.msrb.mxu3 %v430_v4  ;;  %1926 = vmatmul.f32.vlgmr.msra.gmra.mxu1 %v221_v5  ;;  %v478_v4 = vld [vmem:[#allocation5 + $0x500] sm:$0xff]  ;;  %v495_v5 = vld [vmem:[#allocation5 + $0x588] sm:$0xff] }
  0x76   : > { %2051 = vmatpush.msra.mxu0 %v460_v6  ;;  %2070 = vmatpush.msra.mxu1 %v477_v7  ;;  %v228_v6 = vld [vmem:[%s4326_s23 + $0x40] sm:$0xff]  ;;  %v230_v7 = vld [vmem:[%s4326_s23 + $0x50] sm:$0xff] }
  0x77   : > { %2091 = vmatpush.msra.mxu2 %v492_v8  ;;  %2110 = vmatpush.msra.mxu3 %v509_v9  ;;  %v525_v8 = vld [vmem:[#allocation5 + $0x678] sm:$0xff] }
  0x78   : > { %2052 = vmatpush.msra.mxu0 %v459_v10  ;;  %2071 = vmatpush.msra.mxu1 %v476_v11  ;;  %v557_v9 = vld [vmem:[#allocation5 + $0x778] sm:$0xff]  ;;  %v462_v10 = vld [vmem:[#allocation5 + $0x480] sm:$0xff] }
  0x79   : > { %2092 = vmatpush.msra.mxu2 %v491_v12  ;;  %2111 = vmatpush.msra.mxu3 %v508_v13  ;;  %v494_v11 = vld [vmem:[#allocation5 + $0x580] sm:$0xff]  ;;  %v229_v12 = vld [vmem:[%s4326_s23 + $0x48] sm:$0xff]  ;;  %v231_v13 = vld [vmem:[%s4326_s23 + $0x58] sm:$0xff] }
  0x7a   : > { %2026 = vmatmul.f32.vlgmr.msrb.gmra.mxu2 %v226_v14  ;;  %2053 = vmatpush.msra.mxu0 %v458_v15  ;;  %v524_v14 = vld [vmem:[#allocation5 + $0x670] sm:$0xff]  ;;  %v541_v15 = vld [vmem:[#allocation5 + $0x6f8] sm:$0xff] }
  0x7b   : > { %2072 = vmatpush.msra.mxu1 %v475_v16  ;;  %2093 = vmatpush.msra.mxu2 %v490_v17  ;;  %v556_v16 = vld [vmem:[#allocation5 + $0x770] sm:$0xff]  ;;  %v573_v17 = vld [vmem:[#allocation5 + $0x7f8] sm:$0xff] }
  0x7c   : > { %2112 = vmatpush.msra.mxu3 %v507_v18  ;;  %1986 = vmatmul.f32.vlgmr.msrb.gmra.mxu0 %v224_v19  ;;  %v523_v18 = vld [vmem:[#allocation5 + $0x668] sm:$0xff]  ;;  %v540_v19 = vld [vmem:[#allocation5 + $0x6f0] sm:$0xff] }
  0x7d   : > { %2046 = vmatmul.f32.vlgmr.msrb.gmra.mxu3 %v227_v20  ;;  %2054 = vmatpush.msra.mxu0 %v457_v21  ;;  %v555_v20 = vld [vmem:[#allocation5 + $0x768] sm:$0xff]  ;;  %v572_v21 = vld [vmem:[#allocation5 + $0x7f0] sm:$0xff] }
  0x7e   : > { %2073 = vmatpush.msra.mxu1 %v474_v22  ;;  %2094 = vmatpush.msra.mxu2 %v489_v23  ;;  %v522_v22 = vld [vmem:[#allocation5 + $0x660] sm:$0xff]  ;;  %v539_v23 = vld [vmem:[#allocation5 + $0x6e8] sm:$0xff] }
  0x7f   : > { %2113 = vmatpush.msra.mxu3 %v506_v24  ;;  %2006 = vmatmul.f32.vlgmr.msrb.gmra.mxu1 %v225_v25  ;;  %v554_v24 = vld [vmem:[#allocation5 + $0x760] sm:$0xff]  ;;  %v571_v25 = vld [vmem:[#allocation5 + $0x7e8] sm:$0xff] }
  0x80   : > { %2055 = vmatpush.msra.mxu0 %v456_v26  ;;  %2074 = vmatpush.msra.mxu1 %v473_v27  ;;  %v521_v26 = vld [vmem:[#allocation5 + $0x658] sm:$0xff]  ;;  %v538_v27 = vld [vmem:[#allocation5 + $0x6e0] sm:$0xff] }
  0x81   : > { %2095 = vmatpush.msra.mxu2 %v488_v28  ;;  %2114 = vmatpush.msra.mxu3 %v505_v29  ;;  %v553_v28 = vld [vmem:[#allocation5 + $0x758] sm:$0xff]  ;;  %v570_v29 = vld [vmem:[#allocation5 + $0x7e0] sm:$0xff] }
  0x82   : > { %2056 = vmatpush.msra.mxu0 %v455_v30  ;;  %2075 = vmatpush.msra.mxu1 %v472_v31  ;;  %v520_v30 = vld [vmem:[#allocation5 + $0x650] sm:$0xff]  ;;  %v537_v31 = vld [vmem:[#allocation5 + $0x6d8] sm:$0xff] }
  0x83   : > { %2096 = vmatpush.msra.mxu2 %v487_v32  ;;  %2115 = vmatpush.msra.mxu3 %v504_v33  ;;  %v552_v32 = vld [vmem:[#allocation5 + $0x750] sm:$0xff]  ;;  %v569_v33 = vld [vmem:[#allocation5 + $0x7d8] sm:$0xff] }
  0x84   : > { %2057 = vmatpush.msra.mxu0 %v454_v34  ;;  %2076 = vmatpush.msra.mxu1 %v471_v35  ;;  %v519_v34 = vld [vmem:[#allocation5 + $0x648] sm:$0xff]  ;;  %v536_v35 = vld [vmem:[#allocation5 + $0x6d0] sm:$0xff] }
  0x85   : > { %2097 = vmatpush.msra.mxu2 %v486_v36  ;;  %2116 = vmatpush.msra.mxu3 %v503_v37  ;;  %v551_v36 = vld [vmem:[#allocation5 + $0x748] sm:$0xff]  ;;  %v568_v37 = vld [vmem:[#allocation5 + $0x7d0] sm:$0xff] }
  0x86   : > { %2058 = vmatpush.msra.mxu0 %v453_v38  ;;  %2077 = vmatpush.msra.mxu1 %v470_v39  ;;  %v518_v38 = vld [vmem:[#allocation5 + $0x640] sm:$0xff]  ;;  %v535_v39 = vld [vmem:[#allocation5 + $0x6c8] sm:$0xff] }
  0x87   : > { %2098 = vmatpush.msra.mxu2 %v485_v40  ;;  %2117 = vmatpush.msra.mxu3 %v502_v41  ;;  %v550_v40 = vld [vmem:[#allocation5 + $0x740] sm:$0xff]  ;;  %v567_v41 = vld [vmem:[#allocation5 + $0x7c8] sm:$0xff] }
  0x88   : > { %2059 = vmatpush.msra.mxu0 %v452_v42  ;;  %2078 = vmatpush.msra.mxu1 %v469_v43  ;;  %v517_v42 = vld [vmem:[#allocation5 + $0x638] sm:$0xff]  ;;  %v534_v43 = vld [vmem:[#allocation5 + $0x6c0] sm:$0xff] }
  0x89   : > { %2099 = vmatpush.msra.mxu2 %v484_v44  ;;  %2118 = vmatpush.msra.mxu3 %v501_v45  ;;  %v549_v44 = vld [vmem:[#allocation5 + $0x738] sm:$0xff]  ;;  %v566_v45 = vld [vmem:[#allocation5 + $0x7c0] sm:$0xff] }
  0x8a   : > { %2060 = vmatpush.msra.mxu0 %v451_v46  ;;  %2079 = vmatpush.msra.mxu1 %v468_v47  ;;  %v516_v46 = vld [vmem:[#allocation5 + $0x630] sm:$0xff]  ;;  %v533_v47 = vld [vmem:[#allocation5 + $0x6b8] sm:$0xff] }
  0x8b   : > { %2100 = vmatpush.msra.mxu2 %v483_v48  ;;  %2119 = vmatpush.msra.mxu3 %v500_v49  ;;  %v548_v48 = vld [vmem:[#allocation5 + $0x730] sm:$0xff]  ;;  %v565_v49 = vld [vmem:[#allocation5 + $0x7b8] sm:$0xff] }
  0x8c   : > { %2061 = vmatpush.msra.mxu0 %v450_v50  ;;  %2080 = vmatpush.msra.mxu1 %v467_v51  ;;  %v515_v50 = vld [vmem:[#allocation5 + $0x628] sm:$0xff]  ;;  %v532_v51 = vld [vmem:[#allocation5 + $0x6b0] sm:$0xff] }
  0x8d   : > { %2101 = vmatpush.msra.mxu2 %v482_v52  ;;  %2120 = vmatpush.msra.mxu3 %v499_v53  ;;  %v547_v52 = vld [vmem:[#allocation5 + $0x728] sm:$0xff]  ;;  %v564_v53 = vld [vmem:[#allocation5 + $0x7b0] sm:$0xff] }
  0x8e   : > { %2062 = vmatpush.msra.mxu0 %v449_v54  ;;  %2081 = vmatpush.msra.mxu1 %v466_v55  ;;  %v514_v54 = vld [vmem:[#allocation5 + $0x620] sm:$0xff]  ;;  %v531_v55 = vld [vmem:[#allocation5 + $0x6a8] sm:$0xff] }
  0x8f   : > { %2102 = vmatpush.msra.mxu2 %v481_v56  ;;  %2121 = vmatpush.msra.mxu3 %v498_v57  ;;  %v546_v56 = vld [vmem:[#allocation5 + $0x720] sm:$0xff]  ;;  %v563_v57 = vld [vmem:[#allocation5 + $0x7a8] sm:$0xff] }
  0x90   : > { %2063 = vmatpush.msra.mxu0 %v448_v58  ;;  %2082 = vmatpush.msra.mxu1 %v465_v59  ;;  %v513_v58 = vld [vmem:[#allocation5 + $0x618] sm:$0xff]  ;;  %v530_v59 = vld [vmem:[#allocation5 + $0x6a0] sm:$0xff] }
  0x91   : > { %2103 = vmatpush.msra.mxu2 %v480_v60  ;;  %2122 = vmatpush.msra.mxu3 %v497_v61  ;;  %v545_v60 = vld [vmem:[#allocation5 + $0x718] sm:$0xff]  ;;  %v562_v61 = vld [vmem:[#allocation5 + $0x7a0] sm:$0xff] }
  0x92   : > { %2064 = vmatpush.msra.mxu0 %v447_v62  ;;  %2083 = vmatpush.msra.mxu1 %v464_v63  ;;  %v512_v62 = vld [vmem:[#allocation5 + $0x610] sm:$0xff]  ;;  %v529_v63 = vld [vmem:[#allocation5 + $0x698] sm:$0xff] }
  0x93   : > { %2104 = vmatpush.msra.mxu2 %v479_v0  ;;  %2123 = vmatpush.msra.mxu3 %v496_v1  ;;  %v544_v0 = vld [vmem:[#allocation5 + $0x710] sm:$0xff]  ;;  %v561_v1 = vld [vmem:[#allocation5 + $0x798] sm:$0xff] }
  0x94   : > { %2065 = vmatpush.msra.mxu0 %v446_v2  ;;  %2084 = vmatpush.msra.mxu1 %v463_v3  ;;  %v511_v2 = vld [vmem:[#allocation5 + $0x608] sm:$0xff]  ;;  %v528_v3 = vld [vmem:[#allocation5 + $0x690] sm:$0xff] }
  0x95   : > { %2105 = vmatpush.msra.mxu2 %v478_v4  ;;  %2124 = vmatpush.msra.mxu3 %v495_v5  ;;  %v543_v4 = vld [vmem:[#allocation5 + $0x708] sm:$0xff]  ;;  %v560_v5 = vld [vmem:[#allocation5 + $0x790] sm:$0xff] }
  0x96   : > { %2066 = vmatmul.f32.vlgmr.msra.gmra.mxu0 %v228_v6  ;;  %2106 = vmatmul.f32.vlgmr.msra.gmra.mxu2 %v230_v7  ;;  %v510_v6 = vld [vmem:[#allocation5 + $0x600] sm:$0xff]  ;;  %v527_v7 = vld [vmem:[#allocation5 + $0x688] sm:$0xff] }
  0x97   : > { %2130 = vmatpush.msrb.mxu0 %v525_v8  ;;  %2170 = vmatpush.msrb.mxu2 %v557_v9  ;;  %v542_v8 = vld [vmem:[#allocation5 + $0x700] sm:$0xff]  ;;  %v559_v9 = vld [vmem:[#allocation5 + $0x788] sm:$0xff] }
  0x98   : > { %2085 = vmatpush.msra.mxu1 %v462_v10  ;;  %2125 = vmatpush.msra.mxu3 %v494_v11  ;;  %v232_v10 = vld [vmem:[%s4326_s23 + $0x60] sm:$0xff]  ;;  %v234_v11 = vld [vmem:[%s4326_s23 + $0x70] sm:$0xff] }
  0x99   : > { %2086 = vmatmul.f32.vlgmr.msra.gmra.mxu1 %v229_v12  ;;  %2126 = vmatmul.f32.vlgmr.msra.gmra.mxu3 %v231_v13  ;;  %v589_v12 = vld [vmem:[#allocation5 + $0x878] sm:$0xff] }
  0x9a   : > { %2131 = vmatpush.msrb.mxu0 %v524_v14  ;;  %2150 = vmatpush.msrb.mxu1 %v541_v15  ;;  %v621_v13 = vld [vmem:[#allocation5 + $0x978] sm:$0xff]  ;;  %v526_v14 = vld [vmem:[#allocation5 + $0x680] sm:$0xff] }
  0x9b   : > { %2171 = vmatpush.msrb.mxu2 %v556_v16  ;;  %2190 = vmatpush.msrb.mxu3 %v573_v17  ;;  %v558_v15 = vld [vmem:[#allocation5 + $0x780] sm:$0xff]  ;;  %v233_v16 = vld [vmem:[%s4326_s23 + $0x68] sm:$0xff]  ;;  %v235_v17 = vld [vmem:[%s4326_s23 + $0x78] sm:$0xff] }
  0x9c   : > { %2132 = vmatpush.msrb.mxu0 %v523_v18  ;;  %2151 = vmatpush.msrb.mxu1 %v540_v19  ;;  %v588_v18 = vld [vmem:[#allocation5 + $0x870] sm:$0xff]  ;;  %v605_v19 = vld [vmem:[#allocation5 + $0x8f8] sm:$0xff] }
  0x9d   : > { %2172 = vmatpush.msrb.mxu2 %v555_v20  ;;  %2191 = vmatpush.msrb.mxu3 %v572_v21  ;;  %v620_v20 = vld [vmem:[#allocation5 + $0x970] sm:$0xff]  ;;  %v637_v21 = vld [vmem:[#allocation5 + $0x9f8] sm:$0xff] }
  0x9e   : > { %2133 = vmatpush.msrb.mxu0 %v522_v22  ;;  %2152 = vmatpush.msrb.mxu1 %v539_v23  ;;  %v587_v22 = vld [vmem:[#allocation5 + $0x868] sm:$0xff]  ;;  %v604_v23 = vld [vmem:[#allocation5 + $0x8f0] sm:$0xff] }
  0x9f   : > { %2173 = vmatpush.msrb.mxu2 %v554_v24  ;;  %2192 = vmatpush.msrb.mxu3 %v571_v25  ;;  %v619_v24 = vld [vmem:[#allocation5 + $0x968] sm:$0xff]  ;;  %v636_v25 = vld [vmem:[#allocation5 + $0x9f0] sm:$0xff] }
  0xa0   : > { %2134 = vmatpush.msrb.mxu0 %v521_v26  ;;  %2153 = vmatpush.msrb.mxu1 %v538_v27  ;;  %v586_v26 = vld [vmem:[#allocation5 + $0x860] sm:$0xff]  ;;  %v603_v27 = vld [vmem:[#allocation5 + $0x8e8] sm:$0xff] }
  0xa1   : > { %2174 = vmatpush.msrb.mxu2 %v553_v28  ;;  %2193 = vmatpush.msrb.mxu3 %v570_v29  ;;  %v618_v28 = vld [vmem:[#allocation5 + $0x960] sm:$0xff]  ;;  %v635_v29 = vld [vmem:[#allocation5 + $0x9e8] sm:$0xff] }
  0xa2   : > { %2135 = vmatpush.msrb.mxu0 %v520_v30  ;;  %2154 = vmatpush.msrb.mxu1 %v537_v31  ;;  %v585_v30 = vld [vmem:[#allocation5 + $0x858] sm:$0xff]  ;;  %v602_v31 = vld [vmem:[#allocation5 + $0x8e0] sm:$0xff] }
  0xa3   : > { %2175 = vmatpush.msrb.mxu2 %v552_v32  ;;  %2194 = vmatpush.msrb.mxu3 %v569_v33  ;;  %v617_v32 = vld [vmem:[#allocation5 + $0x958] sm:$0xff]  ;;  %v634_v33 = vld [vmem:[#allocation5 + $0x9e0] sm:$0xff] }
  0xa4   : > { %2136 = vmatpush.msrb.mxu0 %v519_v34  ;;  %2155 = vmatpush.msrb.mxu1 %v536_v35  ;;  %v584_v34 = vld [vmem:[#allocation5 + $0x850] sm:$0xff]  ;;  %v601_v35 = vld [vmem:[#allocation5 + $0x8d8] sm:$0xff] }
  0xa5   : > { %2176 = vmatpush.msrb.mxu2 %v551_v36  ;;  %2195 = vmatpush.msrb.mxu3 %v568_v37  ;;  %v616_v36 = vld [vmem:[#allocation5 + $0x950] sm:$0xff]  ;;  %v633_v37 = vld [vmem:[#allocation5 + $0x9d8] sm:$0xff] }
  0xa6   : > { %2137 = vmatpush.msrb.mxu0 %v518_v38  ;;  %2156 = vmatpush.msrb.mxu1 %v535_v39  ;;  %v583_v38 = vld [vmem:[#allocation5 + $0x848] sm:$0xff]  ;;  %v600_v39 = vld [vmem:[#allocation5 + $0x8d0] sm:$0xff] }
  0xa7   : > { %2177 = vmatpush.msrb.mxu2 %v550_v40  ;;  %2196 = vmatpush.msrb.mxu3 %v567_v41  ;;  %v615_v40 = vld [vmem:[#allocation5 + $0x948] sm:$0xff]  ;;  %v632_v41 = vld [vmem:[#allocation5 + $0x9d0] sm:$0xff] }
  0xa8   : > { %2138 = vmatpush.msrb.mxu0 %v517_v42  ;;  %2157 = vmatpush.msrb.mxu1 %v534_v43  ;;  %v582_v42 = vld [vmem:[#allocation5 + $0x840] sm:$0xff]  ;;  %v599_v43 = vld [vmem:[#allocation5 + $0x8c8] sm:$0xff] }
  0xa9   : > { %2178 = vmatpush.msrb.mxu2 %v549_v44  ;;  %2197 = vmatpush.msrb.mxu3 %v566_v45  ;;  %v614_v44 = vld [vmem:[#allocation5 + $0x940] sm:$0xff]  ;;  %v631_v45 = vld [vmem:[#allocation5 + $0x9c8] sm:$0xff] }
  0xaa   : > { %2139 = vmatpush.msrb.mxu0 %v516_v46  ;;  %2158 = vmatpush.msrb.mxu1 %v533_v47  ;;  %v581_v46 = vld [vmem:[#allocation5 + $0x838] sm:$0xff]  ;;  %v598_v47 = vld [vmem:[#allocation5 + $0x8c0] sm:$0xff] }
  0xab   : > { %2179 = vmatpush.msrb.mxu2 %v548_v48  ;;  %2198 = vmatpush.msrb.mxu3 %v565_v49  ;;  %v613_v48 = vld [vmem:[#allocation5 + $0x938] sm:$0xff]  ;;  %v630_v49 = vld [vmem:[#allocation5 + $0x9c0] sm:$0xff] }
  0xac   : > { %2140 = vmatpush.msrb.mxu0 %v515_v50  ;;  %2159 = vmatpush.msrb.mxu1 %v532_v51  ;;  %v580_v50 = vld [vmem:[#allocation5 + $0x830] sm:$0xff]  ;;  %v597_v51 = vld [vmem:[#allocation5 + $0x8b8] sm:$0xff] }
  0xad   : > { %2180 = vmatpush.msrb.mxu2 %v547_v52  ;;  %2199 = vmatpush.msrb.mxu3 %v564_v53  ;;  %v612_v52 = vld [vmem:[#allocation5 + $0x930] sm:$0xff]  ;;  %v629_v53 = vld [vmem:[#allocation5 + $0x9b8] sm:$0xff] }
  0xae   : > { %2141 = vmatpush.msrb.mxu0 %v514_v54  ;;  %2160 = vmatpush.msrb.mxu1 %v531_v55  ;;  %v579_v54 = vld [vmem:[#allocation5 + $0x828] sm:$0xff]  ;;  %v596_v55 = vld [vmem:[#allocation5 + $0x8b0] sm:$0xff] }
  0xaf   : > { %2181 = vmatpush.msrb.mxu2 %v546_v56  ;;  %2200 = vmatpush.msrb.mxu3 %v563_v57  ;;  %v611_v56 = vld [vmem:[#allocation5 + $0x928] sm:$0xff]  ;;  %v628_v57 = vld [vmem:[#allocation5 + $0x9b0] sm:$0xff] }
  0xb0   : > { %2142 = vmatpush.msrb.mxu0 %v513_v58  ;;  %2161 = vmatpush.msrb.mxu1 %v530_v59  ;;  %v578_v58 = vld [vmem:[#allocation5 + $0x820] sm:$0xff]  ;;  %v595_v59 = vld [vmem:[#allocation5 + $0x8a8] sm:$0xff] }
  0xb1   : > { %2182 = vmatpush.msrb.mxu2 %v545_v60  ;;  %2201 = vmatpush.msrb.mxu3 %v562_v61  ;;  %v610_v60 = vld [vmem:[#allocation5 + $0x920] sm:$0xff]  ;;  %v627_v61 = vld [vmem:[#allocation5 + $0x9a8] sm:$0xff] }
  0xb2   : > { %2143 = vmatpush.msrb.mxu0 %v512_v62  ;;  %2162 = vmatpush.msrb.mxu1 %v529_v63  ;;  %v577_v62 = vld [vmem:[#allocation5 + $0x818] sm:$0xff]  ;;  %v594_v63 = vld [vmem:[#allocation5 + $0x8a0] sm:$0xff] }
  0xb3   : > { %2183 = vmatpush.msrb.mxu2 %v544_v0  ;;  %2202 = vmatpush.msrb.mxu3 %v561_v1  ;;  %v609_v0 = vld [vmem:[#allocation5 + $0x918] sm:$0xff]  ;;  %v626_v1 = vld [vmem:[#allocation5 + $0x9a0] sm:$0xff] }
  0xb4   : > { %2144 = vmatpush.msrb.mxu0 %v511_v2  ;;  %2163 = vmatpush.msrb.mxu1 %v528_v3  ;;  %v576_v2 = vld [vmem:[#allocation5 + $0x810] sm:$0xff]  ;;  %v593_v3 = vld [vmem:[#allocation5 + $0x898] sm:$0xff] }
  0xb5   : > { %2184 = vmatpush.msrb.mxu2 %v543_v4  ;;  %2203 = vmatpush.msrb.mxu3 %v560_v5  ;;  %v608_v4 = vld [vmem:[#allocation5 + $0x910] sm:$0xff]  ;;  %v625_v5 = vld [vmem:[#allocation5 + $0x998] sm:$0xff] }
  0xb6   : > { %2145 = vmatpush.msrb.mxu0 %v510_v6  ;;  %2164 = vmatpush.msrb.mxu1 %v527_v7  ;;  %v575_v6 = vld [vmem:[#allocation5 + $0x808] sm:$0xff]  ;;  %v592_v7 = vld [vmem:[#allocation5 + $0x890] sm:$0xff] }
  0xb7   : > { %2185 = vmatpush.msrb.mxu2 %v542_v8  ;;  %2204 = vmatpush.msrb.mxu3 %v559_v9  ;;  %v607_v8 = vld [vmem:[#allocation5 + $0x908] sm:$0xff]  ;;  %v624_v9 = vld [vmem:[#allocation5 + $0x990] sm:$0xff] }
  0xb8   : > { %2146 = vmatmul.f32.vlgmr.msrb.gmra.mxu0 %v232_v10  ;;  %2186 = vmatmul.f32.vlgmr.msrb.gmra.mxu2 %v234_v11  ;;  %v574_v10 = vld [vmem:[#allocation5 + $0x800] sm:$0xff]  ;;  %v591_v11 = vld [vmem:[#allocation5 + $0x888] sm:$0xff] }
  0xb9   : > { %2210 = vmatpush.msra.mxu0 %v589_v12  ;;  %2250 = vmatpush.msra.mxu2 %v621_v13  ;;  %v606_v12 = vld [vmem:[#allocation5 + $0x900] sm:$0xff]  ;;  %v623_v13 = vld [vmem:[#allocation5 + $0x988] sm:$0xff] }
  0xba   : > { %2165 = vmatpush.msrb.mxu1 %v526_v14  ;;  %2205 = vmatpush.msrb.mxu3 %v558_v15  ;;  %v236_v14 = vld [vmem:[%s4326_s23 + $0x80] sm:$0xff]  ;;  %v238_v15 = vld [vmem:[%s4326_s23 + $0x90] sm:$0xff] }
  0xbb   : > { %2166 = vmatmul.f32.vlgmr.msrb.gmra.mxu1 %v233_v16  ;;  %2206 = vmatmul.f32.vlgmr.msrb.gmra.mxu3 %v235_v17  ;;  %v653_v16 = vld [vmem:[#allocation5 + $0xa78] sm:$0xff] }
  0xbc   : > { %2211 = vmatpush.msra.mxu0 %v588_v18  ;;  %2230 = vmatpush.msra.mxu1 %v605_v19  ;;  %v685_v17 = vld [vmem:[#allocation5 + $0xb78] sm:$0xff]  ;;  %v590_v18 = vld [vmem:[#allocation5 + $0x880] sm:$0xff] }
  0xbd   : > { %2251 = vmatpush.msra.mxu2 %v620_v20  ;;  %2270 = vmatpush.msra.mxu3 %v637_v21  ;;  %v622_v19 = vld [vmem:[#allocation5 + $0x980] sm:$0xff]  ;;  %v237_v20 = vld [vmem:[%s4326_s23 + $0x88] sm:$0xff]  ;;  %v239_v21 = vld [vmem:[%s4326_s23 + $0x98] sm:$0xff] }
  0xbe   : > { %2212 = vmatpush.msra.mxu0 %v587_v22  ;;  %2231 = vmatpush.msra.mxu1 %v604_v23  ;;  %v652_v22 = vld [vmem:[#allocation5 + $0xa70] sm:$0xff]  ;;  %v669_v23 = vld [vmem:[#allocation5 + $0xaf8] sm:$0xff] }
  0xbf   : > { %2252 = vmatpush.msra.mxu2 %v619_v24  ;;  %2271 = vmatpush.msra.mxu3 %v636_v25  ;;  %v684_v24 = vld [vmem:[#allocation5 + $0xb70] sm:$0xff]  ;;  %v701_v25 = vld [vmem:[#allocation5 + $0xbf8] sm:$0xff] }
  0xc0   : > { %2213 = vmatpush.msra.mxu0 %v586_v26  ;;  %2232 = vmatpush.msra.mxu1 %v603_v27  ;;  %v651_v26 = vld [vmem:[#allocation5 + $0xa68] sm:$0xff]  ;;  %v668_v27 = vld [vmem:[#allocation5 + $0xaf0] sm:$0xff] }
  0xc1   : > { %2253 = vmatpush.msra.mxu2 %v618_v28  ;;  %2272 = vmatpush.msra.mxu3 %v635_v29  ;;  %v683_v28 = vld [vmem:[#allocation5 + $0xb68] sm:$0xff]  ;;  %v700_v29 = vld [vmem:[#allocation5 + $0xbf0] sm:$0xff] }
  0xc2   : > { %2214 = vmatpush.msra.mxu0 %v585_v30  ;;  %2233 = vmatpush.msra.mxu1 %v602_v31  ;;  %v650_v30 = vld [vmem:[#allocation5 + $0xa60] sm:$0xff]  ;;  %v667_v31 = vld [vmem:[#allocation5 + $0xae8] sm:$0xff] }
  0xc3   : > { %2254 = vmatpush.msra.mxu2 %v617_v32  ;;  %2273 = vmatpush.msra.mxu3 %v634_v33  ;;  %v682_v32 = vld [vmem:[#allocation5 + $0xb60] sm:$0xff]  ;;  %v699_v33 = vld [vmem:[#allocation5 + $0xbe8] sm:$0xff] }
  0xc4   : > { %2215 = vmatpush.msra.mxu0 %v584_v34  ;;  %2234 = vmatpush.msra.mxu1 %v601_v35  ;;  %v649_v34 = vld [vmem:[#allocation5 + $0xa58] sm:$0xff]  ;;  %v666_v35 = vld [vmem:[#allocation5 + $0xae0] sm:$0xff] }
  0xc5   : > { %2255 = vmatpush.msra.mxu2 %v616_v36  ;;  %2274 = vmatpush.msra.mxu3 %v633_v37  ;;  %v681_v36 = vld [vmem:[#allocation5 + $0xb58] sm:$0xff]  ;;  %v698_v37 = vld [vmem:[#allocation5 + $0xbe0] sm:$0xff] }
  0xc6   : > { %2216 = vmatpush.msra.mxu0 %v583_v38  ;;  %2235 = vmatpush.msra.mxu1 %v600_v39  ;;  %v648_v38 = vld [vmem:[#allocation5 + $0xa50] sm:$0xff]  ;;  %v665_v39 = vld [vmem:[#allocation5 + $0xad8] sm:$0xff] }
  0xc7   : > { %2256 = vmatpush.msra.mxu2 %v615_v40  ;;  %2275 = vmatpush.msra.mxu3 %v632_v41  ;;  %v680_v40 = vld [vmem:[#allocation5 + $0xb50] sm:$0xff]  ;;  %v697_v41 = vld [vmem:[#allocation5 + $0xbd8] sm:$0xff] }
  0xc8   : > { %2217 = vmatpush.msra.mxu0 %v582_v42  ;;  %2236 = vmatpush.msra.mxu1 %v599_v43  ;;  %v647_v42 = vld [vmem:[#allocation5 + $0xa48] sm:$0xff]  ;;  %v664_v43 = vld [vmem:[#allocation5 + $0xad0] sm:$0xff] }
  0xc9   : > { %2257 = vmatpush.msra.mxu2 %v614_v44  ;;  %2276 = vmatpush.msra.mxu3 %v631_v45  ;;  %v679_v44 = vld [vmem:[#allocation5 + $0xb48] sm:$0xff]  ;;  %v696_v45 = vld [vmem:[#allocation5 + $0xbd0] sm:$0xff] }
  0xca   : > { %2218 = vmatpush.msra.mxu0 %v581_v46  ;;  %2237 = vmatpush.msra.mxu1 %v598_v47  ;;  %v646_v46 = vld [vmem:[#allocation5 + $0xa40] sm:$0xff]  ;;  %v663_v47 = vld [vmem:[#allocation5 + $0xac8] sm:$0xff] }
  0xcb   : > { %2258 = vmatpush.msra.mxu2 %v613_v48  ;;  %2277 = vmatpush.msra.mxu3 %v630_v49  ;;  %v678_v48 = vld [vmem:[#allocation5 + $0xb40] sm:$0xff]  ;;  %v695_v49 = vld [vmem:[#allocation5 + $0xbc8] sm:$0xff] }
  0xcc   : > { %2219 = vmatpush.msra.mxu0 %v580_v50  ;;  %2238 = vmatpush.msra.mxu1 %v597_v51  ;;  %v645_v50 = vld [vmem:[#allocation5 + $0xa38] sm:$0xff]  ;;  %v662_v51 = vld [vmem:[#allocation5 + $0xac0] sm:$0xff] }
  0xcd   : > { %2259 = vmatpush.msra.mxu2 %v612_v52  ;;  %2278 = vmatpush.msra.mxu3 %v629_v53  ;;  %v677_v52 = vld [vmem:[#allocation5 + $0xb38] sm:$0xff]  ;;  %v694_v53 = vld [vmem:[#allocation5 + $0xbc0] sm:$0xff] }
  0xce   : > { %2220 = vmatpush.msra.mxu0 %v579_v54  ;;  %2239 = vmatpush.msra.mxu1 %v596_v55  ;;  %v644_v54 = vld [vmem:[#allocation5 + $0xa30] sm:$0xff]  ;;  %v661_v55 = vld [vmem:[#allocation5 + $0xab8] sm:$0xff] }
  0xcf   : > { %2260 = vmatpush.msra.mxu2 %v611_v56  ;;  %2279 = vmatpush.msra.mxu3 %v628_v57  ;;  %v676_v56 = vld [vmem:[#allocation5 + $0xb30] sm:$0xff]  ;;  %v693_v57 = vld [vmem:[#allocation5 + $0xbb8] sm:$0xff] }
  0xd0   : > { %2221 = vmatpush.msra.mxu0 %v578_v58  ;;  %2240 = vmatpush.msra.mxu1 %v595_v59  ;;  %v643_v58 = vld [vmem:[#allocation5 + $0xa28] sm:$0xff]  ;;  %v660_v59 = vld [vmem:[#allocation5 + $0xab0] sm:$0xff] }
  0xd1   : > { %2261 = vmatpush.msra.mxu2 %v610_v60  ;;  %2280 = vmatpush.msra.mxu3 %v627_v61  ;;  %v675_v60 = vld [vmem:[#allocation5 + $0xb28] sm:$0xff]  ;;  %v692_v61 = vld [vmem:[#allocation5 + $0xbb0] sm:$0xff] }
  0xd2   : > { %2222 = vmatpush.msra.mxu0 %v577_v62  ;;  %2241 = vmatpush.msra.mxu1 %v594_v63  ;;  %v642_v62 = vld [vmem:[#allocation5 + $0xa20] sm:$0xff]  ;;  %v659_v63 = vld [vmem:[#allocation5 + $0xaa8] sm:$0xff] }
  0xd3   : > { %2262 = vmatpush.msra.mxu2 %v609_v0  ;;  %2281 = vmatpush.msra.mxu3 %v626_v1  ;;  %v674_v0 = vld [vmem:[#allocation5 + $0xb20] sm:$0xff]  ;;  %v691_v1 = vld [vmem:[#allocation5 + $0xba8] sm:$0xff] }
  0xd4   : > { %2223 = vmatpush.msra.mxu0 %v576_v2  ;;  %2242 = vmatpush.msra.mxu1 %v593_v3  ;;  %v641_v2 = vld [vmem:[#allocation5 + $0xa18] sm:$0xff]  ;;  %v658_v3 = vld [vmem:[#allocation5 + $0xaa0] sm:$0xff] }
  0xd5   : > { %2263 = vmatpush.msra.mxu2 %v608_v4  ;;  %2282 = vmatpush.msra.mxu3 %v625_v5  ;;  %v673_v4 = vld [vmem:[#allocation5 + $0xb18] sm:$0xff]  ;;  %v690_v5 = vld [vmem:[#allocation5 + $0xba0] sm:$0xff] }
  0xd6   : > { %2224 = vmatpush.msra.mxu0 %v575_v6  ;;  %2243 = vmatpush.msra.mxu1 %v592_v7  ;;  %v640_v6 = vld [vmem:[#allocation5 + $0xa10] sm:$0xff]  ;;  %v657_v7 = vld [vmem:[#allocation5 + $0xa98] sm:$0xff] }
  0xd7   : > { %2264 = vmatpush.msra.mxu2 %v607_v8  ;;  %2283 = vmatpush.msra.mxu3 %v624_v9  ;;  %v672_v8 = vld [vmem:[#allocation5 + $0xb10] sm:$0xff]  ;;  %v689_v9 = vld [vmem:[#allocation5 + $0xb98] sm:$0xff] }
  0xd8   : > { %2225 = vmatpush.msra.mxu0 %v574_v10  ;;  %2244 = vmatpush.msra.mxu1 %v591_v11  ;;  %v639_v10 = vld [vmem:[#allocation5 + $0xa08] sm:$0xff]  ;;  %v656_v11 = vld [vmem:[#allocation5 + $0xa90] sm:$0xff] }
  0xd9   : > { %2265 = vmatpush.msra.mxu2 %v606_v12  ;;  %2284 = vmatpush.msra.mxu3 %v623_v13  ;;  %v671_v12 = vld [vmem:[#allocation5 + $0xb08] sm:$0xff]  ;;  %v688_v13 = vld [vmem:[#allocation5 + $0xb90] sm:$0xff] }
  0xda   : > { %2226 = vmatmul.f32.vlgmr.msra.gmra.mxu0 %v236_v14  ;;  %2266 = vmatmul.f32.vlgmr.msra.gmra.mxu2 %v238_v15  ;;  %v638_v14 = vld [vmem:[#allocation5 + $0xa00] sm:$0xff]  ;;  %v655_v15 = vld [vmem:[#allocation5 + $0xa88] sm:$0xff] }
  0xdb   : > { %2290 = vmatpush.msrb.mxu0 %v653_v16  ;;  %2330 = vmatpush.msrb.mxu2 %v685_v17  ;;  %v670_v16 = vld [vmem:[#allocation5 + $0xb00] sm:$0xff]  ;;  %v687_v17 = vld [vmem:[#allocation5 + $0xb88] sm:$0xff] }
  0xdc   : > { %2245 = vmatpush.msra.mxu1 %v590_v18  ;;  %2285 = vmatpush.msra.mxu3 %v622_v19  ;;  %v240_v18 = vld [vmem:[%s4326_s23 + $0xa0] sm:$0xff]  ;;  %v242_v19 = vld [vmem:[%s4326_s23 + $0xb0] sm:$0xff] }
  0xdd   : > { %2246 = vmatmul.f32.vlgmr.msra.gmra.mxu1 %v237_v20  ;;  %2286 = vmatmul.f32.vlgmr.msra.gmra.mxu3 %v239_v21  ;;  %v717_v20 = vld [vmem:[#allocation5 + $0xc78] sm:$0xff] }
  0xde   : > { %2291 = vmatpush.msrb.mxu0 %v652_v22  ;;  %2310 = vmatpush.msrb.mxu1 %v669_v23  ;;  %v749_v21 = vld [vmem:[#allocation5 + $0xd78] sm:$0xff]  ;;  %v654_v22 = vld [vmem:[#allocation5 + $0xa80] sm:$0xff] }
  0xdf   : > { %2331 = vmatpush.msrb.mxu2 %v684_v24  ;;  %2350 = vmatpush.msrb.mxu3 %v701_v25  ;;  %v686_v23 = vld [vmem:[#allocation5 + $0xb80] sm:$0xff]  ;;  %v241_v24 = vld [vmem:[%s4326_s23 + $0xa8] sm:$0xff]  ;;  %v243_v25 = vld [vmem:[%s4326_s23 + $0xb8] sm:$0xff] }
  0xe0   : > { %2292 = vmatpush.msrb.mxu0 %v651_v26  ;;  %2311 = vmatpush.msrb.mxu1 %v668_v27  ;;  %v716_v26 = vld [vmem:[#allocation5 + $0xc70] sm:$0xff]  ;;  %v733_v27 = vld [vmem:[#allocation5 + $0xcf8] sm:$0xff] }
  0xe1   : > { %2332 = vmatpush.msrb.mxu2 %v683_v28  ;;  %2351 = vmatpush.msrb.mxu3 %v700_v29  ;;  %v748_v28 = vld [vmem:[#allocation5 + $0xd70] sm:$0xff]  ;;  %v765_v29 = vld [vmem:[#allocation5 + $0xdf8] sm:$0xff] }
  0xe2   : > { %2293 = vmatpush.msrb.mxu0 %v650_v30  ;;  %2312 = vmatpush.msrb.mxu1 %v667_v31  ;;  %v715_v30 = vld [vmem:[#allocation5 + $0xc68] sm:$0xff]  ;;  %v732_v31 = vld [vmem:[#allocation5 + $0xcf0] sm:$0xff] }
  0xe3   : > { %2333 = vmatpush.msrb.mxu2 %v682_v32  ;;  %2352 = vmatpush.msrb.mxu3 %v699_v33  ;;  %v747_v32 = vld [vmem:[#allocation5 + $0xd68] sm:$0xff]  ;;  %v764_v33 = vld [vmem:[#allocation5 + $0xdf0] sm:$0xff] }
  0xe4   : > { %2294 = vmatpush.msrb.mxu0 %v649_v34  ;;  %2313 = vmatpush.msrb.mxu1 %v666_v35  ;;  %v714_v34 = vld [vmem:[#allocation5 + $0xc60] sm:$0xff]  ;;  %v731_v35 = vld [vmem:[#allocation5 + $0xce8] sm:$0xff] }
  0xe5   : > { %2334 = vmatpush.msrb.mxu2 %v681_v36  ;;  %2353 = vmatpush.msrb.mxu3 %v698_v37  ;;  %v746_v36 = vld [vmem:[#allocation5 + $0xd60] sm:$0xff]  ;;  %v763_v37 = vld [vmem:[#allocation5 + $0xde8] sm:$0xff] }
  0xe6   : > { %2295 = vmatpush.msrb.mxu0 %v648_v38  ;;  %2314 = vmatpush.msrb.mxu1 %v665_v39  ;;  %v713_v38 = vld [vmem:[#allocation5 + $0xc58] sm:$0xff]  ;;  %v730_v39 = vld [vmem:[#allocation5 + $0xce0] sm:$0xff] }
  0xe7   : > { %2335 = vmatpush.msrb.mxu2 %v680_v40  ;;  %2354 = vmatpush.msrb.mxu3 %v697_v41  ;;  %v745_v40 = vld [vmem:[#allocation5 + $0xd58] sm:$0xff]  ;;  %v762_v41 = vld [vmem:[#allocation5 + $0xde0] sm:$0xff] }
  0xe8   : > { %2296 = vmatpush.msrb.mxu0 %v647_v42  ;;  %2315 = vmatpush.msrb.mxu1 %v664_v43  ;;  %v712_v42 = vld [vmem:[#allocation5 + $0xc50] sm:$0xff]  ;;  %v729_v43 = vld [vmem:[#allocation5 + $0xcd8] sm:$0xff] }
  0xe9   : > { %2336 = vmatpush.msrb.mxu2 %v679_v44  ;;  %2355 = vmatpush.msrb.mxu3 %v696_v45  ;;  %v744_v44 = vld [vmem:[#allocation5 + $0xd50] sm:$0xff]  ;;  %v761_v45 = vld [vmem:[#allocation5 + $0xdd8] sm:$0xff] }
  0xea   : > { %2297 = vmatpush.msrb.mxu0 %v646_v46  ;;  %2316 = vmatpush.msrb.mxu1 %v663_v47  ;;  %v711_v46 = vld [vmem:[#allocation5 + $0xc48] sm:$0xff]  ;;  %v728_v47 = vld [vmem:[#allocation5 + $0xcd0] sm:$0xff] }
  0xeb   : > { %2337 = vmatpush.msrb.mxu2 %v678_v48  ;;  %2356 = vmatpush.msrb.mxu3 %v695_v49  ;;  %v743_v48 = vld [vmem:[#allocation5 + $0xd48] sm:$0xff]  ;;  %v760_v49 = vld [vmem:[#allocation5 + $0xdd0] sm:$0xff] }
  0xec   : > { %2298 = vmatpush.msrb.mxu0 %v645_v50  ;;  %2317 = vmatpush.msrb.mxu1 %v662_v51  ;;  %v710_v50 = vld [vmem:[#allocation5 + $0xc40] sm:$0xff]  ;;  %v727_v51 = vld [vmem:[#allocation5 + $0xcc8] sm:$0xff] }
  0xed   : > { %2338 = vmatpush.msrb.mxu2 %v677_v52  ;;  %2357 = vmatpush.msrb.mxu3 %v694_v53  ;;  %v742_v52 = vld [vmem:[#allocation5 + $0xd40] sm:$0xff]  ;;  %v759_v53 = vld [vmem:[#allocation5 + $0xdc8] sm:$0xff] }
  0xee   : > { %2299 = vmatpush.msrb.mxu0 %v644_v54  ;;  %2318 = vmatpush.msrb.mxu1 %v661_v55  ;;  %v709_v54 = vld [vmem:[#allocation5 + $0xc38] sm:$0xff]  ;;  %v726_v55 = vld [vmem:[#allocation5 + $0xcc0] sm:$0xff] }
  0xef   : > { %2339 = vmatpush.msrb.mxu2 %v676_v56  ;;  %2358 = vmatpush.msrb.mxu3 %v693_v57  ;;  %v741_v56 = vld [vmem:[#allocation5 + $0xd38] sm:$0xff]  ;;  %v758_v57 = vld [vmem:[#allocation5 + $0xdc0] sm:$0xff] }
  0xf0   : > { %2300 = vmatpush.msrb.mxu0 %v643_v58  ;;  %2319 = vmatpush.msrb.mxu1 %v660_v59  ;;  %v708_v58 = vld [vmem:[#allocation5 + $0xc30] sm:$0xff]  ;;  %v725_v59 = vld [vmem:[#allocation5 + $0xcb8] sm:$0xff] }
  0xf1   : > { %2340 = vmatpush.msrb.mxu2 %v675_v60  ;;  %2359 = vmatpush.msrb.mxu3 %v692_v61  ;;  %v740_v60 = vld [vmem:[#allocation5 + $0xd30] sm:$0xff]  ;;  %v757_v61 = vld [vmem:[#allocation5 + $0xdb8] sm:$0xff] }
  0xf2   : > { %2301 = vmatpush.msrb.mxu0 %v642_v62  ;;  %2320 = vmatpush.msrb.mxu1 %v659_v63  ;;  %v707_v62 = vld [vmem:[#allocation5 + $0xc28] sm:$0xff]  ;;  %v724_v63 = vld [vmem:[#allocation5 + $0xcb0] sm:$0xff] }
  0xf3   : > { %2341 = vmatpush.msrb.mxu2 %v674_v0  ;;  %2360 = vmatpush.msrb.mxu3 %v691_v1  ;;  %v739_v0 = vld [vmem:[#allocation5 + $0xd28] sm:$0xff]  ;;  %v756_v1 = vld [vmem:[#allocation5 + $0xdb0] sm:$0xff] }
  0xf4   : > { %2302 = vmatpush.msrb.mxu0 %v641_v2  ;;  %2321 = vmatpush.msrb.mxu1 %v658_v3  ;;  %v706_v2 = vld [vmem:[#allocation5 + $0xc20] sm:$0xff]  ;;  %v723_v3 = vld [vmem:[#allocation5 + $0xca8] sm:$0xff] }
  0xf5   : > { %2342 = vmatpush.msrb.mxu2 %v673_v4  ;;  %2361 = vmatpush.msrb.mxu3 %v690_v5  ;;  %v738_v4 = vld [vmem:[#allocation5 + $0xd20] sm:$0xff]  ;;  %v755_v5 = vld [vmem:[#allocation5 + $0xda8] sm:$0xff] }
  0xf6   : > { %2303 = vmatpush.msrb.mxu0 %v640_v6  ;;  %2322 = vmatpush.msrb.mxu1 %v657_v7  ;;  %v705_v6 = vld [vmem:[#allocation5 + $0xc18] sm:$0xff]  ;;  %v722_v7 = vld [vmem:[#allocation5 + $0xca0] sm:$0xff] }
  0xf7   : > { %2343 = vmatpush.msrb.mxu2 %v672_v8  ;;  %2362 = vmatpush.msrb.mxu3 %v689_v9  ;;  %v737_v8 = vld [vmem:[#allocation5 + $0xd18] sm:$0xff]  ;;  %v754_v9 = vld [vmem:[#allocation5 + $0xda0] sm:$0xff] }
  0xf8   : > { %2304 = vmatpush.msrb.mxu0 %v639_v10  ;;  %2323 = vmatpush.msrb.mxu1 %v656_v11  ;;  %v704_v10 = vld [vmem:[#allocation5 + $0xc10] sm:$0xff]  ;;  %v721_v11 = vld [vmem:[#allocation5 + $0xc98] sm:$0xff] }
  0xf9   : > { %2344 = vmatpush.msrb.mxu2 %v671_v12  ;;  %2363 = vmatpush.msrb.mxu3 %v688_v13  ;;  %v736_v12 = vld [vmem:[#allocation5 + $0xd10] sm:$0xff]  ;;  %v753_v13 = vld [vmem:[#allocation5 + $0xd98] sm:$0xff] }
  0xfa   : > { %2305 = vmatpush.msrb.mxu0 %v638_v14  ;;  %2324 = vmatpush.msrb.mxu1 %v655_v15  ;;  %v703_v14 = vld [vmem:[#allocation5 + $0xc08] sm:$0xff]  ;;  %v720_v15 = vld [vmem:[#allocation5 + $0xc90] sm:$0xff] }
  0xfb   : > { %2345 = vmatpush.msrb.mxu2 %v670_v16  ;;  %2364 = vmatpush.msrb.mxu3 %v687_v17  ;;  %v735_v16 = vld [vmem:[#allocation5 + $0xd08] sm:$0xff]  ;;  %v752_v17 = vld [vmem:[#allocation5 + $0xd90] sm:$0xff] }
  0xfc   : > { %2306 = vmatmul.f32.vlgmr.msrb.gmra.mxu0 %v240_v18  ;;  %2346 = vmatmul.f32.vlgmr.msrb.gmra.mxu2 %v242_v19  ;;  %v702_v18 = vld [vmem:[#allocation5 + $0xc00] sm:$0xff]  ;;  %v719_v19 = vld [vmem:[#allocation5 + $0xc88] sm:$0xff] }
  0xfd   : > { %2370 = vmatpush.msra.mxu0 %v717_v20  ;;  %2410 = vmatpush.msra.mxu2 %v749_v21  ;;  %v734_v20 = vld [vmem:[#allocation5 + $0xd00] sm:$0xff]  ;;  %v751_v21 = vld [vmem:[#allocation5 + $0xd88] sm:$0xff] }
  0xfe   : > { %2325 = vmatpush.msrb.mxu1 %v654_v22  ;;  %2365 = vmatpush.msrb.mxu3 %v686_v23  ;;  %v244_v22 = vld [vmem:[%s4326_s23 + $0xc0] sm:$0xff]  ;;  %v246_v23 = vld [vmem:[%s4326_s23 + $0xd0] sm:$0xff] }
  0xff   : > { %2326 = vmatmul.f32.vlgmr.msrb.gmra.mxu1 %v241_v24  ;;  %2366 = vmatmul.f32.vlgmr.msrb.gmra.mxu3 %v243_v25  ;;  %v781_v24 = vld [vmem:[#allocation5 + $0xe78] sm:$0xff] }
 0x100   : > { %2371 = vmatpush.msra.mxu0 %v716_v26  ;;  %2390 = vmatpush.msra.mxu1 %v733_v27  ;;  %v813_v25 = vld [vmem:[#allocation5 + $0xf78] sm:$0xff]  ;;  %v718_v26 = vld [vmem:[#allocation5 + $0xc80] sm:$0xff] }
 0x101   : > { %2411 = vmatpush.msra.mxu2 %v748_v28  ;;  %2430 = vmatpush.msra.mxu3 %v765_v29  ;;  %v750_v27 = vld [vmem:[#allocation5 + $0xd80] sm:$0xff]  ;;  %v245_v28 = vld [vmem:[%s4326_s23 + $0xc8] sm:$0xff]  ;;  %v247_v29 = vld [vmem:[%s4326_s23 + $0xd8] sm:$0xff] }
 0x102   : > { %2372 = vmatpush.msra.mxu0 %v715_v30  ;;  %2391 = vmatpush.msra.mxu1 %v732_v31  ;;  %v780_v30 = vld [vmem:[#allocation5 + $0xe70] sm:$0xff]  ;;  %v797_v31 = vld [vmem:[#allocation5 + $0xef8] sm:$0xff] }
 0x103   : > { %2412 = vmatpush.msra.mxu2 %v747_v32  ;;  %2431 = vmatpush.msra.mxu3 %v764_v33  ;;  %v812_v32 = vld [vmem:[#allocation5 + $0xf70] sm:$0xff]  ;;  %v829_v33 = vld [vmem:[#allocation5 + $0xff8] sm:$0xff] }
 0x104   : > { %2373 = vmatpush.msra.mxu0 %v714_v34  ;;  %2392 = vmatpush.msra.mxu1 %v731_v35  ;;  %v779_v34 = vld [vmem:[#allocation5 + $0xe68] sm:$0xff]  ;;  %v796_v35 = vld [vmem:[#allocation5 + $0xef0] sm:$0xff] }
 0x105   : > { %2413 = vmatpush.msra.mxu2 %v746_v36  ;;  %2432 = vmatpush.msra.mxu3 %v763_v37  ;;  %v811_v36 = vld [vmem:[#allocation5 + $0xf68] sm:$0xff]  ;;  %v828_v37 = vld [vmem:[#allocation5 + $0xff0] sm:$0xff] }
 0x106   : > { %2374 = vmatpush.msra.mxu0 %v713_v38  ;;  %2393 = vmatpush.msra.mxu1 %v730_v39  ;;  %v778_v38 = vld [vmem:[#allocation5 + $0xe60] sm:$0xff]  ;;  %v795_v39 = vld [vmem:[#allocation5 + $0xee8] sm:$0xff] }
 0x107   : > { %2414 = vmatpush.msra.mxu2 %v745_v40  ;;  %2433 = vmatpush.msra.mxu3 %v762_v41  ;;  %v810_v40 = vld [vmem:[#allocation5 + $0xf60] sm:$0xff]  ;;  %v827_v41 = vld [vmem:[#allocation5 + $0xfe8] sm:$0xff] }
 0x108   : > { %2375 = vmatpush.msra.mxu0 %v712_v42  ;;  %2394 = vmatpush.msra.mxu1 %v729_v43  ;;  %v777_v42 = vld [vmem:[#allocation5 + $0xe58] sm:$0xff]  ;;  %v794_v43 = vld [vmem:[#allocation5 + $0xee0] sm:$0xff] }
 0x109   : > { %2415 = vmatpush.msra.mxu2 %v744_v44  ;;  %2434 = vmatpush.msra.mxu3 %v761_v45  ;;  %v809_v44 = vld [vmem:[#allocation5 + $0xf58] sm:$0xff]  ;;  %v826_v45 = vld [vmem:[#allocation5 + $0xfe0] sm:$0xff] }
 0x10a   : > { %2376 = vmatpush.msra.mxu0 %v711_v46  ;;  %2395 = vmatpush.msra.mxu1 %v728_v47  ;;  %v776_v46 = vld [vmem:[#allocation5 + $0xe50] sm:$0xff]  ;;  %v793_v47 = vld [vmem:[#allocation5 + $0xed8] sm:$0xff] }
 0x10b   : > { %2416 = vmatpush.msra.mxu2 %v743_v48  ;;  %2435 = vmatpush.msra.mxu3 %v760_v49  ;;  %v808_v48 = vld [vmem:[#allocation5 + $0xf50] sm:$0xff]  ;;  %v825_v49 = vld [vmem:[#allocation5 + $0xfd8] sm:$0xff] }
 0x10c   : > { %2377 = vmatpush.msra.mxu0 %v710_v50  ;;  %2396 = vmatpush.msra.mxu1 %v727_v51  ;;  %v775_v50 = vld [vmem:[#allocation5 + $0xe48] sm:$0xff]  ;;  %v792_v51 = vld [vmem:[#allocation5 + $0xed0] sm:$0xff] }
 0x10d   : > { %2417 = vmatpush.msra.mxu2 %v742_v52  ;;  %2436 = vmatpush.msra.mxu3 %v759_v53  ;;  %v807_v52 = vld [vmem:[#allocation5 + $0xf48] sm:$0xff]  ;;  %v824_v53 = vld [vmem:[#allocation5 + $0xfd0] sm:$0xff] }
 0x10e   : > { %2378 = vmatpush.msra.mxu0 %v709_v54  ;;  %2397 = vmatpush.msra.mxu1 %v726_v55  ;;  %v774_v54 = vld [vmem:[#allocation5 + $0xe40] sm:$0xff]  ;;  %v791_v55 = vld [vmem:[#allocation5 + $0xec8] sm:$0xff] }
 0x10f   : > { %2418 = vmatpush.msra.mxu2 %v741_v56  ;;  %2437 = vmatpush.msra.mxu3 %v758_v57  ;;  %v806_v56 = vld [vmem:[#allocation5 + $0xf40] sm:$0xff]  ;;  %v823_v57 = vld [vmem:[#allocation5 + $0xfc8] sm:$0xff] }
 0x110   : > { %2379 = vmatpush.msra.mxu0 %v708_v58  ;;  %2398 = vmatpush.msra.mxu1 %v725_v59  ;;  %v773_v58 = vld [vmem:[#allocation5 + $0xe38] sm:$0xff]  ;;  %v790_v59 = vld [vmem:[#allocation5 + $0xec0] sm:$0xff] }
 0x111   : > { %2419 = vmatpush.msra.mxu2 %v740_v60  ;;  %2438 = vmatpush.msra.mxu3 %v757_v61  ;;  %v805_v60 = vld [vmem:[#allocation5 + $0xf38] sm:$0xff]  ;;  %v822_v61 = vld [vmem:[#allocation5 + $0xfc0] sm:$0xff] }
 0x112   : > { %2380 = vmatpush.msra.mxu0 %v707_v62  ;;  %2399 = vmatpush.msra.mxu1 %v724_v63  ;;  %v772_v62 = vld [vmem:[#allocation5 + $0xe30] sm:$0xff]  ;;  %v789_v63 = vld [vmem:[#allocation5 + $0xeb8] sm:$0xff] }
 0x113   : > { %2420 = vmatpush.msra.mxu2 %v739_v0  ;;  %2439 = vmatpush.msra.mxu3 %v756_v1  ;;  %v804_v0 = vld [vmem:[#allocation5 + $0xf30] sm:$0xff]  ;;  %v821_v1 = vld [vmem:[#allocation5 + $0xfb8] sm:$0xff] }
 0x114   : > { %2381 = vmatpush.msra.mxu0 %v706_v2  ;;  %2400 = vmatpush.msra.mxu1 %v723_v3  ;;  %v771_v2 = vld [vmem:[#allocation5 + $0xe28] sm:$0xff]  ;;  %v788_v3 = vld [vmem:[#allocation5 + $0xeb0] sm:$0xff] }
 0x115   : > { %2421 = vmatpush.msra.mxu2 %v738_v4  ;;  %2440 = vmatpush.msra.mxu3 %v755_v5  ;;  %v803_v4 = vld [vmem:[#allocation5 + $0xf28] sm:$0xff]  ;;  %v820_v5 = vld [vmem:[#allocation5 + $0xfb0] sm:$0xff] }
 0x116   : > { %2382 = vmatpush.msra.mxu0 %v705_v6  ;;  %2401 = vmatpush.msra.mxu1 %v722_v7  ;;  %v770_v6 = vld [vmem:[#allocation5 + $0xe20] sm:$0xff]  ;;  %v787_v7 = vld [vmem:[#allocation5 + $0xea8] sm:$0xff] }
 0x117   : > { %2422 = vmatpush.msra.mxu2 %v737_v8  ;;  %2441 = vmatpush.msra.mxu3 %v754_v9  ;;  %v802_v8 = vld [vmem:[#allocation5 + $0xf20] sm:$0xff]  ;;  %v819_v9 = vld [vmem:[#allocation5 + $0xfa8] sm:$0xff] }
 0x118   : > { %2383 = vmatpush.msra.mxu0 %v704_v10  ;;  %2402 = vmatpush.msra.mxu1 %v721_v11  ;;  %v769_v10 = vld [vmem:[#allocation5 + $0xe18] sm:$0xff]  ;;  %v786_v11 = vld [vmem:[#allocation5 + $0xea0] sm:$0xff] }
 0x119   : > { %2423 = vmatpush.msra.mxu2 %v736_v12  ;;  %2442 = vmatpush.msra.mxu3 %v753_v13  ;;  %v801_v12 = vld [vmem:[#allocation5 + $0xf18] sm:$0xff]  ;;  %v818_v13 = vld [vmem:[#allocation5 + $0xfa0] sm:$0xff] }
 0x11a   : > { %2384 = vmatpush.msra.mxu0 %v703_v14  ;;  %2403 = vmatpush.msra.mxu1 %v720_v15  ;;  %v768_v14 = vld [vmem:[#allocation5 + $0xe10] sm:$0xff]  ;;  %v785_v15 = vld [vmem:[#allocation5 + $0xe98] sm:$0xff] }
 0x11b   : > { %2424 = vmatpush.msra.mxu2 %v735_v16  ;;  %2443 = vmatpush.msra.mxu3 %v752_v17  ;;  %v800_v16 = vld [vmem:[#allocation5 + $0xf10] sm:$0xff]  ;;  %v817_v17 = vld [vmem:[#allocation5 + $0xf98] sm:$0xff] }
 0x11c   : > { %2385 = vmatpush.msra.mxu0 %v702_v18  ;;  %2404 = vmatpush.msra.mxu1 %v719_v19  ;;  %v767_v18 = vld [vmem:[#allocation5 + $0xe08] sm:$0xff]  ;;  %v784_v19 = vld [vmem:[#allocation5 + $0xe90] sm:$0xff] }
 0x11d   : > { %2425 = vmatpush.msra.mxu2 %v734_v20  ;;  %2444 = vmatpush.msra.mxu3 %v751_v21  ;;  %v799_v20 = vld [vmem:[#allocation5 + $0xf08] sm:$0xff]  ;;  %v816_v21 = vld [vmem:[#allocation5 + $0xf90] sm:$0xff] }
 0x11e   : > { %2386 = vmatmul.f32.vlgmr.msra.gmra.mxu0 %v244_v22  ;;  %2426 = vmatmul.f32.vlgmr.msra.gmra.mxu2 %v246_v23  ;;  %v766_v22 = vld [vmem:[#allocation5 + $0xe00] sm:$0xff]  ;;  %v783_v23 = vld [vmem:[#allocation5 + $0xe88] sm:$0xff] }
 0x11f   : > { %2450 = vmatpush.msrb.mxu0 %v781_v24  ;;  %2490 = vmatpush.msrb.mxu2 %v813_v25  ;;  %v798_v24 = vld [vmem:[#allocation5 + $0xf00] sm:$0xff]  ;;  %v815_v25 = vld [vmem:[#allocation5 + $0xf88] sm:$0xff] }
 0x120   : > { %2405 = vmatpush.msra.mxu1 %v718_v26  ;;  %2445 = vmatpush.msra.mxu3 %v750_v27  ;;  %v248_v26 = vld [vmem:[%s4326_s23 + $0xe0] sm:$0xff]  ;;  %v250_v27 = vld [vmem:[%s4326_s23 + $0xf0] sm:$0xff] }
 0x121   : > { %2406 = vmatmul.f32.vlgmr.msra.gmra.mxu1 %v245_v28  ;;  %2446 = vmatmul.f32.vlgmr.msra.gmra.mxu3 %v247_v29  ;;  %v845_v28 = vld [vmem:[#allocation5 + $0x1078] sm:$0xff] }
 0x122   : > { %2451 = vmatpush.msrb.mxu0 %v780_v30  ;;  %2470 = vmatpush.msrb.mxu1 %v797_v31  ;;  %v877_v29 = vld [vmem:[#allocation5 + $0x1178] sm:$0xff]  ;;  %v782_v30 = vld [vmem:[#allocation5 + $0xe80] sm:$0xff] }
 0x123   : > { %2491 = vmatpush.msrb.mxu2 %v812_v32  ;;  %2510 = vmatpush.msrb.mxu3 %v829_v33  ;;  %v814_v31 = vld [vmem:[#allocation5 + $0xf80] sm:$0xff]  ;;  %v249_v32 = vld [vmem:[%s4326_s23 + $0xe8] sm:$0xff]  ;;  %v251_v33 = vld [vmem:[%s4326_s23 + $0xf8] sm:$0xff] }
 0x124   : > { %2452 = vmatpush.msrb.mxu0 %v779_v34  ;;  %2471 = vmatpush.msrb.mxu1 %v796_v35  ;;  %v844_v34 = vld [vmem:[#allocation5 + $0x1070] sm:$0xff]  ;;  %v861_v35 = vld [vmem:[#allocation5 + $0x10f8] sm:$0xff] }
 0x125   : > { %2492 = vmatpush.msrb.mxu2 %v811_v36  ;;  %2511 = vmatpush.msrb.mxu3 %v828_v37  ;;  %v876_v36 = vld [vmem:[#allocation5 + $0x1170] sm:$0xff]  ;;  %v893_v37 = vld [vmem:[#allocation5 + $0x11f8] sm:$0xff] }
 0x126   : > { %2453 = vmatpush.msrb.mxu0 %v778_v38  ;;  %2472 = vmatpush.msrb.mxu1 %v795_v39  ;;  %v843_v38 = vld [vmem:[#allocation5 + $0x1068] sm:$0xff]  ;;  %v860_v39 = vld [vmem:[#allocation5 + $0x10f0] sm:$0xff] }
 0x127   : > { %2493 = vmatpush.msrb.mxu2 %v810_v40  ;;  %2512 = vmatpush.msrb.mxu3 %v827_v41  ;;  %v875_v40 = vld [vmem:[#allocation5 + $0x1168] sm:$0xff]  ;;  %v892_v41 = vld [vmem:[#allocation5 + $0x11f0] sm:$0xff] }
 0x128   : > { %2454 = vmatpush.msrb.mxu0 %v777_v42  ;;  %2473 = vmatpush.msrb.mxu1 %v794_v43  ;;  %v842_v42 = vld [vmem:[#allocation5 + $0x1060] sm:$0xff]  ;;  %v859_v43 = vld [vmem:[#allocation5 + $0x10e8] sm:$0xff] }
 0x129   : > { %2494 = vmatpush.msrb.mxu2 %v809_v44  ;;  %2513 = vmatpush.msrb.mxu3 %v826_v45  ;;  %v874_v44 = vld [vmem:[#allocation5 + $0x1160] sm:$0xff]  ;;  %v891_v45 = vld [vmem:[#allocation5 + $0x11e8] sm:$0xff] }
 0x12a   : > { %2455 = vmatpush.msrb.mxu0 %v776_v46  ;;  %2474 = vmatpush.msrb.mxu1 %v793_v47  ;;  %v841_v46 = vld [vmem:[#allocation5 + $0x1058] sm:$0xff]  ;;  %v858_v47 = vld [vmem:[#allocation5 + $0x10e0] sm:$0xff] }
 0x12b   : > { %2495 = vmatpush.msrb.mxu2 %v808_v48  ;;  %2514 = vmatpush.msrb.mxu3 %v825_v49  ;;  %v873_v48 = vld [vmem:[#allocation5 + $0x1158] sm:$0xff]  ;;  %v890_v49 = vld [vmem:[#allocation5 + $0x11e0] sm:$0xff] }
 0x12c   : > { %2456 = vmatpush.msrb.mxu0 %v775_v50  ;;  %2475 = vmatpush.msrb.mxu1 %v792_v51  ;;  %v840_v50 = vld [vmem:[#allocation5 + $0x1050] sm:$0xff]  ;;  %v857_v51 = vld [vmem:[#allocation5 + $0x10d8] sm:$0xff] }
 0x12d   : > { %2496 = vmatpush.msrb.mxu2 %v807_v52  ;;  %2515 = vmatpush.msrb.mxu3 %v824_v53  ;;  %v872_v52 = vld [vmem:[#allocation5 + $0x1150] sm:$0xff]  ;;  %v889_v53 = vld [vmem:[#allocation5 + $0x11d8] sm:$0xff] }
 0x12e   : > { %2457 = vmatpush.msrb.mxu0 %v774_v54  ;;  %2476 = vmatpush.msrb.mxu1 %v791_v55  ;;  %v839_v54 = vld [vmem:[#allocation5 + $0x1048] sm:$0xff]  ;;  %v856_v55 = vld [vmem:[#allocation5 + $0x10d0] sm:$0xff] }
 0x12f   : > { %2497 = vmatpush.msrb.mxu2 %v806_v56  ;;  %2516 = vmatpush.msrb.mxu3 %v823_v57  ;;  %v871_v56 = vld [vmem:[#allocation5 + $0x1148] sm:$0xff]  ;;  %v888_v57 = vld [vmem:[#allocation5 + $0x11d0] sm:$0xff] }
 0x130   : > { %2458 = vmatpush.msrb.mxu0 %v773_v58  ;;  %2477 = vmatpush.msrb.mxu1 %v790_v59  ;;  %v838_v58 = vld [vmem:[#allocation5 + $0x1040] sm:$0xff]  ;;  %v855_v59 = vld [vmem:[#allocation5 + $0x10c8] sm:$0xff] }
 0x131   : > { %2498 = vmatpush.msrb.mxu2 %v805_v60  ;;  %2517 = vmatpush.msrb.mxu3 %v822_v61  ;;  %v870_v60 = vld [vmem:[#allocation5 + $0x1140] sm:$0xff]  ;;  %v887_v61 = vld [vmem:[#allocation5 + $0x11c8] sm:$0xff] }
 0x132   : > { %2459 = vmatpush.msrb.mxu0 %v772_v62  ;;  %2478 = vmatpush.msrb.mxu1 %v789_v63  ;;  %v837_v62 = vld [vmem:[#allocation5 + $0x1038] sm:$0xff]  ;;  %v854_v63 = vld [vmem:[#allocation5 + $0x10c0] sm:$0xff] }
 0x133   : > { %2499 = vmatpush.msrb.mxu2 %v804_v0  ;;  %2518 = vmatpush.msrb.mxu3 %v821_v1  ;;  %v869_v0 = vld [vmem:[#allocation5 + $0x1138] sm:$0xff]  ;;  %v886_v1 = vld [vmem:[#allocation5 + $0x11c0] sm:$0xff] }
 0x134   : > { %2460 = vmatpush.msrb.mxu0 %v771_v2  ;;  %2479 = vmatpush.msrb.mxu1 %v788_v3  ;;  %v836_v2 = vld [vmem:[#allocation5 + $0x1030] sm:$0xff]  ;;  %v853_v3 = vld [vmem:[#allocation5 + $0x10b8] sm:$0xff] }
 0x135   : > { %2500 = vmatpush.msrb.mxu2 %v803_v4  ;;  %2519 = vmatpush.msrb.mxu3 %v820_v5  ;;  %v868_v4 = vld [vmem:[#allocation5 + $0x1130] sm:$0xff]  ;;  %v885_v5 = vld [vmem:[#allocation5 + $0x11b8] sm:$0xff] }
 0x136   : > { %2461 = vmatpush.msrb.mxu0 %v770_v6  ;;  %2480 = vmatpush.msrb.mxu1 %v787_v7  ;;  %v835_v6 = vld [vmem:[#allocation5 + $0x1028] sm:$0xff]  ;;  %v852_v7 = vld [vmem:[#allocation5 + $0x10b0] sm:$0xff] }
 0x137   : > { %2501 = vmatpush.msrb.mxu2 %v802_v8  ;;  %2520 = vmatpush.msrb.mxu3 %v819_v9  ;;  %v867_v8 = vld [vmem:[#allocation5 + $0x1128] sm:$0xff]  ;;  %v884_v9 = vld [vmem:[#allocation5 + $0x11b0] sm:$0xff] }
 0x138   : > { %2462 = vmatpush.msrb.mxu0 %v769_v10  ;;  %2481 = vmatpush.msrb.mxu1 %v786_v11  ;;  %v834_v10 = vld [vmem:[#allocation5 + $0x1020] sm:$0xff]  ;;  %v851_v11 = vld [vmem:[#allocation5 + $0x10a8] sm:$0xff] }
 0x139   : > { %2502 = vmatpush.msrb.mxu2 %v801_v12  ;;  %2521 = vmatpush.msrb.mxu3 %v818_v13  ;;  %v866_v12 = vld [vmem:[#allocation5 + $0x1120] sm:$0xff]  ;;  %v883_v13 = vld [vmem:[#allocation5 + $0x11a8] sm:$0xff] }
 0x13a   : > { %2463 = vmatpush.msrb.mxu0 %v768_v14  ;;  %2482 = vmatpush.msrb.mxu1 %v785_v15  ;;  %v833_v14 = vld [vmem:[#allocation5 + $0x1018] sm:$0xff]  ;;  %v850_v15 = vld [vmem:[#allocation5 + $0x10a0] sm:$0xff] }
 0x13b   : > { %2503 = vmatpush.msrb.mxu2 %v800_v16  ;;  %2522 = vmatpush.msrb.mxu3 %v817_v17  ;;  %v865_v16 = vld [vmem:[#allocation5 + $0x1118] sm:$0xff]  ;;  %v882_v17 = vld [vmem:[#allocation5 + $0x11a0] sm:$0xff] }
 0x13c   : > { %2464 = vmatpush.msrb.mxu0 %v767_v18  ;;  %2483 = vmatpush.msrb.mxu1 %v784_v19  ;;  %v832_v18 = vld [vmem:[#allocation5 + $0x1010] sm:$0xff]  ;;  %v849_v19 = vld [vmem:[#allocation5 + $0x1098] sm:$0xff] }
 0x13d   : > { %2504 = vmatpush.msrb.mxu2 %v799_v20  ;;  %2523 = vmatpush.msrb.mxu3 %v816_v21  ;;  %v864_v20 = vld [vmem:[#allocation5 + $0x1110] sm:$0xff]  ;;  %v881_v21 = vld [vmem:[#allocation5 + $0x1198] sm:$0xff] }
 0x13e   : > { %2465 = vmatpush.msrb.mxu0 %v766_v22  ;;  %2484 = vmatpush.msrb.mxu1 %v783_v23  ;;  %v831_v22 = vld [vmem:[#allocation5 + $0x1008] sm:$0xff]  ;;  %v848_v23 = vld [vmem:[#allocation5 + $0x1090] sm:$0xff] }
 0x13f   : > { %2505 = vmatpush.msrb.mxu2 %v798_v24  ;;  %2524 = vmatpush.msrb.mxu3 %v815_v25  ;;  %v863_v24 = vld [vmem:[#allocation5 + $0x1108] sm:$0xff]  ;;  %v880_v25 = vld [vmem:[#allocation5 + $0x1190] sm:$0xff] }
 0x140   : > { %2466 = vmatmul.f32.vlgmr.msrb.gmra.mxu0 %v248_v26  ;;  %2506 = vmatmul.f32.vlgmr.msrb.gmra.mxu2 %v250_v27  ;;  %v830_v26 = vld [vmem:[#allocation5 + $0x1000] sm:$0xff]  ;;  %v847_v27 = vld [vmem:[#allocation5 + $0x1088] sm:$0xff] }
 0x141   : > { %2530 = vmatpush.msra.mxu0 %v845_v28  ;;  %2570 = vmatpush.msra.mxu2 %v877_v29  ;;  %v862_v28 = vld [vmem:[#allocation5 + $0x1100] sm:$0xff]  ;;  %v879_v29 = vld [vmem:[#allocation5 + $0x1188] sm:$0xff] }
 0x142   : > { %2485 = vmatpush.msrb.mxu1 %v782_v30  ;;  %2525 = vmatpush.msrb.mxu3 %v814_v31  ;;  %v252_v30 = vld [vmem:[%s4326_s23 + $0x100] sm:$0xff]  ;;  %v254_v31 = vld [vmem:[%s4326_s23 + $0x110] sm:$0xff] }
 0x143   : > { %2486 = vmatmul.f32.vlgmr.msrb.gmra.mxu1 %v249_v32  ;;  %2526 = vmatmul.f32.vlgmr.msrb.gmra.mxu3 %v251_v33  ;;  %v909_v32 = vld [vmem:[#allocation5 + $0x1278] sm:$0xff] }
 0x144   : > { %2531 = vmatpush.msra.mxu0 %v844_v34  ;;  %2550 = vmatpush.msra.mxu1 %v861_v35  ;;  %v941_v33 = vld [vmem:[#allocation5 + $0x1378] sm:$0xff]  ;;  %v846_v34 = vld [vmem:[#allocation5 + $0x1080] sm:$0xff] }
 0x145   : > { %2571 = vmatpush.msra.mxu2 %v876_v36  ;;  %2590 = vmatpush.msra.mxu3 %v893_v37  ;;  %v878_v35 = vld [vmem:[#allocation5 + $0x1180] sm:$0xff]  ;;  %v253_v36 = vld [vmem:[%s4326_s23 + $0x108] sm:$0xff]  ;;  %v255_v37 = vld [vmem:[%s4326_s23 + $0x118] sm:$0xff] }
 0x146   : > { %2532 = vmatpush.msra.mxu0 %v843_v38  ;;  %2551 = vmatpush.msra.mxu1 %v860_v39  ;;  %v908_v38 = vld [vmem:[#allocation5 + $0x1270] sm:$0xff]  ;;  %v925_v39 = vld [vmem:[#allocation5 + $0x12f8] sm:$0xff] }
 0x147   : > { %2572 = vmatpush.msra.mxu2 %v875_v40  ;;  %2591 = vmatpush.msra.mxu3 %v892_v41  ;;  %v940_v40 = vld [vmem:[#allocation5 + $0x1370] sm:$0xff]  ;;  %v957_v41 = vld [vmem:[#allocation5 + $0x13f8] sm:$0xff] }
 0x148   : > { %2533 = vmatpush.msra.mxu0 %v842_v42  ;;  %2552 = vmatpush.msra.mxu1 %v859_v43  ;;  %v907_v42 = vld [vmem:[#allocation5 + $0x1268] sm:$0xff]  ;;  %v924_v43 = vld [vmem:[#allocation5 + $0x12f0] sm:$0xff] }
 0x149   : > { %2573 = vmatpush.msra.mxu2 %v874_v44  ;;  %2592 = vmatpush.msra.mxu3 %v891_v45  ;;  %v939_v44 = vld [vmem:[#allocation5 + $0x1368] sm:$0xff]  ;;  %v956_v45 = vld [vmem:[#allocation5 + $0x13f0] sm:$0xff] }
 0x14a   : > { %2534 = vmatpush.msra.mxu0 %v841_v46  ;;  %2553 = vmatpush.msra.mxu1 %v858_v47  ;;  %v906_v46 = vld [vmem:[#allocation5 + $0x1260] sm:$0xff]  ;;  %v923_v47 = vld [vmem:[#allocation5 + $0x12e8] sm:$0xff] }
 0x14b   : > { %2574 = vmatpush.msra.mxu2 %v873_v48  ;;  %2593 = vmatpush.msra.mxu3 %v890_v49  ;;  %v938_v48 = vld [vmem:[#allocation5 + $0x1360] sm:$0xff]  ;;  %v955_v49 = vld [vmem:[#allocation5 + $0x13e8] sm:$0xff] }
 0x14c   : > { %2535 = vmatpush.msra.mxu0 %v840_v50  ;;  %2554 = vmatpush.msra.mxu1 %v857_v51  ;;  %v905_v50 = vld [vmem:[#allocation5 + $0x1258] sm:$0xff]  ;;  %v922_v51 = vld [vmem:[#allocation5 + $0x12e0] sm:$0xff] }
 0x14d   : > { %2575 = vmatpush.msra.mxu2 %v872_v52  ;;  %2594 = vmatpush.msra.mxu3 %v889_v53  ;;  %v937_v52 = vld [vmem:[#allocation5 + $0x1358] sm:$0xff]  ;;  %v954_v53 = vld [vmem:[#allocation5 + $0x13e0] sm:$0xff] }
 0x14e   : > { %2536 = vmatpush.msra.mxu0 %v839_v54  ;;  %2555 = vmatpush.msra.mxu1 %v856_v55  ;;  %v904_v54 = vld [vmem:[#allocation5 + $0x1250] sm:$0xff]  ;;  %v921_v55 = vld [vmem:[#allocation5 + $0x12d8] sm:$0xff] }
 0x14f   : > { %2576 = vmatpush.msra.mxu2 %v871_v56  ;;  %2595 = vmatpush.msra.mxu3 %v888_v57  ;;  %v936_v56 = vld [vmem:[#allocation5 + $0x1350] sm:$0xff]  ;;  %v953_v57 = vld [vmem:[#allocation5 + $0x13d8] sm:$0xff] }
 0x150   : > { %2537 = vmatpush.msra.mxu0 %v838_v58  ;;  %2556 = vmatpush.msra.mxu1 %v855_v59  ;;  %v903_v58 = vld [vmem:[#allocation5 + $0x1248] sm:$0xff]  ;;  %v920_v59 = vld [vmem:[#allocation5 + $0x12d0] sm:$0xff] }
 0x151   : > { %2577 = vmatpush.msra.mxu2 %v870_v60  ;;  %2596 = vmatpush.msra.mxu3 %v887_v61  ;;  %v935_v60 = vld [vmem:[#allocation5 + $0x1348] sm:$0xff]  ;;  %v952_v61 = vld [vmem:[#allocation5 + $0x13d0] sm:$0xff] }
 0x152   : > { %2538 = vmatpush.msra.mxu0 %v837_v62  ;;  %2557 = vmatpush.msra.mxu1 %v854_v63  ;;  %v902_v62 = vld [vmem:[#allocation5 + $0x1240] sm:$0xff]  ;;  %v919_v63 = vld [vmem:[#allocation5 + $0x12c8] sm:$0xff] }
 0x153   : > { %2578 = vmatpush.msra.mxu2 %v869_v0  ;;  %2597 = vmatpush.msra.mxu3 %v886_v1  ;;  %v934_v0 = vld [vmem:[#allocation5 + $0x1340] sm:$0xff]  ;;  %v951_v1 = vld [vmem:[#allocation5 + $0x13c8] sm:$0xff] }
 0x154   : > { %2539 = vmatpush.msra.mxu0 %v836_v2  ;;  %2558 = vmatpush.msra.mxu1 %v853_v3  ;;  %v901_v2 = vld [vmem:[#allocation5 + $0x1238] sm:$0xff]  ;;  %v918_v3 = vld [vmem:[#allocation5 + $0x12c0] sm:$0xff] }
 0x155   : > { %2579 = vmatpush.msra.mxu2 %v868_v4  ;;  %2598 = vmatpush.msra.mxu3 %v885_v5  ;;  %v933_v4 = vld [vmem:[#allocation5 + $0x1338] sm:$0xff]  ;;  %v950_v5 = vld [vmem:[#allocation5 + $0x13c0] sm:$0xff] }
 0x156   : > { %2540 = vmatpush.msra.mxu0 %v835_v6  ;;  %2559 = vmatpush.msra.mxu1 %v852_v7  ;;  %v900_v6 = vld [vmem:[#allocation5 + $0x1230] sm:$0xff]  ;;  %v917_v7 = vld [vmem:[#allocation5 + $0x12b8] sm:$0xff] }
 0x157   : > { %2580 = vmatpush.msra.mxu2 %v867_v8  ;;  %2599 = vmatpush.msra.mxu3 %v884_v9  ;;  %v932_v8 = vld [vmem:[#allocation5 + $0x1330] sm:$0xff]  ;;  %v949_v9 = vld [vmem:[#allocation5 + $0x13b8] sm:$0xff] }
 0x158   : > { %2541 = vmatpush.msra.mxu0 %v834_v10  ;;  %2560 = vmatpush.msra.mxu1 %v851_v11  ;;  %v899_v10 = vld [vmem:[#allocation5 + $0x1228] sm:$0xff]  ;;  %v916_v11 = vld [vmem:[#allocation5 + $0x12b0] sm:$0xff] }
 0x159   : > { %2581 = vmatpush.msra.mxu2 %v866_v12  ;;  %2600 = vmatpush.msra.mxu3 %v883_v13  ;;  %v931_v12 = vld [vmem:[#allocation5 + $0x1328] sm:$0xff]  ;;  %v948_v13 = vld [vmem:[#allocation5 + $0x13b0] sm:$0xff] }
 0x15a   : > { %2542 = vmatpush.msra.mxu0 %v833_v14  ;;  %2561 = vmatpush.msra.mxu1 %v850_v15  ;;  %v898_v14 = vld [vmem:[#allocation5 + $0x1220] sm:$0xff]  ;;  %v915_v15 = vld [vmem:[#allocation5 + $0x12a8] sm:$0xff] }
 0x15b   : > { %2582 = vmatpush.msra.mxu2 %v865_v16  ;;  %2601 = vmatpush.msra.mxu3 %v882_v17  ;;  %v930_v16 = vld [vmem:[#allocation5 + $0x1320] sm:$0xff]  ;;  %v947_v17 = vld [vmem:[#allocation5 + $0x13a8] sm:$0xff] }
 0x15c   : > { %2543 = vmatpush.msra.mxu0 %v832_v18  ;;  %2562 = vmatpush.msra.mxu1 %v849_v19  ;;  %v897_v18 = vld [vmem:[#allocation5 + $0x1218] sm:$0xff]  ;;  %v914_v19 = vld [vmem:[#allocation5 + $0x12a0] sm:$0xff] }
 0x15d   : > { %2583 = vmatpush.msra.mxu2 %v864_v20  ;;  %2602 = vmatpush.msra.mxu3 %v881_v21  ;;  %v929_v20 = vld [vmem:[#allocation5 + $0x1318] sm:$0xff]  ;;  %v946_v21 = vld [vmem:[#allocation5 + $0x13a0] sm:$0xff] }
 0x15e   : > { %2544 = vmatpush.msra.mxu0 %v831_v22  ;;  %2563 = vmatpush.msra.mxu1 %v848_v23  ;;  %v896_v22 = vld [vmem:[#allocation5 + $0x1210] sm:$0xff]  ;;  %v913_v23 = vld [vmem:[#allocation5 + $0x1298] sm:$0xff] }
 0x15f   : > { %2584 = vmatpush.msra.mxu2 %v863_v24  ;;  %2603 = vmatpush.msra.mxu3 %v880_v25  ;;  %v928_v24 = vld [vmem:[#allocation5 + $0x1310] sm:$0xff]  ;;  %v945_v25 = vld [vmem:[#allocation5 + $0x1398] sm:$0xff] }
 0x160   : > { %2545 = vmatpush.msra.mxu0 %v830_v26  ;;  %2564 = vmatpush.msra.mxu1 %v847_v27  ;;  %v895_v26 = vld [vmem:[#allocation5 + $0x1208] sm:$0xff]  ;;  %v912_v27 = vld [vmem:[#allocation5 + $0x1290] sm:$0xff] }
 0x161   : > { %2585 = vmatpush.msra.mxu2 %v862_v28  ;;  %2604 = vmatpush.msra.mxu3 %v879_v29  ;;  %v927_v28 = vld [vmem:[#allocation5 + $0x1308] sm:$0xff]  ;;  %v944_v29 = vld [vmem:[#allocation5 + $0x1390] sm:$0xff] }
 0x162   : > { %2546 = vmatmul.f32.vlgmr.msra.gmra.mxu0 %v252_v30  ;;  %2586 = vmatmul.f32.vlgmr.msra.gmra.mxu2 %v254_v31  ;;  %v894_v30 = vld [vmem:[#allocation5 + $0x1200] sm:$0xff]  ;;  %v911_v31 = vld [vmem:[#allocation5 + $0x1288] sm:$0xff] }
 0x163   : > { %2610 = vmatpush.msrb.mxu0 %v909_v32  ;;  %2650 = vmatpush.msrb.mxu2 %v941_v33  ;;  %v926_v32 = vld [vmem:[#allocation5 + $0x1300] sm:$0xff]  ;;  %v943_v33 = vld [vmem:[#allocation5 + $0x1388] sm:$0xff] }
 0x164   : > { %2565 = vmatpush.msra.mxu1 %v846_v34  ;;  %2605 = vmatpush.msra.mxu3 %v878_v35  ;;  %v256_v34 = vld [vmem:[%s4326_s23 + $0x120] sm:$0xff]  ;;  %v258_v35 = vld [vmem:[%s4326_s23 + $0x130] sm:$0xff] }
 0x165   : > { %2566 = vmatmul.f32.vlgmr.msra.gmra.mxu1 %v253_v36  ;;  %2606 = vmatmul.f32.vlgmr.msra.gmra.mxu3 %v255_v37  ;;  %v973_v36 = vld [vmem:[#allocation5 + $0x1478] sm:$0xff] }
 0x166   : > { %2611 = vmatpush.msrb.mxu0 %v908_v38  ;;  %2630 = vmatpush.msrb.mxu1 %v925_v39  ;;  %v1005_v37 = vld [vmem:[#allocation5 + $0x1578] sm:$0xff]  ;;  %v910_v38 = vld [vmem:[#allocation5 + $0x1280] sm:$0xff] }
 0x167   : > { %2651 = vmatpush.msrb.mxu2 %v940_v40  ;;  %2670 = vmatpush.msrb.mxu3 %v957_v41  ;;  %v942_v39 = vld [vmem:[#allocation5 + $0x1380] sm:$0xff]  ;;  %v257_v40 = vld [vmem:[%s4326_s23 + $0x128] sm:$0xff]  ;;  %v259_v41 = vld [vmem:[%s4326_s23 + $0x138] sm:$0xff] }
 0x168   : > { %2612 = vmatpush.msrb.mxu0 %v907_v42  ;;  %2631 = vmatpush.msrb.mxu1 %v924_v43  ;;  %v972_v42 = vld [vmem:[#allocation5 + $0x1470] sm:$0xff]  ;;  %v989_v43 = vld [vmem:[#allocation5 + $0x14f8] sm:$0xff] }
 0x169   : > { %2652 = vmatpush.msrb.mxu2 %v939_v44  ;;  %2671 = vmatpush.msrb.mxu3 %v956_v45  ;;  %v1004_v44 = vld [vmem:[#allocation5 + $0x1570] sm:$0xff]  ;;  %v1021_v45 = vld [vmem:[#allocation5 + $0x15f8] sm:$0xff] }
 0x16a   : > { %2613 = vmatpush.msrb.mxu0 %v906_v46  ;;  %2632 = vmatpush.msrb.mxu1 %v923_v47  ;;  %v971_v46 = vld [vmem:[#allocation5 + $0x1468] sm:$0xff]  ;;  %v988_v47 = vld [vmem:[#allocation5 + $0x14f0] sm:$0xff] }
 0x16b   : > { %2653 = vmatpush.msrb.mxu2 %v938_v48  ;;  %2672 = vmatpush.msrb.mxu3 %v955_v49  ;;  %v1003_v48 = vld [vmem:[#allocation5 + $0x1568] sm:$0xff]  ;;  %v1020_v49 = vld [vmem:[#allocation5 + $0x15f0] sm:$0xff] }
 0x16c   : > { %2614 = vmatpush.msrb.mxu0 %v905_v50  ;;  %2633 = vmatpush.msrb.mxu1 %v922_v51  ;;  %v970_v50 = vld [vmem:[#allocation5 + $0x1460] sm:$0xff]  ;;  %v987_v51 = vld [vmem:[#allocation5 + $0x14e8] sm:$0xff] }
 0x16d   : > { %2654 = vmatpush.msrb.mxu2 %v937_v52  ;;  %2673 = vmatpush.msrb.mxu3 %v954_v53  ;;  %v1002_v52 = vld [vmem:[#allocation5 + $0x1560] sm:$0xff]  ;;  %v1019_v53 = vld [vmem:[#allocation5 + $0x15e8] sm:$0xff] }
 0x16e   : > { %2615 = vmatpush.msrb.mxu0 %v904_v54  ;;  %2634 = vmatpush.msrb.mxu1 %v921_v55  ;;  %v969_v54 = vld [vmem:[#allocation5 + $0x1458] sm:$0xff]  ;;  %v986_v55 = vld [vmem:[#allocation5 + $0x14e0] sm:$0xff] }
 0x16f   : > { %2655 = vmatpush.msrb.mxu2 %v936_v56  ;;  %2674 = vmatpush.msrb.mxu3 %v953_v57  ;;  %v1001_v56 = vld [vmem:[#allocation5 + $0x1558] sm:$0xff]  ;;  %v1018_v57 = vld [vmem:[#allocation5 + $0x15e0] sm:$0xff] }
 0x170   : > { %2616 = vmatpush.msrb.mxu0 %v903_v58  ;;  %2635 = vmatpush.msrb.mxu1 %v920_v59  ;;  %v968_v58 = vld [vmem:[#allocation5 + $0x1450] sm:$0xff]  ;;  %v985_v59 = vld [vmem:[#allocation5 + $0x14d8] sm:$0xff] }
 0x171   : > { %2656 = vmatpush.msrb.mxu2 %v935_v60  ;;  %2675 = vmatpush.msrb.mxu3 %v952_v61  ;;  %v1000_v60 = vld [vmem:[#allocation5 + $0x1550] sm:$0xff]  ;;  %v1017_v61 = vld [vmem:[#allocation5 + $0x15d8] sm:$0xff] }
 0x172   : > { %2617 = vmatpush.msrb.mxu0 %v902_v62  ;;  %2636 = vmatpush.msrb.mxu1 %v919_v63  ;;  %v967_v62 = vld [vmem:[#allocation5 + $0x1448] sm:$0xff]  ;;  %v984_v63 = vld [vmem:[#allocation5 + $0x14d0] sm:$0xff] }
 0x173   : > { %2657 = vmatpush.msrb.mxu2 %v934_v0  ;;  %2676 = vmatpush.msrb.mxu3 %v951_v1  ;;  %v999_v0 = vld [vmem:[#allocation5 + $0x1548] sm:$0xff]  ;;  %v1016_v1 = vld [vmem:[#allocation5 + $0x15d0] sm:$0xff] }
 0x174   : > { %2618 = vmatpush.msrb.mxu0 %v901_v2  ;;  %2637 = vmatpush.msrb.mxu1 %v918_v3  ;;  %v966_v2 = vld [vmem:[#allocation5 + $0x1440] sm:$0xff]  ;;  %v983_v3 = vld [vmem:[#allocation5 + $0x14c8] sm:$0xff] }
 0x175   : > { %2658 = vmatpush.msrb.mxu2 %v933_v4  ;;  %2677 = vmatpush.msrb.mxu3 %v950_v5  ;;  %v998_v4 = vld [vmem:[#allocation5 + $0x1540] sm:$0xff]  ;;  %v1015_v5 = vld [vmem:[#allocation5 + $0x15c8] sm:$0xff] }
 0x176   : > { %2619 = vmatpush.msrb.mxu0 %v900_v6  ;;  %2638 = vmatpush.msrb.mxu1 %v917_v7  ;;  %v965_v6 = vld [vmem:[#allocation5 + $0x1438] sm:$0xff]  ;;  %v982_v7 = vld [vmem:[#allocation5 + $0x14c0] sm:$0xff] }
 0x177   : > { %2659 = vmatpush.msrb.mxu2 %v932_v8  ;;  %2678 = vmatpush.msrb.mxu3 %v949_v9  ;;  %v997_v8 = vld [vmem:[#allocation5 + $0x1538] sm:$0xff]  ;;  %v1014_v9 = vld [vmem:[#allocation5 + $0x15c0] sm:$0xff] }
 0x178   : > { %2620 = vmatpush.msrb.mxu0 %v899_v10  ;;  %2639 = vmatpush.msrb.mxu1 %v916_v11  ;;  %v964_v10 = vld [vmem:[#allocation5 + $0x1430] sm:$0xff]  ;;  %v981_v11 = vld [vmem:[#allocation5 + $0x14b8] sm:$0xff] }
 0x179   : > { %2660 = vmatpush.msrb.mxu2 %v931_v12  ;;  %2679 = vmatpush.msrb.mxu3 %v948_v13  ;;  %v996_v12 = vld [vmem:[#allocation5 + $0x1530] sm:$0xff]  ;;  %v1013_v13 = vld [vmem:[#allocation5 + $0x15b8] sm:$0xff] }
 0x17a   : > { %2621 = vmatpush.msrb.mxu0 %v898_v14  ;;  %2640 = vmatpush.msrb.mxu1 %v915_v15  ;;  %v963_v14 = vld [vmem:[#allocation5 + $0x1428] sm:$0xff]  ;;  %v980_v15 = vld [vmem:[#allocation5 + $0x14b0] sm:$0xff] }
 0x17b   : > { %2661 = vmatpush.msrb.mxu2 %v930_v16  ;;  %2680 = vmatpush.msrb.mxu3 %v947_v17  ;;  %v995_v16 = vld [vmem:[#allocation5 + $0x1528] sm:$0xff]  ;;  %v1012_v17 = vld [vmem:[#allocation5 + $0x15b0] sm:$0xff] }
 0x17c   : > { %2622 = vmatpush.msrb.mxu0 %v897_v18  ;;  %2641 = vmatpush.msrb.mxu1 %v914_v19  ;;  %v962_v18 = vld [vmem:[#allocation5 + $0x1420] sm:$0xff]  ;;  %v979_v19 = vld [vmem:[#allocation5 + $0x14a8] sm:$0xff] }
 0x17d   : > { %2662 = vmatpush.msrb.mxu2 %v929_v20  ;;  %2681 = vmatpush.msrb.mxu3 %v946_v21  ;;  %v994_v20 = vld [vmem:[#allocation5 + $0x1520] sm:$0xff]  ;;  %v1011_v21 = vld [vmem:[#allocation5 + $0x15a8] sm:$0xff] }
 0x17e   : > { %2623 = vmatpush.msrb.mxu0 %v896_v22  ;;  %2642 = vmatpush.msrb.mxu1 %v913_v23  ;;  %v961_v22 = vld [vmem:[#allocation5 + $0x1418] sm:$0xff]  ;;  %v978_v23 = vld [vmem:[#allocation5 + $0x14a0] sm:$0xff] }
 0x17f   : > { %2663 = vmatpush.msrb.mxu2 %v928_v24  ;;  %2682 = vmatpush.msrb.mxu3 %v945_v25  ;;  %v993_v24 = vld [vmem:[#allocation5 + $0x1518] sm:$0xff]  ;;  %v1010_v25 = vld [vmem:[#allocation5 + $0x15a0] sm:$0xff] }
 0x180   : > { %2624 = vmatpush.msrb.mxu0 %v895_v26  ;;  %2643 = vmatpush.msrb.mxu1 %v912_v27  ;;  %v960_v26 = vld [vmem:[#allocation5 + $0x1410] sm:$0xff]  ;;  %v977_v27 = vld [vmem:[#allocation5 + $0x1498] sm:$0xff] }
 0x181   : > { %2664 = vmatpush.msrb.mxu2 %v927_v28  ;;  %2683 = vmatpush.msrb.mxu3 %v944_v29  ;;  %v992_v28 = vld [vmem:[#allocation5 + $0x1510] sm:$0xff]  ;;  %v1009_v29 = vld [vmem:[#allocation5 + $0x1598] sm:$0xff] }
 0x182   : > { %2625 = vmatpush.msrb.mxu0 %v894_v30  ;;  %2644 = vmatpush.msrb.mxu1 %v911_v31  ;;  %v959_v30 = vld [vmem:[#allocation5 + $0x1408] sm:$0xff]  ;;  %v976_v31 = vld [vmem:[#allocation5 + $0x1490] sm:$0xff] }
 0x183   : > { %2665 = vmatpush.msrb.mxu2 %v926_v32  ;;  %2684 = vmatpush.msrb.mxu3 %v943_v33  ;;  %v991_v32 = vld [vmem:[#allocation5 + $0x1508] sm:$0xff]  ;;  %v1008_v33 = vld [vmem:[#allocation5 + $0x1590] sm:$0xff] }
 0x184   : > { %2626 = vmatmul.f32.vlgmr.msrb.gmra.mxu0 %v256_v34  ;;  %2666 = vmatmul.f32.vlgmr.msrb.gmra.mxu2 %v258_v35  ;;  %v958_v34 = vld [vmem:[#allocation5 + $0x1400] sm:$0xff]  ;;  %v975_v35 = vld [vmem:[#allocation5 + $0x1488] sm:$0xff] }
 0x185   : > { %2690 = vmatpush.msra.mxu0 %v973_v36  ;;  %2730 = vmatpush.msra.mxu2 %v1005_v37  ;;  %v990_v36 = vld [vmem:[#allocation5 + $0x1500] sm:$0xff]  ;;  %v1007_v37 = vld [vmem:[#allocation5 + $0x1588] sm:$0xff] }
 0x186   : > { %2645 = vmatpush.msrb.mxu1 %v910_v38  ;;  %2685 = vmatpush.msrb.mxu3 %v942_v39  ;;  %v260_v38 = vld [vmem:[%s4326_s23 + $0x140] sm:$0xff]  ;;  %v262_v39 = vld [vmem:[%s4326_s23 + $0x150] sm:$0xff] }
 0x187   : > { %2646 = vmatmul.f32.vlgmr.msrb.gmra.mxu1 %v257_v40  ;;  %2686 = vmatmul.f32.vlgmr.msrb.gmra.mxu3 %v259_v41  ;;  %v1037_v40 = vld [vmem:[#allocation5 + $0x1678] sm:$0xff] }
 0x188   : > { %2691 = vmatpush.msra.mxu0 %v972_v42  ;;  %2710 = vmatpush.msra.mxu1 %v989_v43  ;;  %v1069_v41 = vld [vmem:[#allocation5 + $0x1778] sm:$0xff]  ;;  %v974_v42 = vld [vmem:[#allocation5 + $0x1480] sm:$0xff] }
 0x189   : > { %2731 = vmatpush.msra.mxu2 %v1004_v44  ;;  %2750 = vmatpush.msra.mxu3 %v1021_v45  ;;  %v1006_v43 = vld [vmem:[#allocation5 + $0x1580] sm:$0xff]  ;;  %v261_v44 = vld [vmem:[%s4326_s23 + $0x148] sm:$0xff]  ;;  %v263_v45 = vld [vmem:[%s4326_s23 + $0x158] sm:$0xff] }
 0x18a   : > { %2692 = vmatpush.msra.mxu0 %v971_v46  ;;  %2711 = vmatpush.msra.mxu1 %v988_v47  ;;  %v1036_v46 = vld [vmem:[#allocation5 + $0x1670] sm:$0xff]  ;;  %v1053_v47 = vld [vmem:[#allocation5 + $0x16f8] sm:$0xff] }
 0x18b   : > { %2732 = vmatpush.msra.mxu2 %v1003_v48  ;;  %2751 = vmatpush.msra.mxu3 %v1020_v49  ;;  %v1068_v48 = vld [vmem:[#allocation5 + $0x1770] sm:$0xff]  ;;  %v1085_v49 = vld [vmem:[#allocation5 + $0x17f8] sm:$0xff] }
 0x18c   : > { %2693 = vmatpush.msra.mxu0 %v970_v50  ;;  %2712 = vmatpush.msra.mxu1 %v987_v51  ;;  %v1035_v50 = vld [vmem:[#allocation5 + $0x1668] sm:$0xff]  ;;  %v1052_v51 = vld [vmem:[#allocation5 + $0x16f0] sm:$0xff] }
 0x18d   : > { %2733 = vmatpush.msra.mxu2 %v1002_v52  ;;  %2752 = vmatpush.msra.mxu3 %v1019_v53  ;;  %v1067_v52 = vld [vmem:[#allocation5 + $0x1768] sm:$0xff]  ;;  %v1084_v53 = vld [vmem:[#allocation5 + $0x17f0] sm:$0xff] }
 0x18e   : > { %2694 = vmatpush.msra.mxu0 %v969_v54  ;;  %2713 = vmatpush.msra.mxu1 %v986_v55  ;;  %v1034_v54 = vld [vmem:[#allocation5 + $0x1660] sm:$0xff]  ;;  %v1051_v55 = vld [vmem:[#allocation5 + $0x16e8] sm:$0xff] }
 0x18f   : > { %2734 = vmatpush.msra.mxu2 %v1001_v56  ;;  %2753 = vmatpush.msra.mxu3 %v1018_v57  ;;  %v1066_v56 = vld [vmem:[#allocation5 + $0x1760] sm:$0xff]  ;;  %v1083_v57 = vld [vmem:[#allocation5 + $0x17e8] sm:$0xff] }
 0x190   : > { %2695 = vmatpush.msra.mxu0 %v968_v58  ;;  %2714 = vmatpush.msra.mxu1 %v985_v59  ;;  %v1033_v58 = vld [vmem:[#allocation5 + $0x1658] sm:$0xff]  ;;  %v1050_v59 = vld [vmem:[#allocation5 + $0x16e0] sm:$0xff] }
 0x191   : > { %2735 = vmatpush.msra.mxu2 %v1000_v60  ;;  %2754 = vmatpush.msra.mxu3 %v1017_v61  ;;  %v1065_v60 = vld [vmem:[#allocation5 + $0x1758] sm:$0xff]  ;;  %v1082_v61 = vld [vmem:[#allocation5 + $0x17e0] sm:$0xff] }
 0x192   : > { %2696 = vmatpush.msra.mxu0 %v967_v62  ;;  %2715 = vmatpush.msra.mxu1 %v984_v63  ;;  %v1032_v62 = vld [vmem:[#allocation5 + $0x1650] sm:$0xff]  ;;  %v1049_v63 = vld [vmem:[#allocation5 + $0x16d8] sm:$0xff] }
 0x193   : > { %2736 = vmatpush.msra.mxu2 %v999_v0  ;;  %2755 = vmatpush.msra.mxu3 %v1016_v1  ;;  %v1064_v0 = vld [vmem:[#allocation5 + $0x1750] sm:$0xff]  ;;  %v1081_v1 = vld [vmem:[#allocation5 + $0x17d8] sm:$0xff] }
 0x194   : > { %2697 = vmatpush.msra.mxu0 %v966_v2  ;;  %2716 = vmatpush.msra.mxu1 %v983_v3  ;;  %v1031_v2 = vld [vmem:[#allocation5 + $0x1648] sm:$0xff]  ;;  %v1048_v3 = vld [vmem:[#allocation5 + $0x16d0] sm:$0xff] }
 0x195   : > { %2737 = vmatpush.msra.mxu2 %v998_v4  ;;  %2756 = vmatpush.msra.mxu3 %v1015_v5  ;;  %v1063_v4 = vld [vmem:[#allocation5 + $0x1748] sm:$0xff]  ;;  %v1080_v5 = vld [vmem:[#allocation5 + $0x17d0] sm:$0xff] }
 0x196   : > { %2698 = vmatpush.msra.mxu0 %v965_v6  ;;  %2717 = vmatpush.msra.mxu1 %v982_v7  ;;  %v1030_v6 = vld [vmem:[#allocation5 + $0x1640] sm:$0xff]  ;;  %v1047_v7 = vld [vmem:[#allocation5 + $0x16c8] sm:$0xff] }
 0x197   : > { %2738 = vmatpush.msra.mxu2 %v997_v8  ;;  %2757 = vmatpush.msra.mxu3 %v1014_v9  ;;  %v1062_v8 = vld [vmem:[#allocation5 + $0x1740] sm:$0xff]  ;;  %v1079_v9 = vld [vmem:[#allocation5 + $0x17c8] sm:$0xff] }
 0x198   : > { %2699 = vmatpush.msra.mxu0 %v964_v10  ;;  %2718 = vmatpush.msra.mxu1 %v981_v11  ;;  %v1029_v10 = vld [vmem:[#allocation5 + $0x1638] sm:$0xff]  ;;  %v1046_v11 = vld [vmem:[#allocation5 + $0x16c0] sm:$0xff] }
 0x199   : > { %2739 = vmatpush.msra.mxu2 %v996_v12  ;;  %2758 = vmatpush.msra.mxu3 %v1013_v13  ;;  %v1061_v12 = vld [vmem:[#allocation5 + $0x1738] sm:$0xff]  ;;  %v1078_v13 = vld [vmem:[#allocation5 + $0x17c0] sm:$0xff] }
 0x19a   : > { %2700 = vmatpush.msra.mxu0 %v963_v14  ;;  %2719 = vmatpush.msra.mxu1 %v980_v15  ;;  %v1028_v14 = vld [vmem:[#allocation5 + $0x1630] sm:$0xff]  ;;  %v1045_v15 = vld [vmem:[#allocation5 + $0x16b8] sm:$0xff] }
 0x19b   : > { %2740 = vmatpush.msra.mxu2 %v995_v16  ;;  %2759 = vmatpush.msra.mxu3 %v1012_v17  ;;  %v1060_v16 = vld [vmem:[#allocation5 + $0x1730] sm:$0xff]  ;;  %v1077_v17 = vld [vmem:[#allocation5 + $0x17b8] sm:$0xff] }
 0x19c   : > { %2701 = vmatpush.msra.mxu0 %v962_v18  ;;  %2720 = vmatpush.msra.mxu1 %v979_v19  ;;  %v1027_v18 = vld [vmem:[#allocation5 + $0x1628] sm:$0xff]  ;;  %v1044_v19 = vld [vmem:[#allocation5 + $0x16b0] sm:$0xff] }
 0x19d   : > { %2741 = vmatpush.msra.mxu2 %v994_v20  ;;  %2760 = vmatpush.msra.mxu3 %v1011_v21  ;;  %v1059_v20 = vld [vmem:[#allocation5 + $0x1728] sm:$0xff]  ;;  %v1076_v21 = vld [vmem:[#allocation5 + $0x17b0] sm:$0xff] }
 0x19e   : > { %2702 = vmatpush.msra.mxu0 %v961_v22  ;;  %2721 = vmatpush.msra.mxu1 %v978_v23  ;;  %v1026_v22 = vld [vmem:[#allocation5 + $0x1620] sm:$0xff]  ;;  %v1043_v23 = vld [vmem:[#allocation5 + $0x16a8] sm:$0xff] }
 0x19f   : > { %2742 = vmatpush.msra.mxu2 %v993_v24  ;;  %2761 = vmatpush.msra.mxu3 %v1010_v25  ;;  %v1058_v24 = vld [vmem:[#allocation5 + $0x1720] sm:$0xff]  ;;  %v1075_v25 = vld [vmem:[#allocation5 + $0x17a8] sm:$0xff] }
 0x1a0   : > { %2703 = vmatpush.msra.mxu0 %v960_v26  ;;  %2722 = vmatpush.msra.mxu1 %v977_v27  ;;  %v1025_v26 = vld [vmem:[#allocation5 + $0x1618] sm:$0xff]  ;;  %v1042_v27 = vld [vmem:[#allocation5 + $0x16a0] sm:$0xff] }
 0x1a1   : > { %2743 = vmatpush.msra.mxu2 %v992_v28  ;;  %2762 = vmatpush.msra.mxu3 %v1009_v29  ;;  %v1057_v28 = vld [vmem:[#allocation5 + $0x1718] sm:$0xff]  ;;  %v1074_v29 = vld [vmem:[#allocation5 + $0x17a0] sm:$0xff] }
 0x1a2   : > { %2704 = vmatpush.msra.mxu0 %v959_v30  ;;  %2723 = vmatpush.msra.mxu1 %v976_v31  ;;  %v1024_v30 = vld [vmem:[#allocation5 + $0x1610] sm:$0xff]  ;;  %v1041_v31 = vld [vmem:[#allocation5 + $0x1698] sm:$0xff] }
 0x1a3   : > { %2744 = vmatpush.msra.mxu2 %v991_v32  ;;  %2763 = vmatpush.msra.mxu3 %v1008_v33  ;;  %v1056_v32 = vld [vmem:[#allocation5 + $0x1710] sm:$0xff]  ;;  %v1073_v33 = vld [vmem:[#allocation5 + $0x1798] sm:$0xff] }
 0x1a4   : > { %2705 = vmatpush.msra.mxu0 %v958_v34  ;;  %2724 = vmatpush.msra.mxu1 %v975_v35  ;;  %v1023_v34 = vld [vmem:[#allocation5 + $0x1608] sm:$0xff]  ;;  %v1040_v35 = vld [vmem:[#allocation5 + $0x1690] sm:$0xff] }
 0x1a5   : > { %2745 = vmatpush.msra.mxu2 %v990_v36  ;;  %2764 = vmatpush.msra.mxu3 %v1007_v37  ;;  %v1055_v36 = vld [vmem:[#allocation5 + $0x1708] sm:$0xff]  ;;  %v1072_v37 = vld [vmem:[#allocation5 + $0x1790] sm:$0xff] }
 0x1a6   : > { %2706 = vmatmul.f32.vlgmr.msra.gmra.mxu0 %v260_v38  ;;  %2746 = vmatmul.f32.vlgmr.msra.gmra.mxu2 %v262_v39  ;;  %v1022_v38 = vld [vmem:[#allocation5 + $0x1600] sm:$0xff]  ;;  %v1039_v39 = vld [vmem:[#allocation5 + $0x1688] sm:$0xff] }
 0x1a7   : > { %2770 = vmatpush.msrb.mxu0 %v1037_v40  ;;  %2810 = vmatpush.msrb.mxu2 %v1069_v41  ;;  %v1054_v40 = vld [vmem:[#allocation5 + $0x1700] sm:$0xff]  ;;  %v1071_v41 = vld [vmem:[#allocation5 + $0x1788] sm:$0xff] }
 0x1a8   : > { %2725 = vmatpush.msra.mxu1 %v974_v42  ;;  %2765 = vmatpush.msra.mxu3 %v1006_v43  ;;  %v264_v42 = vld [vmem:[%s4326_s23 + $0x160] sm:$0xff]  ;;  %v266_v43 = vld [vmem:[%s4326_s23 + $0x170] sm:$0xff] }
 0x1a9   : > { %2726 = vmatmul.f32.vlgmr.msra.gmra.mxu1 %v261_v44  ;;  %2766 = vmatmul.f32.vlgmr.msra.gmra.mxu3 %v263_v45  ;;  %v1101_v44 = vld [vmem:[#allocation5 + $0x1878] sm:$0xff] }
 0x1aa   : > { %2771 = vmatpush.msrb.mxu0 %v1036_v46  ;;  %2790 = vmatpush.msrb.mxu1 %v1053_v47  ;;  %v1133_v45 = vld [vmem:[#allocation5 + $0x1978] sm:$0xff]  ;;  %v1038_v46 = vld [vmem:[#allocation5 + $0x1680] sm:$0xff] }
 0x1ab   : > { %2811 = vmatpush.msrb.mxu2 %v1068_v48  ;;  %2830 = vmatpush.msrb.mxu3 %v1085_v49  ;;  %v1070_v47 = vld [vmem:[#allocation5 + $0x1780] sm:$0xff]  ;;  %v265_v48 = vld [vmem:[%s4326_s23 + $0x168] sm:$0xff]  ;;  %v267_v49 = vld [vmem:[%s4326_s23 + $0x178] sm:$0xff] }
 0x1ac   : > { %2772 = vmatpush.msrb.mxu0 %v1035_v50  ;;  %2791 = vmatpush.msrb.mxu1 %v1052_v51  ;;  %v1100_v50 = vld [vmem:[#allocation5 + $0x1870] sm:$0xff]  ;;  %v1117_v51 = vld [vmem:[#allocation5 + $0x18f8] sm:$0xff] }
 0x1ad   : > { %2812 = vmatpush.msrb.mxu2 %v1067_v52  ;;  %2831 = vmatpush.msrb.mxu3 %v1084_v53  ;;  %v1132_v52 = vld [vmem:[#allocation5 + $0x1970] sm:$0xff]  ;;  %v1149_v53 = vld [vmem:[#allocation5 + $0x19f8] sm:$0xff] }
 0x1ae   : > { %2773 = vmatpush.msrb.mxu0 %v1034_v54  ;;  %2792 = vmatpush.msrb.mxu1 %v1051_v55  ;;  %v1099_v54 = vld [vmem:[#allocation5 + $0x1868] sm:$0xff]  ;;  %v1116_v55 = vld [vmem:[#allocation5 + $0x18f0] sm:$0xff] }
 0x1af   : > { %2813 = vmatpush.msrb.mxu2 %v1066_v56  ;;  %2832 = vmatpush.msrb.mxu3 %v1083_v57  ;;  %v1131_v56 = vld [vmem:[#allocation5 + $0x1968] sm:$0xff]  ;;  %v1148_v57 = vld [vmem:[#allocation5 + $0x19f0] sm:$0xff] }
 0x1b0   : > { %2774 = vmatpush.msrb.mxu0 %v1033_v58  ;;  %2793 = vmatpush.msrb.mxu1 %v1050_v59  ;;  %v1098_v58 = vld [vmem:[#allocation5 + $0x1860] sm:$0xff]  ;;  %v1115_v59 = vld [vmem:[#allocation5 + $0x18e8] sm:$0xff] }
 0x1b1   : > { %2814 = vmatpush.msrb.mxu2 %v1065_v60  ;;  %2833 = vmatpush.msrb.mxu3 %v1082_v61  ;;  %v1130_v60 = vld [vmem:[#allocation5 + $0x1960] sm:$0xff]  ;;  %v1147_v61 = vld [vmem:[#allocation5 + $0x19e8] sm:$0xff] }
 0x1b2   : > { %2775 = vmatpush.msrb.mxu0 %v1032_v62  ;;  %2794 = vmatpush.msrb.mxu1 %v1049_v63  ;;  %v1097_v62 = vld [vmem:[#allocation5 + $0x1858] sm:$0xff]  ;;  %v1114_v63 = vld [vmem:[#allocation5 + $0x18e0] sm:$0xff] }
 0x1b3   : > { %2815 = vmatpush.msrb.mxu2 %v1064_v0  ;;  %2834 = vmatpush.msrb.mxu3 %v1081_v1  ;;  %v1129_v0 = vld [vmem:[#allocation5 + $0x1958] sm:$0xff]  ;;  %v1146_v1 = vld [vmem:[#allocation5 + $0x19e0] sm:$0xff] }
 0x1b4   : > { %2776 = vmatpush.msrb.mxu0 %v1031_v2  ;;  %2795 = vmatpush.msrb.mxu1 %v1048_v3  ;;  %v1096_v2 = vld [vmem:[#allocation5 + $0x1850] sm:$0xff]  ;;  %v1113_v3 = vld [vmem:[#allocation5 + $0x18d8] sm:$0xff] }
 0x1b5   : > { %2816 = vmatpush.msrb.mxu2 %v1063_v4  ;;  %2835 = vmatpush.msrb.mxu3 %v1080_v5  ;;  %v1128_v4 = vld [vmem:[#allocation5 + $0x1950] sm:$0xff]  ;;  %v1145_v5 = vld [vmem:[#allocation5 + $0x19d8] sm:$0xff] }
 0x1b6   : > { %2777 = vmatpush.msrb.mxu0 %v1030_v6  ;;  %2796 = vmatpush.msrb.mxu1 %v1047_v7  ;;  %v1095_v6 = vld [vmem:[#allocation5 + $0x1848] sm:$0xff]  ;;  %v1112_v7 = vld [vmem:[#allocation5 + $0x18d0] sm:$0xff] }
 0x1b7   : > { %2817 = vmatpush.msrb.mxu2 %v1062_v8  ;;  %2836 = vmatpush.msrb.mxu3 %v1079_v9  ;;  %v1127_v8 = vld [vmem:[#allocation5 + $0x1948] sm:$0xff]  ;;  %v1144_v9 = vld [vmem:[#allocation5 + $0x19d0] sm:$0xff] }
 0x1b8   : > { %2778 = vmatpush.msrb.mxu0 %v1029_v10  ;;  %2797 = vmatpush.msrb.mxu1 %v1046_v11  ;;  %v1094_v10 = vld [vmem:[#allocation5 + $0x1840] sm:$0xff]  ;;  %v1111_v11 = vld [vmem:[#allocation5 + $0x18c8] sm:$0xff] }
 0x1b9   : > { %2818 = vmatpush.msrb.mxu2 %v1061_v12  ;;  %2837 = vmatpush.msrb.mxu3 %v1078_v13  ;;  %v1126_v12 = vld [vmem:[#allocation5 + $0x1940] sm:$0xff]  ;;  %v1143_v13 = vld [vmem:[#allocation5 + $0x19c8] sm:$0xff] }
 0x1ba   : > { %2779 = vmatpush.msrb.mxu0 %v1028_v14  ;;  %2798 = vmatpush.msrb.mxu1 %v1045_v15  ;;  %v1093_v14 = vld [vmem:[#allocation5 + $0x1838] sm:$0xff]  ;;  %v1110_v15 = vld [vmem:[#allocation5 + $0x18c0] sm:$0xff] }
 0x1bb   : > { %2819 = vmatpush.msrb.mxu2 %v1060_v16  ;;  %2838 = vmatpush.msrb.mxu3 %v1077_v17  ;;  %v1125_v16 = vld [vmem:[#allocation5 + $0x1938] sm:$0xff]  ;;  %v1142_v17 = vld [vmem:[#allocation5 + $0x19c0] sm:$0xff] }
 0x1bc   : > { %2780 = vmatpush.msrb.mxu0 %v1027_v18  ;;  %2799 = vmatpush.msrb.mxu1 %v1044_v19  ;;  %v1092_v18 = vld [vmem:[#allocation5 + $0x1830] sm:$0xff]  ;;  %v1109_v19 = vld [vmem:[#allocation5 + $0x18b8] sm:$0xff] }
 0x1bd   : > { %2820 = vmatpush.msrb.mxu2 %v1059_v20  ;;  %2839 = vmatpush.msrb.mxu3 %v1076_v21  ;;  %v1124_v20 = vld [vmem:[#allocation5 + $0x1930] sm:$0xff]  ;;  %v1141_v21 = vld [vmem:[#allocation5 + $0x19b8] sm:$0xff] }
 0x1be   : > { %2781 = vmatpush.msrb.mxu0 %v1026_v22  ;;  %2800 = vmatpush.msrb.mxu1 %v1043_v23  ;;  %v1091_v22 = vld [vmem:[#allocation5 + $0x1828] sm:$0xff]  ;;  %v1108_v23 = vld [vmem:[#allocation5 + $0x18b0] sm:$0xff] }
 0x1bf   : > { %2821 = vmatpush.msrb.mxu2 %v1058_v24  ;;  %2840 = vmatpush.msrb.mxu3 %v1075_v25  ;;  %v1123_v24 = vld [vmem:[#allocation5 + $0x1928] sm:$0xff]  ;;  %v1140_v25 = vld [vmem:[#allocation5 + $0x19b0] sm:$0xff] }
 0x1c0   : > { %2782 = vmatpush.msrb.mxu0 %v1025_v26  ;;  %2801 = vmatpush.msrb.mxu1 %v1042_v27  ;;  %v1090_v26 = vld [vmem:[#allocation5 + $0x1820] sm:$0xff]  ;;  %v1107_v27 = vld [vmem:[#allocation5 + $0x18a8] sm:$0xff] }
 0x1c1   : > { %2822 = vmatpush.msrb.mxu2 %v1057_v28  ;;  %2841 = vmatpush.msrb.mxu3 %v1074_v29  ;;  %v1122_v28 = vld [vmem:[#allocation5 + $0x1920] sm:$0xff]  ;;  %v1139_v29 = vld [vmem:[#allocation5 + $0x19a8] sm:$0xff] }
 0x1c2   : > { %2783 = vmatpush.msrb.mxu0 %v1024_v30  ;;  %2802 = vmatpush.msrb.mxu1 %v1041_v31  ;;  %v1089_v30 = vld [vmem:[#allocation5 + $0x1818] sm:$0xff]  ;;  %v1106_v31 = vld [vmem:[#allocation5 + $0x18a0] sm:$0xff] }
 0x1c3   : > { %2823 = vmatpush.msrb.mxu2 %v1056_v32  ;;  %2842 = vmatpush.msrb.mxu3 %v1073_v33  ;;  %v1121_v32 = vld [vmem:[#allocation5 + $0x1918] sm:$0xff]  ;;  %v1138_v33 = vld [vmem:[#allocation5 + $0x19a0] sm:$0xff] }
 0x1c4   : > { %2784 = vmatpush.msrb.mxu0 %v1023_v34  ;;  %2803 = vmatpush.msrb.mxu1 %v1040_v35  ;;  %v1088_v34 = vld [vmem:[#allocation5 + $0x1810] sm:$0xff]  ;;  %v1105_v35 = vld [vmem:[#allocation5 + $0x1898] sm:$0xff] }
 0x1c5   : > { %2824 = vmatpush.msrb.mxu2 %v1055_v36  ;;  %2843 = vmatpush.msrb.mxu3 %v1072_v37  ;;  %v1120_v36 = vld [vmem:[#allocation5 + $0x1910] sm:$0xff]  ;;  %v1137_v37 = vld [vmem:[#allocation5 + $0x1998] sm:$0xff] }
 0x1c6   : > { %2785 = vmatpush.msrb.mxu0 %v1022_v38  ;;  %2804 = vmatpush.msrb.mxu1 %v1039_v39  ;;  %v1087_v38 = vld [vmem:[#allocation5 + $0x1808] sm:$0xff]  ;;  %v1104_v39 = vld [vmem:[#allocation5 + $0x1890] sm:$0xff] }
 0x1c7   : > { %2825 = vmatpush.msrb.mxu2 %v1054_v40  ;;  %2844 = vmatpush.msrb.mxu3 %v1071_v41  ;;  %v1119_v40 = vld [vmem:[#allocation5 + $0x1908] sm:$0xff]  ;;  %v1136_v41 = vld [vmem:[#allocation5 + $0x1990] sm:$0xff] }
 0x1c8   : > { %2786 = vmatmul.f32.vlgmr.msrb.gmra.mxu0 %v264_v42  ;;  %2826 = vmatmul.f32.vlgmr.msrb.gmra.mxu2 %v266_v43  ;;  %v1086_v42 = vld [vmem:[#allocation5 + $0x1800] sm:$0xff]  ;;  %v1103_v43 = vld [vmem:[#allocation5 + $0x1888] sm:$0xff] }
 0x1c9   : > { %2850 = vmatpush.msra.mxu0 %v1101_v44  ;;  %2890 = vmatpush.msra.mxu2 %v1133_v45  ;;  %v1118_v44 = vld [vmem:[#allocation5 + $0x1900] sm:$0xff]  ;;  %v1135_v45 = vld [vmem:[#allocation5 + $0x1988] sm:$0xff] }
 0x1ca   : > { %2805 = vmatpush.msrb.mxu1 %v1038_v46  ;;  %2845 = vmatpush.msrb.mxu3 %v1070_v47  ;;  %v268_v46 = vld [vmem:[%s4326_s23 + $0x180] sm:$0xff]  ;;  %v270_v47 = vld [vmem:[%s4326_s23 + $0x190] sm:$0xff] }
 0x1cb   : > { %2806 = vmatmul.f32.vlgmr.msrb.gmra.mxu1 %v265_v48  ;;  %2846 = vmatmul.f32.vlgmr.msrb.gmra.mxu3 %v267_v49  ;;  %v1165_v48 = vld [vmem:[#allocation5 + $0x1a78] sm:$0xff] }
 0x1cc   : > { %2851 = vmatpush.msra.mxu0 %v1100_v50  ;;  %2870 = vmatpush.msra.mxu1 %v1117_v51  ;;  %v1197_v49 = vld [vmem:[#allocation5 + $0x1b78] sm:$0xff]  ;;  %v1102_v50 = vld [vmem:[#allocation5 + $0x1880] sm:$0xff] }
 0x1cd   : > { %2891 = vmatpush.msra.mxu2 %v1132_v52  ;;  %2910 = vmatpush.msra.mxu3 %v1149_v53  ;;  %v1134_v51 = vld [vmem:[#allocation5 + $0x1980] sm:$0xff]  ;;  %v269_v52 = vld [vmem:[%s4326_s23 + $0x188] sm:$0xff]  ;;  %v271_v53 = vld [vmem:[%s4326_s23 + $0x198] sm:$0xff] }
 0x1ce   : > { %2852 = vmatpush.msra.mxu0 %v1099_v54  ;;  %2871 = vmatpush.msra.mxu1 %v1116_v55  ;;  %v1164_v54 = vld [vmem:[#allocation5 + $0x1a70] sm:$0xff]  ;;  %v1181_v55 = vld [vmem:[#allocation5 + $0x1af8] sm:$0xff] }
 0x1cf   : > { %2892 = vmatpush.msra.mxu2 %v1131_v56  ;;  %2911 = vmatpush.msra.mxu3 %v1148_v57  ;;  %v1196_v56 = vld [vmem:[#allocation5 + $0x1b70] sm:$0xff]  ;;  %v1213_v57 = vld [vmem:[#allocation5 + $0x1bf8] sm:$0xff] }
 0x1d0   : > { %2853 = vmatpush.msra.mxu0 %v1098_v58  ;;  %2872 = vmatpush.msra.mxu1 %v1115_v59  ;;  %v1163_v58 = vld [vmem:[#allocation5 + $0x1a68] sm:$0xff]  ;;  %v1180_v59 = vld [vmem:[#allocation5 + $0x1af0] sm:$0xff] }
 0x1d1   : > { %2893 = vmatpush.msra.mxu2 %v1130_v60  ;;  %2912 = vmatpush.msra.mxu3 %v1147_v61  ;;  %v1195_v60 = vld [vmem:[#allocation5 + $0x1b68] sm:$0xff]  ;;  %v1212_v61 = vld [vmem:[#allocation5 + $0x1bf0] sm:$0xff] }
 0x1d2   : > { %2854 = vmatpush.msra.mxu0 %v1097_v62  ;;  %2873 = vmatpush.msra.mxu1 %v1114_v63  ;;  %v1162_v62 = vld [vmem:[#allocation5 + $0x1a60] sm:$0xff]  ;;  %v1179_v63 = vld [vmem:[#allocation5 + $0x1ae8] sm:$0xff] }
 0x1d3   : > { %2894 = vmatpush.msra.mxu2 %v1129_v0  ;;  %2913 = vmatpush.msra.mxu3 %v1146_v1  ;;  %v1194_v0 = vld [vmem:[#allocation5 + $0x1b60] sm:$0xff]  ;;  %v1211_v1 = vld [vmem:[#allocation5 + $0x1be8] sm:$0xff] }
 0x1d4   : > { %2855 = vmatpush.msra.mxu0 %v1096_v2  ;;  %2874 = vmatpush.msra.mxu1 %v1113_v3  ;;  %v1161_v2 = vld [vmem:[#allocation5 + $0x1a58] sm:$0xff]  ;;  %v1178_v3 = vld [vmem:[#allocation5 + $0x1ae0] sm:$0xff] }
 0x1d5   : > { %2895 = vmatpush.msra.mxu2 %v1128_v4  ;;  %2914 = vmatpush.msra.mxu3 %v1145_v5  ;;  %v1193_v4 = vld [vmem:[#allocation5 + $0x1b58] sm:$0xff]  ;;  %v1210_v5 = vld [vmem:[#allocation5 + $0x1be0] sm:$0xff] }
 0x1d6   : > { %2856 = vmatpush.msra.mxu0 %v1095_v6  ;;  %2875 = vmatpush.msra.mxu1 %v1112_v7  ;;  %v1160_v6 = vld [vmem:[#allocation5 + $0x1a50] sm:$0xff]  ;;  %v1177_v7 = vld [vmem:[#allocation5 + $0x1ad8] sm:$0xff] }
 0x1d7   : > { %2896 = vmatpush.msra.mxu2 %v1127_v8  ;;  %2915 = vmatpush.msra.mxu3 %v1144_v9  ;;  %v1192_v8 = vld [vmem:[#allocation5 + $0x1b50] sm:$0xff]  ;;  %v1209_v9 = vld [vmem:[#allocation5 + $0x1bd8] sm:$0xff] }
 0x1d8   : > { %2857 = vmatpush.msra.mxu0 %v1094_v10  ;;  %2876 = vmatpush.msra.mxu1 %v1111_v11  ;;  %v1159_v10 = vld [vmem:[#allocation5 + $0x1a48] sm:$0xff]  ;;  %v1176_v11 = vld [vmem:[#allocation5 + $0x1ad0] sm:$0xff] }
 0x1d9   : > { %2897 = vmatpush.msra.mxu2 %v1126_v12  ;;  %2916 = vmatpush.msra.mxu3 %v1143_v13  ;;  %v1191_v12 = vld [vmem:[#allocation5 + $0x1b48] sm:$0xff]  ;;  %v1208_v13 = vld [vmem:[#allocation5 + $0x1bd0] sm:$0xff] }
 0x1da   : > { %2858 = vmatpush.msra.mxu0 %v1093_v14  ;;  %2877 = vmatpush.msra.mxu1 %v1110_v15  ;;  %v1158_v14 = vld [vmem:[#allocation5 + $0x1a40] sm:$0xff]  ;;  %v1175_v15 = vld [vmem:[#allocation5 + $0x1ac8] sm:$0xff] }
 0x1db   : > { %2898 = vmatpush.msra.mxu2 %v1125_v16  ;;  %2917 = vmatpush.msra.mxu3 %v1142_v17  ;;  %v1190_v16 = vld [vmem:[#allocation5 + $0x1b40] sm:$0xff]  ;;  %v1207_v17 = vld [vmem:[#allocation5 + $0x1bc8] sm:$0xff] }
 0x1dc   : > { %2859 = vmatpush.msra.mxu0 %v1092_v18  ;;  %2878 = vmatpush.msra.mxu1 %v1109_v19  ;;  %v1157_v18 = vld [vmem:[#allocation5 + $0x1a38] sm:$0xff]  ;;  %v1174_v19 = vld [vmem:[#allocation5 + $0x1ac0] sm:$0xff] }
 0x1dd   : > { %2899 = vmatpush.msra.mxu2 %v1124_v20  ;;  %2918 = vmatpush.msra.mxu3 %v1141_v21  ;;  %v1189_v20 = vld [vmem:[#allocation5 + $0x1b38] sm:$0xff]  ;;  %v1206_v21 = vld [vmem:[#allocation5 + $0x1bc0] sm:$0xff] }
 0x1de   : > { %2860 = vmatpush.msra.mxu0 %v1091_v22  ;;  %2879 = vmatpush.msra.mxu1 %v1108_v23  ;;  %v1156_v22 = vld [vmem:[#allocation5 + $0x1a30] sm:$0xff]  ;;  %v1173_v23 = vld [vmem:[#allocation5 + $0x1ab8] sm:$0xff] }
 0x1df   : > { %2900 = vmatpush.msra.mxu2 %v1123_v24  ;;  %2919 = vmatpush.msra.mxu3 %v1140_v25  ;;  %v1188_v24 = vld [vmem:[#allocation5 + $0x1b30] sm:$0xff]  ;;  %v1205_v25 = vld [vmem:[#allocation5 + $0x1bb8] sm:$0xff] }
 0x1e0   : > { %2861 = vmatpush.msra.mxu0 %v1090_v26  ;;  %2880 = vmatpush.msra.mxu1 %v1107_v27  ;;  %v1155_v26 = vld [vmem:[#allocation5 + $0x1a28] sm:$0xff]  ;;  %v1172_v27 = vld [vmem:[#allocation5 + $0x1ab0] sm:$0xff] }
 0x1e1   : > { %2901 = vmatpush.msra.mxu2 %v1122_v28  ;;  %2920 = vmatpush.msra.mxu3 %v1139_v29  ;;  %v1187_v28 = vld [vmem:[#allocation5 + $0x1b28] sm:$0xff]  ;;  %v1204_v29 = vld [vmem:[#allocation5 + $0x1bb0] sm:$0xff] }
 0x1e2   : > { %2862 = vmatpush.msra.mxu0 %v1089_v30  ;;  %2881 = vmatpush.msra.mxu1 %v1106_v31  ;;  %v1154_v30 = vld [vmem:[#allocation5 + $0x1a20] sm:$0xff]  ;;  %v1171_v31 = vld [vmem:[#allocation5 + $0x1aa8] sm:$0xff] }
 0x1e3   : > { %2902 = vmatpush.msra.mxu2 %v1121_v32  ;;  %2921 = vmatpush.msra.mxu3 %v1138_v33  ;;  %v1186_v32 = vld [vmem:[#allocation5 + $0x1b20] sm:$0xff]  ;;  %v1203_v33 = vld [vmem:[#allocation5 + $0x1ba8] sm:$0xff] }
 0x1e4   : > { %2863 = vmatpush.msra.mxu0 %v1088_v34  ;;  %2882 = vmatpush.msra.mxu1 %v1105_v35  ;;  %v1153_v34 = vld [vmem:[#allocation5 + $0x1a18] sm:$0xff]  ;;  %v1170_v35 = vld [vmem:[#allocation5 + $0x1aa0] sm:$0xff] }
 0x1e5   : > { %2903 = vmatpush.msra.mxu2 %v1120_v36  ;;  %2922 = vmatpush.msra.mxu3 %v1137_v37  ;;  %v1185_v36 = vld [vmem:[#allocation5 + $0x1b18] sm:$0xff]  ;;  %v1202_v37 = vld [vmem:[#allocation5 + $0x1ba0] sm:$0xff] }
 0x1e6   : > { %2864 = vmatpush.msra.mxu0 %v1087_v38  ;;  %2883 = vmatpush.msra.mxu1 %v1104_v39  ;;  %v1152_v38 = vld [vmem:[#allocation5 + $0x1a10] sm:$0xff]  ;;  %v1169_v39 = vld [vmem:[#allocation5 + $0x1a98] sm:$0xff] }
 0x1e7   : > { %2904 = vmatpush.msra.mxu2 %v1119_v40  ;;  %2923 = vmatpush.msra.mxu3 %v1136_v41  ;;  %v1184_v40 = vld [vmem:[#allocation5 + $0x1b10] sm:$0xff]  ;;  %v1201_v41 = vld [vmem:[#allocation5 + $0x1b98] sm:$0xff] }
 0x1e8   : > { %2865 = vmatpush.msra.mxu0 %v1086_v42  ;;  %2884 = vmatpush.msra.mxu1 %v1103_v43  ;;  %v1151_v42 = vld [vmem:[#allocation5 + $0x1a08] sm:$0xff]  ;;  %v1168_v43 = vld [vmem:[#allocation5 + $0x1a90] sm:$0xff] }
 0x1e9   : > { %2905 = vmatpush.msra.mxu2 %v1118_v44  ;;  %2924 = vmatpush.msra.mxu3 %v1135_v45  ;;  %v1183_v44 = vld [vmem:[#allocation5 + $0x1b08] sm:$0xff]  ;;  %v1200_v45 = vld [vmem:[#allocation5 + $0x1b90] sm:$0xff] }
 0x1ea   : > { %2866 = vmatmul.f32.vlgmr.msra.gmra.mxu0 %v268_v46  ;;  %2906 = vmatmul.f32.vlgmr.msra.gmra.mxu2 %v270_v47  ;;  %v1150_v46 = vld [vmem:[#allocation5 + $0x1a00] sm:$0xff]  ;;  %v1167_v47 = vld [vmem:[#allocation5 + $0x1a88] sm:$0xff] }
 0x1eb   : > { %2930 = vmatpush.msrb.mxu0 %v1165_v48  ;;  %2970 = vmatpush.msrb.mxu2 %v1197_v49  ;;  %v1182_v48 = vld [vmem:[#allocation5 + $0x1b00] sm:$0xff]  ;;  %v1199_v49 = vld [vmem:[#allocation5 + $0x1b88] sm:$0xff] }
 0x1ec   : > { %2885 = vmatpush.msra.mxu1 %v1102_v50  ;;  %2925 = vmatpush.msra.mxu3 %v1134_v51  ;;  %v272_v50 = vld [vmem:[%s4326_s23 + $0x1a0] sm:$0xff]  ;;  %v274_v51 = vld [vmem:[%s4326_s23 + $0x1b0] sm:$0xff] }
 0x1ed   : > { %2886 = vmatmul.f32.vlgmr.msra.gmra.mxu1 %v269_v52  ;;  %2926 = vmatmul.f32.vlgmr.msra.gmra.mxu3 %v271_v53  ;;  %v1229_v52 = vld [vmem:[#allocation5 + $0x1c78] sm:$0xff] }
 0x1ee   : > { %2931 = vmatpush.msrb.mxu0 %v1164_v54  ;;  %2950 = vmatpush.msrb.mxu1 %v1181_v55  ;;  %v1261_v53 = vld [vmem:[#allocation5 + $0x1d78] sm:$0xff]  ;;  %v1166_v54 = vld [vmem:[#allocation5 + $0x1a80] sm:$0xff] }
 0x1ef   : > { %2971 = vmatpush.msrb.mxu2 %v1196_v56  ;;  %2990 = vmatpush.msrb.mxu3 %v1213_v57  ;;  %v1198_v55 = vld [vmem:[#allocation5 + $0x1b80] sm:$0xff]  ;;  %v273_v56 = vld [vmem:[%s4326_s23 + $0x1a8] sm:$0xff]  ;;  %v275_v57 = vld [vmem:[%s4326_s23 + $0x1b8] sm:$0xff] }
 0x1f0   : > { %2932 = vmatpush.msrb.mxu0 %v1163_v58  ;;  %2951 = vmatpush.msrb.mxu1 %v1180_v59  ;;  %v1228_v58 = vld [vmem:[#allocation5 + $0x1c70] sm:$0xff]  ;;  %v1245_v59 = vld [vmem:[#allocation5 + $0x1cf8] sm:$0xff] }
 0x1f1   : > { %2972 = vmatpush.msrb.mxu2 %v1195_v60  ;;  %2991 = vmatpush.msrb.mxu3 %v1212_v61  ;;  %v1260_v60 = vld [vmem:[#allocation5 + $0x1d70] sm:$0xff]  ;;  %v1277_v61 = vld [vmem:[#allocation5 + $0x1df8] sm:$0xff] }
 0x1f2   : > { %2933 = vmatpush.msrb.mxu0 %v1162_v62  ;;  %2952 = vmatpush.msrb.mxu1 %v1179_v63  ;;  %v1227_v62 = vld [vmem:[#allocation5 + $0x1c68] sm:$0xff]  ;;  %v1244_v63 = vld [vmem:[#allocation5 + $0x1cf0] sm:$0xff] }
 0x1f3   : > { %2973 = vmatpush.msrb.mxu2 %v1194_v0  ;;  %2992 = vmatpush.msrb.mxu3 %v1211_v1  ;;  %v1259_v0 = vld [vmem:[#allocation5 + $0x1d68] sm:$0xff]  ;;  %v1276_v1 = vld [vmem:[#allocation5 + $0x1df0] sm:$0xff] }
 0x1f4   : > { %2934 = vmatpush.msrb.mxu0 %v1161_v2  ;;  %2953 = vmatpush.msrb.mxu1 %v1178_v3  ;;  %v1226_v2 = vld [vmem:[#allocation5 + $0x1c60] sm:$0xff]  ;;  %v1243_v3 = vld [vmem:[#allocation5 + $0x1ce8] sm:$0xff] }
 0x1f5   : > { %2974 = vmatpush.msrb.mxu2 %v1193_v4  ;;  %2993 = vmatpush.msrb.mxu3 %v1210_v5  ;;  %v1258_v4 = vld [vmem:[#allocation5 + $0x1d60] sm:$0xff]  ;;  %v1275_v5 = vld [vmem:[#allocation5 + $0x1de8] sm:$0xff] }
 0x1f6   : > { %2935 = vmatpush.msrb.mxu0 %v1160_v6  ;;  %2954 = vmatpush.msrb.mxu1 %v1177_v7  ;;  %v1225_v6 = vld [vmem:[#allocation5 + $0x1c58] sm:$0xff]  ;;  %v1242_v7 = vld [vmem:[#allocation5 + $0x1ce0] sm:$0xff] }
 0x1f7   : > { %2975 = vmatpush.msrb.mxu2 %v1192_v8  ;;  %2994 = vmatpush.msrb.mxu3 %v1209_v9  ;;  %v1257_v8 = vld [vmem:[#allocation5 + $0x1d58] sm:$0xff]  ;;  %v1274_v9 = vld [vmem:[#allocation5 + $0x1de0] sm:$0xff] }
 0x1f8   : > { %2936 = vmatpush.msrb.mxu0 %v1159_v10  ;;  %2955 = vmatpush.msrb.mxu1 %v1176_v11  ;;  %v1224_v10 = vld [vmem:[#allocation5 + $0x1c50] sm:$0xff]  ;;  %v1241_v11 = vld [vmem:[#allocation5 + $0x1cd8] sm:$0xff] }
 0x1f9   : > { %2976 = vmatpush.msrb.mxu2 %v1191_v12  ;;  %2995 = vmatpush.msrb.mxu3 %v1208_v13  ;;  %v1256_v12 = vld [vmem:[#allocation5 + $0x1d50] sm:$0xff]  ;;  %v1273_v13 = vld [vmem:[#allocation5 + $0x1dd8] sm:$0xff] }
 0x1fa   : > { %2937 = vmatpush.msrb.mxu0 %v1158_v14  ;;  %2956 = vmatpush.msrb.mxu1 %v1175_v15  ;;  %v1223_v14 = vld [vmem:[#allocation5 + $0x1c48] sm:$0xff]  ;;  %v1240_v15 = vld [vmem:[#allocation5 + $0x1cd0] sm:$0xff] }
 0x1fb   : > { %2977 = vmatpush.msrb.mxu2 %v1190_v16  ;;  %2996 = vmatpush.msrb.mxu3 %v1207_v17  ;;  %v1255_v16 = vld [vmem:[#allocation5 + $0x1d48] sm:$0xff]  ;;  %v1272_v17 = vld [vmem:[#allocation5 + $0x1dd0] sm:$0xff] }
 0x1fc   : > { %2938 = vmatpush.msrb.mxu0 %v1157_v18  ;;  %2957 = vmatpush.msrb.mxu1 %v1174_v19  ;;  %v1222_v18 = vld [vmem:[#allocation5 + $0x1c40] sm:$0xff]  ;;  %v1239_v19 = vld [vmem:[#allocation5 + $0x1cc8] sm:$0xff] }
 0x1fd   : > { %2978 = vmatpush.msrb.mxu2 %v1189_v20  ;;  %2997 = vmatpush.msrb.mxu3 %v1206_v21  ;;  %v1254_v20 = vld [vmem:[#allocation5 + $0x1d40] sm:$0xff]  ;;  %v1271_v21 = vld [vmem:[#allocation5 + $0x1dc8] sm:$0xff] }
 0x1fe   : > { %2939 = vmatpush.msrb.mxu0 %v1156_v22  ;;  %2958 = vmatpush.msrb.mxu1 %v1173_v23  ;;  %v1221_v22 = vld [vmem:[#allocation5 + $0x1c38] sm:$0xff]  ;;  %v1238_v23 = vld [vmem:[#allocation5 + $0x1cc0] sm:$0xff] }
 0x1ff   : > { %2979 = vmatpush.msrb.mxu2 %v1188_v24  ;;  %2998 = vmatpush.msrb.mxu3 %v1205_v25  ;;  %v1253_v24 = vld [vmem:[#allocation5 + $0x1d38] sm:$0xff]  ;;  %v1270_v25 = vld [vmem:[#allocation5 + $0x1dc0] sm:$0xff] }
 0x200   : > { %2940 = vmatpush.msrb.mxu0 %v1155_v26  ;;  %2959 = vmatpush.msrb.mxu1 %v1172_v27  ;;  %v1220_v26 = vld [vmem:[#allocation5 + $0x1c30] sm:$0xff]  ;;  %v1237_v27 = vld [vmem:[#allocation5 + $0x1cb8] sm:$0xff] }
 0x201   : > { %2980 = vmatpush.msrb.mxu2 %v1187_v28  ;;  %2999 = vmatpush.msrb.mxu3 %v1204_v29  ;;  %v1252_v28 = vld [vmem:[#allocation5 + $0x1d30] sm:$0xff]  ;;  %v1269_v29 = vld [vmem:[#allocation5 + $0x1db8] sm:$0xff] }
 0x202   : > { %2941 = vmatpush.msrb.mxu0 %v1154_v30  ;;  %2960 = vmatpush.msrb.mxu1 %v1171_v31  ;;  %v1219_v30 = vld [vmem:[#allocation5 + $0x1c28] sm:$0xff]  ;;  %v1236_v31 = vld [vmem:[#allocation5 + $0x1cb0] sm:$0xff] }
 0x203   : > { %2981 = vmatpush.msrb.mxu2 %v1186_v32  ;;  %3000 = vmatpush.msrb.mxu3 %v1203_v33  ;;  %v1251_v32 = vld [vmem:[#allocation5 + $0x1d28] sm:$0xff]  ;;  %v1268_v33 = vld [vmem:[#allocation5 + $0x1db0] sm:$0xff] }
 0x204   : > { %2942 = vmatpush.msrb.mxu0 %v1153_v34  ;;  %2961 = vmatpush.msrb.mxu1 %v1170_v35  ;;  %v1218_v34 = vld [vmem:[#allocation5 + $0x1c20] sm:$0xff]  ;;  %v1235_v35 = vld [vmem:[#allocation5 + $0x1ca8] sm:$0xff] }
 0x205   : > { %2982 = vmatpush.msrb.mxu2 %v1185_v36  ;;  %3001 = vmatpush.msrb.mxu3 %v1202_v37  ;;  %v1250_v36 = vld [vmem:[#allocation5 + $0x1d20] sm:$0xff]  ;;  %v1267_v37 = vld [vmem:[#allocation5 + $0x1da8] sm:$0xff] }
 0x206   : > { %2943 = vmatpush.msrb.mxu0 %v1152_v38  ;;  %2962 = vmatpush.msrb.mxu1 %v1169_v39  ;;  %v1217_v38 = vld [vmem:[#allocation5 + $0x1c18] sm:$0xff]  ;;  %v1234_v39 = vld [vmem:[#allocation5 + $0x1ca0] sm:$0xff] }
 0x207   : > { %2983 = vmatpush.msrb.mxu2 %v1184_v40  ;;  %3002 = vmatpush.msrb.mxu3 %v1201_v41  ;;  %v1249_v40 = vld [vmem:[#allocation5 + $0x1d18] sm:$0xff]  ;;  %v1266_v41 = vld [vmem:[#allocation5 + $0x1da0] sm:$0xff] }
 0x208   : > { %2944 = vmatpush.msrb.mxu0 %v1151_v42  ;;  %2963 = vmatpush.msrb.mxu1 %v1168_v43  ;;  %v1216_v42 = vld [vmem:[#allocation5 + $0x1c10] sm:$0xff]  ;;  %v1233_v43 = vld [vmem:[#allocation5 + $0x1c98] sm:$0xff] }
 0x209   : > { %2984 = vmatpush.msrb.mxu2 %v1183_v44  ;;  %3003 = vmatpush.msrb.mxu3 %v1200_v45  ;;  %v1248_v44 = vld [vmem:[#allocation5 + $0x1d10] sm:$0xff]  ;;  %v1265_v45 = vld [vmem:[#allocation5 + $0x1d98] sm:$0xff] }
 0x20a   : > { %2945 = vmatpush.msrb.mxu0 %v1150_v46  ;;  %2964 = vmatpush.msrb.mxu1 %v1167_v47  ;;  %v1215_v46 = vld [vmem:[#allocation5 + $0x1c08] sm:$0xff]  ;;  %v1232_v47 = vld [vmem:[#allocation5 + $0x1c90] sm:$0xff] }
 0x20b   : > { %2985 = vmatpush.msrb.mxu2 %v1182_v48  ;;  %3004 = vmatpush.msrb.mxu3 %v1199_v49  ;;  %v1247_v48 = vld [vmem:[#allocation5 + $0x1d08] sm:$0xff]  ;;  %v1264_v49 = vld [vmem:[#allocation5 + $0x1d90] sm:$0xff] }
 0x20c   : > { %2946 = vmatmul.f32.vlgmr.msrb.gmra.mxu0 %v272_v50  ;;  %2986 = vmatmul.f32.vlgmr.msrb.gmra.mxu2 %v274_v51  ;;  %v1214_v50 = vld [vmem:[#allocation5 + $0x1c00] sm:$0xff]  ;;  %v1231_v51 = vld [vmem:[#allocation5 + $0x1c88] sm:$0xff] }
 0x20d   : > { %3010 = vmatpush.msra.mxu0 %v1229_v52  ;;  %3050 = vmatpush.msra.mxu2 %v1261_v53  ;;  %v1246_v52 = vld [vmem:[#allocation5 + $0x1d00] sm:$0xff]  ;;  %v1263_v53 = vld [vmem:[#allocation5 + $0x1d88] sm:$0xff] }
 0x20e   : > { %2965 = vmatpush.msrb.mxu1 %v1166_v54  ;;  %3005 = vmatpush.msrb.mxu3 %v1198_v55  ;;  %v276_v54 = vld [vmem:[%s4326_s23 + $0x1c0] sm:$0xff]  ;;  %v278_v55 = vld [vmem:[%s4326_s23 + $0x1d0] sm:$0xff] }
 0x20f   : > { %2966 = vmatmul.f32.vlgmr.msrb.gmra.mxu1 %v273_v56  ;;  %3006 = vmatmul.f32.vlgmr.msrb.gmra.mxu3 %v275_v57  ;;  %v1293_v56 = vld [vmem:[#allocation5 + $0x1e78] sm:$0xff] }
 0x210   : > { %3011 = vmatpush.msra.mxu0 %v1228_v58  ;;  %3030 = vmatpush.msra.mxu1 %v1245_v59  ;;  %v1325_v57 = vld [vmem:[#allocation5 + $0x1f78] sm:$0xff]  ;;  %v1230_v58 = vld [vmem:[#allocation5 + $0x1c80] sm:$0xff] }
 0x211   : > { %3051 = vmatpush.msra.mxu2 %v1260_v60  ;;  %3070 = vmatpush.msra.mxu3 %v1277_v61  ;;  %v1262_v59 = vld [vmem:[#allocation5 + $0x1d80] sm:$0xff]  ;;  %v277_v60 = vld [vmem:[%s4326_s23 + $0x1c8] sm:$0xff]  ;;  %v279_v61 = vld [vmem:[%s4326_s23 + $0x1d8] sm:$0xff] }
 0x212   : > { %3012 = vmatpush.msra.mxu0 %v1227_v62  ;;  %3031 = vmatpush.msra.mxu1 %v1244_v63  ;;  %v1292_v62 = vld [vmem:[#allocation5 + $0x1e70] sm:$0xff]  ;;  %v1309_v63 = vld [vmem:[#allocation5 + $0x1ef8] sm:$0xff] }
 0x213   : > { %3052 = vmatpush.msra.mxu2 %v1259_v0  ;;  %3071 = vmatpush.msra.mxu3 %v1276_v1  ;;  %v1324_v0 = vld [vmem:[#allocation5 + $0x1f70] sm:$0xff]  ;;  %v1341_v1 = vld [vmem:[#allocation5 + $0x1ff8] sm:$0xff] }
 0x214   : > { %3013 = vmatpush.msra.mxu0 %v1226_v2  ;;  %3032 = vmatpush.msra.mxu1 %v1243_v3  ;;  %v1291_v2 = vld [vmem:[#allocation5 + $0x1e68] sm:$0xff]  ;;  %v1308_v3 = vld [vmem:[#allocation5 + $0x1ef0] sm:$0xff] }
 0x215   : > { %3053 = vmatpush.msra.mxu2 %v1258_v4  ;;  %3072 = vmatpush.msra.mxu3 %v1275_v5  ;;  %v1323_v4 = vld [vmem:[#allocation5 + $0x1f68] sm:$0xff]  ;;  %v1340_v5 = vld [vmem:[#allocation5 + $0x1ff0] sm:$0xff] }
 0x216   : > { %3014 = vmatpush.msra.mxu0 %v1225_v6  ;;  %3033 = vmatpush.msra.mxu1 %v1242_v7  ;;  %v1290_v6 = vld [vmem:[#allocation5 + $0x1e60] sm:$0xff]  ;;  %v1307_v7 = vld [vmem:[#allocation5 + $0x1ee8] sm:$0xff] }
 0x217   : > { %3054 = vmatpush.msra.mxu2 %v1257_v8  ;;  %3073 = vmatpush.msra.mxu3 %v1274_v9  ;;  %v1322_v8 = vld [vmem:[#allocation5 + $0x1f60] sm:$0xff]  ;;  %v1339_v9 = vld [vmem:[#allocation5 + $0x1fe8] sm:$0xff] }
 0x218   : > { %3015 = vmatpush.msra.mxu0 %v1224_v10  ;;  %3034 = vmatpush.msra.mxu1 %v1241_v11  ;;  %v1289_v10 = vld [vmem:[#allocation5 + $0x1e58] sm:$0xff]  ;;  %v1306_v11 = vld [vmem:[#allocation5 + $0x1ee0] sm:$0xff] }
 0x219   : > { %3055 = vmatpush.msra.mxu2 %v1256_v12  ;;  %3074 = vmatpush.msra.mxu3 %v1273_v13  ;;  %v1321_v12 = vld [vmem:[#allocation5 + $0x1f58] sm:$0xff]  ;;  %v1338_v13 = vld [vmem:[#allocation5 + $0x1fe0] sm:$0xff] }
 0x21a   : > { %3016 = vmatpush.msra.mxu0 %v1223_v14  ;;  %3035 = vmatpush.msra.mxu1 %v1240_v15  ;;  %v1288_v14 = vld [vmem:[#allocation5 + $0x1e50] sm:$0xff]  ;;  %v1305_v15 = vld [vmem:[#allocation5 + $0x1ed8] sm:$0xff] }
 0x21b   : > { %3056 = vmatpush.msra.mxu2 %v1255_v16  ;;  %3075 = vmatpush.msra.mxu3 %v1272_v17  ;;  %v1320_v16 = vld [vmem:[#allocation5 + $0x1f50] sm:$0xff]  ;;  %v1337_v17 = vld [vmem:[#allocation5 + $0x1fd8] sm:$0xff] }
 0x21c   : > { %3017 = vmatpush.msra.mxu0 %v1222_v18  ;;  %3036 = vmatpush.msra.mxu1 %v1239_v19  ;;  %v1287_v18 = vld [vmem:[#allocation5 + $0x1e48] sm:$0xff]  ;;  %v1304_v19 = vld [vmem:[#allocation5 + $0x1ed0] sm:$0xff] }
 0x21d   : > { %3057 = vmatpush.msra.mxu2 %v1254_v20  ;;  %3076 = vmatpush.msra.mxu3 %v1271_v21  ;;  %v1319_v20 = vld [vmem:[#allocation5 + $0x1f48] sm:$0xff]  ;;  %v1336_v21 = vld [vmem:[#allocation5 + $0x1fd0] sm:$0xff] }
 0x21e   : > { %3018 = vmatpush.msra.mxu0 %v1221_v22  ;;  %3037 = vmatpush.msra.mxu1 %v1238_v23  ;;  %v1286_v22 = vld [vmem:[#allocation5 + $0x1e40] sm:$0xff]  ;;  %v1303_v23 = vld [vmem:[#allocation5 + $0x1ec8] sm:$0xff] }
 0x21f   : > { %3058 = vmatpush.msra.mxu2 %v1253_v24  ;;  %3077 = vmatpush.msra.mxu3 %v1270_v25  ;;  %v1318_v24 = vld [vmem:[#allocation5 + $0x1f40] sm:$0xff]  ;;  %v1335_v25 = vld [vmem:[#allocation5 + $0x1fc8] sm:$0xff] }
 0x220   : > { %3019 = vmatpush.msra.mxu0 %v1220_v26  ;;  %3038 = vmatpush.msra.mxu1 %v1237_v27  ;;  %v1285_v26 = vld [vmem:[#allocation5 + $0x1e38] sm:$0xff]  ;;  %v1302_v27 = vld [vmem:[#allocation5 + $0x1ec0] sm:$0xff] }
 0x221   : > { %3059 = vmatpush.msra.mxu2 %v1252_v28  ;;  %3078 = vmatpush.msra.mxu3 %v1269_v29  ;;  %v1317_v28 = vld [vmem:[#allocation5 + $0x1f38] sm:$0xff]  ;;  %v1334_v29 = vld [vmem:[#allocation5 + $0x1fc0] sm:$0xff] }
 0x222   : > { %3020 = vmatpush.msra.mxu0 %v1219_v30  ;;  %3039 = vmatpush.msra.mxu1 %v1236_v31  ;;  %v1284_v30 = vld [vmem:[#allocation5 + $0x1e30] sm:$0xff]  ;;  %v1301_v31 = vld [vmem:[#allocation5 + $0x1eb8] sm:$0xff] }
 0x223   : > { %3060 = vmatpush.msra.mxu2 %v1251_v32  ;;  %3079 = vmatpush.msra.mxu3 %v1268_v33  ;;  %v1316_v32 = vld [vmem:[#allocation5 + $0x1f30] sm:$0xff]  ;;  %v1333_v33 = vld [vmem:[#allocation5 + $0x1fb8] sm:$0xff] }
 0x224   : > { %3021 = vmatpush.msra.mxu0 %v1218_v34  ;;  %3040 = vmatpush.msra.mxu1 %v1235_v35  ;;  %v1283_v34 = vld [vmem:[#allocation5 + $0x1e28] sm:$0xff]  ;;  %v1300_v35 = vld [vmem:[#allocation5 + $0x1eb0] sm:$0xff] }
 0x225   : > { %3061 = vmatpush.msra.mxu2 %v1250_v36  ;;  %3080 = vmatpush.msra.mxu3 %v1267_v37  ;;  %v1315_v36 = vld [vmem:[#allocation5 + $0x1f28] sm:$0xff]  ;;  %v1332_v37 = vld [vmem:[#allocation5 + $0x1fb0] sm:$0xff] }
 0x226   : > { %3022 = vmatpush.msra.mxu0 %v1217_v38  ;;  %3041 = vmatpush.msra.mxu1 %v1234_v39  ;;  %v1282_v38 = vld [vmem:[#allocation5 + $0x1e20] sm:$0xff]  ;;  %v1299_v39 = vld [vmem:[#allocation5 + $0x1ea8] sm:$0xff] }
 0x227   : > { %3062 = vmatpush.msra.mxu2 %v1249_v40  ;;  %3081 = vmatpush.msra.mxu3 %v1266_v41  ;;  %v1314_v40 = vld [vmem:[#allocation5 + $0x1f20] sm:$0xff]  ;;  %v1331_v41 = vld [vmem:[#allocation5 + $0x1fa8] sm:$0xff] }
 0x228   : > { %3023 = vmatpush.msra.mxu0 %v1216_v42  ;;  %3042 = vmatpush.msra.mxu1 %v1233_v43  ;;  %v1281_v42 = vld [vmem:[#allocation5 + $0x1e18] sm:$0xff]  ;;  %v1298_v43 = vld [vmem:[#allocation5 + $0x1ea0] sm:$0xff] }
 0x229   : > { %3063 = vmatpush.msra.mxu2 %v1248_v44  ;;  %3082 = vmatpush.msra.mxu3 %v1265_v45  ;;  %v1313_v44 = vld [vmem:[#allocation5 + $0x1f18] sm:$0xff]  ;;  %v1330_v45 = vld [vmem:[#allocation5 + $0x1fa0] sm:$0xff] }
 0x22a   : > { %3024 = vmatpush.msra.mxu0 %v1215_v46  ;;  %3043 = vmatpush.msra.mxu1 %v1232_v47  ;;  %v1280_v46 = vld [vmem:[#allocation5 + $0x1e10] sm:$0xff]  ;;  %v1297_v47 = vld [vmem:[#allocation5 + $0x1e98] sm:$0xff] }
 0x22b   : > { %3064 = vmatpush.msra.mxu2 %v1247_v48  ;;  %3083 = vmatpush.msra.mxu3 %v1264_v49  ;;  %v1312_v48 = vld [vmem:[#allocation5 + $0x1f10] sm:$0xff]  ;;  %v1329_v49 = vld [vmem:[#allocation5 + $0x1f98] sm:$0xff] }
 0x22c   : > { %3025 = vmatpush.msra.mxu0 %v1214_v50  ;;  %3044 = vmatpush.msra.mxu1 %v1231_v51  ;;  %v1279_v50 = vld [vmem:[#allocation5 + $0x1e08] sm:$0xff]  ;;  %v1296_v51 = vld [vmem:[#allocation5 + $0x1e90] sm:$0xff] }
 0x22d   : > { %3065 = vmatpush.msra.mxu2 %v1246_v52  ;;  %3084 = vmatpush.msra.mxu3 %v1263_v53  ;;  %v1311_v52 = vld [vmem:[#allocation5 + $0x1f08] sm:$0xff]  ;;  %v1328_v53 = vld [vmem:[#allocation5 + $0x1f90] sm:$0xff] }
 0x22e   : > { %3026 = vmatmul.f32.vlgmr.msra.gmra.mxu0 %v276_v54  ;;  %3066 = vmatmul.f32.vlgmr.msra.gmra.mxu2 %v278_v55  ;;  %v1278_v54 = vld [vmem:[#allocation5 + $0x1e00] sm:$0xff]  ;;  %v1295_v55 = vld [vmem:[#allocation5 + $0x1e88] sm:$0xff] }
 0x22f   : > { %3090 = vmatpush.msrb.mxu0 %v1293_v56  ;;  %3130 = vmatpush.msrb.mxu2 %v1325_v57  ;;  %v1310_v56 = vld [vmem:[#allocation5 + $0x1f00] sm:$0xff]  ;;  %v1327_v57 = vld [vmem:[#allocation5 + $0x1f88] sm:$0xff] }
 0x230   : > { %3045 = vmatpush.msra.mxu1 %v1230_v58  ;;  %3085 = vmatpush.msra.mxu3 %v1262_v59  ;;  %v280_v58 = vld [vmem:[%s4326_s23 + $0x1e0] sm:$0xff]  ;;  %v282_v59 = vld [vmem:[%s4326_s23 + $0x1f0] sm:$0xff] }
 0x231   : > { %3046 = vmatmul.f32.vlgmr.msra.gmra.mxu1 %v277_v60  ;;  %3086 = vmatmul.f32.vlgmr.msra.gmra.mxu3 %v279_v61  ;;  %v1357_v60 = vld [vmem:[#allocation5 + $0x2078] sm:$0xff] }
 0x232   : > { %3091 = vmatpush.msrb.mxu0 %v1292_v62  ;;  %3110 = vmatpush.msrb.mxu1 %v1309_v63  ;;  %v1389_v61 = vld [vmem:[#allocation5 + $0x2178] sm:$0xff]  ;;  %v1294_v62 = vld [vmem:[#allocation5 + $0x1e80] sm:$0xff] }
 0x233   : > { %3131 = vmatpush.msrb.mxu2 %v1324_v0  ;;  %3150 = vmatpush.msrb.mxu3 %v1341_v1  ;;  %v1326_v63 = vld [vmem:[#allocation5 + $0x1f80] sm:$0xff]  ;;  %v281_v0 = vld [vmem:[%s4326_s23 + $0x1e8] sm:$0xff]  ;;  %v283_v1 = vld [vmem:[%s4326_s23 + $0x1f8] sm:$0xff] }
 0x234   : > { %3092 = vmatpush.msrb.mxu0 %v1291_v2  ;;  %3111 = vmatpush.msrb.mxu1 %v1308_v3  ;;  %v1356_v2 = vld [vmem:[#allocation5 + $0x2070] sm:$0xff]  ;;  %v1373_v3 = vld [vmem:[#allocation5 + $0x20f8] sm:$0xff] }
 0x235   : > { %3132 = vmatpush.msrb.mxu2 %v1323_v4  ;;  %3151 = vmatpush.msrb.mxu3 %v1340_v5  ;;  %v1388_v4 = vld [vmem:[#allocation5 + $0x2170] sm:$0xff]  ;;  %v1405_v5 = vld [vmem:[#allocation5 + $0x21f8] sm:$0xff] }
 0x236   : > { %3093 = vmatpush.msrb.mxu0 %v1290_v6  ;;  %3112 = vmatpush.msrb.mxu1 %v1307_v7  ;;  %v1355_v6 = vld [vmem:[#allocation5 + $0x2068] sm:$0xff]  ;;  %v1372_v7 = vld [vmem:[#allocation5 + $0x20f0] sm:$0xff] }
 0x237   : > { %3133 = vmatpush.msrb.mxu2 %v1322_v8  ;;  %3152 = vmatpush.msrb.mxu3 %v1339_v9  ;;  %v1387_v8 = vld [vmem:[#allocation5 + $0x2168] sm:$0xff]  ;;  %v1404_v9 = vld [vmem:[#allocation5 + $0x21f0] sm:$0xff] }
 0x238   : > { %3094 = vmatpush.msrb.mxu0 %v1289_v10  ;;  %3113 = vmatpush.msrb.mxu1 %v1306_v11  ;;  %v1354_v10 = vld [vmem:[#allocation5 + $0x2060] sm:$0xff]  ;;  %v1371_v11 = vld [vmem:[#allocation5 + $0x20e8] sm:$0xff] }
 0x239   : > { %3134 = vmatpush.msrb.mxu2 %v1321_v12  ;;  %3153 = vmatpush.msrb.mxu3 %v1338_v13  ;;  %v1386_v12 = vld [vmem:[#allocation5 + $0x2160] sm:$0xff]  ;;  %v1403_v13 = vld [vmem:[#allocation5 + $0x21e8] sm:$0xff] }
 0x23a   : > { %3095 = vmatpush.msrb.mxu0 %v1288_v14  ;;  %3114 = vmatpush.msrb.mxu1 %v1305_v15  ;;  %v1353_v14 = vld [vmem:[#allocation5 + $0x2058] sm:$0xff]  ;;  %v1370_v15 = vld [vmem:[#allocation5 + $0x20e0] sm:$0xff] }
 0x23b   : > { %3135 = vmatpush.msrb.mxu2 %v1320_v16  ;;  %3154 = vmatpush.msrb.mxu3 %v1337_v17  ;;  %v1385_v16 = vld [vmem:[#allocation5 + $0x2158] sm:$0xff]  ;;  %v1402_v17 = vld [vmem:[#allocation5 + $0x21e0] sm:$0xff] }
 0x23c   : > { %3096 = vmatpush.msrb.mxu0 %v1287_v18  ;;  %3115 = vmatpush.msrb.mxu1 %v1304_v19  ;;  %v1352_v18 = vld [vmem:[#allocation5 + $0x2050] sm:$0xff]  ;;  %v1369_v19 = vld [vmem:[#allocation5 + $0x20d8] sm:$0xff] }
 0x23d   : > { %3136 = vmatpush.msrb.mxu2 %v1319_v20  ;;  %3155 = vmatpush.msrb.mxu3 %v1336_v21  ;;  %v1384_v20 = vld [vmem:[#allocation5 + $0x2150] sm:$0xff]  ;;  %v1401_v21 = vld [vmem:[#allocation5 + $0x21d8] sm:$0xff] }
 0x23e   : > { %3097 = vmatpush.msrb.mxu0 %v1286_v22  ;;  %3116 = vmatpush.msrb.mxu1 %v1303_v23  ;;  %v1351_v22 = vld [vmem:[#allocation5 + $0x2048] sm:$0xff]  ;;  %v1368_v23 = vld [vmem:[#allocation5 + $0x20d0] sm:$0xff] }
 0x23f   : > { %3137 = vmatpush.msrb.mxu2 %v1318_v24  ;;  %3156 = vmatpush.msrb.mxu3 %v1335_v25  ;;  %v1383_v24 = vld [vmem:[#allocation5 + $0x2148] sm:$0xff]  ;;  %v1400_v25 = vld [vmem:[#allocation5 + $0x21d0] sm:$0xff] }
 0x240   : > { %3098 = vmatpush.msrb.mxu0 %v1285_v26  ;;  %3117 = vmatpush.msrb.mxu1 %v1302_v27  ;;  %v1350_v26 = vld [vmem:[#allocation5 + $0x2040] sm:$0xff]  ;;  %v1367_v27 = vld [vmem:[#allocation5 + $0x20c8] sm:$0xff] }
 0x241   : > { %3138 = vmatpush.msrb.mxu2 %v1317_v28  ;;  %3157 = vmatpush.msrb.mxu3 %v1334_v29  ;;  %v1382_v28 = vld [vmem:[#allocation5 + $0x2140] sm:$0xff]  ;;  %v1399_v29 = vld [vmem:[#allocation5 + $0x21c8] sm:$0xff] }
 0x242   : > { %3099 = vmatpush.msrb.mxu0 %v1284_v30  ;;  %3118 = vmatpush.msrb.mxu1 %v1301_v31  ;;  %v1349_v30 = vld [vmem:[#allocation5 + $0x2038] sm:$0xff]  ;;  %v1366_v31 = vld [vmem:[#allocation5 + $0x20c0] sm:$0xff] }
 0x243   : > { %3139 = vmatpush.msrb.mxu2 %v1316_v32  ;;  %3158 = vmatpush.msrb.mxu3 %v1333_v33  ;;  %v1381_v32 = vld [vmem:[#allocation5 + $0x2138] sm:$0xff]  ;;  %v1398_v33 = vld [vmem:[#allocation5 + $0x21c0] sm:$0xff] }
 0x244   : > { %3100 = vmatpush.msrb.mxu0 %v1283_v34  ;;  %3119 = vmatpush.msrb.mxu1 %v1300_v35  ;;  %v1348_v34 = vld [vmem:[#allocation5 + $0x2030] sm:$0xff]  ;;  %v1365_v35 = vld [vmem:[#allocation5 + $0x20b8] sm:$0xff] }
 0x245   : > { %3140 = vmatpush.msrb.mxu2 %v1315_v36  ;;  %3159 = vmatpush.msrb.mxu3 %v1332_v37  ;;  %v1380_v36 = vld [vmem:[#allocation5 + $0x2130] sm:$0xff]  ;;  %v1397_v37 = vld [vmem:[#allocation5 + $0x21b8] sm:$0xff] }
 0x246   : > { %3101 = vmatpush.msrb.mxu0 %v1282_v38  ;;  %3120 = vmatpush.msrb.mxu1 %v1299_v39  ;;  %v1347_v38 = vld [vmem:[#allocation5 + $0x2028] sm:$0xff]  ;;  %v1364_v39 = vld [vmem:[#allocation5 + $0x20b0] sm:$0xff] }
 0x247   : > { %3141 = vmatpush.msrb.mxu2 %v1314_v40  ;;  %3160 = vmatpush.msrb.mxu3 %v1331_v41  ;;  %v1379_v40 = vld [vmem:[#allocation5 + $0x2128] sm:$0xff]  ;;  %v1396_v41 = vld [vmem:[#allocation5 + $0x21b0] sm:$0xff] }
 0x248   : > { %3102 = vmatpush.msrb.mxu0 %v1281_v42  ;;  %3121 = vmatpush.msrb.mxu1 %v1298_v43  ;;  %v1346_v42 = vld [vmem:[#allocation5 + $0x2020] sm:$0xff]  ;;  %v1363_v43 = vld [vmem:[#allocation5 + $0x20a8] sm:$0xff] }
 0x249   : > { %3142 = vmatpush.msrb.mxu2 %v1313_v44  ;;  %3161 = vmatpush.msrb.mxu3 %v1330_v45  ;;  %v1378_v44 = vld [vmem:[#allocation5 + $0x2120] sm:$0xff]  ;;  %v1395_v45 = vld [vmem:[#allocation5 + $0x21a8] sm:$0xff] }
 0x24a   : > { %3103 = vmatpush.msrb.mxu0 %v1280_v46  ;;  %3122 = vmatpush.msrb.mxu1 %v1297_v47  ;;  %v1345_v46 = vld [vmem:[#allocation5 + $0x2018] sm:$0xff]  ;;  %v1362_v47 = vld [vmem:[#allocation5 + $0x20a0] sm:$0xff] }
 0x24b   : > { %3143 = vmatpush.msrb.mxu2 %v1312_v48  ;;  %3162 = vmatpush.msrb.mxu3 %v1329_v49  ;;  %v1377_v48 = vld [vmem:[#allocation5 + $0x2118] sm:$0xff]  ;;  %v1394_v49 = vld [vmem:[#allocation5 + $0x21a0] sm:$0xff] }
 0x24c   : > { %3104 = vmatpush.msrb.mxu0 %v1279_v50  ;;  %3123 = vmatpush.msrb.mxu1 %v1296_v51  ;;  %v1344_v50 = vld [vmem:[#allocation5 + $0x2010] sm:$0xff]  ;;  %v1361_v51 = vld [vmem:[#allocation5 + $0x2098] sm:$0xff] }
 0x24d   : > { %3144 = vmatpush.msrb.mxu2 %v1311_v52  ;;  %3163 = vmatpush.msrb.mxu3 %v1328_v53  ;;  %v1376_v52 = vld [vmem:[#allocation5 + $0x2110] sm:$0xff]  ;;  %v1393_v53 = vld [vmem:[#allocation5 + $0x2198] sm:$0xff] }
 0x24e   : > { %3105 = vmatpush.msrb.mxu0 %v1278_v54  ;;  %3124 = vmatpush.msrb.mxu1 %v1295_v55  ;;  %v1343_v54 = vld [vmem:[#allocation5 + $0x2008] sm:$0xff]  ;;  %v1360_v55 = vld [vmem:[#allocation5 + $0x2090] sm:$0xff] }
 0x24f   : > { %3145 = vmatpush.msrb.mxu2 %v1310_v56  ;;  %3164 = vmatpush.msrb.mxu3 %v1327_v57  ;;  %v1375_v56 = vld [vmem:[#allocation5 + $0x2108] sm:$0xff]  ;;  %v1392_v57 = vld [vmem:[#allocation5 + $0x2190] sm:$0xff] }
 0x250   : > { %3106 = vmatmul.f32.vlgmr.msrb.gmra.mxu0 %v280_v58  ;;  %3146 = vmatmul.f32.vlgmr.msrb.gmra.mxu2 %v282_v59  ;;  %v1342_v58 = vld [vmem:[#allocation5 + $0x2000] sm:$0xff]  ;;  %v1359_v59 = vld [vmem:[#allocation5 + $0x2088] sm:$0xff] }
 0x251   : > { %3170 = vmatpush.msra.mxu0 %v1357_v60  ;;  %3210 = vmatpush.msra.mxu2 %v1389_v61  ;;  %v1374_v60 = vld [vmem:[#allocation5 + $0x2100] sm:$0xff]  ;;  %v1391_v61 = vld [vmem:[#allocation5 + $0x2188] sm:$0xff] }
 0x252   : > { %3125 = vmatpush.msrb.mxu1 %v1294_v62  ;;  %3165 = vmatpush.msrb.mxu3 %v1326_v63  ;;  %v284_v62 = vld [vmem:[%s4326_s23 + $0x200] sm:$0xff]  ;;  %v286_v63 = vld [vmem:[%s4326_s23 + $0x210] sm:$0xff] }
 0x253   : > { %3126 = vmatmul.f32.vlgmr.msrb.gmra.mxu1 %v281_v0  ;;  %3166 = vmatmul.f32.vlgmr.msrb.gmra.mxu3 %v283_v1  ;;  %v1421_v0 = vld [vmem:[#allocation5 + $0x2278] sm:$0xff] }
 0x254   : > { %3171 = vmatpush.msra.mxu0 %v1356_v2  ;;  %3190 = vmatpush.msra.mxu1 %v1373_v3  ;;  %v1453_v1 = vld [vmem:[#allocation5 + $0x2378] sm:$0xff]  ;;  %v1358_v2 = vld [vmem:[#allocation5 + $0x2080] sm:$0xff] }
 0x255   : > { %3211 = vmatpush.msra.mxu2 %v1388_v4  ;;  %3230 = vmatpush.msra.mxu3 %v1405_v5  ;;  %v1390_v3 = vld [vmem:[#allocation5 + $0x2180] sm:$0xff]  ;;  %v285_v4 = vld [vmem:[%s4326_s23 + $0x208] sm:$0xff]  ;;  %v287_v5 = vld [vmem:[%s4326_s23 + $0x218] sm:$0xff] }
 0x256   : > { %3172 = vmatpush.msra.mxu0 %v1355_v6  ;;  %3191 = vmatpush.msra.mxu1 %v1372_v7  ;;  %v1420_v6 = vld [vmem:[#allocation5 + $0x2270] sm:$0xff]  ;;  %v1437_v7 = vld [vmem:[#allocation5 + $0x22f8] sm:$0xff] }
 0x257   : > { %3212 = vmatpush.msra.mxu2 %v1387_v8  ;;  %3231 = vmatpush.msra.mxu3 %v1404_v9  ;;  %v1452_v8 = vld [vmem:[#allocation5 + $0x2370] sm:$0xff]  ;;  %v1469_v9 = vld [vmem:[#allocation5 + $0x23f8] sm:$0xff] }
 0x258   : > { %3173 = vmatpush.msra.mxu0 %v1354_v10  ;;  %3192 = vmatpush.msra.mxu1 %v1371_v11  ;;  %v1419_v10 = vld [vmem:[#allocation5 + $0x2268] sm:$0xff]  ;;  %v1436_v11 = vld [vmem:[#allocation5 + $0x22f0] sm:$0xff] }
 0x259   : > { %3213 = vmatpush.msra.mxu2 %v1386_v12  ;;  %3232 = vmatpush.msra.mxu3 %v1403_v13  ;;  %v1451_v12 = vld [vmem:[#allocation5 + $0x2368] sm:$0xff]  ;;  %v1468_v13 = vld [vmem:[#allocation5 + $0x23f0] sm:$0xff] }
 0x25a   : > { %3174 = vmatpush.msra.mxu0 %v1353_v14  ;;  %3193 = vmatpush.msra.mxu1 %v1370_v15  ;;  %v1418_v14 = vld [vmem:[#allocation5 + $0x2260] sm:$0xff]  ;;  %v1435_v15 = vld [vmem:[#allocation5 + $0x22e8] sm:$0xff] }
 0x25b   : > { %3214 = vmatpush.msra.mxu2 %v1385_v16  ;;  %3233 = vmatpush.msra.mxu3 %v1402_v17  ;;  %v1450_v16 = vld [vmem:[#allocation5 + $0x2360] sm:$0xff]  ;;  %v1467_v17 = vld [vmem:[#allocation5 + $0x23e8] sm:$0xff] }
 0x25c   : > { %3175 = vmatpush.msra.mxu0 %v1352_v18  ;;  %3194 = vmatpush.msra.mxu1 %v1369_v19  ;;  %v1417_v18 = vld [vmem:[#allocation5 + $0x2258] sm:$0xff]  ;;  %v1434_v19 = vld [vmem:[#allocation5 + $0x22e0] sm:$0xff] }
 0x25d   : > { %3215 = vmatpush.msra.mxu2 %v1384_v20  ;;  %3234 = vmatpush.msra.mxu3 %v1401_v21  ;;  %v1449_v20 = vld [vmem:[#allocation5 + $0x2358] sm:$0xff]  ;;  %v1466_v21 = vld [vmem:[#allocation5 + $0x23e0] sm:$0xff] }
 0x25e   : > { %3176 = vmatpush.msra.mxu0 %v1351_v22  ;;  %3195 = vmatpush.msra.mxu1 %v1368_v23  ;;  %v1416_v22 = vld [vmem:[#allocation5 + $0x2250] sm:$0xff]  ;;  %v1433_v23 = vld [vmem:[#allocation5 + $0x22d8] sm:$0xff] }
 0x25f   : > { %3216 = vmatpush.msra.mxu2 %v1383_v24  ;;  %3235 = vmatpush.msra.mxu3 %v1400_v25  ;;  %v1448_v24 = vld [vmem:[#allocation5 + $0x2350] sm:$0xff]  ;;  %v1465_v25 = vld [vmem:[#allocation5 + $0x23d8] sm:$0xff] }
 0x260   : > { %3177 = vmatpush.msra.mxu0 %v1350_v26  ;;  %3196 = vmatpush.msra.mxu1 %v1367_v27  ;;  %v1415_v26 = vld [vmem:[#allocation5 + $0x2248] sm:$0xff]  ;;  %v1432_v27 = vld [vmem:[#allocation5 + $0x22d0] sm:$0xff] }
 0x261   : > { %3217 = vmatpush.msra.mxu2 %v1382_v28  ;;  %3236 = vmatpush.msra.mxu3 %v1399_v29  ;;  %v1447_v28 = vld [vmem:[#allocation5 + $0x2348] sm:$0xff]  ;;  %v1464_v29 = vld [vmem:[#allocation5 + $0x23d0] sm:$0xff] }
 0x262   : > { %3178 = vmatpush.msra.mxu0 %v1349_v30  ;;  %3197 = vmatpush.msra.mxu1 %v1366_v31  ;;  %v1414_v30 = vld [vmem:[#allocation5 + $0x2240] sm:$0xff]  ;;  %v1431_v31 = vld [vmem:[#allocation5 + $0x22c8] sm:$0xff] }
 0x263   : > { %3218 = vmatpush.msra.mxu2 %v1381_v32  ;;  %3237 = vmatpush.msra.mxu3 %v1398_v33  ;;  %v1446_v32 = vld [vmem:[#allocation5 + $0x2340] sm:$0xff]  ;;  %v1463_v33 = vld [vmem:[#allocation5 + $0x23c8] sm:$0xff] }
 0x264   : > { %3179 = vmatpush.msra.mxu0 %v1348_v34  ;;  %3198 = vmatpush.msra.mxu1 %v1365_v35  ;;  %v1413_v34 = vld [vmem:[#allocation5 + $0x2238] sm:$0xff]  ;;  %v1430_v35 = vld [vmem:[#allocation5 + $0x22c0] sm:$0xff] }
 0x265   : > { %3219 = vmatpush.msra.mxu2 %v1380_v36  ;;  %3238 = vmatpush.msra.mxu3 %v1397_v37  ;;  %v1445_v36 = vld [vmem:[#allocation5 + $0x2338] sm:$0xff]  ;;  %v1462_v37 = vld [vmem:[#allocation5 + $0x23c0] sm:$0xff] }
 0x266   : > { %3180 = vmatpush.msra.mxu0 %v1347_v38  ;;  %3199 = vmatpush.msra.mxu1 %v1364_v39  ;;  %v1412_v38 = vld [vmem:[#allocation5 + $0x2230] sm:$0xff]  ;;  %v1429_v39 = vld [vmem:[#allocation5 + $0x22b8] sm:$0xff] }
 0x267   : > { %3220 = vmatpush.msra.mxu2 %v1379_v40  ;;  %3239 = vmatpush.msra.mxu3 %v1396_v41  ;;  %v1444_v40 = vld [vmem:[#allocation5 + $0x2330] sm:$0xff]  ;;  %v1461_v41 = vld [vmem:[#allocation5 + $0x23b8] sm:$0xff] }
 0x268   : > { %3181 = vmatpush.msra.mxu0 %v1346_v42  ;;  %3200 = vmatpush.msra.mxu1 %v1363_v43  ;;  %v1411_v42 = vld [vmem:[#allocation5 + $0x2228] sm:$0xff]  ;;  %v1428_v43 = vld [vmem:[#allocation5 + $0x22b0] sm:$0xff] }
 0x269   : > { %3221 = vmatpush.msra.mxu2 %v1378_v44  ;;  %3240 = vmatpush.msra.mxu3 %v1395_v45  ;;  %v1443_v44 = vld [vmem:[#allocation5 + $0x2328] sm:$0xff]  ;;  %v1460_v45 = vld [vmem:[#allocation5 + $0x23b0] sm:$0xff] }
 0x26a   : > { %3182 = vmatpush.msra.mxu0 %v1345_v46  ;;  %3201 = vmatpush.msra.mxu1 %v1362_v47  ;;  %v1410_v46 = vld [vmem:[#allocation5 + $0x2220] sm:$0xff]  ;;  %v1427_v47 = vld [vmem:[#allocation5 + $0x22a8] sm:$0xff] }
 0x26b   : > { %3222 = vmatpush.msra.mxu2 %v1377_v48  ;;  %3241 = vmatpush.msra.mxu3 %v1394_v49  ;;  %v1442_v48 = vld [vmem:[#allocation5 + $0x2320] sm:$0xff]  ;;  %v1459_v49 = vld [vmem:[#allocation5 + $0x23a8] sm:$0xff] }
 0x26c   : > { %3183 = vmatpush.msra.mxu0 %v1344_v50  ;;  %3202 = vmatpush.msra.mxu1 %v1361_v51  ;;  %v1409_v50 = vld [vmem:[#allocation5 + $0x2218] sm:$0xff]  ;;  %v1426_v51 = vld [vmem:[#allocation5 + $0x22a0] sm:$0xff] }
 0x26d   : > { %3223 = vmatpush.msra.mxu2 %v1376_v52  ;;  %3242 = vmatpush.msra.mxu3 %v1393_v53  ;;  %v1441_v52 = vld [vmem:[#allocation5 + $0x2318] sm:$0xff]  ;;  %v1458_v53 = vld [vmem:[#allocation5 + $0x23a0] sm:$0xff] }
 0x26e   : > { %3184 = vmatpush.msra.mxu0 %v1343_v54  ;;  %3203 = vmatpush.msra.mxu1 %v1360_v55  ;;  %v1408_v54 = vld [vmem:[#allocation5 + $0x2210] sm:$0xff]  ;;  %v1425_v55 = vld [vmem:[#allocation5 + $0x2298] sm:$0xff] }
 0x26f   : > { %3224 = vmatpush.msra.mxu2 %v1375_v56  ;;  %3243 = vmatpush.msra.mxu3 %v1392_v57  ;;  %v1440_v56 = vld [vmem:[#allocation5 + $0x2310] sm:$0xff]  ;;  %v1457_v57 = vld [vmem:[#allocation5 + $0x2398] sm:$0xff] }
 0x270   : > { %3185 = vmatpush.msra.mxu0 %v1342_v58  ;;  %3204 = vmatpush.msra.mxu1 %v1359_v59  ;;  %v1407_v58 = vld [vmem:[#allocation5 + $0x2208] sm:$0xff]  ;;  %v1424_v59 = vld [vmem:[#allocation5 + $0x2290] sm:$0xff] }
 0x271   : > { %3225 = vmatpush.msra.mxu2 %v1374_v60  ;;  %3244 = vmatpush.msra.mxu3 %v1391_v61  ;;  %v1439_v60 = vld [vmem:[#allocation5 + $0x2308] sm:$0xff]  ;;  %v1456_v61 = vld [vmem:[#allocation5 + $0x2390] sm:$0xff] }
 0x272   : > { %3186 = vmatmul.f32.vlgmr.msra.gmra.mxu0 %v284_v62  ;;  %3226 = vmatmul.f32.vlgmr.msra.gmra.mxu2 %v286_v63  ;;  %v1406_v62 = vld [vmem:[#allocation5 + $0x2200] sm:$0xff]  ;;  %v1423_v63 = vld [vmem:[#allocation5 + $0x2288] sm:$0xff] }
 0x273   : > { %3250 = vmatpush.msrb.mxu0 %v1421_v0  ;;  %3290 = vmatpush.msrb.mxu2 %v1453_v1  ;;  %v1438_v0 = vld [vmem:[#allocation5 + $0x2300] sm:$0xff]  ;;  %v1455_v1 = vld [vmem:[#allocation5 + $0x2388] sm:$0xff] }
 0x274   : > { %3205 = vmatpush.msra.mxu1 %v1358_v2  ;;  %3245 = vmatpush.msra.mxu3 %v1390_v3  ;;  %v288_v2 = vld [vmem:[%s4326_s23 + $0x220] sm:$0xff]  ;;  %v290_v3 = vld [vmem:[%s4326_s23 + $0x230] sm:$0xff] }
 0x275   : > { %3206 = vmatmul.f32.vlgmr.msra.gmra.mxu1 %v285_v4  ;;  %3246 = vmatmul.f32.vlgmr.msra.gmra.mxu3 %v287_v5  ;;  %v1485_v4 = vld [vmem:[#allocation5 + $0x2478] sm:$0xff] }
 0x276   : > { %3251 = vmatpush.msrb.mxu0 %v1420_v6  ;;  %3270 = vmatpush.msrb.mxu1 %v1437_v7  ;;  %v1517_v5 = vld [vmem:[#allocation5 + $0x2578] sm:$0xff]  ;;  %v1422_v6 = vld [vmem:[#allocation5 + $0x2280] sm:$0xff] }
 0x277   : > { %3291 = vmatpush.msrb.mxu2 %v1452_v8  ;;  %3310 = vmatpush.msrb.mxu3 %v1469_v9  ;;  %v1454_v7 = vld [vmem:[#allocation5 + $0x2380] sm:$0xff]  ;;  %v289_v8 = vld [vmem:[%s4326_s23 + $0x228] sm:$0xff]  ;;  %v291_v9 = vld [vmem:[%s4326_s23 + $0x238] sm:$0xff] }
 0x278   : > { %3252 = vmatpush.msrb.mxu0 %v1419_v10  ;;  %3271 = vmatpush.msrb.mxu1 %v1436_v11  ;;  %v1484_v10 = vld [vmem:[#allocation5 + $0x2470] sm:$0xff]  ;;  %v1501_v11 = vld [vmem:[#allocation5 + $0x24f8] sm:$0xff] }
 0x279   : > { %3292 = vmatpush.msrb.mxu2 %v1451_v12  ;;  %3311 = vmatpush.msrb.mxu3 %v1468_v13  ;;  %v1516_v12 = vld [vmem:[#allocation5 + $0x2570] sm:$0xff]  ;;  %v1533_v13 = vld [vmem:[#allocation5 + $0x25f8] sm:$0xff] }
 0x27a   : > { %3253 = vmatpush.msrb.mxu0 %v1418_v14  ;;  %3272 = vmatpush.msrb.mxu1 %v1435_v15  ;;  %v1483_v14 = vld [vmem:[#allocation5 + $0x2468] sm:$0xff]  ;;  %v1500_v15 = vld [vmem:[#allocation5 + $0x24f0] sm:$0xff] }
 0x27b   : > { %3293 = vmatpush.msrb.mxu2 %v1450_v16  ;;  %3312 = vmatpush.msrb.mxu3 %v1467_v17  ;;  %v1515_v16 = vld [vmem:[#allocation5 + $0x2568] sm:$0xff]  ;;  %v1532_v17 = vld [vmem:[#allocation5 + $0x25f0] sm:$0xff] }
 0x27c   : > { %3254 = vmatpush.msrb.mxu0 %v1417_v18  ;;  %3273 = vmatpush.msrb.mxu1 %v1434_v19  ;;  %v1482_v18 = vld [vmem:[#allocation5 + $0x2460] sm:$0xff]  ;;  %v1499_v19 = vld [vmem:[#allocation5 + $0x24e8] sm:$0xff] }
 0x27d   : > { %3294 = vmatpush.msrb.mxu2 %v1449_v20  ;;  %3313 = vmatpush.msrb.mxu3 %v1466_v21  ;;  %v1514_v20 = vld [vmem:[#allocation5 + $0x2560] sm:$0xff]  ;;  %v1531_v21 = vld [vmem:[#allocation5 + $0x25e8] sm:$0xff] }
 0x27e   : > { %3255 = vmatpush.msrb.mxu0 %v1416_v22  ;;  %3274 = vmatpush.msrb.mxu1 %v1433_v23  ;;  %v1481_v22 = vld [vmem:[#allocation5 + $0x2458] sm:$0xff]  ;;  %v1498_v23 = vld [vmem:[#allocation5 + $0x24e0] sm:$0xff] }
 0x27f   : > { %3295 = vmatpush.msrb.mxu2 %v1448_v24  ;;  %3314 = vmatpush.msrb.mxu3 %v1465_v25  ;;  %v1513_v24 = vld [vmem:[#allocation5 + $0x2558] sm:$0xff]  ;;  %v1530_v25 = vld [vmem:[#allocation5 + $0x25e0] sm:$0xff] }
 0x280   : > { %3256 = vmatpush.msrb.mxu0 %v1415_v26  ;;  %3275 = vmatpush.msrb.mxu1 %v1432_v27  ;;  %v1480_v26 = vld [vmem:[#allocation5 + $0x2450] sm:$0xff]  ;;  %v1497_v27 = vld [vmem:[#allocation5 + $0x24d8] sm:$0xff] }
 0x281   : > { %3296 = vmatpush.msrb.mxu2 %v1447_v28  ;;  %3315 = vmatpush.msrb.mxu3 %v1464_v29  ;;  %v1512_v28 = vld [vmem:[#allocation5 + $0x2550] sm:$0xff]  ;;  %v1529_v29 = vld [vmem:[#allocation5 + $0x25d8] sm:$0xff] }
 0x282   : > { %3257 = vmatpush.msrb.mxu0 %v1414_v30  ;;  %3276 = vmatpush.msrb.mxu1 %v1431_v31  ;;  %v1479_v30 = vld [vmem:[#allocation5 + $0x2448] sm:$0xff]  ;;  %v1496_v31 = vld [vmem:[#allocation5 + $0x24d0] sm:$0xff] }
 0x283   : > { %3297 = vmatpush.msrb.mxu2 %v1446_v32  ;;  %3316 = vmatpush.msrb.mxu3 %v1463_v33  ;;  %v1511_v32 = vld [vmem:[#allocation5 + $0x2548] sm:$0xff]  ;;  %v1528_v33 = vld [vmem:[#allocation5 + $0x25d0] sm:$0xff] }
 0x284   : > { %3258 = vmatpush.msrb.mxu0 %v1413_v34  ;;  %3277 = vmatpush.msrb.mxu1 %v1430_v35  ;;  %v1478_v34 = vld [vmem:[#allocation5 + $0x2440] sm:$0xff]  ;;  %v1495_v35 = vld [vmem:[#allocation5 + $0x24c8] sm:$0xff] }
 0x285   : > { %3298 = vmatpush.msrb.mxu2 %v1445_v36  ;;  %3317 = vmatpush.msrb.mxu3 %v1462_v37  ;;  %v1510_v36 = vld [vmem:[#allocation5 + $0x2540] sm:$0xff]  ;;  %v1527_v37 = vld [vmem:[#allocation5 + $0x25c8] sm:$0xff] }
 0x286   : > { %3259 = vmatpush.msrb.mxu0 %v1412_v38  ;;  %3278 = vmatpush.msrb.mxu1 %v1429_v39  ;;  %v1477_v38 = vld [vmem:[#allocation5 + $0x2438] sm:$0xff]  ;;  %v1494_v39 = vld [vmem:[#allocation5 + $0x24c0] sm:$0xff] }
 0x287   : > { %3299 = vmatpush.msrb.mxu2 %v1444_v40  ;;  %3318 = vmatpush.msrb.mxu3 %v1461_v41  ;;  %v1509_v40 = vld [vmem:[#allocation5 + $0x2538] sm:$0xff]  ;;  %v1526_v41 = vld [vmem:[#allocation5 + $0x25c0] sm:$0xff] }
 0x288   : > { %3260 = vmatpush.msrb.mxu0 %v1411_v42  ;;  %3279 = vmatpush.msrb.mxu1 %v1428_v43  ;;  %v1476_v42 = vld [vmem:[#allocation5 + $0x2430] sm:$0xff]  ;;  %v1493_v43 = vld [vmem:[#allocation5 + $0x24b8] sm:$0xff] }
 0x289   : > { %3300 = vmatpush.msrb.mxu2 %v1443_v44  ;;  %3319 = vmatpush.msrb.mxu3 %v1460_v45  ;;  %v1508_v44 = vld [vmem:[#allocation5 + $0x2530] sm:$0xff]  ;;  %v1525_v45 = vld [vmem:[#allocation5 + $0x25b8] sm:$0xff] }
 0x28a   : > { %3261 = vmatpush.msrb.mxu0 %v1410_v46  ;;  %3280 = vmatpush.msrb.mxu1 %v1427_v47  ;;  %v1475_v46 = vld [vmem:[#allocation5 + $0x2428] sm:$0xff]  ;;  %v1492_v47 = vld [vmem:[#allocation5 + $0x24b0] sm:$0xff] }
 0x28b   : > { %3301 = vmatpush.msrb.mxu2 %v1442_v48  ;;  %3320 = vmatpush.msrb.mxu3 %v1459_v49  ;;  %v1507_v48 = vld [vmem:[#allocation5 + $0x2528] sm:$0xff]  ;;  %v1524_v49 = vld [vmem:[#allocation5 + $0x25b0] sm:$0xff] }
 0x28c   : > { %3262 = vmatpush.msrb.mxu0 %v1409_v50  ;;  %3281 = vmatpush.msrb.mxu1 %v1426_v51  ;;  %v1474_v50 = vld [vmem:[#allocation5 + $0x2420] sm:$0xff]  ;;  %v1491_v51 = vld [vmem:[#allocation5 + $0x24a8] sm:$0xff] }
 0x28d   : > { %3302 = vmatpush.msrb.mxu2 %v1441_v52  ;;  %3321 = vmatpush.msrb.mxu3 %v1458_v53  ;;  %v1506_v52 = vld [vmem:[#allocation5 + $0x2520] sm:$0xff]  ;;  %v1523_v53 = vld [vmem:[#allocation5 + $0x25a8] sm:$0xff] }
 0x28e   : > { %3263 = vmatpush.msrb.mxu0 %v1408_v54  ;;  %3282 = vmatpush.msrb.mxu1 %v1425_v55  ;;  %v1473_v54 = vld [vmem:[#allocation5 + $0x2418] sm:$0xff]  ;;  %v1490_v55 = vld [vmem:[#allocation5 + $0x24a0] sm:$0xff] }
 0x28f   : > { %3303 = vmatpush.msrb.mxu2 %v1440_v56  ;;  %3322 = vmatpush.msrb.mxu3 %v1457_v57  ;;  %v1505_v56 = vld [vmem:[#allocation5 + $0x2518] sm:$0xff]  ;;  %v1522_v57 = vld [vmem:[#allocation5 + $0x25a0] sm:$0xff] }
 0x290   : > { %3264 = vmatpush.msrb.mxu0 %v1407_v58  ;;  %3283 = vmatpush.msrb.mxu1 %v1424_v59  ;;  %v1472_v58 = vld [vmem:[#allocation5 + $0x2410] sm:$0xff]  ;;  %v1489_v59 = vld [vmem:[#allocation5 + $0x2498] sm:$0xff] }
 0x291   : > { %3304 = vmatpush.msrb.mxu2 %v1439_v60  ;;  %3323 = vmatpush.msrb.mxu3 %v1456_v61  ;;  %v1504_v60 = vld [vmem:[#allocation5 + $0x2510] sm:$0xff]  ;;  %v1521_v61 = vld [vmem:[#allocation5 + $0x2598] sm:$0xff] }
 0x292   : > { %3265 = vmatpush.msrb.mxu0 %v1406_v62  ;;  %3284 = vmatpush.msrb.mxu1 %v1423_v63  ;;  %v1471_v62 = vld [vmem:[#allocation5 + $0x2408] sm:$0xff]  ;;  %v1488_v63 = vld [vmem:[#allocation5 + $0x2490] sm:$0xff] }
 0x293   : > { %3305 = vmatpush.msrb.mxu2 %v1438_v0  ;;  %3324 = vmatpush.msrb.mxu3 %v1455_v1  ;;  %v1503_v0 = vld [vmem:[#allocation5 + $0x2508] sm:$0xff]  ;;  %v1520_v1 = vld [vmem:[#allocation5 + $0x2590] sm:$0xff] }
 0x294   : > { %3266 = vmatmul.f32.vlgmr.msrb.gmra.mxu0 %v288_v2  ;;  %3306 = vmatmul.f32.vlgmr.msrb.gmra.mxu2 %v290_v3  ;;  %v1470_v2 = vld [vmem:[#allocation5 + $0x2400] sm:$0xff]  ;;  %v1487_v3 = vld [vmem:[#allocation5 + $0x2488] sm:$0xff] }
 0x295   : > { %3330 = vmatpush.msra.mxu0 %v1485_v4  ;;  %3370 = vmatpush.msra.mxu2 %v1517_v5  ;;  %v1502_v4 = vld [vmem:[#allocation5 + $0x2500] sm:$0xff]  ;;  %v1519_v5 = vld [vmem:[#allocation5 + $0x2588] sm:$0xff] }
 0x296   : > { %3285 = vmatpush.msrb.mxu1 %v1422_v6  ;;  %3325 = vmatpush.msrb.mxu3 %v1454_v7  ;;  %v292_v6 = vld [vmem:[%s4326_s23 + $0x240] sm:$0xff]  ;;  %v294_v7 = vld [vmem:[%s4326_s23 + $0x250] sm:$0xff] }
 0x297   : > { %3286 = vmatmul.f32.vlgmr.msrb.gmra.mxu1 %v289_v8  ;;  %3326 = vmatmul.f32.vlgmr.msrb.gmra.mxu3 %v291_v9  ;;  %v1549_v8 = vld [vmem:[#allocation5 + $0x2678] sm:$0xff] }
 0x298   : > { %3331 = vmatpush.msra.mxu0 %v1484_v10  ;;  %3350 = vmatpush.msra.mxu1 %v1501_v11  ;;  %v1581_v9 = vld [vmem:[#allocation5 + $0x2778] sm:$0xff]  ;;  %v1486_v10 = vld [vmem:[#allocation5 + $0x2480] sm:$0xff] }
 0x299   : > { %3371 = vmatpush.msra.mxu2 %v1516_v12  ;;  %3390 = vmatpush.msra.mxu3 %v1533_v13  ;;  %v1518_v11 = vld [vmem:[#allocation5 + $0x2580] sm:$0xff]  ;;  %v293_v12 = vld [vmem:[%s4326_s23 + $0x248] sm:$0xff]  ;;  %v295_v13 = vld [vmem:[%s4326_s23 + $0x258] sm:$0xff] }
 0x29a   : > { %3332 = vmatpush.msra.mxu0 %v1483_v14  ;;  %3351 = vmatpush.msra.mxu1 %v1500_v15  ;;  %v1548_v14 = vld [vmem:[#allocation5 + $0x2670] sm:$0xff]  ;;  %v1565_v15 = vld [vmem:[#allocation5 + $0x26f8] sm:$0xff] }
 0x29b   : > { %3372 = vmatpush.msra.mxu2 %v1515_v16  ;;  %3391 = vmatpush.msra.mxu3 %v1532_v17  ;;  %v1580_v16 = vld [vmem:[#allocation5 + $0x2770] sm:$0xff]  ;;  %v1597_v17 = vld [vmem:[#allocation5 + $0x27f8] sm:$0xff] }
 0x29c   : > { %3333 = vmatpush.msra.mxu0 %v1482_v18  ;;  %3352 = vmatpush.msra.mxu1 %v1499_v19  ;;  %v1547_v18 = vld [vmem:[#allocation5 + $0x2668] sm:$0xff]  ;;  %v1564_v19 = vld [vmem:[#allocation5 + $0x26f0] sm:$0xff] }
 0x29d   : > { %3373 = vmatpush.msra.mxu2 %v1514_v20  ;;  %3392 = vmatpush.msra.mxu3 %v1531_v21  ;;  %v1579_v20 = vld [vmem:[#allocation5 + $0x2768] sm:$0xff]  ;;  %v1596_v21 = vld [vmem:[#allocation5 + $0x27f0] sm:$0xff] }
 0x29e   : > { %3334 = vmatpush.msra.mxu0 %v1481_v22  ;;  %3353 = vmatpush.msra.mxu1 %v1498_v23  ;;  %v1546_v22 = vld [vmem:[#allocation5 + $0x2660] sm:$0xff]  ;;  %v1563_v23 = vld [vmem:[#allocation5 + $0x26e8] sm:$0xff] }
 0x29f   : > { %3374 = vmatpush.msra.mxu2 %v1513_v24  ;;  %3393 = vmatpush.msra.mxu3 %v1530_v25  ;;  %v1578_v24 = vld [vmem:[#allocation5 + $0x2760] sm:$0xff]  ;;  %v1595_v25 = vld [vmem:[#allocation5 + $0x27e8] sm:$0xff] }
 0x2a0   : > { %3335 = vmatpush.msra.mxu0 %v1480_v26  ;;  %3354 = vmatpush.msra.mxu1 %v1497_v27  ;;  %v1545_v26 = vld [vmem:[#allocation5 + $0x2658] sm:$0xff]  ;;  %v1562_v27 = vld [vmem:[#allocation5 + $0x26e0] sm:$0xff] }
 0x2a1   : > { %3375 = vmatpush.msra.mxu2 %v1512_v28  ;;  %3394 = vmatpush.msra.mxu3 %v1529_v29  ;;  %v1577_v28 = vld [vmem:[#allocation5 + $0x2758] sm:$0xff]  ;;  %v1594_v29 = vld [vmem:[#allocation5 + $0x27e0] sm:$0xff] }
 0x2a2   : > { %3336 = vmatpush.msra.mxu0 %v1479_v30  ;;  %3355 = vmatpush.msra.mxu1 %v1496_v31  ;;  %v1544_v30 = vld [vmem:[#allocation5 + $0x2650] sm:$0xff]  ;;  %v1561_v31 = vld [vmem:[#allocation5 + $0x26d8] sm:$0xff] }
 0x2a3   : > { %3376 = vmatpush.msra.mxu2 %v1511_v32  ;;  %3395 = vmatpush.msra.mxu3 %v1528_v33  ;;  %v1576_v32 = vld [vmem:[#allocation5 + $0x2750] sm:$0xff]  ;;  %v1593_v33 = vld [vmem:[#allocation5 + $0x27d8] sm:$0xff] }
 0x2a4   : > { %3337 = vmatpush.msra.mxu0 %v1478_v34  ;;  %3356 = vmatpush.msra.mxu1 %v1495_v35  ;;  %v1543_v34 = vld [vmem:[#allocation5 + $0x2648] sm:$0xff]  ;;  %v1560_v35 = vld [vmem:[#allocation5 + $0x26d0] sm:$0xff] }
 0x2a5   : > { %3377 = vmatpush.msra.mxu2 %v1510_v36  ;;  %3396 = vmatpush.msra.mxu3 %v1527_v37  ;;  %v1575_v36 = vld [vmem:[#allocation5 + $0x2748] sm:$0xff]  ;;  %v1592_v37 = vld [vmem:[#allocation5 + $0x27d0] sm:$0xff] }
 0x2a6   : > { %3338 = vmatpush.msra.mxu0 %v1477_v38  ;;  %3357 = vmatpush.msra.mxu1 %v1494_v39  ;;  %v1542_v38 = vld [vmem:[#allocation5 + $0x2640] sm:$0xff]  ;;  %v1559_v39 = vld [vmem:[#allocation5 + $0x26c8] sm:$0xff] }
 0x2a7   : > { %3378 = vmatpush.msra.mxu2 %v1509_v40  ;;  %3397 = vmatpush.msra.mxu3 %v1526_v41  ;;  %v1574_v40 = vld [vmem:[#allocation5 + $0x2740] sm:$0xff]  ;;  %v1591_v41 = vld [vmem:[#allocation5 + $0x27c8] sm:$0xff] }
 0x2a8   : > { %3339 = vmatpush.msra.mxu0 %v1476_v42  ;;  %3358 = vmatpush.msra.mxu1 %v1493_v43  ;;  %v1541_v42 = vld [vmem:[#allocation5 + $0x2638] sm:$0xff]  ;;  %v1558_v43 = vld [vmem:[#allocation5 + $0x26c0] sm:$0xff] }
 0x2a9   : > { %3379 = vmatpush.msra.mxu2 %v1508_v44  ;;  %3398 = vmatpush.msra.mxu3 %v1525_v45  ;;  %v1573_v44 = vld [vmem:[#allocation5 + $0x2738] sm:$0xff]  ;;  %v1590_v45 = vld [vmem:[#allocation5 + $0x27c0] sm:$0xff] }
 0x2aa   : > { %3340 = vmatpush.msra.mxu0 %v1475_v46  ;;  %3359 = vmatpush.msra.mxu1 %v1492_v47  ;;  %v1540_v46 = vld [vmem:[#allocation5 + $0x2630] sm:$0xff]  ;;  %v1557_v47 = vld [vmem:[#allocation5 + $0x26b8] sm:$0xff] }
 0x2ab   : > { %3380 = vmatpush.msra.mxu2 %v1507_v48  ;;  %3399 = vmatpush.msra.mxu3 %v1524_v49  ;;  %v1572_v48 = vld [vmem:[#allocation5 + $0x2730] sm:$0xff]  ;;  %v1589_v49 = vld [vmem:[#allocation5 + $0x27b8] sm:$0xff] }
 0x2ac   : > { %3341 = vmatpush.msra.mxu0 %v1474_v50  ;;  %3360 = vmatpush.msra.mxu1 %v1491_v51  ;;  %v1539_v50 = vld [vmem:[#allocation5 + $0x2628] sm:$0xff]  ;;  %v1556_v51 = vld [vmem:[#allocation5 + $0x26b0] sm:$0xff] }
 0x2ad   : > { %3381 = vmatpush.msra.mxu2 %v1506_v52  ;;  %3400 = vmatpush.msra.mxu3 %v1523_v53  ;;  %v1571_v52 = vld [vmem:[#allocation5 + $0x2728] sm:$0xff]  ;;  %v1588_v53 = vld [vmem:[#allocation5 + $0x27b0] sm:$0xff] }
 0x2ae   : > { %3342 = vmatpush.msra.mxu0 %v1473_v54  ;;  %3361 = vmatpush.msra.mxu1 %v1490_v55  ;;  %v1538_v54 = vld [vmem:[#allocation5 + $0x2620] sm:$0xff]  ;;  %v1555_v55 = vld [vmem:[#allocation5 + $0x26a8] sm:$0xff] }
 0x2af   : > { %3382 = vmatpush.msra.mxu2 %v1505_v56  ;;  %3401 = vmatpush.msra.mxu3 %v1522_v57  ;;  %v1570_v56 = vld [vmem:[#allocation5 + $0x2720] sm:$0xff]  ;;  %v1587_v57 = vld [vmem:[#allocation5 + $0x27a8] sm:$0xff] }
 0x2b0   : > { %3343 = vmatpush.msra.mxu0 %v1472_v58  ;;  %3362 = vmatpush.msra.mxu1 %v1489_v59  ;;  %v1537_v58 = vld [vmem:[#allocation5 + $0x2618] sm:$0xff]  ;;  %v1554_v59 = vld [vmem:[#allocation5 + $0x26a0] sm:$0xff] }
 0x2b1   : > { %3383 = vmatpush.msra.mxu2 %v1504_v60  ;;  %3402 = vmatpush.msra.mxu3 %v1521_v61  ;;  %v1569_v60 = vld [vmem:[#allocation5 + $0x2718] sm:$0xff]  ;;  %v1586_v61 = vld [vmem:[#allocation5 + $0x27a0] sm:$0xff] }
 0x2b2   : > { %3344 = vmatpush.msra.mxu0 %v1471_v62  ;;  %3363 = vmatpush.msra.mxu1 %v1488_v63  ;;  %v1536_v62 = vld [vmem:[#allocation5 + $0x2610] sm:$0xff]  ;;  %v1553_v63 = vld [vmem:[#allocation5 + $0x2698] sm:$0xff] }
 0x2b3   : > { %3384 = vmatpush.msra.mxu2 %v1503_v0  ;;  %3403 = vmatpush.msra.mxu3 %v1520_v1  ;;  %v1568_v0 = vld [vmem:[#allocation5 + $0x2710] sm:$0xff]  ;;  %v1585_v1 = vld [vmem:[#allocation5 + $0x2798] sm:$0xff] }
 0x2b4   : > { %3345 = vmatpush.msra.mxu0 %v1470_v2  ;;  %3364 = vmatpush.msra.mxu1 %v1487_v3  ;;  %v1535_v2 = vld [vmem:[#allocation5 + $0x2608] sm:$0xff]  ;;  %v1552_v3 = vld [vmem:[#allocation5 + $0x2690] sm:$0xff] }
 0x2b5   : > { %3385 = vmatpush.msra.mxu2 %v1502_v4  ;;  %3404 = vmatpush.msra.mxu3 %v1519_v5  ;;  %v1567_v4 = vld [vmem:[#allocation5 + $0x2708] sm:$0xff]  ;;  %v1584_v5 = vld [vmem:[#allocation5 + $0x2790] sm:$0xff] }
 0x2b6   : > { %3346 = vmatmul.f32.vlgmr.msra.gmra.mxu0 %v292_v6  ;;  %3386 = vmatmul.f32.vlgmr.msra.gmra.mxu2 %v294_v7  ;;  %v1534_v6 = vld [vmem:[#allocation5 + $0x2600] sm:$0xff]  ;;  %v1551_v7 = vld [vmem:[#allocation5 + $0x2688] sm:$0xff] }
 0x2b7   : > { %3410 = vmatpush.msrb.mxu0 %v1549_v8  ;;  %3450 = vmatpush.msrb.mxu2 %v1581_v9  ;;  %v4042_v8 = vld [vmem:[#allocation7] ss:$0 sm:$0xff] }
 0x2b8   : > { %3365 = vmatpush.msra.mxu1 %v1486_v10  ;;  %3405 = vmatpush.msra.mxu3 %v1518_v11  ;;  %v1566_v9 = vld [vmem:[#allocation5 + $0x2700] sm:$0xff]  ;;  %v1583_v10 = vld [vmem:[#allocation5 + $0x2788] sm:$0xff]  ;;  %v1907_v11 = vpop.f32.mrf.mxu0 }
 0x2b9   : > { %3366 = vmatmul.f32.vlgmr.msra.gmra.mxu1 %v293_v12  ;;  %3406 = vmatmul.f32.vlgmr.msra.gmra.mxu3 %v295_v13  ;;  %v296_v12 = vld [vmem:[%s4326_s23 + $0x260] sm:$0xff]  ;;  %v298_v13 = vld [vmem:[%s4326_s23 + $0x270] sm:$0xff] }
 0x2ba   : > { %3411 = vmatpush.msrb.mxu0 %v1548_v14  ;;  %3430 = vmatpush.msrb.mxu1 %v1565_v15  ;;  %v1613_v14 = vld [vmem:[#allocation5 + $0x2878] sm:$0xff] }
 0x2bb   : > { %3451 = vmatpush.msrb.mxu2 %v1580_v16  ;;  %3470 = vmatpush.msrb.mxu3 %v1597_v17  ;;  %v1645_v15 = vld [vmem:[#allocation5 + $0x2978] sm:$0xff]  ;;  %v1550_v16 = vld [vmem:[#allocation5 + $0x2680] sm:$0xff] }
 0x2bc   : > { %3412 = vmatpush.msrb.mxu0 %v1547_v18  ;;  %3431 = vmatpush.msrb.mxu1 %v1564_v19  ;;  %v1582_v17 = vld [vmem:[#allocation5 + $0x2780] sm:$0xff]  ;;  %v1908_v18 = vadd.f32 %v4042_v8, %v1907_v11  ;;  %v297_v19 = vld [vmem:[%s4326_s23 + $0x268] sm:$0xff] }
 0x2bd   : > { %3452 = vmatpush.msrb.mxu2 %v1579_v20  ;;  %3471 = vmatpush.msrb.mxu3 %v1596_v21  ;;  %v299_v20 = vld [vmem:[%s4326_s23 + $0x278] sm:$0xff]  ;;  %v1927_v21 = vpop.f32.mrf.mxu1  ;;  %v1602_v8 = vld [vmem:[#allocation5 + $0x2820] sm:$0xff] }
 0x2be   : > { %3413 = vmatpush.msrb.mxu0 %v1546_v22  ;;  %3432 = vmatpush.msrb.mxu1 %v1563_v23  ;;  %v1612_v22 = vld [vmem:[#allocation5 + $0x2870] sm:$0xff]  ;;  %v1629_v23 = vld [vmem:[#allocation5 + $0x28f8] sm:$0xff]  ;;  %v1651_v11 = vld [vmem:[#allocation5 + $0x29a8] sm:$0xff] }
 0x2bf   : > { %3453 = vmatpush.msrb.mxu2 %v1578_v24  ;;  %3472 = vmatpush.msrb.mxu3 %v1595_v25  ;;  %v1644_v24 = vld [vmem:[#allocation5 + $0x2970] sm:$0xff]  ;;  %v1661_v25 = vld [vmem:[#allocation5 + $0x29f8] sm:$0xff] }
 0x2c0   : > { %3414 = vmatpush.msrb.mxu0 %v1545_v26  ;;  %3433 = vmatpush.msrb.mxu1 %v1562_v27  ;;  %v1611_v26 = vld [vmem:[#allocation5 + $0x2868] sm:$0xff]  ;;  %v1628_v27 = vld [vmem:[#allocation5 + $0x28f0] sm:$0xff] }
 0x2c1   : > { %3454 = vmatpush.msrb.mxu2 %v1577_v28  ;;  %3473 = vmatpush.msrb.mxu3 %v1594_v29  ;;  %v1928_v28 = vadd.f32 %v1927_v21, %v1908_v18  ;;  %v1643_v29 = vld [vmem:[#allocation5 + $0x2968] sm:$0xff]  ;;  %v1600_v18 = vld [vmem:[#allocation5 + $0x2810] sm:$0xff]  ;;  %v1649_v21 = vld [vmem:[#allocation5 + $0x2998] sm:$0xff] }
 0x2c2   : > { %3415 = vmatpush.msrb.mxu0 %v1544_v30  ;;  %3434 = vmatpush.msrb.mxu1 %v1561_v31  ;;  %v1660_v30 = vld [vmem:[#allocation5 + $0x29f0] sm:$0xff]  ;;  %v1947_v31 = vpop.f32.mrf.mxu2 }
 0x2c3   : > { %3455 = vmatpush.msrb.mxu2 %v1576_v32  ;;  %3474 = vmatpush.msrb.mxu3 %v1593_v33  ;;  %v1610_v32 = vld [vmem:[#allocation5 + $0x2860] sm:$0xff]  ;;  %v1627_v33 = vld [vmem:[#allocation5 + $0x28e8] sm:$0xff] }
 0x2c4   : > { %3416 = vmatpush.msrb.mxu0 %v1543_v34  ;;  %3435 = vmatpush.msrb.mxu1 %v1560_v35  ;;  %v1642_v34 = vld [vmem:[#allocation5 + $0x2960] sm:$0xff]  ;;  %v1659_v35 = vld [vmem:[#allocation5 + $0x29e8] sm:$0xff] }
 0x2c5   : > { %3456 = vmatpush.msrb.mxu2 %v1575_v36  ;;  %3475 = vmatpush.msrb.mxu3 %v1592_v37  ;;  %v1609_v36 = vld [vmem:[#allocation5 + $0x2858] sm:$0xff]  ;;  %v1626_v37 = vld [vmem:[#allocation5 + $0x28e0] sm:$0xff] }
 0x2c6   : > { %3417 = vmatpush.msrb.mxu0 %v1542_v38  ;;  %3436 = vmatpush.msrb.mxu1 %v1559_v39  ;;  %v1948_v38 = vadd.f32 %v1947_v31, %v1928_v28  ;;  %v1641_v39 = vld [vmem:[#allocation5 + $0x2958] sm:$0xff]  ;;  %v1598_v28 = vld [vmem:[#allocation5 + $0x2800] sm:$0xff] }
 0x2c7   : > { %3457 = vmatpush.msrb.mxu2 %v1574_v40  ;;  %3476 = vmatpush.msrb.mxu3 %v1591_v41  ;;  %v1658_v40 = vld [vmem:[#allocation5 + $0x29e0] sm:$0xff]  ;;  %v1967_v41 = vpop.f32.mrf.mxu3 }
 0x2c8   : > { %3418 = vmatpush.msrb.mxu0 %v1541_v42  ;;  %3437 = vmatpush.msrb.mxu1 %v1558_v43  ;;  %v1608_v42 = vld [vmem:[#allocation5 + $0x2850] sm:$0xff]  ;;  %v1625_v43 = vld [vmem:[#allocation5 + $0x28d8] sm:$0xff]  ;;  %v1630_v31 = vld [vmem:[#allocation5 + $0x2900] sm:$0xff] }
 0x2c9   : > { %3458 = vmatpush.msrb.mxu2 %v1573_v44  ;;  %3477 = vmatpush.msrb.mxu3 %v1590_v45  ;;  %v1640_v44 = vld [vmem:[#allocation5 + $0x2950] sm:$0xff]  ;;  %v1657_v45 = vld [vmem:[#allocation5 + $0x29d8] sm:$0xff] }
 0x2ca   : > { %3419 = vmatpush.msrb.mxu0 %v1540_v46  ;;  %3438 = vmatpush.msrb.mxu1 %v1557_v47  ;;  %v1607_v46 = vld [vmem:[#allocation5 + $0x2848] sm:$0xff]  ;;  %v1624_v47 = vld [vmem:[#allocation5 + $0x28d0] sm:$0xff] }
 0x2cb   : > { %3459 = vmatpush.msrb.mxu2 %v1572_v48  ;;  %3478 = vmatpush.msrb.mxu3 %v1589_v49  ;;  %v1968_v48 = vadd.f32 %v1967_v41, %v1948_v38  ;;  %v1639_v49 = vld [vmem:[#allocation5 + $0x2948] sm:$0xff] }
 0x2cc   : > { %3420 = vmatpush.msrb.mxu0 %v1539_v50  ;;  %3439 = vmatpush.msrb.mxu1 %v1556_v51  ;;  %v1656_v50 = vld [vmem:[#allocation5 + $0x29d0] sm:$0xff]  ;;  %v1987_v51 = vpop.f32.mrf.mxu0 }
 0x2cd   : > { %3460 = vmatpush.msrb.mxu2 %v1571_v52  ;;  %3479 = vmatpush.msrb.mxu3 %v1588_v53  ;;  %v1606_v52 = vld [vmem:[#allocation5 + $0x2840] sm:$0xff]  ;;  %v1623_v53 = vld [vmem:[#allocation5 + $0x28c8] sm:$0xff] }
 0x2ce   : > { %3421 = vmatpush.msrb.mxu0 %v1538_v54  ;;  %3440 = vmatpush.msrb.mxu1 %v1555_v55  ;;  %v1638_v54 = vld [vmem:[#allocation5 + $0x2940] sm:$0xff]  ;;  %v1655_v55 = vld [vmem:[#allocation5 + $0x29c8] sm:$0xff] }
 0x2cf   : > { %3461 = vmatpush.msrb.mxu2 %v1570_v56  ;;  %3480 = vmatpush.msrb.mxu3 %v1587_v57  ;;  %v1605_v56 = vld [vmem:[#allocation5 + $0x2838] sm:$0xff]  ;;  %v1622_v57 = vld [vmem:[#allocation5 + $0x28c0] sm:$0xff] }
 0x2d0   : > { %3422 = vmatpush.msrb.mxu0 %v1537_v58  ;;  %3441 = vmatpush.msrb.mxu1 %v1554_v59  ;;  %v1988_v58 = vadd.f32 %v1987_v51, %v1968_v48  ;;  %v1637_v59 = vld [vmem:[#allocation5 + $0x2938] sm:$0xff]  ;;  %v1692_v51 = vld [vmem:[#allocation5 + $0x2af0] sm:$0xff] }
 0x2d1   : > { %3462 = vmatpush.msrb.mxu2 %v1569_v60  ;;  %3481 = vmatpush.msrb.mxu3 %v1586_v61  ;;  %v1654_v60 = vld [vmem:[#allocation5 + $0x29c0] sm:$0xff]  ;;  %v2007_v61 = vpop.f32.mrf.mxu1  ;;  %v1725_v48 = vld [vmem:[#allocation5 + $0x2bf8] sm:$0xff] }
 0x2d2   : > { %3423 = vmatpush.msrb.mxu0 %v1536_v62  ;;  %3442 = vmatpush.msrb.mxu1 %v1553_v63  ;;  %v1604_v62 = vld [vmem:[#allocation5 + $0x2830] sm:$0xff]  ;;  %v1621_v63 = vld [vmem:[#allocation5 + $0x28b8] sm:$0xff] }
 0x2d3   : > { %3463 = vmatpush.msrb.mxu2 %v1568_v0  ;;  %3482 = vmatpush.msrb.mxu3 %v1585_v1  ;;  %v1636_v0 = vld [vmem:[#allocation5 + $0x2930] sm:$0xff]  ;;  %v1653_v1 = vld [vmem:[#allocation5 + $0x29b8] sm:$0xff] }
 0x2d4   : > { %3424 = vmatpush.msrb.mxu0 %v1535_v2  ;;  %3443 = vmatpush.msrb.mxu1 %v1552_v3  ;;  %v1603_v2 = vld [vmem:[#allocation5 + $0x2828] sm:$0xff]  ;;  %v1620_v3 = vld [vmem:[#allocation5 + $0x28b0] sm:$0xff] }
 0x2d5   : > { %3464 = vmatpush.msrb.mxu2 %v1567_v4  ;;  %3483 = vmatpush.msrb.mxu3 %v1584_v5  ;;  %v2008_v4 = vadd.f32 %v2007_v61, %v1988_v58  ;;  %v1635_v5 = vld [vmem:[#allocation5 + $0x2928] sm:$0xff]  ;;  %v1706_v58 = vld [vmem:[#allocation5 + $0x2b60] sm:$0xff] }
 0x2d6   : > { %3425 = vmatpush.msrb.mxu0 %v1534_v6  ;;  %3444 = vmatpush.msrb.mxu1 %v1551_v7  ;;  %v1652_v6 = vld [vmem:[#allocation5 + $0x29b0] sm:$0xff]  ;;  %v2027_v7 = vpop.f32.mrf.mxu2  ;;  %v1690_v61 = vld [vmem:[#allocation5 + $0x2ae0] sm:$0xff] }
 0x2d7   : > { %3465 = vmatpush.msrb.mxu2 %v1566_v9  ;;  %3484 = vmatpush.msrb.mxu3 %v1583_v10  ;;  %v1619_v9 = vld [vmem:[#allocation5 + $0x28a8] sm:$0xff]  ;;  %v1634_v10 = vld [vmem:[#allocation5 + $0x2920] sm:$0xff] }
 0x2d8   : > { %3426 = vmatmul.f32.vlgmr.msrb.gmra.mxu0 %v296_v12  ;;  %3466 = vmatmul.f32.vlgmr.msrb.gmra.mxu2 %v298_v13  ;;  %v1601_v12 = vld [vmem:[#allocation5 + $0x2818] sm:$0xff]  ;;  %v1618_v13 = vld [vmem:[#allocation5 + $0x28a0] sm:$0xff] }
 0x2d9   : > { %3490 = vmatpush.msra.mxu0 %v1613_v14  ;;  %3530 = vmatpush.msra.mxu2 %v1645_v15  ;;  %v2028_v14 = vadd.f32 %v2027_v7, %v2008_v4  ;;  %v1633_v15 = vld [vmem:[#allocation5 + $0x2918] sm:$0xff]  ;;  %v1704_v4 = vld [vmem:[#allocation5 + $0x2b50] sm:$0xff]  ;;  %v1671_v7 = vld [vmem:[#allocation5 + $0x2a48] sm:$0xff] }
 0x2da   : > { %3445 = vmatpush.msrb.mxu1 %v1550_v16  ;;  %3485 = vmatpush.msrb.mxu3 %v1582_v17  ;;  %v1650_v16 = vld [vmem:[#allocation5 + $0x29a0] sm:$0xff]  ;;  %v2047_v17 = vpop.f32.mrf.mxu3 }
 0x2db   : > { %3446 = vmatmul.f32.vlgmr.msrb.gmra.mxu1 %v297_v19  ;;  %3486 = vmatmul.f32.vlgmr.msrb.gmra.mxu3 %v299_v20  ;;  %v1617_v19 = vld [vmem:[#allocation5 + $0x2898] sm:$0xff]  ;;  %v1632_v20 = vld [vmem:[#allocation5 + $0x2910] sm:$0xff] }
 0x2dc   : > { %3491 = vmatpush.msra.mxu0 %v1612_v22  ;;  %3510 = vmatpush.msra.mxu1 %v1629_v23  ;;  %v2067_v22 = vpop.f32.mrf.mxu0  ;;  %v1599_v23 = vld [vmem:[#allocation5 + $0x2808] sm:$0xff] }
 0x2dd   : > { %3531 = vmatpush.msra.mxu2 %v1644_v24  ;;  %3550 = vmatpush.msra.mxu3 %v1661_v25  ;;  %v1616_v24 = vld [vmem:[#allocation5 + $0x2890] sm:$0xff]  ;;  %v2048_v25 = vadd.f32 %v2047_v17, %v2028_v14 }
 0x2de   : > { %3492 = vmatpush.msra.mxu0 %v1611_v26  ;;  %3511 = vmatpush.msra.mxu1 %v1628_v27  ;;  %v1631_v26 = vld [vmem:[#allocation5 + $0x2908] sm:$0xff]  ;;  %v1648_v27 = vld [vmem:[#allocation5 + $0x2990] sm:$0xff]  ;;  %v2107_v38 = vpop.f32.mrf.mxu2 }
 0x2df   : > { %3532 = vmatpush.msra.mxu2 %v1643_v29  ;;  %3551 = vmatpush.msra.mxu3 %v1660_v30  ;;  %v1615_v29 = vld [vmem:[#allocation5 + $0x2888] sm:$0xff]  ;;  %v2068_v30 = vadd.f32 %v2067_v22, %v2048_v25 }
 0x2e0   : > { %3493 = vmatpush.msra.mxu0 %v1610_v32  ;;  %3512 = vmatpush.msra.mxu1 %v1627_v33  ;;  %v1647_v32 = vld [vmem:[#allocation5 + $0x2988] sm:$0xff]  ;;  %v2087_v33 = vpop.f32.mrf.mxu1 }
 0x2e1   : > { %3533 = vmatpush.msra.mxu2 %v1642_v34  ;;  %3552 = vmatpush.msra.mxu3 %v1659_v35  ;;  %v300_v34 = vld [vmem:[%s4326_s23 + $0x280] sm:$0xff]  ;;  %v302_v35 = vld [vmem:[%s4326_s23 + $0x290] sm:$0xff]  ;;  %v2088_v41 = vadd.f32 %v2087_v33, %v2068_v30 }
 0x2e2   : > { %3494 = vmatpush.msra.mxu0 %v1609_v36  ;;  %3513 = vmatpush.msra.mxu1 %v1626_v37  ;;  %v1677_v36 = vld [vmem:[#allocation5 + $0x2a78] sm:$0xff] }
 0x2e3   : > { %3534 = vmatpush.msra.mxu2 %v1641_v39  ;;  %3553 = vmatpush.msra.mxu3 %v1658_v40  ;;  %v1709_v37 = vld [vmem:[#allocation5 + $0x2b78] sm:$0xff]  ;;  %v1614_v39 = vld [vmem:[#allocation5 + $0x2880] sm:$0xff] }
 0x2e4   : > { %3495 = vmatpush.msra.mxu0 %v1608_v42  ;;  %3514 = vmatpush.msra.mxu1 %v1625_v43  ;;  %v1646_v40 = vld [vmem:[#allocation5 + $0x2980] sm:$0xff]  ;;  %v301_v42 = vld [vmem:[%s4326_s23 + $0x288] sm:$0xff]  ;;  %v303_v43 = vld [vmem:[%s4326_s23 + $0x298] sm:$0xff] }
 0x2e5   : > { %3535 = vmatpush.msra.mxu2 %v1640_v44  ;;  %3554 = vmatpush.msra.mxu3 %v1657_v45  ;;  %v1676_v44 = vld [vmem:[#allocation5 + $0x2a70] sm:$0xff]  ;;  %v1693_v45 = vld [vmem:[#allocation5 + $0x2af8] sm:$0xff] }
 0x2e6   : > { %3496 = vmatpush.msra.mxu0 %v1607_v46  ;;  %3515 = vmatpush.msra.mxu1 %v1624_v47  ;;  %v2108_v46 = vadd.f32 %v2107_v38, %v2088_v41  ;;  %v1708_v47 = vld [vmem:[#allocation5 + $0x2b70] sm:$0xff] }
 0x2e7   : > { %3536 = vmatpush.msra.mxu2 %v1639_v49  ;;  %3555 = vmatpush.msra.mxu3 %v1656_v50  ;;  %v2127_v49 = vpop.f32.mrf.mxu3  ;;  %v1675_v50 = vld [vmem:[#allocation5 + $0x2a68] sm:$0xff] }
 0x2e8   : > { %3497 = vmatpush.msra.mxu0 %v1606_v52  ;;  %3516 = vmatpush.msra.mxu1 %v1623_v53  ;;  %v1707_v52 = vld [vmem:[#allocation5 + $0x2b68] sm:$0xff]  ;;  %v1724_v53 = vld [vmem:[#allocation5 + $0x2bf0] sm:$0xff] }
 0x2e9   : > { %3537 = vmatpush.msra.mxu2 %v1638_v54  ;;  %3556 = vmatpush.msra.mxu3 %v1655_v55  ;;  %v2147_v54 = vpop.f32.mrf.mxu0  ;;  %v1674_v55 = vld [vmem:[#allocation5 + $0x2a60] sm:$0xff] }
 0x2ea   : > { %3498 = vmatpush.msra.mxu0 %v1605_v56  ;;  %3517 = vmatpush.msra.mxu1 %v1622_v57  ;;  %v1691_v56 = vld [vmem:[#allocation5 + $0x2ae8] sm:$0xff]  ;;  %v2128_v57 = vadd.f32 %v2127_v49, %v2108_v46 }
 0x2eb   : > { %3538 = vmatpush.msra.mxu2 %v1637_v59  ;;  %3557 = vmatpush.msra.mxu3 %v1654_v60  ;;  %v1723_v59 = vld [vmem:[#allocation5 + $0x2be8] sm:$0xff]  ;;  %v1673_v60 = vld [vmem:[#allocation5 + $0x2a58] sm:$0xff] }
 0x2ec   : > { %3499 = vmatpush.msra.mxu0 %v1604_v62  ;;  %3518 = vmatpush.msra.mxu1 %v1621_v63  ;;  %v2148_v62 = vadd.f32 %v2147_v54, %v2128_v57  ;;  %v1705_v63 = vld [vmem:[#allocation5 + $0x2b58] sm:$0xff] }
 0x2ed   : > { %3539 = vmatpush.msra.mxu2 %v1636_v0  ;;  %3558 = vmatpush.msra.mxu3 %v1653_v1  ;;  %v1722_v0 = vld [vmem:[#allocation5 + $0x2be0] sm:$0xff]  ;;  %v2167_v1 = vpop.f32.mrf.mxu1 }
 0x2ee   : > { %3500 = vmatpush.msra.mxu0 %v1603_v2  ;;  %3519 = vmatpush.msra.mxu1 %v1620_v3  ;;  %v1672_v2 = vld [vmem:[#allocation5 + $0x2a50] sm:$0xff]  ;;  %v1689_v3 = vld [vmem:[#allocation5 + $0x2ad8] sm:$0xff] }
 0x2ef   : > { %3540 = vmatpush.msra.mxu2 %v1635_v5  ;;  %3559 = vmatpush.msra.mxu3 %v1652_v6  ;;  %v1721_v5 = vld [vmem:[#allocation5 + $0x2bd8] sm:$0xff]  ;;  %v2187_v6 = vpop.f32.mrf.mxu2  ;;  %v2207_v17 = vpop.f32.mrf.mxu3 }
 0x2f0   : > { %3501 = vmatpush.msra.mxu0 %v1602_v8  ;;  %3520 = vmatpush.msra.mxu1 %v1619_v9  ;;  %v1688_v8 = vld [vmem:[#allocation5 + $0x2ad0] sm:$0xff]  ;;  %v2168_v9 = vadd.f32 %v2167_v1, %v2148_v62 }
 0x2f1   : > { %3541 = vmatpush.msra.mxu2 %v1634_v10  ;;  %3560 = vmatpush.msra.mxu3 %v1651_v11  ;;  %v1703_v10 = vld [vmem:[#allocation5 + $0x2b48] sm:$0xff]  ;;  %v1720_v11 = vld [vmem:[#allocation5 + $0x2bd0] sm:$0xff]  ;;  %v2227_v22 = vpop.f32.mrf.mxu0 }
 0x2f2   : > { %3502 = vmatpush.msra.mxu0 %v1601_v12  ;;  %3521 = vmatpush.msra.mxu1 %v1618_v13  ;;  %v1670_v12 = vld [vmem:[#allocation5 + $0x2a40] sm:$0xff]  ;;  %v1687_v13 = vld [vmem:[#allocation5 + $0x2ac8] sm:$0xff]  ;;  %v2188_v14 = vadd.f32 %v2187_v6, %v2168_v9 }
 0x2f3   : > { %3542 = vmatpush.msra.mxu2 %v1633_v15  ;;  %3561 = vmatpush.msra.mxu3 %v1650_v16  ;;  %v1702_v15 = vld [vmem:[#allocation5 + $0x2b40] sm:$0xff]  ;;  %v1719_v16 = vld [vmem:[#allocation5 + $0x2bc8] sm:$0xff] }
 0x2f4   : > { %3503 = vmatpush.msra.mxu0 %v1600_v18  ;;  %3522 = vmatpush.msra.mxu1 %v1617_v19  ;;  %v1669_v18 = vld [vmem:[#allocation5 + $0x2a38] sm:$0xff]  ;;  %v1686_v19 = vld [vmem:[#allocation5 + $0x2ac0] sm:$0xff]  ;;  %v2208_v25 = vadd.f32 %v2207_v17, %v2188_v14 }
 0x2f5   : > { %3543 = vmatpush.msra.mxu2 %v1632_v20  ;;  %3562 = vmatpush.msra.mxu3 %v1649_v21  ;;  %v1701_v20 = vld [vmem:[#allocation5 + $0x2b38] sm:$0xff]  ;;  %v1718_v21 = vld [vmem:[#allocation5 + $0x2bc0] sm:$0xff]  ;;  %v2247_v33 = vpop.f32.mrf.mxu1 }
 0x2f6   : > { %3504 = vmatpush.msra.mxu0 %v1599_v23  ;;  %3523 = vmatpush.msra.mxu1 %v1616_v24  ;;  %v1668_v23 = vld [vmem:[#allocation5 + $0x2a30] sm:$0xff]  ;;  %v1685_v24 = vld [vmem:[#allocation5 + $0x2ab8] sm:$0xff]  ;;  %v2228_v30 = vadd.f32 %v2227_v22, %v2208_v25 }
 0x2f7   : > { %3544 = vmatpush.msra.mxu2 %v1631_v26  ;;  %3563 = vmatpush.msra.mxu3 %v1648_v27  ;;  %v1700_v26 = vld [vmem:[#allocation5 + $0x2b30] sm:$0xff]  ;;  %v1717_v27 = vld [vmem:[#allocation5 + $0x2bb8] sm:$0xff]  ;;  %v2267_v38 = vpop.f32.mrf.mxu2  ;;  %v2287_v49 = vpop.f32.mrf.mxu3 }
 0x2f8   : > { %3505 = vmatpush.msra.mxu0 %v1598_v28  ;;  %3524 = vmatpush.msra.mxu1 %v1615_v29  ;;  %v1667_v28 = vld [vmem:[#allocation5 + $0x2a28] sm:$0xff]  ;;  %v1684_v29 = vld [vmem:[#allocation5 + $0x2ab0] sm:$0xff]  ;;  %v2248_v41 = vadd.f32 %v2247_v33, %v2228_v30 }
 0x2f9   : > { %3545 = vmatpush.msra.mxu2 %v1630_v31  ;;  %3564 = vmatpush.msra.mxu3 %v1647_v32  ;;  %v1699_v31 = vld [vmem:[#allocation5 + $0x2b28] sm:$0xff]  ;;  %v1716_v32 = vld [vmem:[#allocation5 + $0x2bb0] sm:$0xff]  ;;  %v2307_v54 = vpop.f32.mrf.mxu0 }
 0x2fa   : > { %3506 = vmatmul.f32.vlgmr.msra.gmra.mxu0 %v300_v34  ;;  %3546 = vmatmul.f32.vlgmr.msra.gmra.mxu2 %v302_v35  ;;  %v1666_v34 = vld [vmem:[#allocation5 + $0x2a20] sm:$0xff]  ;;  %v1683_v35 = vld [vmem:[#allocation5 + $0x2aa8] sm:$0xff]  ;;  %v2268_v46 = vadd.f32 %v2267_v38, %v2248_v41 }
 0x2fb   : > { %3570 = vmatpush.msrb.mxu0 %v1677_v36  ;;  %3610 = vmatpush.msrb.mxu2 %v1709_v37  ;;  %v1698_v36 = vld [vmem:[#allocation5 + $0x2b20] sm:$0xff]  ;;  %v1715_v37 = vld [vmem:[#allocation5 + $0x2ba8] sm:$0xff] }
 0x2fc   : > { %3525 = vmatpush.msra.mxu1 %v1614_v39  ;;  %3565 = vmatpush.msra.mxu3 %v1646_v40  ;;  %v1665_v39 = vld [vmem:[#allocation5 + $0x2a18] sm:$0xff]  ;;  %v1682_v40 = vld [vmem:[#allocation5 + $0x2aa0] sm:$0xff]  ;;  %v2288_v57 = vadd.f32 %v2287_v49, %v2268_v46 }
 0x2fd   : > { %3526 = vmatmul.f32.vlgmr.msra.gmra.mxu1 %v301_v42  ;;  %3566 = vmatmul.f32.vlgmr.msra.gmra.mxu3 %v303_v43  ;;  %v1697_v42 = vld [vmem:[#allocation5 + $0x2b18] sm:$0xff]  ;;  %v1714_v43 = vld [vmem:[#allocation5 + $0x2ba0] sm:$0xff]  ;;  %v2327_v1 = vpop.f32.mrf.mxu1 }
 0x2fe   : > { %3571 = vmatpush.msrb.mxu0 %v1676_v44  ;;  %3590 = vmatpush.msrb.mxu1 %v1693_v45  ;;  %v1664_v44 = vld [vmem:[#allocation5 + $0x2a10] sm:$0xff]  ;;  %v1681_v45 = vld [vmem:[#allocation5 + $0x2a98] sm:$0xff]  ;;  %v2308_v62 = vadd.f32 %v2307_v54, %v2288_v57 }
 0x2ff   : > { %3611 = vmatpush.msrb.mxu2 %v1708_v47  ;;  %3630 = vmatpush.msrb.mxu3 %v1725_v48  ;;  %v1696_v47 = vld [vmem:[#allocation5 + $0x2b10] sm:$0xff]  ;;  %v1713_v48 = vld [vmem:[#allocation5 + $0x2b98] sm:$0xff]  ;;  %v2347_v6 = vpop.f32.mrf.mxu2  ;;  %v2367_v17 = vpop.f32.mrf.mxu3 }
 0x300   : > { %3572 = vmatpush.msrb.mxu0 %v1675_v50  ;;  %3591 = vmatpush.msrb.mxu1 %v1692_v51  ;;  %v1663_v50 = vld [vmem:[#allocation5 + $0x2a08] sm:$0xff]  ;;  %v1680_v51 = vld [vmem:[#allocation5 + $0x2a90] sm:$0xff]  ;;  %v2328_v9 = vadd.f32 %v2327_v1, %v2308_v62 }
 0x301   : > { %3612 = vmatpush.msrb.mxu2 %v1707_v52  ;;  %3631 = vmatpush.msrb.mxu3 %v1724_v53  ;;  %v1695_v52 = vld [vmem:[#allocation5 + $0x2b08] sm:$0xff]  ;;  %v1712_v53 = vld [vmem:[#allocation5 + $0x2b90] sm:$0xff]  ;;  %v2387_v22 = vpop.f32.mrf.mxu0 }
 0x302   : > { %3573 = vmatpush.msrb.mxu0 %v1674_v55  ;;  %3592 = vmatpush.msrb.mxu1 %v1691_v56  ;;  %v1662_v55 = vld [vmem:[#allocation5 + $0x2a00] sm:$0xff]  ;;  %v1679_v56 = vld [vmem:[#allocation5 + $0x2a88] sm:$0xff]  ;;  %v2348_v14 = vadd.f32 %v2347_v6, %v2328_v9 }
 0x303   : > { %3613 = vmatpush.msrb.mxu2 %v1706_v58  ;;  %3632 = vmatpush.msrb.mxu3 %v1723_v59  ;;  %v1694_v58 = vld [vmem:[#allocation5 + $0x2b00] sm:$0xff]  ;;  %v1711_v59 = vld [vmem:[#allocation5 + $0x2b88] sm:$0xff] }
 0x304   : > { %3574 = vmatpush.msrb.mxu0 %v1673_v60  ;;  %3593 = vmatpush.msrb.mxu1 %v1690_v61  ;;  %v304_v60 = vld [vmem:[%s4326_s23 + $0x2a0] sm:$0xff]  ;;  %v306_v61 = vld [vmem:[%s4326_s23 + $0x2b0] sm:$0xff]  ;;  %v2368_v25 = vadd.f32 %v2367_v17, %v2348_v14 }
 0x305   : > { %3614 = vmatpush.msrb.mxu2 %v1705_v63  ;;  %3633 = vmatpush.msrb.mxu3 %v1722_v0  ;;  %v1741_v63 = vld [vmem:[#allocation5 + $0x2c78] sm:$0xff]  ;;  %v2407_v33 = vpop.f32.mrf.mxu1 }
 0x306   : > { %3575 = vmatpush.msrb.mxu0 %v1672_v2  ;;  %3594 = vmatpush.msrb.mxu1 %v1689_v3  ;;  %v1773_v0 = vld [vmem:[#allocation5 + $0x2d78] sm:$0xff]  ;;  %v1678_v2 = vld [vmem:[#allocation5 + $0x2a80] sm:$0xff]  ;;  %v2388_v30 = vadd.f32 %v2387_v22, %v2368_v25 }
 0x307   : > { %3615 = vmatpush.msrb.mxu2 %v1704_v4  ;;  %3634 = vmatpush.msrb.mxu3 %v1721_v5  ;;  %v1710_v3 = vld [vmem:[#allocation5 + $0x2b80] sm:$0xff]  ;;  %v305_v4 = vld [vmem:[%s4326_s23 + $0x2a8] sm:$0xff]  ;;  %v307_v5 = vld [vmem:[%s4326_s23 + $0x2b8] sm:$0xff]  ;;  %v2427_v38 = vpop.f32.mrf.mxu2  ;;  %v2447_v49 = vpop.f32.mrf.mxu3 }
 0x308   : > { %3576 = vmatpush.msrb.mxu0 %v1671_v7  ;;  %3595 = vmatpush.msrb.mxu1 %v1688_v8  ;;  %v1740_v7 = vld [vmem:[#allocation5 + $0x2c70] sm:$0xff]  ;;  %v1757_v8 = vld [vmem:[#allocation5 + $0x2cf8] sm:$0xff]  ;;  %v2408_v41 = vadd.f32 %v2407_v33, %v2388_v30 }
 0x309   : > { %3616 = vmatpush.msrb.mxu2 %v1703_v10  ;;  %3635 = vmatpush.msrb.mxu3 %v1720_v11  ;;  %v1772_v10 = vld [vmem:[#allocation5 + $0x2d70] sm:$0xff]  ;;  %v1789_v11 = vld [vmem:[#allocation5 + $0x2df8] sm:$0xff]  ;;  %v2467_v54 = vpop.f32.mrf.mxu0 }
 0x30a   : > { %3577 = vmatpush.msrb.mxu0 %v1670_v12  ;;  %3596 = vmatpush.msrb.mxu1 %v1687_v13  ;;  %v1739_v12 = vld [vmem:[#allocation5 + $0x2c68] sm:$0xff]  ;;  %v1756_v13 = vld [vmem:[#allocation5 + $0x2cf0] sm:$0xff]  ;;  %v2428_v46 = vadd.f32 %v2427_v38, %v2408_v41 }
 0x30b   : > { %3617 = vmatpush.msrb.mxu2 %v1702_v15  ;;  %3636 = vmatpush.msrb.mxu3 %v1719_v16  ;;  %v1771_v15 = vld [vmem:[#allocation5 + $0x2d68] sm:$0xff]  ;;  %v1788_v16 = vld [vmem:[#allocation5 + $0x2df0] sm:$0xff] }
 0x30c   : > { %3578 = vmatpush.msrb.mxu0 %v1669_v18  ;;  %3597 = vmatpush.msrb.mxu1 %v1686_v19  ;;  %v1738_v18 = vld [vmem:[#allocation5 + $0x2c60] sm:$0xff]  ;;  %v1755_v19 = vld [vmem:[#allocation5 + $0x2ce8] sm:$0xff]  ;;  %v2448_v57 = vadd.f32 %v2447_v49, %v2428_v46 }
 0x30d   : > { %3618 = vmatpush.msrb.mxu2 %v1701_v20  ;;  %3637 = vmatpush.msrb.mxu3 %v1718_v21  ;;  %v1770_v20 = vld [vmem:[#allocation5 + $0x2d60] sm:$0xff]  ;;  %v1787_v21 = vld [vmem:[#allocation5 + $0x2de8] sm:$0xff]  ;;  %v2487_v1 = vpop.f32.mrf.mxu1 }
 0x30e   : > { %3579 = vmatpush.msrb.mxu0 %v1668_v23  ;;  %3598 = vmatpush.msrb.mxu1 %v1685_v24  ;;  %v1737_v23 = vld [vmem:[#allocation5 + $0x2c58] sm:$0xff]  ;;  %v1754_v24 = vld [vmem:[#allocation5 + $0x2ce0] sm:$0xff]  ;;  %v2468_v62 = vadd.f32 %v2467_v54, %v2448_v57 }
 0x30f   : > { %3619 = vmatpush.msrb.mxu2 %v1700_v26  ;;  %3638 = vmatpush.msrb.mxu3 %v1717_v27  ;;  %v1769_v26 = vld [vmem:[#allocation5 + $0x2d58] sm:$0xff]  ;;  %v1786_v27 = vld [vmem:[#allocation5 + $0x2de0] sm:$0xff]  ;;  %v2507_v6 = vpop.f32.mrf.mxu2  ;;  %v2527_v17 = vpop.f32.mrf.mxu3 }
 0x310   : > { %3580 = vmatpush.msrb.mxu0 %v1667_v28  ;;  %3599 = vmatpush.msrb.mxu1 %v1684_v29  ;;  %v1736_v28 = vld [vmem:[#allocation5 + $0x2c50] sm:$0xff]  ;;  %v1753_v29 = vld [vmem:[#allocation5 + $0x2cd8] sm:$0xff]  ;;  %v2488_v9 = vadd.f32 %v2487_v1, %v2468_v62 }
 0x311   : > { %3620 = vmatpush.msrb.mxu2 %v1699_v31  ;;  %3639 = vmatpush.msrb.mxu3 %v1716_v32  ;;  %v1768_v31 = vld [vmem:[#allocation5 + $0x2d50] sm:$0xff]  ;;  %v1785_v32 = vld [vmem:[#allocation5 + $0x2dd8] sm:$0xff]  ;;  %v2547_v22 = vpop.f32.mrf.mxu0 }
 0x312   : > { %3581 = vmatpush.msrb.mxu0 %v1666_v34  ;;  %3600 = vmatpush.msrb.mxu1 %v1683_v35  ;;  %v1735_v34 = vld [vmem:[#allocation5 + $0x2c48] sm:$0xff]  ;;  %v1752_v35 = vld [vmem:[#allocation5 + $0x2cd0] sm:$0xff]  ;;  %v2508_v14 = vadd.f32 %v2507_v6, %v2488_v9 }
 0x313   : > { %3621 = vmatpush.msrb.mxu2 %v1698_v36  ;;  %3640 = vmatpush.msrb.mxu3 %v1715_v37  ;;  %v1767_v36 = vld [vmem:[#allocation5 + $0x2d48] sm:$0xff]  ;;  %v1784_v37 = vld [vmem:[#allocation5 + $0x2dd0] sm:$0xff] }
 0x314   : > { %3582 = vmatpush.msrb.mxu0 %v1665_v39  ;;  %3601 = vmatpush.msrb.mxu1 %v1682_v40  ;;  %v1734_v39 = vld [vmem:[#allocation5 + $0x2c40] sm:$0xff]  ;;  %v1751_v40 = vld [vmem:[#allocation5 + $0x2cc8] sm:$0xff]  ;;  %v2528_v25 = vadd.f32 %v2527_v17, %v2508_v14 }
 0x315   : > { %3622 = vmatpush.msrb.mxu2 %v1697_v42  ;;  %3641 = vmatpush.msrb.mxu3 %v1714_v43  ;;  %v1766_v42 = vld [vmem:[#allocation5 + $0x2d40] sm:$0xff]  ;;  %v1783_v43 = vld [vmem:[#allocation5 + $0x2dc8] sm:$0xff]  ;;  %v2567_v33 = vpop.f32.mrf.mxu1 }
 0x316   : > { %3583 = vmatpush.msrb.mxu0 %v1664_v44  ;;  %3602 = vmatpush.msrb.mxu1 %v1681_v45  ;;  %v1733_v44 = vld [vmem:[#allocation5 + $0x2c38] sm:$0xff]  ;;  %v1750_v45 = vld [vmem:[#allocation5 + $0x2cc0] sm:$0xff]  ;;  %v2548_v30 = vadd.f32 %v2547_v22, %v2528_v25 }
 0x317   : > { %3623 = vmatpush.msrb.mxu2 %v1696_v47  ;;  %3642 = vmatpush.msrb.mxu3 %v1713_v48  ;;  %v1765_v47 = vld [vmem:[#allocation5 + $0x2d38] sm:$0xff]  ;;  %v1782_v48 = vld [vmem:[#allocation5 + $0x2dc0] sm:$0xff]  ;;  %v2587_v38 = vpop.f32.mrf.mxu2  ;;  %v2607_v49 = vpop.f32.mrf.mxu3 }
 0x318   : > { %3584 = vmatpush.msrb.mxu0 %v1663_v50  ;;  %3603 = vmatpush.msrb.mxu1 %v1680_v51  ;;  %v1732_v50 = vld [vmem:[#allocation5 + $0x2c30] sm:$0xff]  ;;  %v1749_v51 = vld [vmem:[#allocation5 + $0x2cb8] sm:$0xff]  ;;  %v2568_v41 = vadd.f32 %v2567_v33, %v2548_v30 }
 0x319   : > { %3624 = vmatpush.msrb.mxu2 %v1695_v52  ;;  %3643 = vmatpush.msrb.mxu3 %v1712_v53  ;;  %v1764_v52 = vld [vmem:[#allocation5 + $0x2d30] sm:$0xff]  ;;  %v1781_v53 = vld [vmem:[#allocation5 + $0x2db8] sm:$0xff]  ;;  %v2627_v54 = vpop.f32.mrf.mxu0 }
 0x31a   : > { %3585 = vmatpush.msrb.mxu0 %v1662_v55  ;;  %3604 = vmatpush.msrb.mxu1 %v1679_v56  ;;  %v1731_v55 = vld [vmem:[#allocation5 + $0x2c28] sm:$0xff]  ;;  %v1748_v56 = vld [vmem:[#allocation5 + $0x2cb0] sm:$0xff]  ;;  %v2588_v46 = vadd.f32 %v2587_v38, %v2568_v41 }
 0x31b   : > { %3625 = vmatpush.msrb.mxu2 %v1694_v58  ;;  %3644 = vmatpush.msrb.mxu3 %v1711_v59  ;;  %v1763_v58 = vld [vmem:[#allocation5 + $0x2d28] sm:$0xff]  ;;  %v1780_v59 = vld [vmem:[#allocation5 + $0x2db0] sm:$0xff] }
 0x31c   : > { %3586 = vmatmul.f32.vlgmr.msrb.gmra.mxu0 %v304_v60  ;;  %3626 = vmatmul.f32.vlgmr.msrb.gmra.mxu2 %v306_v61  ;;  %v1730_v60 = vld [vmem:[#allocation5 + $0x2c20] sm:$0xff]  ;;  %v1747_v61 = vld [vmem:[#allocation5 + $0x2ca8] sm:$0xff]  ;;  %v2608_v57 = vadd.f32 %v2607_v49, %v2588_v46 }
 0x31d   : > { %3650 = vmatpush.msra.mxu0 %v1741_v63  ;;  %3690 = vmatpush.msra.mxu2 %v1773_v0  ;;  %v1762_v63 = vld [vmem:[#allocation5 + $0x2d20] sm:$0xff]  ;;  %v1779_v0 = vld [vmem:[#allocation5 + $0x2da8] sm:$0xff]  ;;  %v2647_v1 = vpop.f32.mrf.mxu1 }
 0x31e   : > { %3605 = vmatpush.msrb.mxu1 %v1678_v2  ;;  %3645 = vmatpush.msrb.mxu3 %v1710_v3  ;;  %v1729_v2 = vld [vmem:[#allocation5 + $0x2c18] sm:$0xff]  ;;  %v1746_v3 = vld [vmem:[#allocation5 + $0x2ca0] sm:$0xff]  ;;  %v2628_v62 = vadd.f32 %v2627_v54, %v2608_v57 }
 0x31f   : > { %3606 = vmatmul.f32.vlgmr.msrb.gmra.mxu1 %v305_v4  ;;  %3646 = vmatmul.f32.vlgmr.msrb.gmra.mxu3 %v307_v5  ;;  %v1761_v4 = vld [vmem:[#allocation5 + $0x2d18] sm:$0xff]  ;;  %v1778_v5 = vld [vmem:[#allocation5 + $0x2da0] sm:$0xff]  ;;  %v2667_v6 = vpop.f32.mrf.mxu2  ;;  %v2687_v17 = vpop.f32.mrf.mxu3 }
 0x320   : > { %3651 = vmatpush.msra.mxu0 %v1740_v7  ;;  %3670 = vmatpush.msra.mxu1 %v1757_v8  ;;  %v1728_v7 = vld [vmem:[#allocation5 + $0x2c10] sm:$0xff]  ;;  %v1745_v8 = vld [vmem:[#allocation5 + $0x2c98] sm:$0xff]  ;;  %v2648_v9 = vadd.f32 %v2647_v1, %v2628_v62  ;;  %v1867_v62 = vld [vmem:[#allocation5 + $0x3068] sm:$0xff] }
 0x321   : > { %3691 = vmatpush.msra.mxu2 %v1772_v10  ;;  %3710 = vmatpush.msra.mxu3 %v1789_v11  ;;  %v1760_v10 = vld [vmem:[#allocation5 + $0x2d10] sm:$0xff]  ;;  %v1777_v11 = vld [vmem:[#allocation5 + $0x2d98] sm:$0xff]  ;;  %v2707_v22 = vpop.f32.mrf.mxu0  ;;  %v1866_v1 = vld [vmem:[#allocation5 + $0x3060] sm:$0xff] }
 0x322   : > { %3652 = vmatpush.msra.mxu0 %v1739_v12  ;;  %3671 = vmatpush.msra.mxu1 %v1756_v13  ;;  %v1727_v12 = vld [vmem:[#allocation5 + $0x2c08] sm:$0xff]  ;;  %v1744_v13 = vld [vmem:[#allocation5 + $0x2c90] sm:$0xff]  ;;  %v2668_v14 = vadd.f32 %v2667_v6, %v2648_v9  ;;  %v1882_v6 = vld [vmem:[#allocation5 + $0x30e0] sm:$0xff] }
 0x323   : > { %3692 = vmatpush.msra.mxu2 %v1771_v15  ;;  %3711 = vmatpush.msra.mxu3 %v1788_v16  ;;  %v1759_v15 = vld [vmem:[#allocation5 + $0x2d08] sm:$0xff]  ;;  %v1776_v16 = vld [vmem:[#allocation5 + $0x2d90] sm:$0xff] }
 0x324   : > { %3653 = vmatpush.msra.mxu0 %v1738_v18  ;;  %3672 = vmatpush.msra.mxu1 %v1755_v19  ;;  %v1726_v18 = vld [vmem:[#allocation5 + $0x2c00] sm:$0xff]  ;;  %v1743_v19 = vld [vmem:[#allocation5 + $0x2c88] sm:$0xff]  ;;  %v2688_v25 = vadd.f32 %v2687_v17, %v2668_v14 }
 0x325   : > { %3693 = vmatpush.msra.mxu2 %v1770_v20  ;;  %3712 = vmatpush.msra.mxu3 %v1787_v21  ;;  %v1758_v20 = vld [vmem:[#allocation5 + $0x2d00] sm:$0xff]  ;;  %v1775_v21 = vld [vmem:[#allocation5 + $0x2d88] sm:$0xff]  ;;  %v2727_v33 = vpop.f32.mrf.mxu1 }
 0x326   : > { %3654 = vmatpush.msra.mxu0 %v1737_v23  ;;  %3673 = vmatpush.msra.mxu1 %v1754_v24  ;;  %v308_v23 = vld [vmem:[%s4326_s23 + $0x2c0] sm:$0xff]  ;;  %v310_v24 = vld [vmem:[%s4326_s23 + $0x2d0] sm:$0xff]  ;;  %v2708_v30 = vadd.f32 %v2707_v22, %v2688_v25  ;;  %v1859_v25 = vld [vmem:[#allocation5 + $0x3028] sm:$0xff] }
 0x327   : > { %3694 = vmatpush.msra.mxu2 %v1769_v26  ;;  %3713 = vmatpush.msra.mxu3 %v1786_v27  ;;  %v1805_v26 = vld [vmem:[#allocation5 + $0x2e78] sm:$0xff]  ;;  %v2747_v38 = vpop.f32.mrf.mxu2  ;;  %v2767_v49 = vpop.f32.mrf.mxu3 }
 0x328   : > { %3655 = vmatpush.msra.mxu0 %v1736_v28  ;;  %3674 = vmatpush.msra.mxu1 %v1753_v29  ;;  %v1837_v27 = vld [vmem:[#allocation5 + $0x2f78] sm:$0xff]  ;;  %v1742_v28 = vld [vmem:[#allocation5 + $0x2c80] sm:$0xff]  ;;  %v2728_v41 = vadd.f32 %v2727_v33, %v2708_v30  ;;  %v1875_v30 = vld [vmem:[#allocation5 + $0x30a8] sm:$0xff] }
 0x329   : > { %3695 = vmatpush.msra.mxu2 %v1768_v31  ;;  %3714 = vmatpush.msra.mxu3 %v1785_v32  ;;  %v1774_v29 = vld [vmem:[#allocation5 + $0x2d80] sm:$0xff]  ;;  %v309_v31 = vld [vmem:[%s4326_s23 + $0x2c8] sm:$0xff]  ;;  %v311_v32 = vld [vmem:[%s4326_s23 + $0x2d8] sm:$0xff]  ;;  %v2787_v54 = vpop.f32.mrf.mxu0 }
 0x32a   : > { %3656 = vmatpush.msra.mxu0 %v1735_v34  ;;  %3675 = vmatpush.msra.mxu1 %v1752_v35  ;;  %v1804_v34 = vld [vmem:[#allocation5 + $0x2e70] sm:$0xff]  ;;  %v1821_v35 = vld [vmem:[#allocation5 + $0x2ef8] sm:$0xff]  ;;  %v2748_v46 = vadd.f32 %v2747_v38, %v2728_v41  ;;  %v1874_v33 = vld [vmem:[#allocation5 + $0x30a0] sm:$0xff] }
 0x32b   : > { %3696 = vmatpush.msra.mxu2 %v1767_v36  ;;  %3715 = vmatpush.msra.mxu3 %v1784_v37  ;;  %v1836_v36 = vld [vmem:[#allocation5 + $0x2f70] sm:$0xff]  ;;  %v1853_v37 = vld [vmem:[#allocation5 + $0x2ff8] sm:$0xff]  ;;  %v1855_v38 = vld [vmem:[#allocation5 + $0x3008] sm:$0xff] }
 0x32c   : > { %3657 = vmatpush.msra.mxu0 %v1734_v39  ;;  %3676 = vmatpush.msra.mxu1 %v1751_v40  ;;  %v1803_v39 = vld [vmem:[#allocation5 + $0x2e68] sm:$0xff]  ;;  %v1820_v40 = vld [vmem:[#allocation5 + $0x2ef0] sm:$0xff]  ;;  %v2768_v57 = vadd.f32 %v2767_v49, %v2748_v46  ;;  %v1854_v41 = vld [vmem:[#allocation5 + $0x3000] sm:$0xff] }
 0x32d   : > { %3697 = vmatpush.msra.mxu2 %v1766_v42  ;;  %3716 = vmatpush.msra.mxu3 %v1783_v43  ;;  %v1835_v42 = vld [vmem:[#allocation5 + $0x2f68] sm:$0xff]  ;;  %v1852_v43 = vld [vmem:[#allocation5 + $0x2ff0] sm:$0xff]  ;;  %v1870_v46 = vld [vmem:[#allocation5 + $0x3080] sm:$0xff] }
 0x32e   : > { %3658 = vmatpush.msra.mxu0 %v1733_v44  ;;  %3677 = vmatpush.msra.mxu1 %v1750_v45  ;;  %v1802_v44 = vld [vmem:[#allocation5 + $0x2e60] sm:$0xff]  ;;  %v1819_v45 = vld [vmem:[#allocation5 + $0x2ee8] sm:$0xff] }
 0x32f   : > { %3698 = vmatpush.msra.mxu2 %v1765_v47  ;;  %3717 = vmatpush.msra.mxu3 %v1782_v48  ;;  %v1834_v47 = vld [vmem:[#allocation5 + $0x2f60] sm:$0xff]  ;;  %v1851_v48 = vld [vmem:[#allocation5 + $0x2fe8] sm:$0xff]  ;;  %v2847_v9 = vpop.f32.mrf.mxu3 }
 0x330   : > { %3659 = vmatpush.msra.mxu0 %v1732_v50  ;;  %3678 = vmatpush.msra.mxu1 %v1749_v51  ;;  %v1801_v50 = vld [vmem:[#allocation5 + $0x2e58] sm:$0xff]  ;;  %v1818_v51 = vld [vmem:[#allocation5 + $0x2ee0] sm:$0xff] }
 0x331   : > { %3699 = vmatpush.msra.mxu2 %v1764_v52  ;;  %3718 = vmatpush.msra.mxu3 %v1781_v53  ;;  %v1833_v52 = vld [vmem:[#allocation5 + $0x2f58] sm:$0xff]  ;;  %v1850_v53 = vld [vmem:[#allocation5 + $0x2fe0] sm:$0xff] }
 0x332   : > { %3660 = vmatpush.msra.mxu0 %v1731_v55  ;;  %3679 = vmatpush.msra.mxu1 %v1748_v56  ;;  %v1800_v55 = vld [vmem:[#allocation5 + $0x2e50] sm:$0xff]  ;;  %v1817_v56 = vld [vmem:[#allocation5 + $0x2ed8] sm:$0xff] }
 0x333   : > { %3700 = vmatpush.msra.mxu2 %v1763_v58  ;;  %3719 = vmatpush.msra.mxu3 %v1780_v59  ;;  %v1832_v58 = vld [vmem:[#allocation5 + $0x2f50] sm:$0xff]  ;;  %v1849_v59 = vld [vmem:[#allocation5 + $0x2fd8] sm:$0xff] }
 0x334   : > { %3661 = vmatpush.msra.mxu0 %v1730_v60  ;;  %3680 = vmatpush.msra.mxu1 %v1747_v61  ;;  %v1799_v60 = vld [vmem:[#allocation5 + $0x2e48] sm:$0xff]  ;;  %v1816_v61 = vld [vmem:[#allocation5 + $0x2ed0] sm:$0xff] }
 0x335   : > { %3701 = vmatpush.msra.mxu2 %v1762_v63  ;;  %3720 = vmatpush.msra.mxu3 %v1779_v0  ;;  %v1831_v63 = vld [vmem:[#allocation5 + $0x2f48] sm:$0xff]  ;;  %v1848_v0 = vld [vmem:[#allocation5 + $0x2fd0] sm:$0xff] }
 0x336   : > { %3662 = vmatpush.msra.mxu0 %v1729_v2  ;;  %3681 = vmatpush.msra.mxu1 %v1746_v3  ;;  %v1798_v2 = vld [vmem:[#allocation5 + $0x2e40] sm:$0xff]  ;;  %v1815_v3 = vld [vmem:[#allocation5 + $0x2ec8] sm:$0xff] }
 0x337   : > { %3702 = vmatpush.msra.mxu2 %v1761_v4  ;;  %3721 = vmatpush.msra.mxu3 %v1778_v5  ;;  %v1830_v4 = vld [vmem:[#allocation5 + $0x2f40] sm:$0xff]  ;;  %v1847_v5 = vld [vmem:[#allocation5 + $0x2fc8] sm:$0xff] }
 0x338   : > { %3663 = vmatpush.msra.mxu0 %v1728_v7  ;;  %3682 = vmatpush.msra.mxu1 %v1745_v8  ;;  %v1797_v7 = vld [vmem:[#allocation5 + $0x2e38] sm:$0xff]  ;;  %v1814_v8 = vld [vmem:[#allocation5 + $0x2ec0] sm:$0xff] }
 0x339   : > { %3703 = vmatpush.msra.mxu2 %v1760_v10  ;;  %3722 = vmatpush.msra.mxu3 %v1777_v11  ;;  %v1829_v10 = vld [vmem:[#allocation5 + $0x2f38] sm:$0xff]  ;;  %v1846_v11 = vld [vmem:[#allocation5 + $0x2fc0] sm:$0xff] }
 0x33a   : > { %3664 = vmatpush.msra.mxu0 %v1727_v12  ;;  %3683 = vmatpush.msra.mxu1 %v1744_v13  ;;  %v1796_v12 = vld [vmem:[#allocation5 + $0x2e30] sm:$0xff]  ;;  %v1813_v13 = vld [vmem:[#allocation5 + $0x2eb8] sm:$0xff] }
 0x33b   : > { %3704 = vmatpush.msra.mxu2 %v1759_v15  ;;  %3723 = vmatpush.msra.mxu3 %v1776_v16  ;;  %v1828_v15 = vld [vmem:[#allocation5 + $0x2f30] sm:$0xff]  ;;  %v1845_v16 = vld [vmem:[#allocation5 + $0x2fb8] sm:$0xff] }
 0x33c   : > { %3665 = vmatpush.msra.mxu0 %v1726_v18  ;;  %3684 = vmatpush.msra.mxu1 %v1743_v19  ;;  %v1795_v18 = vld [vmem:[#allocation5 + $0x2e28] sm:$0xff]  ;;  %v1812_v19 = vld [vmem:[#allocation5 + $0x2eb0] sm:$0xff] }
 0x33d   : > { %3705 = vmatpush.msra.mxu2 %v1758_v20  ;;  %3724 = vmatpush.msra.mxu3 %v1775_v21  ;;  %v1827_v20 = vld [vmem:[#allocation5 + $0x2f28] sm:$0xff]  ;;  %v1844_v21 = vld [vmem:[#allocation5 + $0x2fb0] sm:$0xff] }
 0x33e   : > { %3666 = vmatmul.f32.vlgmr.msra.gmra.mxu0 %v308_v23  ;;  %3706 = vmatmul.f32.vlgmr.msra.gmra.mxu2 %v310_v24  ;;  %v1794_v23 = vld [vmem:[#allocation5 + $0x2e20] sm:$0xff]  ;;  %v1811_v24 = vld [vmem:[#allocation5 + $0x2ea8] sm:$0xff] }
 0x33f   : > { %3730 = vmatpush.msrb.mxu0 %v1805_v26  ;;  %3770 = vmatpush.msrb.mxu2 %v1837_v27  ;;  %v1826_v26 = vld [vmem:[#allocation5 + $0x2f20] sm:$0xff]  ;;  %v1843_v27 = vld [vmem:[#allocation5 + $0x2fa8] sm:$0xff] }
 0x340   : > { %3685 = vmatpush.msra.mxu1 %v1742_v28  ;;  %3725 = vmatpush.msra.mxu3 %v1774_v29  ;;  %v1793_v28 = vld [vmem:[#allocation5 + $0x2e18] sm:$0xff]  ;;  %v1810_v29 = vld [vmem:[#allocation5 + $0x2ea0] sm:$0xff] }
 0x341   : > { %3686 = vmatmul.f32.vlgmr.msra.gmra.mxu1 %v309_v31  ;;  %3726 = vmatmul.f32.vlgmr.msra.gmra.mxu3 %v311_v32  ;;  %v1825_v31 = vld [vmem:[#allocation5 + $0x2f18] sm:$0xff]  ;;  %v1842_v32 = vld [vmem:[#allocation5 + $0x2fa0] sm:$0xff] }
 0x342   : > { %3731 = vmatpush.msrb.mxu0 %v1804_v34  ;;  %3750 = vmatpush.msrb.mxu1 %v1821_v35  ;;  %v1792_v34 = vld [vmem:[#allocation5 + $0x2e10] sm:$0xff]  ;;  %v1809_v35 = vld [vmem:[#allocation5 + $0x2e98] sm:$0xff] }
 0x343   : > { %3771 = vmatpush.msrb.mxu2 %v1836_v36  ;;  %3790 = vmatpush.msrb.mxu3 %v1853_v37  ;;  %v1824_v36 = vld [vmem:[#allocation5 + $0x2f10] sm:$0xff]  ;;  %v1841_v37 = vld [vmem:[#allocation5 + $0x2f98] sm:$0xff] }
 0x344   : > { %3732 = vmatpush.msrb.mxu0 %v1803_v39  ;;  %3751 = vmatpush.msrb.mxu1 %v1820_v40  ;;  %v1791_v39 = vld [vmem:[#allocation5 + $0x2e08] sm:$0xff]  ;;  %v1808_v40 = vld [vmem:[#allocation5 + $0x2e90] sm:$0xff] }
 0x345   : > { %3772 = vmatpush.msrb.mxu2 %v1835_v42  ;;  %3791 = vmatpush.msrb.mxu3 %v1852_v43  ;;  %v1823_v42 = vld [vmem:[#allocation5 + $0x2f08] sm:$0xff]  ;;  %v1840_v43 = vld [vmem:[#allocation5 + $0x2f90] sm:$0xff] }
 0x346   : > { %3733 = vmatpush.msrb.mxu0 %v1802_v44  ;;  %3752 = vmatpush.msrb.mxu1 %v1819_v45  ;;  %v1790_v44 = vld [vmem:[#allocation5 + $0x2e00] sm:$0xff]  ;;  %v1807_v45 = vld [vmem:[#allocation5 + $0x2e88] sm:$0xff] }
 0x347   : > { %3773 = vmatpush.msrb.mxu2 %v1834_v47  ;;  %3792 = vmatpush.msrb.mxu3 %v1851_v48  ;;  %v1822_v47 = vld [vmem:[#allocation5 + $0x2f00] sm:$0xff]  ;;  %v1839_v48 = vld [vmem:[#allocation5 + $0x2f88] sm:$0xff] }
 0x348   : > { %3734 = vmatpush.msrb.mxu0 %v1801_v50  ;;  %3753 = vmatpush.msrb.mxu1 %v1818_v51  ;;  %v312_v50 = vld [vmem:[%s4326_s23 + $0x2e0] sm:$0xff]  ;;  %v314_v51 = vld [vmem:[%s4326_s23 + $0x2f0] sm:$0xff] }
 0x349   : > { %3774 = vmatpush.msrb.mxu2 %v1833_v52  ;;  %3793 = vmatpush.msrb.mxu3 %v1850_v53  ;;  %v1869_v52 = vld [vmem:[#allocation5 + $0x3078] sm:$0xff]  ;;  %v1806_v53 = vld [vmem:[#allocation5 + $0x2e80] sm:$0xff] }
 0x34a   : > { %3735 = vmatpush.msrb.mxu0 %v1800_v55  ;;  %3754 = vmatpush.msrb.mxu1 %v1817_v56  ;;  %v1838_v55 = vld [vmem:[#allocation5 + $0x2f80] sm:$0xff]  ;;  %v313_v56 = vld [vmem:[%s4326_s23 + $0x2e8] sm:$0xff] }
 0x34b   : > { %3775 = vmatpush.msrb.mxu2 %v1832_v58  ;;  %3794 = vmatpush.msrb.mxu3 %v1849_v59  ;;  %v315_v58 = vld [vmem:[%s4326_s23 + $0x2f8] sm:$0xff]  ;;  %v1868_v59 = vld [vmem:[#allocation5 + $0x3070] sm:$0xff] }
 0x34c   : > { %3736 = vmatpush.msrb.mxu0 %v1799_v60  ;;  %3755 = vmatpush.msrb.mxu1 %v1816_v61  ;;  %v1885_v60 = vld [vmem:[#allocation5 + $0x30f8] sm:$0xff]  ;;  %v2788_v61 = vadd.f32 %v2787_v54, %v2768_v57 }
 0x34d   : > { %3776 = vmatpush.msrb.mxu2 %v1831_v63  ;;  %3795 = vmatpush.msrb.mxu3 %v1848_v0  ;;  %v2807_v63 = vpop.f32.mrf.mxu1  ;;  %v1884_v0 = vld [vmem:[#allocation5 + $0x30f0] sm:$0xff] }
 0x34e   : > { %3737 = vmatpush.msrb.mxu0 %v1798_v2  ;;  %3756 = vmatpush.msrb.mxu1 %v1815_v3  ;;  %v2827_v2 = vpop.f32.mrf.mxu2  ;;  %v1883_v3 = vld [vmem:[#allocation5 + $0x30e8] sm:$0xff] }
 0x34f   : > { %3777 = vmatpush.msrb.mxu2 %v1830_v4  ;;  %3796 = vmatpush.msrb.mxu3 %v1847_v5  ;;  %v2808_v4 = vadd.f32 %v2807_v63, %v2788_v61  ;;  %v1865_v5 = vld [vmem:[#allocation5 + $0x3058] sm:$0xff] }
 0x350   : > { %3738 = vmatpush.msrb.mxu0 %v1797_v7  ;;  %3757 = vmatpush.msrb.mxu1 %v1814_v8  ;;  %v1864_v8 = vld [vmem:[#allocation5 + $0x3050] sm:$0xff] }
 0x351   : > { %3778 = vmatpush.msrb.mxu2 %v1829_v10  ;;  %3797 = vmatpush.msrb.mxu3 %v1846_v11  ;;  %v2828_v7 = vadd.f32 %v2827_v2, %v2808_v4  ;;  %v1881_v10 = vld [vmem:[#allocation5 + $0x30d8] sm:$0xff]  ;;  %v1863_v11 = vld [vmem:[#allocation5 + $0x3048] sm:$0xff] }
 0x352   : > { %3739 = vmatpush.msrb.mxu0 %v1796_v12  ;;  %3758 = vmatpush.msrb.mxu1 %v1813_v13  ;;  %v2867_v12 = vpop.f32.mrf.mxu0  ;;  %v1880_v13 = vld [vmem:[#allocation5 + $0x30d0] sm:$0xff] }
 0x353   : > { %3779 = vmatpush.msrb.mxu2 %v1828_v15  ;;  %3798 = vmatpush.msrb.mxu3 %v1845_v16  ;;  %v2848_v14 = vadd.f32 %v2847_v9, %v2828_v7  ;;  %v1862_v15 = vld [vmem:[#allocation5 + $0x3040] sm:$0xff]  ;;  %v1879_v16 = vld [vmem:[#allocation5 + $0x30c8] sm:$0xff] }
 0x354   : > { %3740 = vmatpush.msrb.mxu0 %v1795_v18  ;;  %3759 = vmatpush.msrb.mxu1 %v1812_v19  ;;  %v1861_v18 = vld [vmem:[#allocation5 + $0x3038] sm:$0xff] }
 0x355   : > { %3780 = vmatpush.msrb.mxu2 %v1827_v20  ;;  %3799 = vmatpush.msrb.mxu3 %v1844_v21  ;;  %v2868_v17 = vadd.f32 %v2867_v12, %v2848_v14  ;;  %v2887_v19 = vpop.f32.mrf.mxu1  ;;  %v1878_v20 = vld [vmem:[#allocation5 + $0x30c0] sm:$0xff]  ;;  %v1860_v21 = vld [vmem:[#allocation5 + $0x3030] sm:$0xff] }
 0x356   : > { %3741 = vmatpush.msrb.mxu0 %v1794_v23  ;;  %3760 = vmatpush.msrb.mxu1 %v1811_v24  ;;  %v2907_v22 = vpop.f32.mrf.mxu2  ;;  %v1877_v23 = vld [vmem:[#allocation5 + $0x30b8] sm:$0xff] }
 0x357   : > { %3781 = vmatpush.msrb.mxu2 %v1826_v26  ;;  %3800 = vmatpush.msrb.mxu3 %v1843_v27  ;;  %v2888_v24 = vadd.f32 %v2887_v19, %v2868_v17  ;;  %v1876_v26 = vld [vmem:[#allocation5 + $0x30b0] sm:$0xff] }
 0x358   : > { %3742 = vmatpush.msrb.mxu0 %v1793_v28  ;;  %3761 = vmatpush.msrb.mxu1 %v1810_v29  ;;  %v1858_v28 = vld [vmem:[#allocation5 + $0x3020] sm:$0xff]  ;;  %v2927_v29 = vpop.f32.mrf.mxu3 }
 0x359   : > { %3782 = vmatpush.msrb.mxu2 %v1825_v31  ;;  %3801 = vmatpush.msrb.mxu3 %v1842_v32  ;;  %v2908_v27 = vadd.f32 %v2907_v22, %v2888_v24  ;;  %v1857_v31 = vld [vmem:[#allocation5 + $0x3018] sm:$0xff] }
 0x35a   : > { %3743 = vmatpush.msrb.mxu0 %v1792_v34  ;;  %3762 = vmatpush.msrb.mxu1 %v1809_v35  ;;  %v2947_v32 = vpop.f32.mrf.mxu0  ;;  %v1856_v35 = vld [vmem:[#allocation5 + $0x3010] sm:$0xff] }
 0x35b   : > { %3783 = vmatpush.msrb.mxu2 %v1824_v36  ;;  %3802 = vmatpush.msrb.mxu3 %v1841_v37  ;;  %v2928_v34 = vadd.f32 %v2927_v29, %v2908_v27  ;;  %v1873_v36 = vld [vmem:[#allocation5 + $0x3098] sm:$0xff] }
 0x35c   : > { %3744 = vmatpush.msrb.mxu0 %v1791_v39  ;;  %3763 = vmatpush.msrb.mxu1 %v1808_v40  ;;  %v1872_v40 = vld [vmem:[#allocation5 + $0x3090] sm:$0xff] }
 0x35d   : > { %3784 = vmatpush.msrb.mxu2 %v1823_v42  ;;  %3803 = vmatpush.msrb.mxu3 %v1840_v43  ;;  %v2948_v37 = vadd.f32 %v2947_v32, %v2928_v34  ;;  %v2967_v39 = vpop.f32.mrf.mxu1  ;;  %v1871_v43 = vld [vmem:[#allocation5 + $0x3088] sm:$0xff] }
 0x35e   : > { %3745 = vmatpush.msrb.mxu0 %v1790_v44  ;;  %3764 = vmatpush.msrb.mxu1 %v1807_v45  ;;  %v2987_v42 = vpop.f32.mrf.mxu2  ;;  %v316_v44 = vld [vmem:[%s4326_s23 + $0x300] sm:$0xff] }
 0x35f   : > { %3785 = vmatpush.msrb.mxu2 %v1822_v47  ;;  %3804 = vmatpush.msrb.mxu3 %v1839_v48  ;;  %v2968_v45 = vadd.f32 %v2967_v39, %v2948_v37  ;;  %v317_v48 = vld [vmem:[%s4326_s23 + $0x308] sm:$0xff] }
 0x360   : > { %3746 = vmatmul.f32.vlgmr.msrb.gmra.mxu0 %v312_v50  ;;  %3786 = vmatmul.f32.vlgmr.msrb.gmra.mxu2 %v314_v51  ;;  %v3007_v49 = vpop.f32.mrf.mxu3 }
 0x361   : > { %3810 = vmatpush.msra.mxu0 %v1869_v52  ;;  %3765 = vmatpush.msrb.mxu1 %v1806_v53  ;;  %v2988_v47 = vadd.f32 %v2987_v42, %v2968_v45 }
 0x362   : > { %3805 = vmatpush.msrb.mxu3 %v1838_v55  ;;  %3766 = vmatmul.f32.vlgmr.msrb.gmra.mxu1 %v313_v56  ;;  %v3027_v50 = vpop.f32.mrf.mxu0 }
 0x363   : > { %3806 = vmatmul.f32.vlgmr.msrb.gmra.mxu3 %v315_v58  ;;  %3811 = vmatpush.msra.mxu0 %v1868_v59  ;;  %v3008_v51 = vadd.f32 %v3007_v49, %v2988_v47 }
 0x364   : > { %3830 = vmatpush.msra.mxu1 %v1885_v60 }
 0x365   : > { %3812 = vmatpush.msra.mxu0 %v1867_v62  ;;  %v3028_v52 = vadd.f32 %v3027_v50, %v3008_v51  ;;  %v3047_v53 = vpop.f32.mrf.mxu1 }
 0x366   : > { %3831 = vmatpush.msra.mxu1 %v1884_v0  ;;  %v3067_v54 = vpop.f32.mrf.mxu2 }
 0x367   : > { %3813 = vmatpush.msra.mxu0 %v1866_v1  ;;  %v3048_v55 = vadd.f32 %v3047_v53, %v3028_v52 }
 0x368   : > { %3832 = vmatpush.msra.mxu1 %v1883_v3  ;;  %v3087_v57 = vpop.f32.mrf.mxu3 }
 0x369   : > { %3814 = vmatpush.msra.mxu0 %v1865_v5  ;;  %v3068_v56 = vadd.f32 %v3067_v54, %v3048_v55 }
 0x36a   : > { %3833 = vmatpush.msra.mxu1 %v1882_v6  ;;  %v3107_v58 = vpop.f32.mrf.mxu0 }
 0x36b   : > { %3815 = vmatpush.msra.mxu0 %v1864_v8  ;;  %v3088_v59 = vadd.f32 %v3087_v57, %v3068_v56 }
 0x36c   : > { %3834 = vmatpush.msra.mxu1 %v1881_v10 }
 0x36d   : > { %3816 = vmatpush.msra.mxu0 %v1863_v11  ;;  %v3108_v60 = vadd.f32 %v3107_v58, %v3088_v59  ;;  %v3127_v61 = vpop.f32.mrf.mxu1 }
 0x36e   : > { %3835 = vmatpush.msra.mxu1 %v1880_v13  ;;  %v3147_v62 = vpop.f32.mrf.mxu2 }
 0x36f   : > { %3817 = vmatpush.msra.mxu0 %v1862_v15  ;;  %v3128_v63 = vadd.f32 %v3127_v61, %v3108_v60 }
 0x370   : > { %3836 = vmatpush.msra.mxu1 %v1879_v16  ;;  %v3167_v1 = vpop.f32.mrf.mxu3 }
 0x371   : > { %3818 = vmatpush.msra.mxu0 %v1861_v18  ;;  %v3148_v0 = vadd.f32 %v3147_v62, %v3128_v63 }
 0x372   : > { %3837 = vmatpush.msra.mxu1 %v1878_v20  ;;  %v3187_v2 = vpop.f32.mrf.mxu0 }
 0x373   : > { %3819 = vmatpush.msra.mxu0 %v1860_v21  ;;  %v3168_v3 = vadd.f32 %v3167_v1, %v3148_v0 }
 0x374   : > { %3838 = vmatpush.msra.mxu1 %v1877_v23 }
 0x375   : > { %3820 = vmatpush.msra.mxu0 %v1859_v25  ;;  %v3188_v4 = vadd.f32 %v3187_v2, %v3168_v3  ;;  %v3207_v5 = vpop.f32.mrf.mxu1 }
 0x376   : > { %3839 = vmatpush.msra.mxu1 %v1876_v26  ;;  %v3227_v6 = vpop.f32.mrf.mxu2 }
 0x377   : > { %3821 = vmatpush.msra.mxu0 %v1858_v28  ;;  %v3208_v7 = vadd.f32 %v3207_v5, %v3188_v4 }
 0x378   : > { %3840 = vmatpush.msra.mxu1 %v1875_v30  ;;  %v3247_v9 = vpop.f32.mrf.mxu3 }
 0x379   : > { %3822 = vmatpush.msra.mxu0 %v1857_v31  ;;  %v3228_v8 = vadd.f32 %v3227_v6, %v3208_v7 }
 0x37a   : > { %3841 = vmatpush.msra.mxu1 %v1874_v33  ;;  %v3267_v10 = vpop.f32.mrf.mxu0 }
 0x37b   : > { %3823 = vmatpush.msra.mxu0 %v1856_v35  ;;  %v3248_v11 = vadd.f32 %v3247_v9, %v3228_v8 }
 0x37c   : > { %3842 = vmatpush.msra.mxu1 %v1873_v36 }
 0x37d   : > { %3824 = vmatpush.msra.mxu0 %v1855_v38  ;;  %v3268_v12 = vadd.f32 %v3267_v10, %v3248_v11  ;;  %v3287_v13 = vpop.f32.mrf.mxu1 }
 0x37e   : > { %3843 = vmatpush.msra.mxu1 %v1872_v40  ;;  %v3307_v14 = vpop.f32.mrf.mxu2 }
 0x37f   : > { %3825 = vmatpush.msra.mxu0 %v1854_v41  ;;  %v3288_v15 = vadd.f32 %v3287_v13, %v3268_v12 }
 0x380   : > { %3844 = vmatpush.msra.mxu1 %v1871_v43  ;;  %3826 = vmatmul.f32.vlgmr.msra.gmra.mxu0 %v316_v44  ;;  %v3327_v17 = vpop.f32.mrf.mxu3 }
 0x381   : > { %v3308_v16 = vadd.f32 %v3307_v14, %v3288_v15 }
 0x382   : > { %3845 = vmatpush.msra.mxu1 %v1870_v46  ;;  %v3347_v18 = vpop.f32.mrf.mxu0 }
 0x383   : > { %3846 = vmatmul.f32.vlgmr.msra.gmra.mxu1 %v317_v48  ;;  %v3328_v19 = vadd.f32 %v3327_v17, %v3308_v16 }
 0x385   : > { %v3348_v20 = vadd.f32 %v3347_v18, %v3328_v19  ;;  %v3367_v21 = vpop.f32.mrf.mxu1 }
 0x386   : > { %v3387_v22 = vpop.f32.mrf.mxu2 }
 0x387   : > { %v3368_v23 = vadd.f32 %v3367_v21, %v3348_v20 }
 0x388   : > { %v3407_v25 = vpop.f32.mrf.mxu3 }
 0x389   : > { %v3388_v24 = vadd.f32 %v3387_v22, %v3368_v23 }
 0x38a   : > { %v3427_v26 = vpop.f32.mrf.mxu0 }
 0x38b   : > { %v3408_v27 = vadd.f32 %v3407_v25, %v3388_v24 }
 0x38d   : > { %v3428_v28 = vadd.f32 %v3427_v26, %v3408_v27  ;;  %v3447_v29 = vpop.f32.mrf.mxu1 }
 0x38e   : > { %v3467_v30 = vpop.f32.mrf.mxu2 }
 0x38f   : > { %v3448_v31 = vadd.f32 %v3447_v29, %v3428_v28 }
 0x390   : > { %v3487_v33 = vpop.f32.mrf.mxu3 }
 0x391   : > { %v3468_v32 = vadd.f32 %v3467_v30, %v3448_v31 }
 0x392   : > { %v3507_v34 = vpop.f32.mrf.mxu0 }
 0x393   : > { %v3488_v35 = vadd.f32 %v3487_v33, %v3468_v32 }
 0x395   : > { %v3508_v36 = vadd.f32 %v3507_v34, %v3488_v35  ;;  %v3527_v37 = vpop.f32.mrf.mxu1 }
 0x396   : > { %v3547_v38 = vpop.f32.mrf.mxu2 }
 0x397   : > { %v3528_v39 = vadd.f32 %v3527_v37, %v3508_v36 }
 0x398   : > { %v3567_v41 = vpop.f32.mrf.mxu3 }
 0x399   : > { %v3548_v40 = vadd.f32 %v3547_v38, %v3528_v39 }
 0x39a   : > { %v3587_v42 = vpop.f32.mrf.mxu0 }
 0x39b   : > { %v3568_v43 = vadd.f32 %v3567_v41, %v3548_v40 }
 0x39d   : > { %v3588_v44 = vadd.f32 %v3587_v42, %v3568_v43  ;;  %v3607_v45 = vpop.f32.mrf.mxu1 }
 0x39f   : > { %v3627_v46 = vpop.f32.mrf.mxu2  ;;  %v3608_v47 = vadd.f32 %v3607_v45, %v3588_v44 }
 0x3a1   : > { %v3628_v48 = vadd.f32 %v3627_v46, %v3608_v47 }
 0x3a2   : > { %v3647_v49 = vpop.f32.mrf.mxu3 }
 0x3a3   : > { %v3648_v51 = vadd.f32 %v3647_v49, %v3628_v48 }
 0x3bb   : > { %v3667_v50 = vpop.f32.mrf.mxu0 }
 0x3bc   : > { %v3668_v52 = vadd.f32 %v3667_v50, %v3648_v51 }
 0x3be   : > { %v3687_v53 = vpop.f32.mrf.mxu1 }
 0x3bf   : > { %v3688_v55 = vadd.f32 %v3687_v53, %v3668_v52 }
 0x3c1   : > { %v3707_v54 = vpop.f32.mrf.mxu2 }
 0x3c2   : > { %v3708_v56 = vadd.f32 %v3707_v54, %v3688_v55 }
 0x3c4   : > { %v3727_v57 = vpop.f32.mrf.mxu3 }
 0x3c5   : > { %v3728_v59 = vadd.f32 %v3727_v57, %v3708_v56 }
 0x3dd   : > { %v3747_v58 = vpop.f32.mrf.mxu0 }
 0x3de   : > { %v3748_v60 = vadd.f32 %v3747_v58, %v3728_v59 }
 0x3df   : > { %v3767_v61 = vpop.f32.mrf.mxu1 }
 0x3e0   : > { %v3768_v63 = vadd.f32 %v3767_v61, %v3748_v60 }
 0x3e3   : > { %v3787_v62 = vpop.f32.mrf.mxu2 }
 0x3e4   : > { %v3788_v0 = vadd.f32 %v3787_v62, %v3768_v63 }
 0x3e6   : > { %v3807_v1 = vpop.f32.mrf.mxu3 }
 0x3e7   : > { %v3808_v2 = vadd.f32 %v3807_v1, %v3788_v0 }
 0x3fd   : > { %v3827_v3 = vpop.f32.mrf.mxu0 }
 0x3fe   : > { %v3828_v4 = vadd.f32 %v3827_v3, %v3808_v2 }
 0x400   : > { %v3847_v5 = vpop.f32.mrf.mxu1 }
 0x401   : > { %v3848_v6 = vadd.f32 %v3847_v5, %v3828_v4 }
 0x403   : > { %3850 = vst [vmem:[%s219_s26] sm:$0xff] %v3848_v6 }
 0x404   : > { %4160 = shalt.err (!%p4157_p8)
}
 0x405   : > { %3983 = dma.vmem_to_hbm [thread:$0]  (%p4293_p2), %s3865_s27, 128, %s3867_s28, %s3852_s29  }
 0x406 PF: > { %p4005_p9 = scmp.ge.s32.totalorder %s4203_s15, 2  ;;  %s3878_s9 = sand.u32 1, %s4191_s12  }
 0x407   : > { %s3879_s22 = scalar_lea.sflag [#allocation4], %s3878_s9 }
 0x408   : > { %p3997_p10 = pnand %p4005_p9, %p4297_p4 }
 0x40a   : > { %p3998_p12 = pneg %p3997_p10 }
 0x40c   : > { %4186 = dma.done.wait (%p3998_p12), %s3879_s22, 128  }
 0x40d   : > { %4188 = vsyncadd (%p3998_p12), %s3879_s22, 4294967168  ;;  %p17_p13 = scmp.ge.s32.totalorder %s4271_s4, 5   ;;  %s4476_s12 = smov %s4195_s13 }
 0x40e   : > { %s4477_s13 = smov %s4199_s14  ;;  %s4478_s14 = smov %s4282_s7 }
 0x40f   : > { %s4479_s15 = smov %s4271_s4  ;;  %19 = sbr.rel (!%p17_p13) target bundleno = 6 (0x6), region = 85 }
 0x414   :  { %3885 = vsyncpa [#allocation3], 1 }
 0x415   :  { %3887 = vsyncpa [#allocation3 + $0x1], 1 }
 0x416   :  { %3888 = vsyncpa [#allocation6], 1 }
 0x417   :  { %3889 = vsyncpa [#allocation4], 1 }
 0x418   :  { %3891 = vsyncpa [#allocation4 + $0x1], 1 }

</bundles_post_ra>
